<compile_context>
chip_gen: v6e
topology: v6e:2x2x1
jax: 0.10.0
libtpu: 0.0.40
codegen_flags: <defaults>
</compile_context>

<pallas_src>
import jax
import jax.numpy as jnp
from jax.experimental import pallas as pl
from jax.experimental.pallas import tpu as pltpu

L = 168                  # sequence length produced by linear_4wm reshape
KGE_SIZE = 32            # kge embedding size
KGE_SQ = 20              # kge_squeeze_size
IN_CH = KGE_SQ + KGE_SQ  # 40 channels entering each TCN (USE_KGE = True)
NUM_LEVELS = 6
KERNEL_SIZES = (24, 48, 168)   # kernel_size = [24, 2*24, 7*24]
EPS = 1e-5


def _get_dilations(K):
    dil = []
    for i in range(NUM_LEVELS):
        d = 2 ** i
        if K * d > 168:
            d = int(168 / K)
        dil.append(d)
    return dil


# ---------------------------------------------------------------------------
# Glue: circular dilated conv -> 168x168 circulant matrix (weights only).
#   (x @ M)[s] = sum_k w[k] * x[(s + k*d + offset) mod 168]
# ---------------------------------------------------------------------------
def _circulant(w_k, d, offset):
    K = w_k.shape[0]
    pos = (jnp.arange(L)[None, :] + jnp.arange(K)[:, None] * d + offset) % L   # (K, L)
    oh = jax.nn.one_hot(pos, L, dtype=jnp.float32)                             # (K, L_s, L_j)
    return jnp.einsum('k,ksj->js', w_k.astype(jnp.float32), oh)                # (L_j, L_s)


def _circulant_multi(w_ck, d):
    K = w_ck.shape[1]
    pos = (jnp.arange(L)[None, :] + jnp.arange(K)[:, None] * d) % L
    oh = jax.nn.one_hot(pos, L, dtype=jnp.float32)
    return jnp.einsum('ck,ksj->cjs', w_ck.astype(jnp.float32), oh)             # (C, L_j, L_s)


# ---------------------------------------------------------------------------
# Stage A: linear_kge/linear_4wm heads + LayerNorms, block-0 residual
# (downsample 1x1 conv) and the time-constant kge-channel contributions.
# ---------------------------------------------------------------------------
def prelude_kernel(xk_ref, x4in_ref,
                   wk_ref, bk_ref, gk_ref, bek_ref,
                   w4_ref, b4_ref, g4_ref, be4_ref,
                   kaux_ref, dw20_ref, db_ref,
                   x4_out_ref, g0k_out_ref, res_out_ref):
    B = xk_ref.shape[0]

    # linear_kge + LayerNorm(20)
    h = jnp.dot(xk_ref[...], wk_ref[...], preferred_element_type=jnp.float32) + bk_ref[...]
    mu = jnp.mean(h, axis=-1, keepdims=True)
    var = jnp.mean(jnp.square(h - mu), axis=-1, keepdims=True)
    kge = (h - mu) * jax.lax.rsqrt(var + EPS) * gk_ref[...] + bek_ref[...]      # (B, 20)

    # linear_4wm + LayerNorm(20*168)
    h4 = jnp.dot(x4in_ref[...], w4_ref[...], preferred_element_type=jnp.float32) + b4_ref[...]
    mu4 = jnp.mean(h4, axis=-1, keepdims=True)
    var4 = jnp.mean(jnp.square(h4 - mu4), axis=-1, keepdims=True)
    x4 = (h4 - mu4) * jax.lax.rsqrt(var4 + EPS) * g4_ref[...] + be4_ref[...]    # (B, 3360)
    x4_out_ref[...] = x4.astype(jnp.bfloat16)

    # Time-constant kge channels: a circulant's column sums equal the kernel
    # sum, so their conv1 / downsample contributions collapse to (B,1) scalars.
    #   kaux[:, 0:3]  conv1 kernel sums per branch
    #   kaux[:, 3:6]  downsample weights per branch
    kout = jnp.dot(kge, kaux_ref[...], preferred_element_type=jnp.float32)      # (B, 6)

    # Block-0 residual (Conv1d(40,1,1) downsample) over the 20 real channels.
    acc = [jnp.zeros((B, L), jnp.float32) for _ in range(3)]
    for c in range(KGE_SQ):
        xc = x4[:, c * L:(c + 1) * L]
        for t in range(3):
            acc[t] = acc[t] + dw20_ref[t, c] * xc
    for t in range(3):
        g0k_out_ref[t] = kout[:, t:t + 1]                                       # (B, 1)
        res_out_ref[t] = acc[t] + kout[:, 3 + t:4 + t] + db_ref[t]              # (B, 168)


# ---------------------------------------------------------------------------
# Stage B: one TCN branch per grid step (grid=(3,), "parallel").
# ---------------------------------------------------------------------------
def branch_kernel(x4_ref, g0k_ref, res_ref, w0_ref, c1r_ref, c2_ref,
                  b1_ref, b2_ref, o_ref):
    x4 = x4_ref[...]                                                            # (B, 3360) bf16

    # ---- block 0 (40 -> 1): one fused long-K matmul over the 20 real channels
    g = (jnp.dot(x4, w0_ref[0], preferred_element_type=jnp.float32)
         + g0k_ref[0] + b1_ref[0, 0:1, :])
    r = jnp.maximum(g, 0.0).astype(jnp.bfloat16)                                # relu1
    o2 = jnp.dot(r, c2_ref[0, 0], preferred_element_type=jnp.float32) + b2_ref[0, 0:1, :]
    u = jnp.maximum(jnp.maximum(o2, 0.0) + res_ref[0], 0.0)                     # relu2 + res, relu

    # ---- blocks 1..5 (1 -> 1)
    for blk in range(1, NUM_LEVELS):
        g = (jnp.dot(u.astype(jnp.bfloat16), c1r_ref[0, blk - 1],
                     preferred_element_type=jnp.float32)
             + b1_ref[0, blk:blk + 1, :])
        r = jnp.maximum(g, 0.0).astype(jnp.bfloat16)
        o2 = (jnp.dot(r, c2_ref[0, blk], preferred_element_type=jnp.float32)
              + b2_ref[0, blk:blk + 1, :])
        u = jnp.maximum(jnp.maximum(o2, 0.0) + u, 0.0)

    o_ref[0] = u


# ---------------------------------------------------------------------------
# Stage C: 3->1 branch mix, LayerNorm([1,168]), + days_in_week, GELU.
# ---------------------------------------------------------------------------
def epilogue_kernel(bo_ref, days_ref, gn_ref, bn_ref, wl_ref, bl_ref, out_ref):
    y = (wl_ref[0] * bo_ref[0] + wl_ref[1] * bo_ref[1] + wl_ref[2] * bo_ref[2]
         + bl_ref[0])
    mu = jnp.mean(y, axis=-1, keepdims=True)
    var = jnp.mean(jnp.square(y - mu), axis=-1, keepdims=True)
    y = (y - mu) * jax.lax.rsqrt(var + EPS) * gn_ref[...] + bn_ref[...]
    y = y + days_ref[...]

    # exact (erf-based) GELU; erf via Abramowitz-Stegun 7.1.26 (|err| < 1.5e-7)
    z = y * jnp.float32(0.7071067811865476)
    az = jnp.abs(z)
    tt = 1.0 / (1.0 + 0.3275911 * az)
    poly = tt * (0.254829592 + tt * (-0.284496736 + tt * (1.421413741
              + tt * (-1.453152027 + tt * 1.061405429))))
    erf_abs = 1.0 - poly * jnp.exp(-az * az)
    erf_z = jnp.where(z < 0.0, -erf_abs, erf_abs)
    out_ref[...] = y * 0.5 * (1.0 + erf_z)


# ---------------------------------------------------------------------------
# Deterministic parameter construction (shapes from the module's __init__).
# weight_norm is folded into the effective conv weights.
# ---------------------------------------------------------------------------
def init_params(key):
    keys = iter(jax.random.split(key, 256))
    nk = lambda: next(keys)

    def normal(shape, scale):
        return scale * jax.random.normal(nk(), shape, dtype=jnp.float32)

    def wn_fold(v, g):          # weight_norm (single out channel): w = g * v / ||v||_F
        return g * v / jnp.sqrt(jnp.sum(jnp.square(v)))

    p = {}
    p['wkT'] = normal((KGE_SIZE, KGE_SQ), 0.2)
    p['bk'] = normal((1, KGE_SQ), 0.1)
    p['gk'] = jnp.ones((1, KGE_SQ), jnp.float32)
    p['bek'] = jnp.zeros((1, KGE_SQ), jnp.float32)
    p['w4T'] = normal((KGE_SIZE, KGE_SQ * L), 0.2)
    p['b4'] = normal((1, KGE_SQ * L), 0.1)
    p['g4'] = jnp.ones((1, KGE_SQ * L), jnp.float32)
    p['be4'] = jnp.zeros((1, KGE_SQ * L), jnp.float32)
    p['gn'] = jnp.ones((1, L), jnp.float32)
    p['bn'] = jnp.zeros((1, L), jnp.float32)

    w0s, c1rs, c2s, b1rs, b2rs = [], [], [], [], []
    wsum_cols, dwk_cols, dw20s, dbs = [], [], [], []
    ones_row = jnp.ones((L,), jnp.float32)
    for K in KERNEL_SIZES:
        dil = _get_dilations(K)
        c1r_t, c2_t, b1_t, b2_t = [], [], [], []
        for i in range(NUM_LEVELS):
            cin = IN_CH if i == 0 else 1
            d = dil[i]
            P = (K - 1) * d
            w1 = wn_fold(jax.random.normal(nk(), (cin, K), jnp.float32),
                         jax.random.uniform(nk(), (), jnp.float32, 0.5, 1.5))
            w2 = wn_fold(jax.random.normal(nk(), (1, K), jnp.float32),
                         jax.random.uniform(nk(), (), jnp.float32, 0.5, 1.5))
            b1_t.append(normal((), 0.05))
            b2_t.append(normal((), 0.05))
            if i == 0:
                # 20 "real" channels fused into one (20*168, 168) matmul weight
                w0s.append(_circulant_multi(w1[:KGE_SQ], d).reshape(KGE_SQ * L, L))
                # kge channels are constant over time: circulant column sums
                # collapse to plain kernel sums per channel.
                wsum_cols.append(jnp.sum(w1[KGE_SQ:], axis=1))                  # (20,)
                dw_all = normal((IN_CH,), 0.01)                                 # downsample Conv1d(40,1,1)
                dw20s.append(dw_all[:KGE_SQ])
                dwk_cols.append(dw_all[KGE_SQ:])
                dbs.append(normal((), 0.05))
            else:
                c1r_t.append(_circulant(w1[0], d, 0))
            c2_t.append(_circulant(w2[0], d, -P))
        c1rs.append(jnp.stack(c1r_t))
        c2s.append(jnp.stack(c2_t))
        b1rs.append(jnp.stack([b * ones_row for b in b1_t]))
        b2rs.append(jnp.stack([b * ones_row for b in b2_t]))

    p['w0'] = jnp.stack(w0s).astype(jnp.bfloat16)         # (3, 3360, 168)
    p['c1r'] = jnp.stack(c1rs).astype(jnp.bfloat16)       # (3, 5, 168, 168)
    p['c2'] = jnp.stack(c2s).astype(jnp.bfloat16)         # (3, 6, 168, 168)
    p['b1rows'] = jnp.stack(b1rs)                         # (3, 6, 168) f32
    p['b2rows'] = jnp.stack(b2rs)                         # (3, 6, 168) f32
    p['kaux'] = jnp.concatenate([jnp.stack(wsum_cols, axis=1),
                                 jnp.stack(dwk_cols, axis=1)], axis=1)          # (20, 6)
    p['dw20'] = jnp.stack(dw20s)                          # (3, 20)
    p['db'] = jnp.stack(dbs)                              # (3,)
    p['wl'] = 0.01 * jax.random.normal(nk(), (3,), dtype=jnp.float32)
    p['bl'] = normal((1,), 0.1)
    return p


# ---------------------------------------------------------------------------
# Wrapper
# ---------------------------------------------------------------------------
def generator_p_wm_sum(x, days_in_week, params):
    B = x.shape[0]
    xf = x.astype(jnp.float32)
    days = days_in_week.astype(jnp.float32).reshape(B, L)

    vmem = pl.BlockSpec(memory_space=pltpu.MemorySpace.VMEM)
    smem = pl.BlockSpec(memory_space=pltpu.MemorySpace.SMEM)

    # ---- stage A: heads + LayerNorms + block-0 residual / kge folding ----
    x4_bf, g0k, res_all = pl.pallas_call(
        prelude_kernel,
        out_shape=(jax.ShapeDtypeStruct((B, KGE_SQ * L), jnp.bfloat16),
                   jax.ShapeDtypeStruct((3, B, 1), jnp.float32),
                   jax.ShapeDtypeStruct((3, B, L), jnp.float32)),
        in_specs=[vmem] * 11 + [smem, smem],
        out_specs=(vmem, vmem, vmem),
    )(xf[:, KGE_SIZE:], xf[:, :KGE_SIZE],
      params['wkT'], params['bk'], params['gk'], params['bek'],
      params['w4T'], params['b4'], params['g4'], params['be4'],
      params['kaux'], params['dw20'], params['db'])

    # ---- stage B: the three TCN branches, one per grid step ----
    flops = int(3 * (2 * B * (KGE_SQ * L) * L + 2 * B * (2 * NUM_LEVELS - 1) * L * L))
    bytes_acc = int((params['w0'].size + params['c1r'].size + params['c2'].size) * 2
                    + (params['b1rows'].size + params['b2rows'].size) * 4
                    + 3 * (B * KGE_SQ * L * 2 + 3 * B * L * 4))
    branch_out = pl.pallas_call(
        branch_kernel,
        out_shape=jax.ShapeDtypeStruct((3, B, L), jnp.float32),
        grid=(3,),
        in_specs=[
            pl.BlockSpec((B, KGE_SQ * L), lambda t: (0, 0)),                    # x4 (bf16)
            pl.BlockSpec((1, B, 1), lambda t: (t, 0, 0)),                       # kge conv1 part
            pl.BlockSpec((1, B, L), lambda t: (t, 0, 0)),                       # block-0 residual
            pl.BlockSpec((1, KGE_SQ * L, L), lambda t: (t, 0, 0)),              # fused block-0 weight
            pl.BlockSpec((1, NUM_LEVELS - 1, L, L), lambda t: (t, 0, 0, 0)),    # conv1 blocks 1..5
            pl.BlockSpec((1, NUM_LEVELS, L, L), lambda t: (t, 0, 0, 0)),        # conv2 blocks 0..5
            pl.BlockSpec((1, NUM_LEVELS, L), lambda t: (t, 0, 0)),              # conv1 bias rows
            pl.BlockSpec((1, NUM_LEVELS, L), lambda t: (t, 0, 0)),              # conv2 bias rows
        ],
        out_specs=pl.BlockSpec((1, B, L), lambda t: (t, 0, 0)),
        compiler_params=pltpu.CompilerParams(
            dimension_semantics=("parallel",),
            vmem_limit_bytes=24 * 1024 * 1024),
        cost_estimate=pl.CostEstimate(flops=flops, transcendentals=0,
                                      bytes_accessed=bytes_acc),
    )(x4_bf, g0k, res_all, params['w0'], params['c1r'], params['c2'],
      params['b1rows'], params['b2rows'])

    # ---- stage C: 3->1 mix, LayerNorm([1,168]), + days, GELU ----
    return pl.pallas_call(
        epilogue_kernel,
        out_shape=jax.ShapeDtypeStruct((B, L), jnp.float32),
        in_specs=[vmem, vmem, vmem, vmem, smem, smem],
        out_specs=vmem,
    )(branch_out, days, params['gn'], params['bn'], params['wl'], params['bl'])


if __name__ == "__main__":
    key = jax.random.PRNGKey(0)
    kp, kx, kd = jax.random.split(key, 3)
    params = init_params(kp)

    BZ = 2
    # x: (BZ, 64): first 32 features feed linear_4wm, last 32 feed linear_kge
    x = jax.random.normal(kx, (BZ, 2 * KGE_SIZE), dtype=jnp.float32)
    # days_in_week: reshaped to (BZ, 1, 168) and added to the normed output
    days = 0.1 * jax.random.normal(kd, (BZ, L), dtype=jnp.float32)

    y = jax.jit(generator_p_wm_sum)(x, days, params)
    y = jax.block_until_ready(y)
    assert y.shape == (BZ, L)
    assert bool(jnp.all(jnp.isfinite(y)))
    print("KERNEL_OK")
</pallas_src>

<mosaic_0001>
module attributes {stable_mosaic.version = 11 : i64} {
  func.func @prelude_kernel(%arg0: memref<2x32xf32, #tpu.memory_space<vmem>>, %arg1: memref<2x32xf32, #tpu.memory_space<vmem>>, %arg2: memref<32x20xf32, #tpu.memory_space<vmem>>, %arg3: memref<1x20xf32, #tpu.memory_space<vmem>>, %arg4: memref<1x20xf32, #tpu.memory_space<vmem>>, %arg5: memref<1x20xf32, #tpu.memory_space<vmem>>, %arg6: memref<32x3360xf32, #tpu.memory_space<vmem>>, %arg7: memref<1x3360xf32, #tpu.memory_space<vmem>>, %arg8: memref<1x3360xf32, #tpu.memory_space<vmem>>, %arg9: memref<1x3360xf32, #tpu.memory_space<vmem>>, %arg10: memref<20x6xf32, #tpu.memory_space<vmem>>, %arg11: memref<3x20xf32, #tpu.memory_space<smem>>, %arg12: memref<3xf32, #tpu.memory_space<smem>>, %arg13: memref<2x3360xbf16, #tpu.memory_space<vmem>>, %arg14: memref<3x2x1xf32, #tpu.memory_space<vmem>>, %arg15: memref<3x2x168xf32, #tpu.memory_space<vmem>>) attributes {dimension_semantics = [], scalar_prefetch = 0 : i64, scratch_operands = 0 : i64, tpu.core_type = #tpu.core_type<tc>} {
    %c0 = arith.constant 0 : index
    %c0_0 = arith.constant 0 : index
    %0 = vector.load %arg0[%c0, %c0_0] : memref<2x32xf32, #tpu.memory_space<vmem>>, vector<2x32xf32>
    %c0_1 = arith.constant 0 : index
    %c0_2 = arith.constant 0 : index
    %1 = vector.load %arg2[%c0_1, %c0_2] : memref<32x20xf32, #tpu.memory_space<vmem>>, vector<32x20xf32>
    %cst = arith.constant dense<0.000000e+00> : vector<2x20xf32>
    %2 = tpu.matmul %0, %1, %cst {dimension_numbers = #tpu.dot_dimension_numbers<[1], [0], [0], [1], [0, 0, 1, 1], [], []>} : vector<2x32xf32>, vector<32x20xf32>, vector<2x20xf32> -> vector<2x20xf32>
    %c0_3 = arith.constant 0 : index
    %c0_4 = arith.constant 0 : index
    %3 = vector.load %arg3[%c0_3, %c0_4] : memref<1x20xf32, #tpu.memory_space<vmem>>, vector<1x20xf32>
    %4 = vector.broadcast %3 : vector<1x20xf32> to vector<2x20xf32>
    %5 = arith.addf %2, %4 : vector<2x20xf32>
    %cst_5 = arith.constant dense<0.000000e+00> : vector<2xf32>
    %6 = vector.multi_reduction <add>, %5, %cst_5 [1] : vector<2x20xf32> to vector<2xf32>
    %7 = vector.shape_cast %6 : vector<2xf32> to vector<2x1xf32>
    %cst_6 = arith.constant 2.000000e+01 : f32
    %8 = vector.broadcast %cst_6 : f32 to vector<2x1xf32>
    %9 = arith.divf %7, %8 : vector<2x1xf32>
    %10 = vector.broadcast %9 : vector<2x1xf32> to vector<2x20xf32>
    %11 = arith.subf %5, %10 : vector<2x20xf32>
    %12 = arith.mulf %11, %11 : vector<2x20xf32>
    %cst_7 = arith.constant dense<0.000000e+00> : vector<2xf32>
    %13 = vector.multi_reduction <add>, %12, %cst_7 [1] : vector<2x20xf32> to vector<2xf32>
    %14 = vector.shape_cast %13 : vector<2xf32> to vector<2x1xf32>
    %cst_8 = arith.constant 2.000000e+01 : f32
    %15 = vector.broadcast %cst_8 : f32 to vector<2x1xf32>
    %16 = arith.divf %14, %15 : vector<2x1xf32>
    %17 = vector.broadcast %9 : vector<2x1xf32> to vector<2x20xf32>
    %18 = arith.subf %5, %17 : vector<2x20xf32>
    %cst_9 = arith.constant 9.99999974E-6 : f32
    %19 = vector.broadcast %cst_9 : f32 to vector<2x1xf32>
    %20 = arith.addf %16, %19 : vector<2x1xf32>
    %21 = math.rsqrt %20 : vector<2x1xf32>
    %22 = vector.broadcast %21 : vector<2x1xf32> to vector<2x20xf32>
    %23 = arith.mulf %18, %22 : vector<2x20xf32>
    %c0_10 = arith.constant 0 : index
    %c0_11 = arith.constant 0 : index
    %24 = vector.load %arg4[%c0_10, %c0_11] : memref<1x20xf32, #tpu.memory_space<vmem>>, vector<1x20xf32>
    %25 = vector.broadcast %24 : vector<1x20xf32> to vector<2x20xf32>
    %26 = arith.mulf %23, %25 : vector<2x20xf32>
    %c0_12 = arith.constant 0 : index
    %c0_13 = arith.constant 0 : index
    %27 = vector.load %arg5[%c0_12, %c0_13] : memref<1x20xf32, #tpu.memory_space<vmem>>, vector<1x20xf32>
    %28 = vector.broadcast %27 : vector<1x20xf32> to vector<2x20xf32>
    %29 = arith.addf %26, %28 : vector<2x20xf32>
    %c0_14 = arith.constant 0 : index
    %c0_15 = arith.constant 0 : index
    %30 = vector.load %arg1[%c0_14, %c0_15] : memref<2x32xf32, #tpu.memory_space<vmem>>, vector<2x32xf32>
    %c0_16 = arith.constant 0 : index
    %c0_17 = arith.constant 0 : index
    %31 = vector.load %arg6[%c0_16, %c0_17] : memref<32x3360xf32, #tpu.memory_space<vmem>>, vector<32x3360xf32>
    %cst_18 = arith.constant dense<0.000000e+00> : vector<2x3360xf32>
    %32 = tpu.matmul %30, %31, %cst_18 {dimension_numbers = #tpu.dot_dimension_numbers<[1], [0], [0], [1], [0, 0, 1, 1], [], []>} : vector<2x32xf32>, vector<32x3360xf32>, vector<2x3360xf32> -> vector<2x3360xf32>
    %c0_19 = arith.constant 0 : index
    %c0_20 = arith.constant 0 : index
    %33 = vector.load %arg7[%c0_19, %c0_20] : memref<1x3360xf32, #tpu.memory_space<vmem>>, vector<1x3360xf32>
    %34 = vector.broadcast %33 : vector<1x3360xf32> to vector<2x3360xf32>
    %35 = arith.addf %32, %34 : vector<2x3360xf32>
    %cst_21 = arith.constant dense<0.000000e+00> : vector<2xf32>
    %36 = vector.multi_reduction <add>, %35, %cst_21 [1] : vector<2x3360xf32> to vector<2xf32>
    %37 = vector.shape_cast %36 : vector<2xf32> to vector<2x1xf32>
    %cst_22 = arith.constant 3.360000e+03 : f32
    %38 = vector.broadcast %cst_22 : f32 to vector<2x1xf32>
    %39 = arith.divf %37, %38 : vector<2x1xf32>
    %40 = vector.broadcast %39 : vector<2x1xf32> to vector<2x3360xf32>
    %41 = arith.subf %35, %40 : vector<2x3360xf32>
    %42 = arith.mulf %41, %41 : vector<2x3360xf32>
    %cst_23 = arith.constant dense<0.000000e+00> : vector<2xf32>
    %43 = vector.multi_reduction <add>, %42, %cst_23 [1] : vector<2x3360xf32> to vector<2xf32>
    %44 = vector.shape_cast %43 : vector<2xf32> to vector<2x1xf32>
    %cst_24 = arith.constant 3.360000e+03 : f32
    %45 = vector.broadcast %cst_24 : f32 to vector<2x1xf32>
    %46 = arith.divf %44, %45 : vector<2x1xf32>
    %47 = vector.broadcast %39 : vector<2x1xf32> to vector<2x3360xf32>
    %48 = arith.subf %35, %47 : vector<2x3360xf32>
    %cst_25 = arith.constant 9.99999974E-6 : f32
    %49 = vector.broadcast %cst_25 : f32 to vector<2x1xf32>
    %50 = arith.addf %46, %49 : vector<2x1xf32>
    %51 = math.rsqrt %50 : vector<2x1xf32>
    %52 = vector.broadcast %51 : vector<2x1xf32> to vector<2x3360xf32>
    %53 = arith.mulf %48, %52 : vector<2x3360xf32>
    %c0_26 = arith.constant 0 : index
    %c0_27 = arith.constant 0 : index
    %54 = vector.load %arg8[%c0_26, %c0_27] : memref<1x3360xf32, #tpu.memory_space<vmem>>, vector<1x3360xf32>
    %55 = vector.broadcast %54 : vector<1x3360xf32> to vector<2x3360xf32>
    %56 = arith.mulf %53, %55 : vector<2x3360xf32>
    %c0_28 = arith.constant 0 : index
    %c0_29 = arith.constant 0 : index
    %57 = vector.load %arg9[%c0_28, %c0_29] : memref<1x3360xf32, #tpu.memory_space<vmem>>, vector<1x3360xf32>
    %58 = vector.broadcast %57 : vector<1x3360xf32> to vector<2x3360xf32>
    %59 = arith.addf %56, %58 : vector<2x3360xf32>
    %60 = arith.truncf %59 : vector<2x3360xf32> to vector<2x3360xbf16>
    %c0_30 = arith.constant 0 : index
    %c0_31 = arith.constant 0 : index
    %61 = vector.load %arg13[%c0_30, %c0_31] : memref<2x3360xbf16, #tpu.memory_space<vmem>>, vector<2x3360xbf16>
    tpu.vector_store %arg13[%c0_30, %c0_31], %60 {strides = array<i32>} : memref<2x3360xbf16, #tpu.memory_space<vmem>>, vector<2x3360xbf16>,
    %c0_32 = arith.constant 0 : index
    %c0_33 = arith.constant 0 : index
    %62 = vector.load %arg10[%c0_32, %c0_33] : memref<20x6xf32, #tpu.memory_space<vmem>>, vector<20x6xf32>
    %cst_34 = arith.constant dense<0.000000e+00> : vector<2x6xf32>
    %63 = tpu.matmul %29, %62, %cst_34 {dimension_numbers = #tpu.dot_dimension_numbers<[1], [0], [0], [1], [0, 0, 1, 1], [], []>} : vector<2x20xf32>, vector<20x6xf32>, vector<2x6xf32> -> vector<2x6xf32>
    %cst_35 = arith.constant 0.000000e+00 : f32
    %64 = vector.broadcast %cst_35 : f32 to vector<2x168xf32>
    %cst_36 = arith.constant 0.000000e+00 : f32
    %65 = vector.broadcast %cst_36 : f32 to vector<2x168xf32>
    %cst_37 = arith.constant 0.000000e+00 : f32
    %66 = vector.broadcast %cst_37 : f32 to vector<2x168xf32>
    %67 = vector.extract_strided_slice %59 {offsets = [0, 0], sizes = [2, 168], strides = [1, 1]} : vector<2x3360xf32> to vector<2x168xf32>
    %c0_38 = arith.constant 0 : index
    %c0_39 = arith.constant 0 : index
    %68 = memref.load %arg11[%c0_38, %c0_39] : memref<3x20xf32, #tpu.memory_space<smem>>
    %69 = vector.broadcast %68 : f32 to vector<2x168xf32>
    %70 = arith.mulf %69, %67 : vector<2x168xf32>
    %71 = arith.addf %64, %70 : vector<2x168xf32>
    %c1 = arith.constant 1 : index
    %c0_40 = arith.constant 0 : index
    %72 = memref.load %arg11[%c1, %c0_40] : memref<3x20xf32, #tpu.memory_space<smem>>
    %73 = vector.broadcast %72 : f32 to vector<2x168xf32>
    %74 = arith.mulf %73, %67 : vector<2x168xf32>
    %75 = arith.addf %65, %74 : vector<2x168xf32>
    %c2 = arith.constant 2 : index
    %c0_41 = arith.constant 0 : index
    %76 = memref.load %arg11[%c2, %c0_41] : memref<3x20xf32, #tpu.memory_space<smem>>
    %77 = vector.broadcast %76 : f32 to vector<2x168xf32>
    %78 = arith.mulf %77, %67 : vector<2x168xf32>
    %79 = arith.addf %66, %78 : vector<2x168xf32>
    %80 = vector.extract_strided_slice %59 {offsets = [0, 168], sizes = [2, 168], strides = [1, 1]} : vector<2x3360xf32> to vector<2x168xf32>
    %c0_42 = arith.constant 0 : index
    %c1_43 = arith.constant 1 : index
    %81 = memref.load %arg11[%c0_42, %c1_43] : memref<3x20xf32, #tpu.memory_space<smem>>
    %82 = vector.broadcast %81 : f32 to vector<2x168xf32>
    %83 = arith.mulf %82, %80 : vector<2x168xf32>
    %84 = arith.addf %71, %83 : vector<2x168xf32>
    %c1_44 = arith.constant 1 : index
    %c1_45 = arith.constant 1 : index
    %85 = memref.load %arg11[%c1_44, %c1_45] : memref<3x20xf32, #tpu.memory_space<smem>>
    %86 = vector.broadcast %85 : f32 to vector<2x168xf32>
    %87 = arith.mulf %86, %80 : vector<2x168xf32>
    %88 = arith.addf %75, %87 : vector<2x168xf32>
    %c2_46 = arith.constant 2 : index
    %c1_47 = arith.constant 1 : index
    %89 = memref.load %arg11[%c2_46, %c1_47] : memref<3x20xf32, #tpu.memory_space<smem>>
    %90 = vector.broadcast %89 : f32 to vector<2x168xf32>
    %91 = arith.mulf %90, %80 : vector<2x168xf32>
    %92 = arith.addf %79, %91 : vector<2x168xf32>
    %93 = vector.extract_strided_slice %59 {offsets = [0, 336], sizes = [2, 168], strides = [1, 1]} : vector<2x3360xf32> to vector<2x168xf32>
    %c0_48 = arith.constant 0 : index
    %c2_49 = arith.constant 2 : index
    %94 = memref.load %arg11[%c0_48, %c2_49] : memref<3x20xf32, #tpu.memory_space<smem>>
    %95 = vector.broadcast %94 : f32 to vector<2x168xf32>
    %96 = arith.mulf %95, %93 : vector<2x168xf32>
    %97 = arith.addf %84, %96 : vector<2x168xf32>
    %c1_50 = arith.constant 1 : index
    %c2_51 = arith.constant 2 : index
    %98 = memref.load %arg11[%c1_50, %c2_51] : memref<3x20xf32, #tpu.memory_space<smem>>
    %99 = vector.broadcast %98 : f32 to vector<2x168xf32>
    %100 = arith.mulf %99, %93 : vector<2x168xf32>
    %101 = arith.addf %88, %100 : vector<2x168xf32>
    %c2_52 = arith.constant 2 : index
    %c2_53 = arith.constant 2 : index
    %102 = memref.load %arg11[%c2_52, %c2_53] : memref<3x20xf32, #tpu.memory_space<smem>>
    %103 = vector.broadcast %102 : f32 to vector<2x168xf32>
    %104 = arith.mulf %103, %93 : vector<2x168xf32>
    %105 = arith.addf %92, %104 : vector<2x168xf32>
    %106 = vector.extract_strided_slice %59 {offsets = [0, 504], sizes = [2, 168], strides = [1, 1]} : vector<2x3360xf32> to vector<2x168xf32>
    %c0_54 = arith.constant 0 : index
    %c3 = arith.constant 3 : index
    %107 = memref.load %arg11[%c0_54, %c3] : memref<3x20xf32, #tpu.memory_space<smem>>
    %108 = vector.broadcast %107 : f32 to vector<2x168xf32>
    %109 = arith.mulf %108, %106 : vector<2x168xf32>
    %110 = arith.addf %97, %109 : vector<2x168xf32>
    %c1_55 = arith.constant 1 : index
    %c3_56 = arith.constant 3 : index
    %111 = memref.load %arg11[%c1_55, %c3_56] : memref<3x20xf32, #tpu.memory_space<smem>>
    %112 = vector.broadcast %111 : f32 to vector<2x168xf32>
    %113 = arith.mulf %112, %106 : vector<2x168xf32>
    %114 = arith.addf %101, %113 : vector<2x168xf32>
    %c2_57 = arith.constant 2 : index
    %c3_58 = arith.constant 3 : index
    %115 = memref.load %arg11[%c2_57, %c3_58] : memref<3x20xf32, #tpu.memory_space<smem>>
    %116 = vector.broadcast %115 : f32 to vector<2x168xf32>
    %117 = arith.mulf %116, %106 : vector<2x168xf32>
    %118 = arith.addf %105, %117 : vector<2x168xf32>
    %119 = vector.extract_strided_slice %59 {offsets = [0, 672], sizes = [2, 168], strides = [1, 1]} : vector<2x3360xf32> to vector<2x168xf32>
    %c0_59 = arith.constant 0 : index
    %c4 = arith.constant 4 : index
    %120 = memref.load %arg11[%c0_59, %c4] : memref<3x20xf32, #tpu.memory_space<smem>>
    %121 = vector.broadcast %120 : f32 to vector<2x168xf32>
    %122 = arith.mulf %121, %119 : vector<2x168xf32>
    %123 = arith.addf %110, %122 : vector<2x168xf32>
    %c1_60 = arith.constant 1 : index
    %c4_61 = arith.constant 4 : index
    %124 = memref.load %arg11[%c1_60, %c4_61] : memref<3x20xf32, #tpu.memory_space<smem>>
    %125 = vector.broadcast %124 : f32 to vector<2x168xf32>
    %126 = arith.mulf %125, %119 : vector<2x168xf32>
    %127 = arith.addf %114, %126 : vector<2x168xf32>
    %c2_62 = arith.constant 2 : index
    %c4_63 = arith.constant 4 : index
    %128 = memref.load %arg11[%c2_62, %c4_63] : memref<3x20xf32, #tpu.memory_space<smem>>
    %129 = vector.broadcast %128 : f32 to vector<2x168xf32>
    %130 = arith.mulf %129, %119 : vector<2x168xf32>
    %131 = arith.addf %118, %130 : vector<2x168xf32>
    %132 = vector.extract_strided_slice %59 {offsets = [0, 840], sizes = [2, 168], strides = [1, 1]} : vector<2x3360xf32> to vector<2x168xf32>
    %c0_64 = arith.constant 0 : index
    %c5 = arith.constant 5 : index
    %133 = memref.load %arg11[%c0_64, %c5] : memref<3x20xf32, #tpu.memory_space<smem>>
    %134 = vector.broadcast %133 : f32 to vector<2x168xf32>
    %135 = arith.mulf %134, %132 : vector<2x168xf32>
    %136 = arith.addf %123, %135 : vector<2x168xf32>
    %c1_65 = arith.constant 1 : index
    %c5_66 = arith.constant 5 : index
    %137 = memref.load %arg11[%c1_65, %c5_66] : memref<3x20xf32, #tpu.memory_space<smem>>
    %138 = vector.broadcast %137 : f32 to vector<2x168xf32>
    %139 = arith.mulf %138, %132 : vector<2x168xf32>
    %140 = arith.addf %127, %139 : vector<2x168xf32>
    %c2_67 = arith.constant 2 : index
    %c5_68 = arith.constant 5 : index
    %141 = memref.load %arg11[%c2_67, %c5_68] : memref<3x20xf32, #tpu.memory_space<smem>>
    %142 = vector.broadcast %141 : f32 to vector<2x168xf32>
    %143 = arith.mulf %142, %132 : vector<2x168xf32>
    %144 = arith.addf %131, %143 : vector<2x168xf32>
    %145 = vector.extract_strided_slice %59 {offsets = [0, 1008], sizes = [2, 168], strides = [1, 1]} : vector<2x3360xf32> to vector<2x168xf32>
    %c0_69 = arith.constant 0 : index
    %c6 = arith.constant 6 : index
    %146 = memref.load %arg11[%c0_69, %c6] : memref<3x20xf32, #tpu.memory_space<smem>>
    %147 = vector.broadcast %146 : f32 to vector<2x168xf32>
    %148 = arith.mulf %147, %145 : vector<2x168xf32>
    %149 = arith.addf %136, %148 : vector<2x168xf32>
    %c1_70 = arith.constant 1 : index
    %c6_71 = arith.constant 6 : index
    %150 = memref.load %arg11[%c1_70, %c6_71] : memref<3x20xf32, #tpu.memory_space<smem>>
    %151 = vector.broadcast %150 : f32 to vector<2x168xf32>
    %152 = arith.mulf %151, %145 : vector<2x168xf32>
    %153 = arith.addf %140, %152 : vector<2x168xf32>
    %c2_72 = arith.constant 2 : index
    %c6_73 = arith.constant 6 : index
    %154 = memref.load %arg11[%c2_72, %c6_73] : memref<3x20xf32, #tpu.memory_space<smem>>
    %155 = vector.broadcast %154 : f32 to vector<2x168xf32>
    %156 = arith.mulf %155, %145 : vector<2x168xf32>
    %157 = arith.addf %144, %156 : vector<2x168xf32>
    %158 = vector.extract_strided_slice %59 {offsets = [0, 1176], sizes = [2, 168], strides = [1, 1]} : vector<2x3360xf32> to vector<2x168xf32>
    %c0_74 = arith.constant 0 : index
    %c7 = arith.constant 7 : index
    %159 = memref.load %arg11[%c0_74, %c7] : memref<3x20xf32, #tpu.memory_space<smem>>
    %160 = vector.broadcast %159 : f32 to vector<2x168xf32>
    %161 = arith.mulf %160, %158 : vector<2x168xf32>
    %162 = arith.addf %149, %161 : vector<2x168xf32>
    %c1_75 = arith.constant 1 : index
    %c7_76 = arith.constant 7 : index
    %163 = memref.load %arg11[%c1_75, %c7_76] : memref<3x20xf32, #tpu.memory_space<smem>>
    %164 = vector.broadcast %163 : f32 to vector<2x168xf32>
    %165 = arith.mulf %164, %158 : vector<2x168xf32>
    %166 = arith.addf %153, %165 : vector<2x168xf32>
    %c2_77 = arith.constant 2 : index
    %c7_78 = arith.constant 7 : index
    %167 = memref.load %arg11[%c2_77, %c7_78] : memref<3x20xf32, #tpu.memory_space<smem>>
    %168 = vector.broadcast %167 : f32 to vector<2x168xf32>
    %169 = arith.mulf %168, %158 : vector<2x168xf32>
    %170 = arith.addf %157, %169 : vector<2x168xf32>
    %171 = vector.extract_strided_slice %59 {offsets = [0, 1344], sizes = [2, 168], strides = [1, 1]} : vector<2x3360xf32> to vector<2x168xf32>
    %c0_79 = arith.constant 0 : index
    %c8 = arith.constant 8 : index
    %172 = memref.load %arg11[%c0_79, %c8] : memref<3x20xf32, #tpu.memory_space<smem>>
    %173 = vector.broadcast %172 : f32 to vector<2x168xf32>
    %174 = arith.mulf %173, %171 : vector<2x168xf32>
    %175 = arith.addf %162, %174 : vector<2x168xf32>
    %c1_80 = arith.constant 1 : index
    %c8_81 = arith.constant 8 : index
    %176 = memref.load %arg11[%c1_80, %c8_81] : memref<3x20xf32, #tpu.memory_space<smem>>
    %177 = vector.broadcast %176 : f32 to vector<2x168xf32>
    %178 = arith.mulf %177, %171 : vector<2x168xf32>
    %179 = arith.addf %166, %178 : vector<2x168xf32>
    %c2_82 = arith.constant 2 : index
    %c8_83 = arith.constant 8 : index
    %180 = memref.load %arg11[%c2_82, %c8_83] : memref<3x20xf32, #tpu.memory_space<smem>>
    %181 = vector.broadcast %180 : f32 to vector<2x168xf32>
    %182 = arith.mulf %181, %171 : vector<2x168xf32>
    %183 = arith.addf %170, %182 : vector<2x168xf32>
    %184 = vector.extract_strided_slice %59 {offsets = [0, 1512], sizes = [2, 168], strides = [1, 1]} : vector<2x3360xf32> to vector<2x168xf32>
    %c0_84 = arith.constant 0 : index
    %c9 = arith.constant 9 : index
    %185 = memref.load %arg11[%c0_84, %c9] : memref<3x20xf32, #tpu.memory_space<smem>>
    %186 = vector.broadcast %185 : f32 to vector<2x168xf32>
    %187 = arith.mulf %186, %184 : vector<2x168xf32>
    %188 = arith.addf %175, %187 : vector<2x168xf32>
    %c1_85 = arith.constant 1 : index
    %c9_86 = arith.constant 9 : index
    %189 = memref.load %arg11[%c1_85, %c9_86] : memref<3x20xf32, #tpu.memory_space<smem>>
    %190 = vector.broadcast %189 : f32 to vector<2x168xf32>
    %191 = arith.mulf %190, %184 : vector<2x168xf32>
    %192 = arith.addf %179, %191 : vector<2x168xf32>
    %c2_87 = arith.constant 2 : index
    %c9_88 = arith.constant 9 : index
    %193 = memref.load %arg11[%c2_87, %c9_88] : memref<3x20xf32, #tpu.memory_space<smem>>
    %194 = vector.broadcast %193 : f32 to vector<2x168xf32>
    %195 = arith.mulf %194, %184 : vector<2x168xf32>
    %196 = arith.addf %183, %195 : vector<2x168xf32>
    %197 = vector.extract_strided_slice %59 {offsets = [0, 1680], sizes = [2, 168], strides = [1, 1]} : vector<2x3360xf32> to vector<2x168xf32>
    %c0_89 = arith.constant 0 : index
    %c10 = arith.constant 10 : index
    %198 = memref.load %arg11[%c0_89, %c10] : memref<3x20xf32, #tpu.memory_space<smem>>
    %199 = vector.broadcast %198 : f32 to vector<2x168xf32>
    %200 = arith.mulf %199, %197 : vector<2x168xf32>
    %201 = arith.addf %188, %200 : vector<2x168xf32>
    %c1_90 = arith.constant 1 : index
    %c10_91 = arith.constant 10 : index
    %202 = memref.load %arg11[%c1_90, %c10_91] : memref<3x20xf32, #tpu.memory_space<smem>>
    %203 = vector.broadcast %202 : f32 to vector<2x168xf32>
    %204 = arith.mulf %203, %197 : vector<2x168xf32>
    %205 = arith.addf %192, %204 : vector<2x168xf32>
    %c2_92 = arith.constant 2 : index
    %c10_93 = arith.constant 10 : index
    %206 = memref.load %arg11[%c2_92, %c10_93] : memref<3x20xf32, #tpu.memory_space<smem>>
    %207 = vector.broadcast %206 : f32 to vector<2x168xf32>
    %208 = arith.mulf %207, %197 : vector<2x168xf32>
    %209 = arith.addf %196, %208 : vector<2x168xf32>
    %210 = vector.extract_strided_slice %59 {offsets = [0, 1848], sizes = [2, 168], strides = [1, 1]} : vector<2x3360xf32> to vector<2x168xf32>
    %c0_94 = arith.constant 0 : index
    %c11 = arith.constant 11 : index
    %211 = memref.load %arg11[%c0_94, %c11] : memref<3x20xf32, #tpu.memory_space<smem>>
    %212 = vector.broadcast %211 : f32 to vector<2x168xf32>
    %213 = arith.mulf %212, %210 : vector<2x168xf32>
    %214 = arith.addf %201, %213 : vector<2x168xf32>
    %c1_95 = arith.constant 1 : index
    %c11_96 = arith.constant 11 : index
    %215 = memref.load %arg11[%c1_95, %c11_96] : memref<3x20xf32, #tpu.memory_space<smem>>
    %216 = vector.broadcast %215 : f32 to vector<2x168xf32>
    %217 = arith.mulf %216, %210 : vector<2x168xf32>
    %218 = arith.addf %205, %217 : vector<2x168xf32>
    %c2_97 = arith.constant 2 : index
    %c11_98 = arith.constant 11 : index
    %219 = memref.load %arg11[%c2_97, %c11_98] : memref<3x20xf32, #tpu.memory_space<smem>>
    %220 = vector.broadcast %219 : f32 to vector<2x168xf32>
    %221 = arith.mulf %220, %210 : vector<2x168xf32>
    %222 = arith.addf %209, %221 : vector<2x168xf32>
    %223 = vector.extract_strided_slice %59 {offsets = [0, 2016], sizes = [2, 168], strides = [1, 1]} : vector<2x3360xf32> to vector<2x168xf32>
    %c0_99 = arith.constant 0 : index
    %c12 = arith.constant 12 : index
    %224 = memref.load %arg11[%c0_99, %c12] : memref<3x20xf32, #tpu.memory_space<smem>>
    %225 = vector.broadcast %224 : f32 to vector<2x168xf32>
    %226 = arith.mulf %225, %223 : vector<2x168xf32>
    %227 = arith.addf %214, %226 : vector<2x168xf32>
    %c1_100 = arith.constant 1 : index
    %c12_101 = arith.constant 12 : index
    %228 = memref.load %arg11[%c1_100, %c12_101] : memref<3x20xf32, #tpu.memory_space<smem>>
    %229 = vector.broadcast %228 : f32 to vector<2x168xf32>
    %230 = arith.mulf %229, %223 : vector<2x168xf32>
    %231 = arith.addf %218, %230 : vector<2x168xf32>
    %c2_102 = arith.constant 2 : index
    %c12_103 = arith.constant 12 : index
    %232 = memref.load %arg11[%c2_102, %c12_103] : memref<3x20xf32, #tpu.memory_space<smem>>
    %233 = vector.broadcast %232 : f32 to vector<2x168xf32>
    %234 = arith.mulf %233, %223 : vector<2x168xf32>
    %235 = arith.addf %222, %234 : vector<2x168xf32>
    %236 = vector.extract_strided_slice %59 {offsets = [0, 2184], sizes = [2, 168], strides = [1, 1]} : vector<2x3360xf32> to vector<2x168xf32>
    %c0_104 = arith.constant 0 : index
    %c13 = arith.constant 13 : index
    %237 = memref.load %arg11[%c0_104, %c13] : memref<3x20xf32, #tpu.memory_space<smem>>
    %238 = vector.broadcast %237 : f32 to vector<2x168xf32>
    %239 = arith.mulf %238, %236 : vector<2x168xf32>
    %240 = arith.addf %227, %239 : vector<2x168xf32>
    %c1_105 = arith.constant 1 : index
    %c13_106 = arith.constant 13 : index
    %241 = memref.load %arg11[%c1_105, %c13_106] : memref<3x20xf32, #tpu.memory_space<smem>>
    %242 = vector.broadcast %241 : f32 to vector<2x168xf32>
    %243 = arith.mulf %242, %236 : vector<2x168xf32>
    %244 = arith.addf %231, %243 : vector<2x168xf32>
    %c2_107 = arith.constant 2 : index
    %c13_108 = arith.constant 13 : index
    %245 = memref.load %arg11[%c2_107, %c13_108] : memref<3x20xf32, #tpu.memory_space<smem>>
    %246 = vector.broadcast %245 : f32 to vector<2x168xf32>
    %247 = arith.mulf %246, %236 : vector<2x168xf32>
    %248 = arith.addf %235, %247 : vector<2x168xf32>
    %249 = vector.extract_strided_slice %59 {offsets = [0, 2352], sizes = [2, 168], strides = [1, 1]} : vector<2x3360xf32> to vector<2x168xf32>
    %c0_109 = arith.constant 0 : index
    %c14 = arith.constant 14 : index
    %250 = memref.load %arg11[%c0_109, %c14] : memref<3x20xf32, #tpu.memory_space<smem>>
    %251 = vector.broadcast %250 : f32 to vector<2x168xf32>
    %252 = arith.mulf %251, %249 : vector<2x168xf32>
    %253 = arith.addf %240, %252 : vector<2x168xf32>
    %c1_110 = arith.constant 1 : index
    %c14_111 = arith.constant 14 : index
    %254 = memref.load %arg11[%c1_110, %c14_111] : memref<3x20xf32, #tpu.memory_space<smem>>
    %255 = vector.broadcast %254 : f32 to vector<2x168xf32>
    %256 = arith.mulf %255, %249 : vector<2x168xf32>
    %257 = arith.addf %244, %256 : vector<2x168xf32>
    %c2_112 = arith.constant 2 : index
    %c14_113 = arith.constant 14 : index
    %258 = memref.load %arg11[%c2_112, %c14_113] : memref<3x20xf32, #tpu.memory_space<smem>>
    %259 = vector.broadcast %258 : f32 to vector<2x168xf32>
    %260 = arith.mulf %259, %249 : vector<2x168xf32>
    %261 = arith.addf %248, %260 : vector<2x168xf32>
    %262 = vector.extract_strided_slice %59 {offsets = [0, 2520], sizes = [2, 168], strides = [1, 1]} : vector<2x3360xf32> to vector<2x168xf32>
    %c0_114 = arith.constant 0 : index
    %c15 = arith.constant 15 : index
    %263 = memref.load %arg11[%c0_114, %c15] : memref<3x20xf32, #tpu.memory_space<smem>>
    %264 = vector.broadcast %263 : f32 to vector<2x168xf32>
    %265 = arith.mulf %264, %262 : vector<2x168xf32>
    %266 = arith.addf %253, %265 : vector<2x168xf32>
    %c1_115 = arith.constant 1 : index
    %c15_116 = arith.constant 15 : index
    %267 = memref.load %arg11[%c1_115, %c15_116] : memref<3x20xf32, #tpu.memory_space<smem>>
    %268 = vector.broadcast %267 : f32 to vector<2x168xf32>
    %269 = arith.mulf %268, %262 : vector<2x168xf32>
    %270 = arith.addf %257, %269 : vector<2x168xf32>
    %c2_117 = arith.constant 2 : index
    %c15_118 = arith.constant 15 : index
    %271 = memref.load %arg11[%c2_117, %c15_118] : memref<3x20xf32, #tpu.memory_space<smem>>
    %272 = vector.broadcast %271 : f32 to vector<2x168xf32>
    %273 = arith.mulf %272, %262 : vector<2x168xf32>
    %274 = arith.addf %261, %273 : vector<2x168xf32>
    %275 = vector.extract_strided_slice %59 {offsets = [0, 2688], sizes = [2, 168], strides = [1, 1]} : vector<2x3360xf32> to vector<2x168xf32>
    %c0_119 = arith.constant 0 : index
    %c16 = arith.constant 16 : index
    %276 = memref.load %arg11[%c0_119, %c16] : memref<3x20xf32, #tpu.memory_space<smem>>
    %277 = vector.broadcast %276 : f32 to vector<2x168xf32>
    %278 = arith.mulf %277, %275 : vector<2x168xf32>
    %279 = arith.addf %266, %278 : vector<2x168xf32>
    %c1_120 = arith.constant 1 : index
    %c16_121 = arith.constant 16 : index
    %280 = memref.load %arg11[%c1_120, %c16_121] : memref<3x20xf32, #tpu.memory_space<smem>>
    %281 = vector.broadcast %280 : f32 to vector<2x168xf32>
    %282 = arith.mulf %281, %275 : vector<2x168xf32>
    %283 = arith.addf %270, %282 : vector<2x168xf32>
    %c2_122 = arith.constant 2 : index
    %c16_123 = arith.constant 16 : index
    %284 = memref.load %arg11[%c2_122, %c16_123] : memref<3x20xf32, #tpu.memory_space<smem>>
    %285 = vector.broadcast %284 : f32 to vector<2x168xf32>
    %286 = arith.mulf %285, %275 : vector<2x168xf32>
    %287 = arith.addf %274, %286 : vector<2x168xf32>
    %288 = vector.extract_strided_slice %59 {offsets = [0, 2856], sizes = [2, 168], strides = [1, 1]} : vector<2x3360xf32> to vector<2x168xf32>
    %c0_124 = arith.constant 0 : index
    %c17 = arith.constant 17 : index
    %289 = memref.load %arg11[%c0_124, %c17] : memref<3x20xf32, #tpu.memory_space<smem>>
    %290 = vector.broadcast %289 : f32 to vector<2x168xf32>
    %291 = arith.mulf %290, %288 : vector<2x168xf32>
    %292 = arith.addf %279, %291 : vector<2x168xf32>
    %c1_125 = arith.constant 1 : index
    %c17_126 = arith.constant 17 : index
    %293 = memref.load %arg11[%c1_125, %c17_126] : memref<3x20xf32, #tpu.memory_space<smem>>
    %294 = vector.broadcast %293 : f32 to vector<2x168xf32>
    %295 = arith.mulf %294, %288 : vector<2x168xf32>
    %296 = arith.addf %283, %295 : vector<2x168xf32>
    %c2_127 = arith.constant 2 : index
    %c17_128 = arith.constant 17 : index
    %297 = memref.load %arg11[%c2_127, %c17_128] : memref<3x20xf32, #tpu.memory_space<smem>>
    %298 = vector.broadcast %297 : f32 to vector<2x168xf32>
    %299 = arith.mulf %298, %288 : vector<2x168xf32>
    %300 = arith.addf %287, %299 : vector<2x168xf32>
    %301 = vector.extract_strided_slice %59 {offsets = [0, 3024], sizes = [2, 168], strides = [1, 1]} : vector<2x3360xf32> to vector<2x168xf32>
    %c0_129 = arith.constant 0 : index
    %c18 = arith.constant 18 : index
    %302 = memref.load %arg11[%c0_129, %c18] : memref<3x20xf32, #tpu.memory_space<smem>>
    %303 = vector.broadcast %302 : f32 to vector<2x168xf32>
    %304 = arith.mulf %303, %301 : vector<2x168xf32>
    %305 = arith.addf %292, %304 : vector<2x168xf32>
    %c1_130 = arith.constant 1 : index
    %c18_131 = arith.constant 18 : index
    %306 = memref.load %arg11[%c1_130, %c18_131] : memref<3x20xf32, #tpu.memory_space<smem>>
    %307 = vector.broadcast %306 : f32 to vector<2x168xf32>
    %308 = arith.mulf %307, %301 : vector<2x168xf32>
    %309 = arith.addf %296, %308 : vector<2x168xf32>
    %c2_132 = arith.constant 2 : index
    %c18_133 = arith.constant 18 : index
    %310 = memref.load %arg11[%c2_132, %c18_133] : memref<3x20xf32, #tpu.memory_space<smem>>
    %311 = vector.broadcast %310 : f32 to vector<2x168xf32>
    %312 = arith.mulf %311, %301 : vector<2x168xf32>
    %313 = arith.addf %300, %312 : vector<2x168xf32>
    %314 = vector.extract_strided_slice %59 {offsets = [0, 3192], sizes = [2, 168], strides = [1, 1]} : vector<2x3360xf32> to vector<2x168xf32>
    %c0_134 = arith.constant 0 : index
    %c19 = arith.constant 19 : index
    %315 = memref.load %arg11[%c0_134, %c19] : memref<3x20xf32, #tpu.memory_space<smem>>
    %316 = vector.broadcast %315 : f32 to vector<2x168xf32>
    %317 = arith.mulf %316, %314 : vector<2x168xf32>
    %318 = arith.addf %305, %317 : vector<2x168xf32>
    %c1_135 = arith.constant 1 : index
    %c19_136 = arith.constant 19 : index
    %319 = memref.load %arg11[%c1_135, %c19_136] : memref<3x20xf32, #tpu.memory_space<smem>>
    %320 = vector.broadcast %319 : f32 to vector<2x168xf32>
    %321 = arith.mulf %320, %314 : vector<2x168xf32>
    %322 = arith.addf %309, %321 : vector<2x168xf32>
    %c2_137 = arith.constant 2 : index
    %c19_138 = arith.constant 19 : index
    %323 = memref.load %arg11[%c2_137, %c19_138] : memref<3x20xf32, #tpu.memory_space<smem>>
    %324 = vector.broadcast %323 : f32 to vector<2x168xf32>
    %325 = arith.mulf %324, %314 : vector<2x168xf32>
    %326 = arith.addf %313, %325 : vector<2x168xf32>
    %327 = vector.extract_strided_slice %63 {offsets = [0, 0], sizes = [2, 1], strides = [1, 1]} : vector<2x6xf32> to vector<2x1xf32>
    %c0_139 = arith.constant 0 : index
    %c0_140 = arith.constant 0 : index
    %c0_141 = arith.constant 0 : index
    %328 = vector.load %arg14[%c0_139, %c0_140, %c0_141] : memref<3x2x1xf32, #tpu.memory_space<vmem>>, vector<1x2x1xf32>
    %329 = vector.shape_cast %328 : vector<1x2x1xf32> to vector<2x1xf32>
    %330 = vector.shape_cast %327 : vector<2x1xf32> to vector<1x2x1xf32>
    tpu.vector_store %arg14[%c0_139, %c0_140, %c0_141], %330 {strides = array<i32>} : memref<3x2x1xf32, #tpu.memory_space<vmem>>, vector<1x2x1xf32>,
    %331 = vector.extract_strided_slice %63 {offsets = [0, 3], sizes = [2, 1], strides = [1, 1]} : vector<2x6xf32> to vector<2x1xf32>
    %332 = vector.broadcast %331 : vector<2x1xf32> to vector<2x168xf32>
    %333 = arith.addf %318, %332 : vector<2x168xf32>
    %c0_142 = arith.constant 0 : index
    %334 = memref.load %arg12[%c0_142] : memref<3xf32, #tpu.memory_space<smem>>
    %335 = vector.broadcast %334 : f32 to vector<2x168xf32>
    %336 = arith.addf %333, %335 : vector<2x168xf32>
    %c0_143 = arith.constant 0 : index
    %c0_144 = arith.constant 0 : index
    %c0_145 = arith.constant 0 : index
    %337 = vector.load %arg15[%c0_143, %c0_144, %c0_145] : memref<3x2x168xf32, #tpu.memory_space<vmem>>, vector<1x2x168xf32>
    %338 = vector.shape_cast %337 : vector<1x2x168xf32> to vector<2x168xf32>
    %339 = vector.shape_cast %336 : vector<2x168xf32> to vector<1x2x168xf32>
    tpu.vector_store %arg15[%c0_143, %c0_144, %c0_145], %339 {strides = array<i32>} : memref<3x2x168xf32, #tpu.memory_space<vmem>>, vector<1x2x168xf32>,
    %340 = vector.extract_strided_slice %63 {offsets = [0, 1], sizes = [2, 1], strides = [1, 1]} : vector<2x6xf32> to vector<2x1xf32>
    %c1_146 = arith.constant 1 : index
    %c0_147 = arith.constant 0 : index
    %c0_148 = arith.constant 0 : index
    %341 = vector.load %arg14[%c1_146, %c0_147, %c0_148] : memref<3x2x1xf32, #tpu.memory_space<vmem>>, vector<1x2x1xf32>
    %342 = vector.shape_cast %341 : vector<1x2x1xf32> to vector<2x1xf32>
    %343 = vector.shape_cast %340 : vector<2x1xf32> to vector<1x2x1xf32>
    tpu.vector_store %arg14[%c1_146, %c0_147, %c0_148], %343 {strides = array<i32>} : memref<3x2x1xf32, #tpu.memory_space<vmem>>, vector<1x2x1xf32>,
    %344 = vector.extract_strided_slice %63 {offsets = [0, 4], sizes = [2, 1], strides = [1, 1]} : vector<2x6xf32> to vector<2x1xf32>
    %345 = vector.broadcast %344 : vector<2x1xf32> to vector<2x168xf32>
    %346 = arith.addf %322, %345 : vector<2x168xf32>
    %c1_149 = arith.constant 1 : index
    %347 = memref.load %arg12[%c1_149] : memref<3xf32, #tpu.memory_space<smem>>
    %348 = vector.broadcast %347 : f32 to vector<2x168xf32>
    %349 = arith.addf %346, %348 : vector<2x168xf32>
    %c1_150 = arith.constant 1 : index
    %c0_151 = arith.constant 0 : index
    %c0_152 = arith.constant 0 : index
    %350 = vector.load %arg15[%c1_150, %c0_151, %c0_152] : memref<3x2x168xf32, #tpu.memory_space<vmem>>, vector<1x2x168xf32>
    %351 = vector.shape_cast %350 : vector<1x2x168xf32> to vector<2x168xf32>
    %352 = vector.shape_cast %349 : vector<2x168xf32> to vector<1x2x168xf32>
    tpu.vector_store %arg15[%c1_150, %c0_151, %c0_152], %352 {strides = array<i32>} : memref<3x2x168xf32, #tpu.memory_space<vmem>>, vector<1x2x168xf32>,
    %353 = vector.extract_strided_slice %63 {offsets = [0, 2], sizes = [2, 1], strides = [1, 1]} : vector<2x6xf32> to vector<2x1xf32>
    %c2_153 = arith.constant 2 : index
    %c0_154 = arith.constant 0 : index
    %c0_155 = arith.constant 0 : index
    %354 = vector.load %arg14[%c2_153, %c0_154, %c0_155] : memref<3x2x1xf32, #tpu.memory_space<vmem>>, vector<1x2x1xf32>
    %355 = vector.shape_cast %354 : vector<1x2x1xf32> to vector<2x1xf32>
    %356 = vector.shape_cast %353 : vector<2x1xf32> to vector<1x2x1xf32>
    tpu.vector_store %arg14[%c2_153, %c0_154, %c0_155], %356 {strides = array<i32>} : memref<3x2x1xf32, #tpu.memory_space<vmem>>, vector<1x2x1xf32>,
    %357 = vector.extract_strided_slice %63 {offsets = [0, 5], sizes = [2, 1], strides = [1, 1]} : vector<2x6xf32> to vector<2x1xf32>
    %358 = vector.broadcast %357 : vector<2x1xf32> to vector<2x168xf32>
    %359 = arith.addf %326, %358 : vector<2x168xf32>
    %c2_156 = arith.constant 2 : index
    %360 = memref.load %arg12[%c2_156] : memref<3xf32, #tpu.memory_space<smem>>
    %361 = vector.broadcast %360 : f32 to vector<2x168xf32>
    %362 = arith.addf %359, %361 : vector<2x168xf32>
    %c2_157 = arith.constant 2 : index
    %c0_158 = arith.constant 0 : index
    %c0_159 = arith.constant 0 : index
    %363 = vector.load %arg15[%c2_157, %c0_158, %c0_159] : memref<3x2x168xf32, #tpu.memory_space<vmem>>, vector<1x2x168xf32>
    %364 = vector.shape_cast %363 : vector<1x2x168xf32> to vector<2x168xf32>
    %365 = vector.shape_cast %362 : vector<2x168xf32> to vector<1x2x168xf32>
    tpu.vector_store %arg15[%c2_157, %c0_158, %c0_159], %365 {strides = array<i32>} : memref<3x2x168xf32, #tpu.memory_space<vmem>>, vector<1x2x168xf32>,
    return
  }
}

module attributes {stable_mosaic.version = 11 : i64} {
  func.func @branch_kernel(%arg0: i32, %arg1: memref<2x3360xbf16, #tpu.memory_space<vmem>>, %arg2: memref<1x2x1xf32, #tpu.memory_space<vmem>>, %arg3: memref<1x2x168xf32, #tpu.memory_space<vmem>>, %arg4: memref<1x3360x168xbf16, #tpu.memory_space<vmem>>, %arg5: memref<1x5x168x168xbf16, #tpu.memory_space<vmem>>, %arg6: memref<1x6x168x168xbf16, #tpu.memory_space<vmem>>, %arg7: memref<1x6x168xf32, #tpu.memory_space<vmem>>, %arg8: memref<1x6x168xf32, #tpu.memory_space<vmem>>, %arg9: memref<1x2x168xf32, #tpu.memory_space<vmem>>) attributes {dimension_semantics = [#tpu.dimension_semantics<parallel>], iteration_bounds = array<i64: 3>, scalar_prefetch = 0 : i64, scratch_operands = 0 : i64, tpu.core_type = #tpu.core_type<tc>, window_params = [{pipeline_mode = #tpu.pipeline_mode<synchronous>, transform_indices = @transform_0, window_bounds = array<i64: 2, 3360>}, {transform_indices = @transform_1, window_bounds = array<i64: 1, 2, 1>}, {transform_indices = @transform_2, window_bounds = array<i64: 1, 2, 168>}, {transform_indices = @transform_3, window_bounds = array<i64: 1, 3360, 168>}, {transform_indices = @transform_4, window_bounds = array<i64: 1, 5, 168, 168>}, {transform_indices = @transform_5, window_bounds = array<i64: 1, 6, 168, 168>}, {transform_indices = @transform_6, window_bounds = array<i64: 1, 6, 168>}, {transform_indices = @transform_7, window_bounds = array<i64: 1, 6, 168>}, {transform_indices = @transform_8, window_bounds = array<i64: 1, 2, 168>}]} {
    %c0 = arith.constant 0 : index
    %c0_0 = arith.constant 0 : index
    %0 = vector.load %arg1[%c0, %c0_0] : memref<2x3360xbf16, #tpu.memory_space<vmem>>, vector<2x3360xbf16>
    %c0_1 = arith.constant 0 : index
    %c0_2 = arith.constant 0 : index
    %c0_3 = arith.constant 0 : index
    %1 = vector.load %arg4[%c0_1, %c0_2, %c0_3] : memref<1x3360x168xbf16, #tpu.memory_space<vmem>>, vector<1x3360x168xbf16>
    %2 = vector.shape_cast %1 : vector<1x3360x168xbf16> to vector<3360x168xbf16>
    %cst = arith.constant dense<0.000000e+00> : vector<2x168xf32>
    %3 = tpu.matmul %0, %2, %cst {dimension_numbers = #tpu.dot_dimension_numbers<[1], [0], [0], [1], [0, 0, 1, 1], [], []>} : vector<2x3360xbf16>, vector<3360x168xbf16>, vector<2x168xf32> -> vector<2x168xf32>
    %c0_4 = arith.constant 0 : index
    %c0_5 = arith.constant 0 : index
    %c0_6 = arith.constant 0 : index
    %4 = vector.load %arg2[%c0_4, %c0_5, %c0_6] : memref<1x2x1xf32, #tpu.memory_space<vmem>>, vector<1x2x1xf32>
    %5 = vector.shape_cast %4 : vector<1x2x1xf32> to vector<2x1xf32>
    %6 = vector.broadcast %5 : vector<2x1xf32> to vector<2x168xf32>
    %7 = arith.addf %3, %6 : vector<2x168xf32>
    %c0_7 = arith.constant 0 : index
    %c0_8 = arith.constant 0 : index
    %c0_9 = arith.constant 0 : index
    %8 = vector.load %arg7[%c0_7, %c0_8, %c0_9] : memref<1x6x168xf32, #tpu.memory_space<vmem>>, vector<1x1x168xf32>
    %9 = vector.shape_cast %8 : vector<1x1x168xf32> to vector<1x168xf32>
    %10 = vector.broadcast %9 : vector<1x168xf32> to vector<2x168xf32>
    %11 = arith.addf %7, %10 : vector<2x168xf32>
    %cst_10 = arith.constant 0.000000e+00 : f32
    %12 = vector.broadcast %cst_10 : f32 to vector<2x168xf32>
    %13 = arith.maximumf %11, %12 : vector<2x168xf32>
    %14 = arith.truncf %13 : vector<2x168xf32> to vector<2x168xbf16>
    %c0_11 = arith.constant 0 : index
    %c0_12 = arith.constant 0 : index
    %c0_13 = arith.constant 0 : index
    %c0_14 = arith.constant 0 : index
    %15 = vector.load %arg6[%c0_11, %c0_12, %c0_13, %c0_14] : memref<1x6x168x168xbf16, #tpu.memory_space<vmem>>, vector<1x1x168x168xbf16>
    %16 = vector.shape_cast %15 : vector<1x1x168x168xbf16> to vector<168x168xbf16>
    %cst_15 = arith.constant dense<0.000000e+00> : vector<2x168xf32>
    %17 = tpu.matmul %14, %16, %cst_15 {dimension_numbers = #tpu.dot_dimension_numbers<[1], [0], [0], [1], [0, 0, 1, 1], [], []>} : vector<2x168xbf16>, vector<168x168xbf16>, vector<2x168xf32> -> vector<2x168xf32>
    %c0_16 = arith.constant 0 : index
    %c0_17 = arith.constant 0 : index
    %c0_18 = arith.constant 0 : index
    %18 = vector.load %arg8[%c0_16, %c0_17, %c0_18] : memref<1x6x168xf32, #tpu.memory_space<vmem>>, vector<1x1x168xf32>
    %19 = vector.shape_cast %18 : vector<1x1x168xf32> to vector<1x168xf32>
    %20 = vector.broadcast %19 : vector<1x168xf32> to vector<2x168xf32>
    %21 = arith.addf %17, %20 : vector<2x168xf32>
    %cst_19 = arith.constant 0.000000e+00 : f32
    %22 = vector.broadcast %cst_19 : f32 to vector<2x168xf32>
    %23 = arith.maximumf %21, %22 : vector<2x168xf32>
    %c0_20 = arith.constant 0 : index
    %c0_21 = arith.constant 0 : index
    %c0_22 = arith.constant 0 : index
    %24 = vector.load %arg3[%c0_20, %c0_21, %c0_22] : memref<1x2x168xf32, #tpu.memory_space<vmem>>, vector<1x2x168xf32>
    %25 = vector.shape_cast %24 : vector<1x2x168xf32> to vector<2x168xf32>
    %26 = arith.addf %23, %25 : vector<2x168xf32>
    %cst_23 = arith.constant 0.000000e+00 : f32
    %27 = vector.broadcast %cst_23 : f32 to vector<2x168xf32>
    %28 = arith.maximumf %26, %27 : vector<2x168xf32>
    %29 = arith.truncf %28 : vector<2x168xf32> to vector<2x168xbf16>
    %c0_24 = arith.constant 0 : index
    %c0_25 = arith.constant 0 : index
    %c0_26 = arith.constant 0 : index
    %c0_27 = arith.constant 0 : index
    %30 = vector.load %arg5[%c0_24, %c0_25, %c0_26, %c0_27] : memref<1x5x168x168xbf16, #tpu.memory_space<vmem>>, vector<1x1x168x168xbf16>
    %31 = vector.shape_cast %30 : vector<1x1x168x168xbf16> to vector<168x168xbf16>
    %cst_28 = arith.constant dense<0.000000e+00> : vector<2x168xf32>
    %32 = tpu.matmul %29, %31, %cst_28 {dimension_numbers = #tpu.dot_dimension_numbers<[1], [0], [0], [1], [0, 0, 1, 1], [], []>} : vector<2x168xbf16>, vector<168x168xbf16>, vector<2x168xf32> -> vector<2x168xf32>
    %c0_29 = arith.constant 0 : index
    %c1 = arith.constant 1 : index
    %c0_30 = arith.constant 0 : index
    %33 = vector.load %arg7[%c0_29, %c1, %c0_30] : memref<1x6x168xf32, #tpu.memory_space<vmem>>, vector<1x1x168xf32>
    %34 = vector.shape_cast %33 : vector<1x1x168xf32> to vector<1x168xf32>
    %35 = vector.broadcast %34 : vector<1x168xf32> to vector<2x168xf32>
    %36 = arith.addf %32, %35 : vector<2x168xf32>
    %cst_31 = arith.constant 0.000000e+00 : f32
    %37 = vector.broadcast %cst_31 : f32 to vector<2x168xf32>
    %38 = arith.maximumf %36, %37 : vector<2x168xf32>
    %39 = arith.truncf %38 : vector<2x168xf32> to vector<2x168xbf16>
    %c0_32 = arith.constant 0 : index
    %c1_33 = arith.constant 1 : index
    %c0_34 = arith.constant 0 : index
    %c0_35 = arith.constant 0 : index
    %40 = vector.load %arg6[%c0_32, %c1_33, %c0_34, %c0_35] : memref<1x6x168x168xbf16, #tpu.memory_space<vmem>>, vector<1x1x168x168xbf16>
    %41 = vector.shape_cast %40 : vector<1x1x168x168xbf16> to vector<168x168xbf16>
    %cst_36 = arith.constant dense<0.000000e+00> : vector<2x168xf32>
    %42 = tpu.matmul %39, %41, %cst_36 {dimension_numbers = #tpu.dot_dimension_numbers<[1], [0], [0], [1], [0, 0, 1, 1], [], []>} : vector<2x168xbf16>, vector<168x168xbf16>, vector<2x168xf32> -> vector<2x168xf32>
    %c0_37 = arith.constant 0 : index
    %c1_38 = arith.constant 1 : index
    %c0_39 = arith.constant 0 : index
    %43 = vector.load %arg8[%c0_37, %c1_38, %c0_39] : memref<1x6x168xf32, #tpu.memory_space<vmem>>, vector<1x1x168xf32>
    %44 = vector.shape_cast %43 : vector<1x1x168xf32> to vector<1x168xf32>
    %45 = vector.broadcast %44 : vector<1x168xf32> to vector<2x168xf32>
    %46 = arith.addf %42, %45 : vector<2x168xf32>
    %cst_40 = arith.constant 0.000000e+00 : f32
    %47 = vector.broadcast %cst_40 : f32 to vector<2x168xf32>
    %48 = arith.maximumf %46, %47 : vector<2x168xf32>
    %49 = arith.addf %48, %28 : vector<2x168xf32>
    %cst_41 = arith.constant 0.000000e+00 : f32
    %50 = vector.broadcast %cst_41 : f32 to vector<2x168xf32>
    %51 = arith.maximumf %49, %50 : vector<2x168xf32>
    %52 = arith.truncf %51 : vector<2x168xf32> to vector<2x168xbf16>
    %c0_42 = arith.constant 0 : index
    %c1_43 = arith.constant 1 : index
    %c0_44 = arith.constant 0 : index
    %c0_45 = arith.constant 0 : index
    %53 = vector.load %arg5[%c0_42, %c1_43, %c0_44, %c0_45] : memref<1x5x168x168xbf16, #tpu.memory_space<vmem>>, vector<1x1x168x168xbf16>
    %54 = vector.shape_cast %53 : vector<1x1x168x168xbf16> to vector<168x168xbf16>
    %cst_46 = arith.constant dense<0.000000e+00> : vector<2x168xf32>
    %55 = tpu.matmul %52, %54, %cst_46 {dimension_numbers = #tpu.dot_dimension_numbers<[1], [0], [0], [1], [0, 0, 1, 1], [], []>} : vector<2x168xbf16>, vector<168x168xbf16>, vector<2x168xf32> -> vector<2x168xf32>
    %c0_47 = arith.constant 0 : index
    %c2 = arith.constant 2 : index
    %c0_48 = arith.constant 0 : index
    %56 = vector.load %arg7[%c0_47, %c2, %c0_48] : memref<1x6x168xf32, #tpu.memory_space<vmem>>, vector<1x1x168xf32>
    %57 = vector.shape_cast %56 : vector<1x1x168xf32> to vector<1x168xf32>
    %58 = vector.broadcast %57 : vector<1x168xf32> to vector<2x168xf32>
    %59 = arith.addf %55, %58 : vector<2x168xf32>
    %cst_49 = arith.constant 0.000000e+00 : f32
    %60 = vector.broadcast %cst_49 : f32 to vector<2x168xf32>
    %61 = arith.maximumf %59, %60 : vector<2x168xf32>
    %62 = arith.truncf %61 : vector<2x168xf32> to vector<2x168xbf16>
    %c0_50 = arith.constant 0 : index
    %c2_51 = arith.constant 2 : index
    %c0_52 = arith.constant 0 : index
    %c0_53 = arith.constant 0 : index
    %63 = vector.load %arg6[%c0_50, %c2_51, %c0_52, %c0_53] : memref<1x6x168x168xbf16, #tpu.memory_space<vmem>>, vector<1x1x168x168xbf16>
    %64 = vector.shape_cast %63 : vector<1x1x168x168xbf16> to vector<168x168xbf16>
    %cst_54 = arith.constant dense<0.000000e+00> : vector<2x168xf32>
    %65 = tpu.matmul %62, %64, %cst_54 {dimension_numbers = #tpu.dot_dimension_numbers<[1], [0], [0], [1], [0, 0, 1, 1], [], []>} : vector<2x168xbf16>, vector<168x168xbf16>, vector<2x168xf32> -> vector<2x168xf32>
    %c0_55 = arith.constant 0 : index
    %c2_56 = arith.constant 2 : index
    %c0_57 = arith.constant 0 : index
    %66 = vector.load %arg8[%c0_55, %c2_56, %c0_57] : memref<1x6x168xf32, #tpu.memory_space<vmem>>, vector<1x1x168xf32>
    %67 = vector.shape_cast %66 : vector<1x1x168xf32> to vector<1x168xf32>
    %68 = vector.broadcast %67 : vector<1x168xf32> to vector<2x168xf32>
    %69 = arith.addf %65, %68 : vector<2x168xf32>
    %cst_58 = arith.constant 0.000000e+00 : f32
    %70 = vector.broadcast %cst_58 : f32 to vector<2x168xf32>
    %71 = arith.maximumf %69, %70 : vector<2x168xf32>
    %72 = arith.addf %71, %51 : vector<2x168xf32>
    %cst_59 = arith.constant 0.000000e+00 : f32
    %73 = vector.broadcast %cst_59 : f32 to vector<2x168xf32>
    %74 = arith.maximumf %72, %73 : vector<2x168xf32>
    %75 = arith.truncf %74 : vector<2x168xf32> to vector<2x168xbf16>
    %c0_60 = arith.constant 0 : index
    %c2_61 = arith.constant 2 : index
    %c0_62 = arith.constant 0 : index
    %c0_63 = arith.constant 0 : index
    %76 = vector.load %arg5[%c0_60, %c2_61, %c0_62, %c0_63] : memref<1x5x168x168xbf16, #tpu.memory_space<vmem>>, vector<1x1x168x168xbf16>
    %77 = vector.shape_cast %76 : vector<1x1x168x168xbf16> to vector<168x168xbf16>
    %cst_64 = arith.constant dense<0.000000e+00> : vector<2x168xf32>
    %78 = tpu.matmul %75, %77, %cst_64 {dimension_numbers = #tpu.dot_dimension_numbers<[1], [0], [0], [1], [0, 0, 1, 1], [], []>} : vector<2x168xbf16>, vector<168x168xbf16>, vector<2x168xf32> -> vector<2x168xf32>
    %c0_65 = arith.constant 0 : index
    %c3 = arith.constant 3 : index
    %c0_66 = arith.constant 0 : index
    %79 = vector.load %arg7[%c0_65, %c3, %c0_66] : memref<1x6x168xf32, #tpu.memory_space<vmem>>, vector<1x1x168xf32>
    %80 = vector.shape_cast %79 : vector<1x1x168xf32> to vector<1x168xf32>
    %81 = vector.broadcast %80 : vector<1x168xf32> to vector<2x168xf32>
    %82 = arith.addf %78, %81 : vector<2x168xf32>
    %cst_67 = arith.constant 0.000000e+00 : f32
    %83 = vector.broadcast %cst_67 : f32 to vector<2x168xf32>
    %84 = arith.maximumf %82, %83 : vector<2x168xf32>
    %85 = arith.truncf %84 : vector<2x168xf32> to vector<2x168xbf16>
    %c0_68 = arith.constant 0 : index
    %c3_69 = arith.constant 3 : index
    %c0_70 = arith.constant 0 : index
    %c0_71 = arith.constant 0 : index
    %86 = vector.load %arg6[%c0_68, %c3_69, %c0_70, %c0_71] : memref<1x6x168x168xbf16, #tpu.memory_space<vmem>>, vector<1x1x168x168xbf16>
    %87 = vector.shape_cast %86 : vector<1x1x168x168xbf16> to vector<168x168xbf16>
    %cst_72 = arith.constant dense<0.000000e+00> : vector<2x168xf32>
    %88 = tpu.matmul %85, %87, %cst_72 {dimension_numbers = #tpu.dot_dimension_numbers<[1], [0], [0], [1], [0, 0, 1, 1], [], []>} : vector<2x168xbf16>, vector<168x168xbf16>, vector<2x168xf32> -> vector<2x168xf32>
    %c0_73 = arith.constant 0 : index
    %c3_74 = arith.constant 3 : index
    %c0_75 = arith.constant 0 : index
    %89 = vector.load %arg8[%c0_73, %c3_74, %c0_75] : memref<1x6x168xf32, #tpu.memory_space<vmem>>, vector<1x1x168xf32>
    %90 = vector.shape_cast %89 : vector<1x1x168xf32> to vector<1x168xf32>
    %91 = vector.broadcast %90 : vector<1x168xf32> to vector<2x168xf32>
    %92 = arith.addf %88, %91 : vector<2x168xf32>
    %cst_76 = arith.constant 0.000000e+00 : f32
    %93 = vector.broadcast %cst_76 : f32 to vector<2x168xf32>
    %94 = arith.maximumf %92, %93 : vector<2x168xf32>
    %95 = arith.addf %94, %74 : vector<2x168xf32>
    %cst_77 = arith.constant 0.000000e+00 : f32
    %96 = vector.broadcast %cst_77 : f32 to vector<2x168xf32>
    %97 = arith.maximumf %95, %96 : vector<2x168xf32>
    %98 = arith.truncf %97 : vector<2x168xf32> to vector<2x168xbf16>
    %c0_78 = arith.constant 0 : index
    %c3_79 = arith.constant 3 : index
    %c0_80 = arith.constant 0 : index
    %c0_81 = arith.constant 0 : index
    %99 = vector.load %arg5[%c0_78, %c3_79, %c0_80, %c0_81] : memref<1x5x168x168xbf16, #tpu.memory_space<vmem>>, vector<1x1x168x168xbf16>
    %100 = vector.shape_cast %99 : vector<1x1x168x168xbf16> to vector<168x168xbf16>
    %cst_82 = arith.constant dense<0.000000e+00> : vector<2x168xf32>
    %101 = tpu.matmul %98, %100, %cst_82 {dimension_numbers = #tpu.dot_dimension_numbers<[1], [0], [0], [1], [0, 0, 1, 1], [], []>} : vector<2x168xbf16>, vector<168x168xbf16>, vector<2x168xf32> -> vector<2x168xf32>
    %c0_83 = arith.constant 0 : index
    %c4 = arith.constant 4 : index
    %c0_84 = arith.constant 0 : index
    %102 = vector.load %arg7[%c0_83, %c4, %c0_84] : memref<1x6x168xf32, #tpu.memory_space<vmem>>, vector<1x1x168xf32>
    %103 = vector.shape_cast %102 : vector<1x1x168xf32> to vector<1x168xf32>
    %104 = vector.broadcast %103 : vector<1x168xf32> to vector<2x168xf32>
    %105 = arith.addf %101, %104 : vector<2x168xf32>
    %cst_85 = arith.constant 0.000000e+00 : f32
    %106 = vector.broadcast %cst_85 : f32 to vector<2x168xf32>
    %107 = arith.maximumf %105, %106 : vector<2x168xf32>
    %108 = arith.truncf %107 : vector<2x168xf32> to vector<2x168xbf16>
    %c0_86 = arith.constant 0 : index
    %c4_87 = arith.constant 4 : index
    %c0_88 = arith.constant 0 : index
    %c0_89 = arith.constant 0 : index
    %109 = vector.load %arg6[%c0_86, %c4_87, %c0_88, %c0_89] : memref<1x6x168x168xbf16, #tpu.memory_space<vmem>>, vector<1x1x168x168xbf16>
    %110 = vector.shape_cast %109 : vector<1x1x168x168xbf16> to vector<168x168xbf16>
    %cst_90 = arith.constant dense<0.000000e+00> : vector<2x168xf32>
    %111 = tpu.matmul %108, %110, %cst_90 {dimension_numbers = #tpu.dot_dimension_numbers<[1], [0], [0], [1], [0, 0, 1, 1], [], []>} : vector<2x168xbf16>, vector<168x168xbf16>, vector<2x168xf32> -> vector<2x168xf32>
    %c0_91 = arith.constant 0 : index
    %c4_92 = arith.constant 4 : index
    %c0_93 = arith.constant 0 : index
    %112 = vector.load %arg8[%c0_91, %c4_92, %c0_93] : memref<1x6x168xf32, #tpu.memory_space<vmem>>, vector<1x1x168xf32>
    %113 = vector.shape_cast %112 : vector<1x1x168xf32> to vector<1x168xf32>
    %114 = vector.broadcast %113 : vector<1x168xf32> to vector<2x168xf32>
    %115 = arith.addf %111, %114 : vector<2x168xf32>
    %cst_94 = arith.constant 0.000000e+00 : f32
    %116 = vector.broadcast %cst_94 : f32 to vector<2x168xf32>
    %117 = arith.maximumf %115, %116 : vector<2x168xf32>
    %118 = arith.addf %117, %97 : vector<2x168xf32>
    %cst_95 = arith.constant 0.000000e+00 : f32
    %119 = vector.broadcast %cst_95 : f32 to vector<2x168xf32>
    %120 = arith.maximumf %118, %119 : vector<2x168xf32>
    %121 = arith.truncf %120 : vector<2x168xf32> to vector<2x168xbf16>
    %c0_96 = arith.constant 0 : index
    %c4_97 = arith.constant 4 : index
    %c0_98 = arith.constant 0 : index
    %c0_99 = arith.constant 0 : index
    %122 = vector.load %arg5[%c0_96, %c4_97, %c0_98, %c0_99] : memref<1x5x168x168xbf16, #tpu.memory_space<vmem>>, vector<1x1x168x168xbf16>
    %123 = vector.shape_cast %122 : vector<1x1x168x168xbf16> to vector<168x168xbf16>
    %cst_100 = arith.constant dense<0.000000e+00> : vector<2x168xf32>
    %124 = tpu.matmul %121, %123, %cst_100 {dimension_numbers = #tpu.dot_dimension_numbers<[1], [0], [0], [1], [0, 0, 1, 1], [], []>} : vector<2x168xbf16>, vector<168x168xbf16>, vector<2x168xf32> -> vector<2x168xf32>
    %c0_101 = arith.constant 0 : index
    %c5 = arith.constant 5 : index
    %c0_102 = arith.constant 0 : index
    %125 = vector.load %arg7[%c0_101, %c5, %c0_102] : memref<1x6x168xf32, #tpu.memory_space<vmem>>, vector<1x1x168xf32>
    %126 = vector.shape_cast %125 : vector<1x1x168xf32> to vector<1x168xf32>
    %127 = vector.broadcast %126 : vector<1x168xf32> to vector<2x168xf32>
    %128 = arith.addf %124, %127 : vector<2x168xf32>
    %cst_103 = arith.constant 0.000000e+00 : f32
    %129 = vector.broadcast %cst_103 : f32 to vector<2x168xf32>
    %130 = arith.maximumf %128, %129 : vector<2x168xf32>
    %131 = arith.truncf %130 : vector<2x168xf32> to vector<2x168xbf16>
    %c0_104 = arith.constant 0 : index
    %c5_105 = arith.constant 5 : index
    %c0_106 = arith.constant 0 : index
    %c0_107 = arith.constant 0 : index
    %132 = vector.load %arg6[%c0_104, %c5_105, %c0_106, %c0_107] : memref<1x6x168x168xbf16, #tpu.memory_space<vmem>>, vector<1x1x168x168xbf16>
    %133 = vector.shape_cast %132 : vector<1x1x168x168xbf16> to vector<168x168xbf16>
    %cst_108 = arith.constant dense<0.000000e+00> : vector<2x168xf32>
    %134 = tpu.matmul %131, %133, %cst_108 {dimension_numbers = #tpu.dot_dimension_numbers<[1], [0], [0], [1], [0, 0, 1, 1], [], []>} : vector<2x168xbf16>, vector<168x168xbf16>, vector<2x168xf32> -> vector<2x168xf32>
    %c0_109 = arith.constant 0 : index
    %c5_110 = arith.constant 5 : index
    %c0_111 = arith.constant 0 : index
    %135 = vector.load %arg8[%c0_109, %c5_110, %c0_111] : memref<1x6x168xf32, #tpu.memory_space<vmem>>, vector<1x1x168xf32>
    %136 = vector.shape_cast %135 : vector<1x1x168xf32> to vector<1x168xf32>
    %137 = vector.broadcast %136 : vector<1x168xf32> to vector<2x168xf32>
    %138 = arith.addf %134, %137 : vector<2x168xf32>
    %cst_112 = arith.constant 0.000000e+00 : f32
    %139 = vector.broadcast %cst_112 : f32 to vector<2x168xf32>
    %140 = arith.maximumf %138, %139 : vector<2x168xf32>
    %141 = arith.addf %140, %120 : vector<2x168xf32>
    %cst_113 = arith.constant 0.000000e+00 : f32
    %142 = vector.broadcast %cst_113 : f32 to vector<2x168xf32>
    %143 = arith.maximumf %141, %142 : vector<2x168xf32>
    %c0_114 = arith.constant 0 : index
    %c0_115 = arith.constant 0 : index
    %c0_116 = arith.constant 0 : index
    %144 = vector.load %arg9[%c0_114, %c0_115, %c0_116] : memref<1x2x168xf32, #tpu.memory_space<vmem>>, vector<1x2x168xf32>
    %145 = vector.shape_cast %144 : vector<1x2x168xf32> to vector<2x168xf32>
    %146 = vector.shape_cast %143 : vector<2x168xf32> to vector<1x2x168xf32>
    tpu.vector_store %arg9[%c0_114, %c0_115, %c0_116], %146 {strides = array<i32>} : memref<1x2x168xf32, #tpu.memory_space<vmem>>, vector<1x2x168xf32>,
    return
  }
  func.func @transform_0(%arg0: i32) -> (i32, i32) {
    %c0_i32 = arith.constant 0 : i32
    %c0_i32_0 = arith.constant 0 : i32
    %c0_i32_1 = arith.constant 0 : i32
    return %c0_i32, %c0_i32_0 : i32, i32
  }
  func.func @transform_1(%arg0: i32) -> (i32, i32, i32) {
    %c0_i32 = arith.constant 0 : i32
    %c0_i32_0 = arith.constant 0 : i32
    %c0_i32_1 = arith.constant 0 : i32
    return %arg0, %c0_i32, %c0_i32_0 : i32, i32, i32
  }
  func.func @transform_2(%arg0: i32) -> (i32, i32, i32) {
    %c0_i32 = arith.constant 0 : i32
    %c0_i32_0 = arith.constant 0 : i32
    %c0_i32_1 = arith.constant 0 : i32
    return %arg0, %c0_i32, %c0_i32_0 : i32, i32, i32
  }
  func.func @transform_3(%arg0: i32) -> (i32, i32, i32) {
    %c0_i32 = arith.constant 0 : i32
    %c0_i32_0 = arith.constant 0 : i32
    %c0_i32_1 = arith.constant 0 : i32
    return %arg0, %c0_i32, %c0_i32_0 : i32, i32, i32
  }
  func.func @transform_4(%arg0: i32) -> (i32, i32, i32, i32) {
    %c0_i32 = arith.constant 0 : i32
    %c0_i32_0 = arith.constant 0 : i32
    %c0_i32_1 = arith.constant 0 : i32
    %c0_i32_2 = arith.constant 0 : i32
    return %arg0, %c0_i32, %c0_i32_0, %c0_i32_1 : i32, i32, i32, i32
  }
  func.func @transform_5(%arg0: i32) -> (i32, i32, i32, i32) {
    %c0_i32 = arith.constant 0 : i32
    %c0_i32_0 = arith.constant 0 : i32
    %c0_i32_1 = arith.constant 0 : i32
    %c0_i32_2 = arith.constant 0 : i32
    return %arg0, %c0_i32, %c0_i32_0, %c0_i32_1 : i32, i32, i32, i32
  }
  func.func @transform_6(%arg0: i32) -> (i32, i32, i32) {
    %c0_i32 = arith.constant 0 : i32
    %c0_i32_0 = arith.constant 0 : i32
    %c0_i32_1 = arith.constant 0 : i32
    return %arg0, %c0_i32, %c0_i32_0 : i32, i32, i32
  }
  func.func @transform_7(%arg0: i32) -> (i32, i32, i32) {
    %c0_i32 = arith.constant 0 : i32
    %c0_i32_0 = arith.constant 0 : i32
    %c0_i32_1 = arith.constant 0 : i32
    return %arg0, %c0_i32, %c0_i32_0 : i32, i32, i32
  }
  func.func @transform_8(%arg0: i32) -> (i32, i32, i32) {
    %c0_i32 = arith.constant 0 : i32
    %c0_i32_0 = arith.constant 0 : i32
    %c0_i32_1 = arith.constant 0 : i32
    return %arg0, %c0_i32, %c0_i32_0 : i32, i32, i32
  }
}

module attributes {stable_mosaic.version = 11 : i64} {
  func.func @epilogue_kernel(%arg0: memref<3x2x168xf32, #tpu.memory_space<vmem>>, %arg1: memref<2x168xf32, #tpu.memory_space<vmem>>, %arg2: memref<1x168xf32, #tpu.memory_space<vmem>>, %arg3: memref<1x168xf32, #tpu.memory_space<vmem>>, %arg4: memref<3xf32, #tpu.memory_space<smem>>, %arg5: memref<1xf32, #tpu.memory_space<smem>>, %arg6: memref<2x168xf32, #tpu.memory_space<vmem>>) attributes {dimension_semantics = [], scalar_prefetch = 0 : i64, scratch_operands = 0 : i64, tpu.core_type = #tpu.core_type<tc>} {
    %c0 = arith.constant 0 : index
    %0 = memref.load %arg4[%c0] : memref<3xf32, #tpu.memory_space<smem>>
    %c0_0 = arith.constant 0 : index
    %c0_1 = arith.constant 0 : index
    %c0_2 = arith.constant 0 : index
    %1 = vector.load %arg0[%c0_0, %c0_1, %c0_2] : memref<3x2x168xf32, #tpu.memory_space<vmem>>, vector<1x2x168xf32>
    %2 = vector.shape_cast %1 : vector<1x2x168xf32> to vector<2x168xf32>
    %3 = vector.broadcast %0 : f32 to vector<2x168xf32>
    %4 = arith.mulf %3, %2 : vector<2x168xf32>
    %c1 = arith.constant 1 : index
    %5 = memref.load %arg4[%c1] : memref<3xf32, #tpu.memory_space<smem>>
    %c1_3 = arith.constant 1 : index
    %c0_4 = arith.constant 0 : index
    %c0_5 = arith.constant 0 : index
    %6 = vector.load %arg0[%c1_3, %c0_4, %c0_5] : memref<3x2x168xf32, #tpu.memory_space<vmem>>, vector<1x2x168xf32>
    %7 = vector.shape_cast %6 : vector<1x2x168xf32> to vector<2x168xf32>
    %8 = vector.broadcast %5 : f32 to vector<2x168xf32>
    %9 = arith.mulf %8, %7 : vector<2x168xf32>
    %10 = arith.addf %4, %9 : vector<2x168xf32>
    %c2 = arith.constant 2 : index
    %11 = memref.load %arg4[%c2] : memref<3xf32, #tpu.memory_space<smem>>
    %c2_6 = arith.constant 2 : index
    %c0_7 = arith.constant 0 : index
    %c0_8 = arith.constant 0 : index
    %12 = vector.load %arg0[%c2_6, %c0_7, %c0_8] : memref<3x2x168xf32, #tpu.memory_space<vmem>>, vector<1x2x168xf32>
    %13 = vector.shape_cast %12 : vector<1x2x168xf32> to vector<2x168xf32>
    %14 = vector.broadcast %11 : f32 to vector<2x168xf32>
    %15 = arith.mulf %14, %13 : vector<2x168xf32>
    %16 = arith.addf %10, %15 : vector<2x168xf32>
    %c0_9 = arith.constant 0 : index
    %17 = memref.load %arg5[%c0_9] : memref<1xf32, #tpu.memory_space<smem>>
    %18 = vector.broadcast %17 : f32 to vector<2x168xf32>
    %19 = arith.addf %16, %18 : vector<2x168xf32>
    %cst = arith.constant dense<0.000000e+00> : vector<2xf32>
    %20 = vector.multi_reduction <add>, %19, %cst [1] : vector<2x168xf32> to vector<2xf32>
    %21 = vector.shape_cast %20 : vector<2xf32> to vector<2x1xf32>
    %cst_10 = arith.constant 1.680000e+02 : f32
    %22 = vector.broadcast %cst_10 : f32 to vector<2x1xf32>
    %23 = arith.divf %21, %22 : vector<2x1xf32>
    %24 = vector.broadcast %23 : vector<2x1xf32> to vector<2x168xf32>
    %25 = arith.subf %19, %24 : vector<2x168xf32>
    %26 = arith.mulf %25, %25 : vector<2x168xf32>
    %cst_11 = arith.constant dense<0.000000e+00> : vector<2xf32>
    %27 = vector.multi_reduction <add>, %26, %cst_11 [1] : vector<2x168xf32> to vector<2xf32>
    %28 = vector.shape_cast %27 : vector<2xf32> to vector<2x1xf32>
    %cst_12 = arith.constant 1.680000e+02 : f32
    %29 = vector.broadcast %cst_12 : f32 to vector<2x1xf32>
    %30 = arith.divf %28, %29 : vector<2x1xf32>
    %31 = vector.broadcast %23 : vector<2x1xf32> to vector<2x168xf32>
    %32 = arith.subf %19, %31 : vector<2x168xf32>
    %cst_13 = arith.constant 9.99999974E-6 : f32
    %33 = vector.broadcast %cst_13 : f32 to vector<2x1xf32>
    %34 = arith.addf %30, %33 : vector<2x1xf32>
    %35 = math.rsqrt %34 : vector<2x1xf32>
    %36 = vector.broadcast %35 : vector<2x1xf32> to vector<2x168xf32>
    %37 = arith.mulf %32, %36 : vector<2x168xf32>
    %c0_14 = arith.constant 0 : index
    %c0_15 = arith.constant 0 : index
    %38 = vector.load %arg2[%c0_14, %c0_15] : memref<1x168xf32, #tpu.memory_space<vmem>>, vector<1x168xf32>
    %39 = vector.broadcast %38 : vector<1x168xf32> to vector<2x168xf32>
    %40 = arith.mulf %37, %39 : vector<2x168xf32>
    %c0_16 = arith.constant 0 : index
    %c0_17 = arith.constant 0 : index
    %41 = vector.load %arg3[%c0_16, %c0_17] : memref<1x168xf32, #tpu.memory_space<vmem>>, vector<1x168xf32>
    %42 = vector.broadcast %41 : vector<1x168xf32> to vector<2x168xf32>
    %43 = arith.addf %40, %42 : vector<2x168xf32>
    %c0_18 = arith.constant 0 : index
    %c0_19 = arith.constant 0 : index
    %44 = vector.load %arg1[%c0_18, %c0_19] : memref<2x168xf32, #tpu.memory_space<vmem>>, vector<2x168xf32>
    %45 = arith.addf %43, %44 : vector<2x168xf32>
    %cst_20 = arith.constant 0.707106769 : f32
    %46 = vector.broadcast %cst_20 : f32 to vector<2x168xf32>
    %47 = arith.mulf %45, %46 : vector<2x168xf32>
    %48 = math.absf %47 : vector<2x168xf32>
    %cst_21 = arith.constant 0.327591091 : f32
    %49 = vector.broadcast %cst_21 : f32 to vector<2x168xf32>
    %50 = arith.mulf %49, %48 : vector<2x168xf32>
    %cst_22 = arith.constant 1.000000e+00 : f32
    %51 = vector.broadcast %cst_22 : f32 to vector<2x168xf32>
    %52 = arith.addf %51, %50 : vector<2x168xf32>
    %cst_23 = arith.constant 1.000000e+00 : f32
    %53 = vector.broadcast %cst_23 : f32 to vector<2x168xf32>
    %54 = arith.divf %53, %52 : vector<2x168xf32>
    %cst_24 = arith.constant 1.06140542 : f32
    %55 = vector.broadcast %cst_24 : f32 to vector<2x168xf32>
    %56 = arith.mulf %54, %55 : vector<2x168xf32>
    %cst_25 = arith.constant -1.45315206 : f32
    %57 = vector.broadcast %cst_25 : f32 to vector<2x168xf32>
    %58 = arith.addf %57, %56 : vector<2x168xf32>
    %59 = arith.mulf %54, %58 : vector<2x168xf32>
    %cst_26 = arith.constant 1.42141378 : f32
    %60 = vector.broadcast %cst_26 : f32 to vector<2x168xf32>
    %61 = arith.addf %60, %59 : vector<2x168xf32>
    %62 = arith.mulf %54, %61 : vector<2x168xf32>
    %cst_27 = arith.constant -0.284496725 : f32
    %63 = vector.broadcast %cst_27 : f32 to vector<2x168xf32>
    %64 = arith.addf %63, %62 : vector<2x168xf32>
    %65 = arith.mulf %54, %64 : vector<2x168xf32>
    %cst_28 = arith.constant 0.254829586 : f32
    %66 = vector.broadcast %cst_28 : f32 to vector<2x168xf32>
    %67 = arith.addf %66, %65 : vector<2x168xf32>
    %68 = arith.mulf %54, %67 : vector<2x168xf32>
    %cst_29 = arith.constant 0.000000e+00 : f32
    %69 = vector.broadcast %cst_29 : f32 to vector<2x168xf32>
    %70 = arith.subf %69, %48 : vector<2x168xf32>
    %71 = arith.mulf %70, %48 : vector<2x168xf32>
    %72 = math.exp %71 : vector<2x168xf32>
    %73 = arith.mulf %68, %72 : vector<2x168xf32>
    %cst_30 = arith.constant 1.000000e+00 : f32
    %74 = vector.broadcast %cst_30 : f32 to vector<2x168xf32>
    %75 = arith.subf %74, %73 : vector<2x168xf32>
    %cst_31 = arith.constant 0.000000e+00 : f32
    %76 = vector.broadcast %cst_31 : f32 to vector<2x168xf32>
    %77 = arith.cmpf olt, %47, %76 : vector<2x168xf32>
    %cst_32 = arith.constant 0.000000e+00 : f32
    %78 = vector.broadcast %cst_32 : f32 to vector<2x168xf32>
    %79 = arith.subf %78, %75 : vector<2x168xf32>
    %80 = arith.select %77, %79, %75 : vector<2x168xi1>, vector<2x168xf32>
    %cst_33 = arith.constant 5.000000e-01 : f32
    %81 = vector.broadcast %cst_33 : f32 to vector<2x168xf32>
    %82 = arith.mulf %45, %81 : vector<2x168xf32>
    %cst_34 = arith.constant 1.000000e+00 : f32
    %83 = vector.broadcast %cst_34 : f32 to vector<2x168xf32>
    %84 = arith.addf %83, %80 : vector<2x168xf32>
    %85 = arith.mulf %82, %84 : vector<2x168xf32>
    %c0_35 = arith.constant 0 : index
    %c0_36 = arith.constant 0 : index
    %86 = vector.load %arg6[%c0_35, %c0_36] : memref<2x168xf32, #tpu.memory_space<vmem>>, vector<2x168xf32>
    tpu.vector_store %arg6[%c0_35, %c0_36], %85 {strides = array<i32>} : memref<2x168xf32, #tpu.memory_space<vmem>>, vector<2x168xf32>,
    return
  }
}

</mosaic_0001>

<bundles_post_ra>
// kernel: generator_p_wm_sum.5
= control target key start
LH: loop header
LB: loop body
LE: loop exit
PB: predicated region body
PF: predicated region fallthrough
CT: control target
= control target key end

     0   :  { %12 = vsyncpa [#allocation5], 0  ;;  %s325_s0 = inlined_call_operand.vmem [shape: f32[3,2,168], index: 0, kind: input, shape index: {}]   ;;  %s326_s1 = inlined_call_operand.vmem [shape: f32[2,168], index: 1, kind: input, shape index: {}]   ;;  %s327_s2 = inlined_call_operand.vmem [shape: f32[1,168], index: 2, kind: input, shape index: {}]   ;;  %s328_s3 = inlined_call_operand.vmem [shape: f32[1,168], index: 3, kind: input, shape index: {}]   ;;  %s329_s4 = inlined_call_operand.vmem [shape: f32[3], index: 4, kind: input, shape index: {}]   ;;  %s330_s5 = inlined_call_operand.<no memory space> [shape: f32[1], index: 5, kind: input, shape index: {}]   ;;  %s331_s6 = inlined_call_operand.hbm [shape: f32[2,168], index: 6, kind: output, shape index: {}]  }
   0x1   :  { %13 = vsyncpa [#allocation4], 0  ;;  %s28_s23 = sshll.u32 %s329_s4, 4  ;;  %s29_s23 = int_to_ptr.vmem [resolvable:$true] %s28_s23 }
   0x2   :  { %s218_s24 = scalar_lea.vmem %s29_s23, 16  ;;  %p223_p1 = scmp.lt.s32.totalorder %s29_s23, %s29_s23 }
   0x3   :  { %p219_p0 = scmp.ne.s32.totalorder %s29_s23, %s218_s24  ;;  %p224_p2 = scmp.lt.s32.totalorder %s218_s24, %s218_s24 }
   0x5   :  { %p225_p3 = por %p224_p2, %p223_p1 }
   0x7   :  { %p226_p4 = pnand %p225_p3, %p219_p0 }
   0x9   :  { %229 = shalt.err (!%p226_p4)
}
   0xa   :  { %s254_s25 = smov [#allocation3]  }
   0xb   :  { %31 = dma.vmem_to_smem %s29_s23, 16, %s254_s25, [#allocation5]  }
   0xc   :  { %250 = dma.done.wait [#allocation5], 16  }
   0xd   :  { %251 = vsyncadd [#allocation5], 4294967280 }
   0xe   :  { %37 = sfence }
   0xf   :  { %s38_s26 = sld [smem:[#allocation3]]  ;;  %v39_v0 = vld [vmem:[%s325_s0] sm:$0xf]  ;;  %v255_v1 = vmov 1983009808   ;;  %v61_v3 = vlaneseq  ;;  %v55_v15 = vstv %s330_s5  ;;  %vm68_vm0 = vcmask 1041408  }
  0x10   :  { %s204_s27 = sld [smem:[#allocation3 + $0x1]]  ;;  %v59_v2 = vunpack.c.l.s4 %v255_v1  ;;  %v205_v4 = vld [vmem:[%s325_s0 + $0x4] sm:$0xf]  ;;  %v207_v6 = vld [vmem:[%s325_s0 + $0x8] sm:$0xf]  ;;  %vm70_vm1 = vcmask 320512  }
  0x11   :  { %s206_s28 = sld [smem:[#allocation3 + $0x2]]  ;;  %v62_v12 = vshrl.u32 %v61_v3, 7  ;;  %v256_v24 = vmov 269488144   ;;  %v117_v43 = vld [vmem:[%s327_s2] sm:$0x3] }
  0x12   :  { %v60_v11 = vunpack.c.0.s8 %v59_v2  ;;  %v79_v25 = vunpack.c.l.s4 %v256_v24  ;;  %v137_v44 = vld [vmem:[%s328_s3] sm:$0x3]  ;;  %vm186_vm3 = vcmask 322562  }
  0x13   :  { %v121_v41 = vsub.s32 0, %v62_v12  ;;  %v125_v42 = vsub.s32 1, %v62_v12  ;;  %v157_v57 = vld [vmem:[%s326_s1] sm:$0xf]  ;;  %s257_s1 = smov [#allocation6]   ;;  %vm187_vm4 = vmor %vm186_vm3, %vm68_vm0 }
  0x14   :  { %v63_v17 = vsub.s32 %v60_v11, %v62_v12  ;;  %v80_v26 = vunpack.c.0.s8 %v79_v25  ;;  %s195_s2 = sshll.u32 %s257_s1, 4  ;;  %s196_s2 = int_to_ptr.vmem [resolvable:$true] %s195_s2 }
  0x15   :  { %v40_v5 = vstv %s38_s26  ;;  %v122_v45 = vrot.slane %v117_v43, %v121_v41  ;;  %v126_v46 = vrot.slane %v117_v43, %v125_v42  ;;  %v142_v47 = vrot.slane %v137_v44, %v121_v41  ;;  %s230_s3 = scalar_lea.vmem %s196_s2, 64  ;;  %p235_p6 = scmp.lt.s32.totalorder %s196_s2, %s196_s2 }
  0x16   :  { %v41_v7 = vmul.f32 %v40_v5, %v39_v0  ;;  %v45_v8 = vstv %s204_s27  ;;  %v83_v27 = vsub.s32 %v80_v26, %v62_v12  ;;  %v146_v48 = vrot.slane %v137_v44, %v125_v42  ;;  %p231_p5 = scmp.ne.s32.totalorder %s196_s2, %s230_s3  ;;  %p236_p7 = scmp.lt.s32.totalorder %s230_s3, %s230_s3 }
  0x17   :  { %v46_v9 = vmul.f32 %v205_v4, %v45_v8  ;;  %v51_v10 = vstv %s206_s28  ;;  %v127_v49 = vcombine.low %v122_v45, %v126_v46 }
  0x18   :  { %v52_v13 = vmul.f32 %v207_v6, %v51_v10  ;;  %v147_v50 = vcombine.low %v142_v47, %v146_v48  ;;  %p237_p8 = por %p236_p7, %p235_p6 }
  0x19   :  { %v47_v14 = vadd.f32 %v46_v9, %v41_v7  ;;  %v134_v53 = vrot.slane %v127_v49, %v63_v17 }
  0x1a   :  { %v154_v55 = vrot.slane %v147_v50, %v63_v17  ;;  %p238_p9 = pnand %p237_p8, %p231_p5 }
  0x1b   :  { %v53_v16 = vadd.f32 %v52_v13, %v47_v14 }
  0x1d   :  { %v56_v18 = vadd.f32 %v55_v15, %v53_v16 }
  0x1f   :  { %v64_v19 = vrot.slane %v56_v18, %v63_v17 }
  0x21   :  { %v65_v20 = vcombine.high %v64_v19, %v64_v19  ;;  %v69_v21 = vsel %vm68_vm0, %v64_v19, 0.0 }
  0x23   :  { %v71_v22 = vsel %vm70_vm1, %v65_v20, 0.0 }
  0x24   :  { %v72_v23 = vadd.f32 %v71_v22, %v69_v21 }
  0x26   :  { %73 = vadd.xlane.f32.xlu0 %v72_v23 }
  0xaf   :  { %v74_v28 = vpop.xlane.xlu0 %73 }
  0xb0   :  { %v76_v29 = vmul.f32 0.005952381, %v74_v28 }
  0xb2   :  { %v84_v30 = vrot.slane %v76_v29, %v83_v27 }
  0xb4   :  { %v86_v31 = vsub.f32 %v56_v18, %v84_v30 }
  0xb6   :  { %v87_v32 = vmul.f32 %v86_v31, %v86_v31 }
  0xb8   :  { %v95_v33 = vrot.slane %v87_v32, %v63_v17 }
  0xba   :  { %v96_v34 = vcombine.high %v95_v33, %v95_v33  ;;  %v99_v35 = vsel %vm68_vm0, %v95_v33, 0.0 }
  0xbc   :  { %v100_v36 = vsel %vm70_vm1, %v96_v34, 0.0 }
  0xbd   :  { %v101_v37 = vadd.f32 %v100_v36, %v99_v35 }
  0xbf   :  { %102 = vadd.xlane.f32.xlu0 %v101_v37 }
 0x148   :  { %v103_v38 = vpop.xlane.xlu0 %102 }
 0x149   :  { %v104_v39 = vmul.f32 0.005952381, %v103_v38 }
 0x14b   :  { %v105_v40 = vadd.f32 1e-05, %v104_v39 }
 0x14d   :  { %212 = vrsqrt.f32 %v105_v40 }
 0x15a   :  { %v213_v51 = vpop.eup %212 }
 0x15b   :  { %v114_v52 = vrot.slane %v213_v51, %v83_v27 }
 0x15d   :  { %v116_v54 = vmul.f32 %v114_v52, %v86_v31 }
 0x15f   :  { %v136_v56 = vmul.f32 %v134_v53, %v116_v54 }
 0x161   :  { %v156_v58 = vadd.f32 %v154_v55, %v136_v56 }
 0x163   :  { %v158_v59 = vadd.f32 %v157_v57, %v156_v58 }
 0x165   :  { %v159_v60 = vmul.f32 0.70710677, %v158_v59  ;;  %v183_v18 = vmul.f32 0.5, %v158_v59 }
 0x167   :  { %v160_v61 = vand.u32 2147483647, %v159_v60  ;;  %vm180_vm2 = vcmp.lt.f32.partialorder %v159_v60, 0.0 }
 0x169   :  { %v161_v62 = vmul.f32 0.3275911, %v160_v61  ;;  %v174_v0 = vsub.f32 0.0, %v160_v61 }
 0x16b   :  { %v162_v63 = vadd.f32 1.0, %v161_v62  ;;  %v175_v1 = vmul.f32 %v174_v0, %v160_v61 }
 0x16d   :  { %214 = vrcp.f32 %v162_v63  ;;  %v176_v4 = vmul.f32 1.442695, %v175_v1 }
 0x16f   :  { %216 = vpow2.f32 %v176_v4 }
 0x17a   :  { %v215_v2 = vpop.eup %214 }
 0x17b   :  { %v165_v3 = vmul.f32 1.0614054, %v215_v2 }
 0x17c   :  { %v217_v13 = vpop.eup %216 }
 0x17d   :  { %v166_v5 = vadd.f32 -1.4531521, %v165_v3 }
 0x17f   :  { %v167_v6 = vmul.f32 %v215_v2, %v166_v5 }
 0x181   :  { %v168_v7 = vadd.f32 1.4214138, %v167_v6 }
 0x183   :  { %v169_v8 = vmul.f32 %v215_v2, %v168_v7 }
 0x185   :  { %v170_v9 = vadd.f32 -0.28449672, %v169_v8 }
 0x187   :  { %v171_v10 = vmul.f32 %v215_v2, %v170_v9 }
 0x189   :  { %v172_v11 = vadd.f32 0.2548296, %v171_v10 }
 0x18b   :  { %v173_v12 = vmul.f32 %v215_v2, %v172_v11 }
 0x18d   :  { %v178_v14 = vmul.f32 %v217_v13, %v173_v12 }
 0x18f   :  { %v179_v15 = vsub.f32 1.0, %v178_v14 }
 0x191   :  { %v181_v16 = vsub.f32 0.0, %v179_v15 }
 0x193   :  { %v182_v17 = vsel %vm180_vm2, %v181_v16, %v179_v15 }
 0x194   :  { %v184_v19 = vadd.f32 1.0, %v182_v17 }
 0x196   :  { %v185_v20 = vmul.f32 %v184_v19, %v183_v18 }
 0x198   :  { %188 = vst.msk [vmem:[#allocation6] sm:$0xf] %vm187_vm4, %v185_v20 }
 0x199   :  { %241 = shalt.err (!%p238_p9)
}
 0x19a   :  { %198 = dma.vmem_to_hbm [thread:$0]  %s196_s2, 64, %s331_s6, [#allocation4]  }
 0x19b   :  { %252 = dma.done.wait [#allocation4], 64  }
 0x19c   :  { %253 = vsyncadd [#allocation4], 4294967232 }
 0x19d   :  { %202 = vsyncpa [#allocation4], 1 }
 0x19e   :  { %203 = vsyncpa [#allocation5], 1 }

// kernel: generator_p_wm_sum.3
= control target key start
LH: loop header
LB: loop body
LE: loop exit
PB: predicated region body
PF: predicated region fallthrough
CT: control target
= control target key end

     0   :  { %21 = vsyncpa [#allocation3], 0  ;;  %s5204_s0 = inlined_call_operand.vmem [shape: f32[2,32], index: 0, kind: input, shape index: {}]   ;;  %s5205_s1 = inlined_call_operand.vmem [shape: f32[2,32], index: 1, kind: input, shape index: {}]   ;;  %s5206_s2 = inlined_call_operand.vmem [shape: f32[32,20], index: 2, kind: input, shape index: {}]   ;;  %s5207_s3 = inlined_call_operand.hbm [shape: f32[1,20], index: 3, kind: input, shape index: {}]   ;;  %s5208_s4 = inlined_call_operand.hbm [shape: f32[1,20], index: 4, kind: input, shape index: {}]   ;;  %s5209_s5 = inlined_call_operand.hbm [shape: f32[1,20], index: 5, kind: input, shape index: {}]   ;;  %s5210_s6 = inlined_call_operand.hbm [shape: f32[32,3360], index: 6, kind: input, shape index: {}]   ;;  %s5211_s7 = inlined_call_operand.hbm [shape: f32[1,3360], index: 7, kind: input, shape index: {}]   ;;  %s5212_s8 = inlined_call_operand.hbm [shape: f32[1,3360], index: 8, kind: input, shape index: {}]   ;;  %s5213_s9 = inlined_call_operand.hbm [shape: f32[1,3360], index: 9, kind: input, shape index: {}]   ;;  %s5214_s10 = inlined_call_operand.vmem [shape: f32[20,6], index: 10, kind: input, shape index: {}]   ;;  %s5215_s11 = inlined_call_operand.hbm [shape: f32[3,20], index: 11, kind: input, shape index: {}]   ;;  %s5216_s12 = inlined_call_operand.hbm [shape: f32[3], index: 12, kind: input, shape index: {}]   ;;  %s5217_s13 = inlined_call_operand.vmem [shape: bf16[2,3360], index: 13, kind: output, shape index: {0}]   ;;  %s5218_s14 = inlined_call_operand.vmem [shape: f32[3,2,1], index: 14, kind: output, shape index: {1}]   ;;  %s5219_s15 = inlined_call_operand.vmem [shape: f32[3,2,168], index: 15, kind: output, shape index: {2}]  }
   0x1   :  { %22 = vsyncpa [#allocation6], 0 }
   0x2   :  { %23 = vsyncpa [#allocation9], 0 }
   0x3   :  { %24 = vsyncpa [#allocation12], 0 }
   0x4   :  { %25 = vsyncpa [#allocation4], 0 }
   0x5   :  { %26 = vsyncpa [#allocation16], 0  ;;  %s3762_s18 = smov [#allocation5]   ;;  %s3763_s20 = smov [#allocation8]  }
   0x6   :  { %s49_s19 = sshll.u32 %s3762_s18, 4  ;;  %s68_s21 = sshll.u32 %s3763_s20, 4  ;;  %s50_s19 = int_to_ptr.vmem [resolvable:$true] %s49_s19  ;;  %s69_s21 = int_to_ptr.vmem [resolvable:$true] %s68_s21 }
   0x7   :  { %s3602_s22 = scalar_lea.vmem %s50_s19, 16  ;;  %s3606_s23 = scalar_lea.vmem %s50_s19, 32 }
   0x8   :  { %p3603_p0 = scmp.ne.s32.totalorder %s50_s19, %s3602_s22  ;;  %p3607_p1 = scmp.lt.s32.totalorder %s50_s19, %s50_s19 }
   0x9   :  { %p3608_p2 = scmp.lt.s32.totalorder %s3606_s23, %s3602_s22 }
   0xb   :  { %p3609_p3 = por %p3608_p2, %p3607_p1 }
   0xd   :  { %p3610_p4 = pnand %p3609_p3, %p3603_p0 }
   0xf   :  { %3613 = shalt.err (!%p3610_p4)
}
  0x10   :  { %52 = dma.hbm_to_vmem [thread:$0]  %s5208_s4, 16, %s50_s19, [#allocation6]  }
  0x11   :  { %s3622_s26 = scalar_lea.vmem %s69_s21, 13824  ;;  %p3627_p6 = scmp.lt.s32.totalorder %s69_s21, %s69_s21 }
  0x12   :  { %p3623_p5 = scmp.ne.s32.totalorder %s69_s21, %s3622_s26  ;;  %p3628_p7 = scmp.lt.s32.totalorder %s3622_s26, %s3622_s26 }
  0x14   :  { %p3629_p8 = por %p3628_p7, %p3627_p6 }
  0x16   :  { %p3630_p9 = pnand %p3629_p8, %p3623_p5 }
  0x18   :  { %3633 = shalt.err (!%p3630_p9)
}
  0x19   :  { %s3764_s27 = smov 3456   ;;  %s3765_s28 = smov 216  }
  0x1a   :  { %74 = dma.hbm_to_vmem [thread:$0]  %s5210_s6, 13824, %s69_s21, [#allocation9], %s3764_s27, %s3764_s27, %s3765_s28  }
  0x1b   :  { %s3766_s16 = smov [#allocation11]   ;;  %s3767_s18 = smov [#allocation2]  }
  0x1c   :  { %s91_s17 = sshll.u32 %s3766_s16, 4  ;;  %s39_s20 = sshll.u32 %s3767_s18, 4  ;;  %s92_s17 = int_to_ptr.vmem [resolvable:$true] %s91_s17  ;;  %s40_s20 = int_to_ptr.vmem [resolvable:$true] %s39_s20 }
  0x1d   :  { %s3642_s4 = scalar_lea.vmem %s92_s17, 432  ;;  %s3646_s19 = scalar_lea.vmem %s92_s17, 448 }
  0x1e   :  { %p3643_p10 = scmp.ne.s32.totalorder %s92_s17, %s3642_s4  ;;  %p3647_p11 = scmp.lt.s32.totalorder %s92_s17, %s92_s17 }
  0x1f   :  { %p3648_p12 = scmp.lt.s32.totalorder %s3646_s19, %s3642_s4 }
  0x21   :  { %p3649_p13 = por %p3648_p12, %p3647_p11 }
  0x23   :  { %p3650_p0 = pnand %p3649_p13, %p3643_p10 }
  0x25   :  { %3653 = shalt.err (!%p3650_p0)
}
  0x26   :  { %94 = dma.hbm_to_vmem [thread:$0]  %s5212_s8, 432, %s92_s17, [#allocation12]  }
  0x27   :  { %s3662_s24 = scalar_lea.vmem %s40_s20, 16  ;;  %s3666_s6 = scalar_lea.vmem %s40_s20, 32 }
  0x28   :  { %p3663_p1 = scmp.ne.s32.totalorder %s40_s20, %s3662_s24  ;;  %p3667_p2 = scmp.lt.s32.totalorder %s40_s20, %s40_s20 }
  0x29   :  { %p3668_p3 = scmp.lt.s32.totalorder %s3666_s6, %s3662_s24 }
  0x2b   :  { %p3669_p4 = por %p3668_p3, %p3667_p2 }
  0x2d   :  { %p3670_p5 = pnand %p3669_p4, %p3663_p1 }
  0x2f   :  { %3673 = shalt.err (!%p3670_p5)
}
  0x30   :  { %42 = dma.hbm_to_vmem [thread:$0]  %s5207_s3, 16, %s40_s20, [#allocation3]  }
  0x31   :  { %s3768_s26 = smov [#allocation7]   ;;  %s3769_s28 = smov [#allocation10]  }
  0x32   :  { %s59_s27 = sshll.u32 %s3768_s26, 4  ;;  %s81_s29 = sshll.u32 %s3769_s28, 4  ;;  %s60_s27 = int_to_ptr.vmem [resolvable:$true] %s59_s27  ;;  %s82_s29 = int_to_ptr.vmem [resolvable:$true] %s81_s29 }
  0x33   :  { %s3682_s30 = scalar_lea.vmem %s60_s27, 16  ;;  %s3686_s8 = scalar_lea.vmem %s60_s27, 32 }
  0x34   :  { %p3683_p6 = scmp.ne.s32.totalorder %s60_s27, %s3682_s30  ;;  %p3687_p7 = scmp.lt.s32.totalorder %s60_s27, %s60_s27 }
  0x35   :  { %p3688_p8 = scmp.lt.s32.totalorder %s3686_s8, %s3682_s30 }
  0x37   :  { %p3689_p9 = por %p3688_p8, %p3687_p7 }
  0x39   :  { %p3690_p10 = pnand %p3689_p9, %p3683_p6 }
  0x3b   :  { %3693 = shalt.err (!%p3690_p10)
}
  0x3c   :  { %62 = dma.hbm_to_vmem [thread:$0]  %s5209_s5, 16, %s60_s27, [#allocation6]  }
  0x3d   :  { %s3702_s18 = scalar_lea.vmem %s82_s29, 432  ;;  %s3706_s3 = scalar_lea.vmem %s82_s29, 448 }
  0x3e   :  { %p3703_p11 = scmp.ne.s32.totalorder %s82_s29, %s3702_s18  ;;  %p3707_p12 = scmp.lt.s32.totalorder %s82_s29, %s82_s29 }
  0x3f   :  { %p3708_p13 = scmp.lt.s32.totalorder %s3706_s3, %s3702_s18 }
  0x41   :  { %p3709_p0 = por %p3708_p13, %p3707_p12 }
  0x43   :  { %p3710_p1 = pnand %p3709_p0, %p3703_p11 }
  0x45   :  { %3713 = shalt.err (!%p3710_p1)
}
  0x46   :  { %84 = dma.hbm_to_vmem [thread:$0]  %s5211_s7, 432, %s82_s29, [#allocation9]  }
  0x47   :  { %s3770_s19 = smov [#allocation13]  }
  0x48   :  { %s101_s22 = sshll.u32 %s3770_s19, 4  ;;  %s102_s22 = int_to_ptr.vmem [resolvable:$true] %s101_s22 }
  0x49   :  { %s3722_s23 = scalar_lea.vmem %s102_s22, 432  ;;  %s3726_s24 = scalar_lea.vmem %s102_s22, 448 }
  0x4a   :  { %p3723_p2 = scmp.ne.s32.totalorder %s102_s22, %s3722_s23  ;;  %p3727_p3 = scmp.lt.s32.totalorder %s102_s22, %s102_s22 }
  0x4b   :  { %p3728_p4 = scmp.lt.s32.totalorder %s3726_s24, %s3722_s23 }
  0x4d   :  { %p3729_p5 = por %p3728_p4, %p3727_p3 }
  0x4f   :  { %p3730_p6 = pnand %p3729_p5, %p3723_p2 }
  0x51   :  { %3733 = shalt.err (!%p3730_p6)
}
  0x52   :  { %104 = dma.hbm_to_vmem [thread:$0]  %s5213_s9, 432, %s102_s22, [#allocation12]  }
  0x53   :  { %s3771_s21 = smov [#allocation14]   ;;  %s3772_s7 = smov [#allocation15]  }
  0x54   :  { %114 = dma.hbm_to_smem %s5215_s11, 64, %s3771_s21, [#allocation4]  }
  0x55   :  { %122 = dma.hbm_to_smem %s5216_s12, 16, %s3772_s7, [#allocation16]  }
  0x56   :  { %3750 = dma.done.wait [#allocation3], 16  }
  0x57   :  { %3751 = vsyncadd [#allocation3], 4294967280 }
  0x58   :  { %3752 = dma.done.wait [#allocation6], 32  }
  0x59   :  { %3753 = vsyncadd [#allocation6], 4294967264 }
  0x5a   :  { %3754 = dma.done.wait [#allocation9], 14256  }
  0x5b   :  { %3755 = vsyncadd [#allocation9], 4294953040 }
  0x5c   :  { %3756 = dma.done.wait [#allocation12], 864  }
  0x5d   :  { %3757 = vsyncadd [#allocation12], 4294966432 }
  0x5e   :  { %3758 = dma.done.wait [#allocation4], 64  }
  0x5f   :  { %3759 = vsyncadd [#allocation4], 4294967232 }
  0x60   :  { %3760 = dma.done.wait [#allocation16], 16  }
  0x61   :  { %3761 = vsyncadd [#allocation16], 4294967280 }
  0x62   :  { %150 = sfence }
  0x63   :  { %v155_v0 = vld [vmem:[%s5206_s2 + $0x18] sm:$0xff]  ;;  %v3773_v2 = vmov 0.0   ;;  %v154_v3 = vld [vmem:[%s5206_s2 + $0x10] sm:$0xff]  ;;  %v297_v7 = vld [vmem:[#allocation8 + $0xe0] sm:$0xff]  ;;  %vm3774_vm0 = vmmov 0   ;;  %vm163_vm1 = vcmask 261120  }
  0x64   :  { %v351_v1 = vld [vmem:[#allocation8 + $0x290] sm:$0xff]  ;;  %3520 = vmatprep.subr.mxu0 %v3773_v2  ;;  %v350_v4 = vld [vmem:[#allocation8 + $0x288] sm:$0xff]  ;;  %v324_v5 = vld [vmem:[#allocation8 + $0x1b8] sm:$0xff]  ;;  %3528 = vmatprep.mubr.msk.f32.mxu0 %vm3774_vm0, %v3773_v2  ;;  %vm237_vm2 = vcmask 156672   ;;  %vm1516_vm3 = vcmask 1041408   ;;  %vm1568_vm4 = vcmask 254976  }
  0x65   :  { %547 = vmatprep.subr.mxu1 %v351_v1  ;;  %3521 = vmatpush3.msra.mxu0 %v155_v0  ;;  %v323_v6 = vld [vmem:[#allocation8 + $0x1b0] sm:$0xff]  ;;  %v153_v8 = vld [vmem:[%s5206_s2 + $0x8] sm:$0xff]  ;;  %v296_v9 = vld [vmem:[#allocation8 + $0xd8] sm:$0xff]  ;;  %vm2298_vm5 = vcmask 1043456   ;;  %vm2294_vm6 = vcmask 162816   ;;  %s4361_s24 = sld [smem:[#allocation14 + $0x81]] }
  0x66   :  { %548 = vmatpush1.msra.mxu1 %v350_v4  ;;  %3522 = vmatprep.subr.mxu0 %v3773_v2  ;;  %v152_v10 = vld [vmem:[%s5206_s2] sm:$0xff]  ;;  %v270_v11 = vld [vmem:[#allocation8 + $0x8] sm:$0xff]  ;;  %v355_v18 = vld [vmem:[#allocation8 + $0x2b0] sm:$0xff]  ;;  %s4375_s5 = sld [smem:[#allocation14 + $0x101]]  ;;  %s3776_s25 = smov 88   ;;  %vm2285_vm7 = vcmask 1040384  }
  0x67   :  { %549 = vmatprep.subr.mxu1 %v324_v5  ;;  %3523 = vmatpush3.msra.mxu0 %v154_v3  ;;  %v151_v12 = vld [vmem:[%s5204_s0] sm:$0x3]  ;;  %v353_v13 = vld [vmem:[#allocation8 + $0x2a0] sm:$0xff]  ;;  %v326_v17 = vld [vmem:[#allocation8 + $0x1c8] sm:$0xff]  ;;  %s4396_s6 = sld [smem:[#allocation14 + $0x2]]  ;;  %s3777_s27 = smov 48  }
  0x68   :  { %550 = vmatpush1.msra.mxu1 %v323_v6  ;;  %3524 = vmatprep.subr.mxu0 %v3773_v2  ;;  %v269_v14 = vld [vmem:[#allocation8] sm:$0xff]  ;;  %v352_v15 = vld [vmem:[#allocation8 + $0x298] sm:$0xff]  ;;  %v354_v20 = vld [vmem:[#allocation8 + $0x2a8] sm:$0xff]  ;;  %s4403_s21 = sld [smem:[#allocation14 + $0x82]]  ;;  %s3778_s29 = smov 8   ;;  %vm2286_vm8 = vcmask 1041409  }
  0x69   :  { %551 = vmatprep.subr.mxu1 %v297_v7  ;;  %3525 = vmatpush3.msra.mxu0 %v153_v8  ;;  %v3928_v16 = vld [vmem:[%s5205_s1] sm:$0x3]  ;;  %v325_v19 = vld [vmem:[#allocation8 + $0x1c0] sm:$0xff]  ;;  %v299_v21 = vld [vmem:[#allocation8 + $0xf0] sm:$0xff]  ;;  %s4425_s26 = sld [smem:[#allocation14 + $0x102]]  ;;  %s3779_s2 = smov 96  }
  0x6a   :  { %3526 = vmatprep.subr.mxu0 %v3773_v2  ;;  %552 = vmatpush1.msra.mxu1 %v296_v9  ;;  %v328_v22 = vld [vmem:[#allocation8 + $0x1d8] sm:$0xff]  ;;  %v298_v23 = vld [vmem:[#allocation8 + $0xe8] sm:$0xff]  ;;  %v327_v24 = vld [vmem:[#allocation8 + $0x1d0] sm:$0xff]  ;;  %s4441_s7 = sld [smem:[#allocation14 + $0x3]]  ;;  %s3780_s4 = smov 56   ;;  %vm2288_vm10 = vcmask 256002  }
  0x6b   :  { %3527 = vmatpush3.msra.mxu0 %v152_v10  ;;  %553 = vmatprep.subr.mxu1 %v270_v11  ;;  %v272_v25 = vld [vmem:[#allocation8 + $0x18] sm:$0xff]  ;;  %v301_v26 = vld [vmem:[#allocation8 + $0x100] sm:$0xff]  ;;  %v271_v27 = vld [vmem:[#allocation8 + $0x10] sm:$0xff]  ;;  %s3450_s11 = sld [smem:[#allocation14 + $0x83]]  ;;  %vm3307_vm11 = vcmask 1024   ;;  %s3784_s3 = smov 24  }
  0x6c   :  { %3529 = vmatmul.mubr.msk.f32.vlgmr.msra.gmra.mxu0 %vm163_vm1, %v151_v12  ;;  %618 = vmatprep.subr.mxu0 %v353_v13  ;;  %v300_v28 = vld [vmem:[#allocation8 + $0xf8] sm:$0xff]  ;;  %v274_v29 = vld [vmem:[#allocation8 + $0x28] sm:$0xff]  ;;  %v357_v30 = vld [vmem:[#allocation8 + $0x2c0] sm:$0xff]  ;;  %s3451_s12 = sld [smem:[#allocation14 + $0x103]]  ;;  %vm2496_vm13 = vcmask 64512   ;;  %vm2400_vm14 = vcmask 719872  }
  0x6d   :  { %554 = vmatpush1.msra.mxu1 %v269_v14  ;;  %587 = vmatprep.mubr.f32.mxu1 %v3773_v2  ;;  %v273_v31 = vld [vmem:[#allocation8 + $0x20] sm:$0xff]  ;;  %v356_v32 = vld [vmem:[#allocation8 + $0x2b8] sm:$0xff]  ;;  %v330_v33 = vld [vmem:[#allocation8 + $0x1e8] sm:$0xff]  ;;  %s4554_s30 = sld [smem:[#allocation14 + $0x4]]  ;;  %vm2446_vm15 = vcmask 392192  }
  0x6e   :  { %619 = vmatpush1.msra.mxu0 %v352_v15  ;;  %3412 = vmatmul.mubr.msk.f32.vlgmr.msra.gmra.mxu1 %vm163_vm1, %v3928_v16  ;;  %v359_v34 = vld [vmem:[#allocation8 + $0x2d0] sm:$0xff]  ;;  %v329_v35 = vld [vmem:[#allocation8 + $0x1e0] sm:$0xff]  ;;  %v358_v36 = vld [vmem:[#allocation8 + $0x2c8] sm:$0xff]  ;;  %s4559_s8 = sld [smem:[#allocation14 + $0x84]] }
  0x6f   :  { %620 = vmatprep.subr.mxu0 %v326_v17  ;;  %689 = vmatprep.subr.mxu1 %v355_v18  ;;  %v303_v37 = vld [vmem:[#allocation8 + $0x110] sm:$0xff]  ;;  %v332_v38 = vld [vmem:[#allocation8 + $0x1f8] sm:$0xff]  ;;  %v302_v39 = vld [vmem:[#allocation8 + $0x108] sm:$0xff]  ;;  %s4567_s16 = sld [smem:[#allocation14 + $0x104]] }
  0x70   :  { %621 = vmatpush1.msra.mxu0 %v325_v19  ;;  %690 = vmatpush1.msra.mxu1 %v354_v20  ;;  %v331_v40 = vld [vmem:[#allocation8 + $0x1f0] sm:$0xff]  ;;  %v276_v41 = vld [vmem:[#allocation8 + $0x38] sm:$0xff]  ;;  %v305_v42 = vld [vmem:[#allocation8 + $0x120] sm:$0xff]  ;;  %s4580_s17 = sld [smem:[#allocation14 + $0x5]] }
  0x71   :  { %622 = vmatprep.subr.mxu0 %v299_v21  ;;  %691 = vmatprep.subr.mxu1 %v328_v22  ;;  %v275_v43 = vld [vmem:[#allocation8 + $0x30] sm:$0xff]  ;;  %v304_v44 = vld [vmem:[#allocation8 + $0x118] sm:$0xff]  ;;  %v278_v45 = vld [vmem:[#allocation8 + $0x48] sm:$0xff]  ;;  %s4616_s20 = sld [smem:[#allocation14 + $0x85]] }
  0x72   :  { %623 = vmatpush1.msra.mxu0 %v298_v23  ;;  %692 = vmatpush1.msra.mxu1 %v327_v24  ;;  %v361_v46 = vld [vmem:[#allocation8 + $0x2e0] sm:$0xff]  ;;  %v360_v48 = vld [vmem:[#allocation8 + $0x2d8] sm:$0xff]  ;;  %v334_v49 = vld [vmem:[#allocation8 + $0x208] sm:$0xff]  ;;  %s4641_s0 = sld [smem:[#allocation14 + $0x105]] }
  0x73   :  { %624 = vmatprep.subr.mxu0 %v272_v25  ;;  %693 = vmatprep.subr.mxu1 %v301_v26  ;;  %v277_v47 = vld [vmem:[#allocation8 + $0x40] sm:$0xff]  ;;  %v363_v50 = vld [vmem:[#allocation8 + $0x2f0] sm:$0xff]  ;;  %v362_v52 = vld [vmem:[#allocation8 + $0x2e8] sm:$0xff]  ;;  %s4676_s1 = sld [smem:[#allocation14 + $0x6]] }
  0x74   :  { %625 = vmatpush1.msra.mxu0 %v271_v27  ;;  %658 = vmatprep.mubr.f32.mxu0 %v3773_v2  ;;  %v333_v51 = vld [vmem:[#allocation8 + $0x200] sm:$0xff]  ;;  %v307_v53 = vld [vmem:[#allocation8 + $0x130] sm:$0xff]  ;;  %v336_v54 = vld [vmem:[#allocation8 + $0x218] sm:$0xff]  ;;  %s4699_s19 = sld [smem:[#allocation14 + $0x86]] }
  0x75   :  { %694 = vmatpush1.msra.mxu1 %v300_v28  ;;  %3413 = vmatmul.mubr.msk.f32.vlgmr.msra.gmra.mxu0 %vm163_vm1, %v3928_v16  ;;  %v306_v55 = vld [vmem:[#allocation8 + $0x128] sm:$0xff]  ;;  %v335_v56 = vld [vmem:[#allocation8 + $0x210] sm:$0xff]  ;;  %v280_v57 = vld [vmem:[#allocation8 + $0x58] sm:$0xff]  ;;  %s3462_s28 = sld [smem:[#allocation14 + $0x87]] }
  0x76   :  { %695 = vmatprep.subr.mxu1 %v274_v29  ;;  %760 = vmatprep.subr.mxu0 %v357_v30  ;;  %v309_v58 = vld [vmem:[#allocation8 + $0x140] sm:$0xff]  ;;  %v279_v59 = vld [vmem:[#allocation8 + $0x50] sm:$0xff]  ;;  %v308_v60 = vld [vmem:[#allocation8 + $0x138] sm:$0xff]  ;;  %s3463_s9 = sld [smem:[#allocation14 + $0x107]] }
  0x77   :  { %696 = vmatpush1.msra.mxu1 %v273_v31  ;;  %729 = vmatprep.mubr.f32.mxu1 %v3773_v2  ;;  %v282_v61 = vld [vmem:[#allocation8 + $0x68] sm:$0xff]  ;;  %v365_v62 = vld [vmem:[#allocation8 + $0x300] sm:$0xff]  ;;  %v364_v0 = vld [vmem:[#allocation8 + $0x2f8] sm:$0xff]  ;;  %s3469_s18 = sld [smem:[#allocation14 + $0x109]] }
  0x78   :  { %761 = vmatpush1.msra.mxu0 %v356_v32  ;;  %3414 = vmatmul.mubr.msk.f32.vlgmr.msra.gmra.mxu1 %vm163_vm1, %v3928_v16  ;;  %v281_v63 = vld [vmem:[#allocation8 + $0x60] sm:$0xff]  ;;  %v338_v1 = vld [vmem:[#allocation8 + $0x228] sm:$0xff]  ;;  %v367_v3 = vld [vmem:[#allocation8 + $0x310] sm:$0xff]  ;;  %s3475_s22 = sld [smem:[#allocation14 + $0x10b]] }
  0x79   :  { %762 = vmatprep.subr.mxu0 %v330_v33  ;;  %831 = vmatprep.subr.mxu1 %v359_v34  ;;  %v337_v4 = vld [vmem:[#allocation8 + $0x220] sm:$0xff]  ;;  %v366_v5 = vld [vmem:[#allocation8 + $0x308] sm:$0xff]  ;;  %v311_v6 = vld [vmem:[#allocation8 + $0x150] sm:$0xff]  ;;  %s3476_s23 = sld [smem:[#allocation14 + $0xc]] }
  0x7a   :  { %763 = vmatpush1.msra.mxu0 %v329_v35  ;;  %832 = vmatpush1.msra.mxu1 %v358_v36  ;;  %v340_v7 = vld [vmem:[#allocation8 + $0x238] sm:$0xff]  ;;  %v310_v8 = vld [vmem:[#allocation8 + $0x148] sm:$0xff]  ;;  %v339_v9 = vld [vmem:[#allocation8 + $0x230] sm:$0xff] }
  0x7b   :  { %764 = vmatprep.subr.mxu0 %v303_v37  ;;  %833 = vmatprep.subr.mxu1 %v332_v38  ;;  %v284_v10 = vld [vmem:[#allocation8 + $0x78] sm:$0xff]  ;;  %v313_v11 = vld [vmem:[#allocation8 + $0x160] sm:$0xff]  ;;  %v283_v12 = vld [vmem:[#allocation8 + $0x70] sm:$0xff] }
  0x7c   :  { %765 = vmatpush1.msra.mxu0 %v302_v39  ;;  %834 = vmatpush1.msra.mxu1 %v331_v40  ;;  %v312_v13 = vld [vmem:[#allocation8 + $0x158] sm:$0xff]  ;;  %v286_v14 = vld [vmem:[#allocation8 + $0x88] sm:$0xff]  ;;  %v369_v15 = vld [vmem:[#allocation8 + $0x320] sm:$0xff] }
  0x7d   :  { %766 = vmatprep.subr.mxu0 %v276_v41  ;;  %835 = vmatprep.subr.mxu1 %v305_v42  ;;  %v285_v17 = vld [vmem:[#allocation8 + $0x80] sm:$0xff]  ;;  %v368_v18 = vld [vmem:[#allocation8 + $0x318] sm:$0xff]  ;;  %v342_v19 = vld [vmem:[#allocation8 + $0x248] sm:$0xff] }
  0x7e   :  { %767 = vmatpush1.msra.mxu0 %v275_v43  ;;  %800 = vmatprep.mubr.f32.mxu0 %v3773_v2  ;;  %v371_v20 = vld [vmem:[#allocation8 + $0x330] sm:$0xff]  ;;  %v341_v21 = vld [vmem:[#allocation8 + $0x240] sm:$0xff]  ;;  %v370_v22 = vld [vmem:[#allocation8 + $0x328] sm:$0xff] }
  0x7f   :  { %836 = vmatpush1.msra.mxu1 %v304_v44  ;;  %3415 = vmatmul.mubr.msk.f32.vlgmr.msra.gmra.mxu0 %vm163_vm1, %v3928_v16  ;;  %v315_v23 = vld [vmem:[#allocation8 + $0x170] sm:$0xff]  ;;  %v344_v24 = vld [vmem:[#allocation8 + $0x258] sm:$0xff]  ;;  %v314_v25 = vld [vmem:[#allocation8 + $0x168] sm:$0xff] }
  0x80   :  { %837 = vmatprep.subr.mxu1 %v278_v45  ;;  %902 = vmatprep.subr.mxu0 %v361_v46  ;;  %v343_v26 = vld [vmem:[#allocation8 + $0x250] sm:$0xff]  ;;  %v288_v27 = vld [vmem:[#allocation8 + $0x98] sm:$0xff]  ;;  %v317_v28 = vld [vmem:[#allocation8 + $0x180] sm:$0xff] }
  0x81   :  { %838 = vmatpush1.msra.mxu1 %v277_v47  ;;  %871 = vmatprep.mubr.f32.mxu1 %v3773_v2  ;;  %v287_v29 = vld [vmem:[#allocation8 + $0x90] sm:$0xff]  ;;  %v316_v30 = vld [vmem:[#allocation8 + $0x178] sm:$0xff]  ;;  %v290_v31 = vld [vmem:[#allocation8 + $0xa8] sm:$0xff] }
  0x82   :  { %903 = vmatpush1.msra.mxu0 %v360_v48  ;;  %3416 = vmatmul.mubr.msk.f32.vlgmr.msra.gmra.mxu1 %vm163_vm1, %v3928_v16  ;;  %v373_v32 = vld [vmem:[#allocation8 + $0x340] sm:$0xff]  ;;  %v372_v34 = vld [vmem:[#allocation8 + $0x338] sm:$0xff]  ;;  %v346_v35 = vld [vmem:[#allocation8 + $0x268] sm:$0xff] }
  0x83   :  { %904 = vmatprep.subr.mxu0 %v334_v49  ;;  %973 = vmatprep.subr.mxu1 %v363_v50  ;;  %v289_v33 = vld [vmem:[#allocation8 + $0xa0] sm:$0xff]  ;;  %v375_v36 = vld [vmem:[#allocation8 + $0x350] sm:$0xff]  ;;  %v374_v38 = vld [vmem:[#allocation8 + $0x348] sm:$0xff] }
  0x84   :  { %905 = vmatpush1.msra.mxu0 %v333_v51  ;;  %974 = vmatpush1.msra.mxu1 %v362_v52  ;;  %v345_v37 = vld [vmem:[#allocation8 + $0x260] sm:$0xff]  ;;  %v319_v39 = vld [vmem:[#allocation8 + $0x190] sm:$0xff]  ;;  %v348_v40 = vld [vmem:[#allocation8 + $0x278] sm:$0xff] }
  0x85   :  { %906 = vmatprep.subr.mxu0 %v307_v53  ;;  %975 = vmatprep.subr.mxu1 %v336_v54  ;;  %v318_v41 = vld [vmem:[#allocation8 + $0x188] sm:$0xff]  ;;  %v347_v42 = vld [vmem:[#allocation8 + $0x270] sm:$0xff]  ;;  %v292_v43 = vld [vmem:[#allocation8 + $0xb8] sm:$0xff]  ;;  %v385_v53 = vlaneseq }
  0x86   :  { %907 = vmatpush1.msra.mxu0 %v306_v55  ;;  %976 = vmatpush1.msra.mxu1 %v335_v56  ;;  %v321_v44 = vld [vmem:[#allocation8 + $0x1a0] sm:$0xff]  ;;  %v291_v45 = vld [vmem:[#allocation8 + $0xb0] sm:$0xff]  ;;  %v320_v46 = vld [vmem:[#allocation8 + $0x198] sm:$0xff] }
  0x87   :  { %908 = vmatprep.subr.mxu0 %v280_v57  ;;  %977 = vmatprep.subr.mxu1 %v309_v58  ;;  %v294_v47 = vld [vmem:[#allocation8 + $0xc8] sm:$0xff]  ;;  %v293_v48 = vld [vmem:[#allocation8 + $0xc0] sm:$0xff]  ;;  %v376_v49 = vld [vmem:[#allocation8 + $0x358] sm:$0xff]  ;;  %v3981_v54 = vshrl.u32 %v385_v53, 7 }
  0x88   :  { %909 = vmatpush1.msra.mxu0 %v279_v59  ;;  %942 = vmatprep.mubr.f32.mxu0 %v3773_v2  ;;  %v349_v50 = vld [vmem:[#allocation8 + $0x280] sm:$0xff]  ;;  %v322_v51 = vld [vmem:[#allocation8 + $0x1a8] sm:$0xff]  ;;  %v295_v52 = vld [vmem:[#allocation8 + $0xd0] sm:$0xff] }
  0x89   :  { %978 = vmatpush1.msra.mxu1 %v308_v60  ;;  %3417 = vmatmul.mubr.msk.f32.vlgmr.msra.gmra.mxu0 %vm163_vm1, %v3928_v16  ;;  %v3984_v55 = vsub.s32 0, %v3981_v54  ;;  %v377_v56 = vld [vmem:[#allocation10] sm:$0xff]  ;;  %v3987_v57 = vsub.s32 1, %v3981_v54  ;;  %v3408_v58 = vld [vmem:[#allocation2] ss:$0 sm:$0xff]  ;;  %vm2287_vm9 = vmor %vm2286_vm8, %vm2285_vm7  ;;  %vm2802_vm7 = vcmask 195584  }
  0x8a   :  { %979 = vmatprep.subr.mxu1 %v282_v61  ;;  %1044 = vmatprep.subr.mxu0 %v365_v62  ;;  %vm2289_vm12 = vmor %vm2288_vm10, %vm2287_vm9  ;;  %vm2859_vm8 = vcmask 916480   ;;  %vm2905_vm9 = vcmask 588800   ;;  %vm3011_vm10 = vcmask 982016  }
  0x8b   :  { %980 = vmatpush1.msra.mxu1 %v281_v63  ;;  %1013 = vmatprep.mubr.f32.mxu1 %v3773_v2  ;;  %v388_v60 = vrot.slane %v377_v56, %v3984_v55  ;;  %v392_v62 = vrot.slane %v377_v56, %v3987_v57 }
  0x8c   :  { %1045 = vmatpush1.msra.mxu0 %v364_v0  ;;  %3418 = vmatmul.mubr.msk.f32.vlgmr.msra.gmra.mxu1 %vm163_vm1, %v3928_v16  ;;  %v3994_v0 = vsub.s32 2, %v3981_v54 }
  0x8d   :  { %1046 = vmatprep.subr.mxu0 %v338_v1  ;;  %1115 = vmatprep.subr.mxu1 %v367_v3 }
  0x8e   :  { %1047 = vmatpush1.msra.mxu0 %v337_v4  ;;  %1116 = vmatpush1.msra.mxu1 %v366_v5  ;;  %v4001_v5 = vsub.s32 3, %v3981_v54 }
  0x8f   :  { %1048 = vmatprep.subr.mxu0 %v311_v6  ;;  %1117 = vmatprep.subr.mxu1 %v340_v7  ;;  %v4006_v7 = vsub.s32 4, %v3981_v54 }
  0x90   :  { %1049 = vmatpush1.msra.mxu0 %v310_v8  ;;  %1118 = vmatpush1.msra.mxu1 %v339_v9  ;;  %v396_v8 = vrot.slane %v377_v56, %v3994_v0  ;;  %v4010_v9 = vsub.s32 5, %v3981_v54 }
  0x91   :  { %1050 = vmatprep.subr.mxu0 %v284_v10  ;;  %1119 = vmatprep.subr.mxu1 %v313_v11 }
  0x92   :  { %1051 = vmatpush1.msra.mxu0 %v283_v12  ;;  %1084 = vmatprep.mubr.f32.mxu0 %v3773_v2  ;;  %v400_v12 = vrot.slane %v377_v56, %v4001_v5 }
  0x93   :  { %1120 = vmatpush1.msra.mxu1 %v312_v13  ;;  %3419 = vmatmul.mubr.msk.f32.vlgmr.msra.gmra.mxu0 %vm163_vm1, %v3928_v16 }
  0x94   :  { %1121 = vmatprep.subr.mxu1 %v286_v14  ;;  %1186 = vmatprep.subr.mxu0 %v369_v15  ;;  %v404_v14 = vrot.slane %v377_v56, %v4006_v7 }
  0x95   :  { %1122 = vmatpush1.msra.mxu1 %v285_v17  ;;  %1155 = vmatprep.mubr.f32.mxu1 %v3773_v2 }
  0x96   :  { %1187 = vmatpush1.msra.mxu0 %v368_v18  ;;  %3420 = vmatmul.mubr.msk.f32.vlgmr.msra.gmra.mxu1 %vm163_vm1, %v3928_v16 }
  0x97   :  { %1188 = vmatprep.subr.mxu0 %v342_v19  ;;  %1257 = vmatprep.subr.mxu1 %v371_v20  ;;  %v408_v19 = vrot.slane %v377_v56, %v4010_v9 }
  0x98   :  { %1189 = vmatpush1.msra.mxu0 %v341_v21  ;;  %1258 = vmatpush1.msra.mxu1 %v370_v22 }
  0x99   :  { %1190 = vmatprep.subr.mxu0 %v315_v23  ;;  %1259 = vmatprep.subr.mxu1 %v344_v24  ;;  %v4026_v23 = vsub.s32 6, %v3981_v54 }
  0x9a   :  { %1191 = vmatpush1.msra.mxu0 %v314_v25  ;;  %1260 = vmatpush1.msra.mxu1 %v343_v26 }
  0x9b   :  { %1192 = vmatprep.subr.mxu0 %v288_v27  ;;  %1261 = vmatprep.subr.mxu1 %v317_v28  ;;  %v4033_v28 = vsub.s32 7, %v3981_v54 }
  0x9c   :  { %1193 = vmatpush1.msra.mxu0 %v287_v29  ;;  %1226 = vmatprep.mubr.f32.mxu0 %v3773_v2 }
  0x9d   :  { %1262 = vmatpush1.msra.mxu1 %v316_v30  ;;  %3421 = vmatmul.mubr.msk.f32.vlgmr.msra.gmra.mxu0 %vm163_vm1, %v3928_v16 }
  0x9e   :  { %1263 = vmatprep.subr.mxu1 %v290_v31  ;;  %1328 = vmatprep.subr.mxu0 %v373_v32  ;;  %v412_v32 = vrot.slane %v377_v56, %v4026_v23 }
  0x9f   :  { %1264 = vmatpush1.msra.mxu1 %v289_v33  ;;  %1297 = vmatprep.mubr.f32.mxu1 %v3773_v2  ;;  %v378_v33 = vld [vmem:[#allocation10 + $0x8] sm:$0xff] }
  0xa0   :  { %1329 = vmatpush1.msra.mxu0 %v372_v34  ;;  %3422 = vmatmul.mubr.msk.f32.vlgmr.msra.gmra.mxu1 %vm163_vm1, %v3928_v16  ;;  %v428_v53 = vrot.slane %v378_v33, %v3994_v0 }
  0xa1   :  { %1330 = vmatprep.subr.mxu0 %v346_v35  ;;  %1399 = vmatprep.subr.mxu1 %v375_v36  ;;  %v416_v36 = vrot.slane %v377_v56, %v4033_v28 }
  0xa2   :  { %1331 = vmatpush1.msra.mxu0 %v345_v37  ;;  %1400 = vmatpush1.msra.mxu1 %v374_v38 }
  0xa3   :  { %1332 = vmatprep.subr.mxu0 %v319_v39  ;;  %1401 = vmatprep.subr.mxu1 %v348_v40  ;;  %v420_v39 = vrot.slane %v378_v33, %v3984_v55 }
  0xa4   :  { %1333 = vmatpush1.msra.mxu0 %v318_v41  ;;  %1402 = vmatpush1.msra.mxu1 %v347_v42  ;;  %v424_v42 = vrot.slane %v378_v33, %v3987_v57 }
  0xa5   :  { %1334 = vmatprep.subr.mxu0 %v292_v43  ;;  %1403 = vmatprep.subr.mxu1 %v321_v44 }
  0xa6   :  { %1335 = vmatpush1.msra.mxu0 %v291_v45  ;;  %1368 = vmatprep.mubr.f32.mxu0 %v3773_v2 }
  0xa7   :  { %1404 = vmatpush1.msra.mxu1 %v320_v46  ;;  %3423 = vmatmul.mubr.msk.f32.vlgmr.msra.gmra.mxu0 %vm163_vm1, %v3928_v16 }
  0xa8   :  { %1405 = vmatprep.subr.mxu1 %v294_v47  ;;  %3531 = vmatprep.subr.mxu0 %v3773_v2 }
  0xa9   :  { %1406 = vmatpush1.msra.mxu1 %v293_v48  ;;  %1439 = vmatprep.mubr.f32.mxu1 %v3773_v2 }
  0xaa   :  { %3532 = vmatpush3.msra.mxu0 %v376_v49  ;;  %3424 = vmatmul.mubr.msk.f32.vlgmr.msra.gmra.mxu1 %vm163_vm1, %v3928_v16 }
  0xab   :  { %3533 = vmatprep.subr.mxu0 %v3773_v2  ;;  %3539 = vmatprep.mubr.msk.f32.mxu0 %vm3774_vm0, %v3773_v2 }
  0xac   :  { %3534 = vmatpush3.msra.mxu0 %v349_v50  ;;  %3542 = vmatprep.subr.mxu1 %v3773_v2 }
  0xad   :  { %3535 = vmatprep.subr.mxu0 %v3773_v2  ;;  %3548 = vmatprep.mubr.msk.f32.mxu1 %vm3774_vm0, %v3773_v2  ;;  %vm2553_vm0 = vcmask 785408  }
  0xae   :  { %3536 = vmatpush3.msra.mxu0 %v322_v51 }
  0xaf   :  { %3537 = vmatprep.subr.mxu0 %v3773_v2 }
  0xb0   :  { %3538 = vmatpush3.msra.mxu0 %v295_v52 }
  0xb1   :  { %3540 = vmatmul.mubr.msk.f32.vlgmr.msra.gmra.mxu0 %vm163_vm1, %v3928_v16 }
 0x12c   :  { %v233_v59 = vpop.f32.mrf.mxu0 }
 0x12d   :  { %v3990_v61 = vadd.f32 %v3408_v58, %v233_v59  ;;  %v432_v59 = vrot.slane %v378_v33, %v4001_v5 }
 0x12e   :  { %v3530_v16 = vpop.f32.mrf.mxu0  ;;  %v589_v63 = vpop.f32.mrf.mxu1 }
 0x12f   :  { %v238_v1 = vsel %vm237_vm2, %v3990_v61, 0.0  ;;  %v3998_v3 = vadd.f32 %v589_v63, %v388_v60  ;;  %v436_v16 = vrot.slane %v378_v33, %v4006_v7 }
 0x130   :  { %v591_v4 = vpop.f32.mrf.mxu1  ;;  %239 = vadd.xlane.f32.xlu0 %v238_v1 }
 0x131   :  { %v4003_v6 = vadd.f32 %v591_v4, %v392_v62  ;;  %v1517_v10 = vsel %vm1516_vm3, %v3998_v3, 0.0  ;;  %v440_v4 = vrot.slane %v378_v33, %v4010_v9 }
 0x133   :  { %v1518_v11 = vsel %vm1516_vm3, %v4003_v6, 0.0 }
 0x134   :  { %v1519_v17 = vadd.f32 %v1518_v11, %v1517_v10 }
 0x135   :  { %v660_v13 = vpop.f32.mrf.mxu0 }
 0x136   :  { %v4018_v15 = vadd.f32 %v660_v13, %v396_v8 }
 0x137   :  { %v662_v18 = vpop.f32.mrf.mxu0 }
 0x138   :  { %v1520_v20 = vsel %vm1516_vm3, %v4018_v15, 0.0  ;;  %v4023_v21 = vadd.f32 %v662_v18, %v400_v12  ;;  %v731_v22 = vpop.f32.mrf.mxu1 }
 0x139   :  { %v1521_v24 = vadd.f32 %v1520_v20, %v1519_v17  ;;  %v4028_v25 = vadd.f32 %v731_v22, %v404_v14  ;;  %v444_v22 = vrot.slane %v378_v33, %v4026_v23 }
 0x13a   :  { %v1522_v26 = vsel %vm1516_vm3, %v4023_v21, 0.0  ;;  %v733_v27 = vpop.f32.mrf.mxu1 }
 0x13b   :  { %v1523_v29 = vadd.f32 %v1522_v26, %v1521_v24  ;;  %v1524_v30 = vsel %vm1516_vm3, %v4028_v25, 0.0  ;;  %v4037_v31 = vadd.f32 %v733_v27, %v408_v19  ;;  %v379_v24 = vld [vmem:[#allocation10 + $0x10] sm:$0xff] }
 0x13d   :  { %v1525_v34 = vadd.f32 %v1524_v30, %v1523_v29  ;;  %v1526_v35 = vsel %vm1516_vm3, %v4037_v31, 0.0  ;;  %v448_v29 = vrot.slane %v378_v33, %v4033_v28 }
 0x13f   :  { %v1527_v37 = vadd.f32 %v1526_v35, %v1525_v34  ;;  %v802_v38 = vpop.f32.mrf.mxu0  ;;  %v452_v34 = vrot.slane %v379_v24, %v3984_v55 }
 0x140   :  { %v4044_v40 = vadd.f32 %v802_v38, %v412_v32 }
 0x141   :  { %v804_v41 = vpop.f32.mrf.mxu0 }
 0x142   :  { %v1528_v43 = vsel %vm1516_vm3, %v4044_v40, 0.0  ;;  %v4049_v44 = vadd.f32 %v804_v41, %v416_v36  ;;  %v873_v45 = vpop.f32.mrf.mxu1 }
 0x143   :  { %v1529_v46 = vadd.f32 %v1528_v43, %v1527_v37  ;;  %v4051_v47 = vadd.f32 %v873_v45, %v420_v39  ;;  %v456_v37 = vrot.slane %v379_v24, %v3987_v57 }
 0x144   :  { %v1530_v48 = vsel %vm1516_vm3, %v4049_v44, 0.0  ;;  %v875_v49 = vpop.f32.mrf.mxu1 }
 0x145   :  { %v1531_v50 = vadd.f32 %v1530_v48, %v1529_v46  ;;  %v1532_v51 = vsel %vm1516_vm3, %v4051_v47, 0.0  ;;  %v4057_v52 = vadd.f32 %v875_v49, %v424_v42 }
 0x147   :  { %v1533_v56 = vadd.f32 %v1532_v51, %v1531_v50  ;;  %v1534_v58 = vsel %vm1516_vm3, %v4057_v52, 0.0  ;;  %v460_v50 = vrot.slane %v379_v24, %v3994_v0 }
 0x149   :  { %v1535_v60 = vadd.f32 %v1534_v58, %v1533_v56  ;;  %v944_v62 = vpop.f32.mrf.mxu0  ;;  %v464_v56 = vrot.slane %v379_v24, %v4001_v5 }
 0x14a   :  { %v4064_v63 = vadd.f32 %v944_v62, %v428_v53 }
 0x14b   :  { %v946_v1 = vpop.f32.mrf.mxu0 }
 0x14c   :  { %v1536_v8 = vsel %vm1516_vm3, %v4064_v63, 0.0  ;;  %v4069_v10 = vadd.f32 %v946_v1, %v432_v59  ;;  %v1015_v11 = vpop.f32.mrf.mxu1  ;;  %v472_v1 = vrot.slane %v379_v24, %v4010_v9 }
 0x14d   :  { %v1537_v12 = vadd.f32 %v1536_v8, %v1535_v60  ;;  %v4071_v13 = vadd.f32 %v1015_v11, %v436_v16  ;;  %v468_v60 = vrot.slane %v379_v24, %v4006_v7 }
 0x14e   :  { %v1538_v14 = vsel %vm1516_vm3, %v4069_v10, 0.0  ;;  %v1017_v17 = vpop.f32.mrf.mxu1 }
 0x14f   :  { %v1539_v18 = vadd.f32 %v1538_v14, %v1537_v12  ;;  %v1540_v19 = vsel %vm1516_vm3, %v4071_v13, 0.0  ;;  %v4077_v20 = vadd.f32 %v1017_v17, %v440_v4 }
 0x151   :  { %v1541_v26 = vadd.f32 %v1540_v19, %v1539_v18  ;;  %v1542_v27 = vsel %vm1516_vm3, %v4077_v20, 0.0 }
 0x153   :  { %v1543_v30 = vadd.f32 %v1542_v27, %v1541_v26  ;;  %v1086_v32 = vpop.f32.mrf.mxu0  ;;  %v476_v27 = vrot.slane %v379_v24, %v4026_v23 }
 0x154   :  { %v4084_v35 = vadd.f32 %v1086_v32, %v444_v22 }
 0x155   :  { %v1088_v36 = vpop.f32.mrf.mxu0 }
 0x156   :  { %v1544_v38 = vsel %vm1516_vm3, %v4084_v35, 0.0  ;;  %v4089_v39 = vadd.f32 %v1088_v36, %v448_v29  ;;  %v1157_v41 = vpop.f32.mrf.mxu1  ;;  %v380_v29 = vld [vmem:[#allocation10 + $0x18] sm:$0x7] }
 0x157   :  { %v1545_v42 = vadd.f32 %v1544_v38, %v1543_v30  ;;  %v4091_v43 = vadd.f32 %v1157_v41, %v452_v34  ;;  %v480_v34 = vrot.slane %v379_v24, %v4033_v28  ;;  %v484_v38 = vrot.slane %v380_v29, %v3984_v55 }
 0x158   :  { %v1546_v33 = vsel %vm1516_vm3, %v4089_v39, 0.0  ;;  %v1159_v45 = vpop.f32.mrf.mxu1 }
 0x159   :  { %v1547_v46 = vadd.f32 %v1546_v33, %v1545_v42  ;;  %v1548_v48 = vsel %vm1516_vm3, %v4091_v43, 0.0  ;;  %v4097_v49 = vadd.f32 %v1159_v45, %v456_v37  ;;  %v488_v33 = vrot.slane %v380_v29, %v3987_v57 }
 0x15b   :  { %v1549_v51 = vadd.f32 %v1548_v48, %v1547_v46  ;;  %v1550_v53 = vsel %vm1516_vm3, %v4097_v49, 0.0 }
 0x15d   :  { %v1551_v58 = vadd.f32 %v1550_v53, %v1549_v51  ;;  %v1228_v59 = vpop.f32.mrf.mxu0 }
 0x15e   :  { %v4104_v62 = vadd.f32 %v1228_v59, %v460_v50 }
 0x15f   :  { %v1230_v16 = vpop.f32.mrf.mxu0 }
 0x160   :  { %v1552_v4 = vsel %vm1516_vm3, %v4104_v62, 0.0  ;;  %v4109_v8 = vadd.f32 %v1230_v16, %v464_v56  ;;  %v1299_v11 = vpop.f32.mrf.mxu1 }
 0x161   :  { %v1553_v12 = vadd.f32 %v1552_v4, %v1551_v58  ;;  %v4111_v14 = vadd.f32 %v1299_v11, %v468_v60  ;;  %v492_v60 = vrot.slane %v380_v29, %v3994_v0 }
 0x162   :  { %v1554_v17 = vsel %vm1516_vm3, %v4109_v8, 0.0  ;;  %v1301_v18 = vpop.f32.mrf.mxu1 }
 0x163   :  { %v1555_v19 = vadd.f32 %v1554_v17, %v1553_v12  ;;  %v1556_v22 = vsel %vm1516_vm3, %v4111_v14, 0.0  ;;  %v4117_v26 = vadd.f32 %v1301_v18, %v472_v1 }
 0x165   :  { %v1557_v30 = vadd.f32 %v1556_v22, %v1555_v19  ;;  %v1558_v32 = vsel %vm1516_vm3, %v4117_v26, 0.0 }
 0x167   :  { %v1559_v36 = vadd.f32 %v1558_v32, %v1557_v30  ;;  %v1370_v37 = vpop.f32.mrf.mxu0 }
 0x168   :  { %v4124_v41 = vadd.f32 %v1370_v37, %v476_v27 }
 0x169   :  { %v1372_v42 = vpop.f32.mrf.mxu0 }
 0x16a   :  { %v1560_v45 = vsel %vm1516_vm3, %v4124_v41, 0.0  ;;  %v4129_v46 = vadd.f32 %v1372_v42, %v480_v34  ;;  %v1441_v48 = vpop.f32.mrf.mxu1  ;;  %v2293_v34 = vld [vmem:[%s5214_s10 + $0x10] sm:$0xf] }
 0x16b   :  { %v1561_v50 = vadd.f32 %v1560_v45, %v1559_v36  ;;  %v4131_v51 = vadd.f32 %v1441_v48, %v484_v38  ;;  %v2292_v36 = vld [vmem:[%s5214_s10 + $0x8] sm:$0xff]  ;;  %3543 = vmatpush3.msk.msra.mxu1 %vm2298_vm5, %v2293_v34  ;;  %vm2706_vm5 = vcmask 850944  }
 0x16c   :  { %v1562_v24 = vsel %vm1516_vm3, %v4129_v46, 0.0  ;;  %v1443_v53 = vpop.f32.mrf.mxu1  ;;  %3544 = vmatprep.subr.mxu1 %v3773_v2 }
 0x16d   :  { %v1563_v56 = vadd.f32 %v1562_v24, %v1561_v50  ;;  %v1564_v58 = vsel %vm1516_vm3, %v4131_v51, 0.0  ;;  %v4137_v59 = vadd.f32 %v1443_v53, %v488_v33  ;;  %3545 = vmatpush3.msra.mxu1 %v2292_v36 }
 0x16e   :  { %3546 = vmatprep.subr.mxu1 %v3773_v2 }
 0x16f   :  { %v1565_v16 = vadd.f32 %v1564_v58, %v1563_v56  ;;  %v1566_v1 = vsel %vm1516_vm3, %v4137_v59, 0.0 }
 0x171   :  { %v1512_v4 = vpop.f32.mrf.mxu0  ;;  %v1567_v11 = vadd.f32 %v1566_v1, %v1565_v16 }
 0x172   :  { %v4142_v12 = vadd.f32 %v1512_v4, %v492_v60 }
 0x173   :  { %v3541_v17 = vpop.f32.mrf.mxu0 }
 0x174   :  { %v1569_v18 = vsel %vm1568_vm4, %v4142_v12, 0.0 }
 0x175   :  { %v1570_v19 = vadd.f32 %v1569_v18, %v1567_v11 }
 0x177   :  { %1571 = vadd.xlane.f32.xlu1 %v1570_v19 }
 0x1b9   :  { %v240_v22 = vpop.xlane.xlu0 %239 }
 0x1ba   :  { %v242_v27 = vmul.f32 0.05, %v240_v22 }
 0x1bc   :  { %v4147_v30 = vsub.f32 %v3990_v61, %v242_v27  ;;  %v2291_v61 = vld [vmem:[%s5214_s10] sm:$0xff]  ;;  %s4355_s10 = sld [smem:[#allocation14 + $0x1]] }
 0x1bd   :  { %3547 = vmatpush3.msra.mxu1 %v2291_v61 }
 0x1be   :  { %v244_v29 = vmul.f32 %v4147_v30, %v4147_v30 }
 0x1c0   :  { %v245_v32 = vsel %vm237_vm2, %v244_v29, 0.0  ;;  %vm2599_vm2 = vcmask 457728  }
 0x1c1   :  { %246 = vadd.xlane.f32.xlu0 %v245_v32 }
 0x200   :  { %v1572_v37 = vpop.xlane.xlu1 %1571 }
 0x201   :  { %v4163_v38 = vmul.f32 0.00029761906, %v1572_v37 }
 0x203   :  { %v4167_v42 = vsub.f32 %v3998_v3, %v4163_v38  ;;  %v4171_v33 = vsub.f32 %v4003_v6, %v4163_v38  ;;  %v4175_v45 = vsub.f32 %v4018_v15, %v4163_v38  ;;  %v4179_v48 = vsub.f32 %v4023_v21, %v4163_v38 }
 0x204   :  { %v4187_v3 = vsub.f32 %v4028_v25, %v4163_v38  ;;  %v4193_v15 = vsub.f32 %v4037_v31, %v4163_v38  ;;  %v4201_v58 = vsub.f32 %v4044_v40, %v4163_v38  ;;  %v4208_v31 = vsub.f32 %v4049_v44, %v4163_v38 }
 0x205   :  { %v1602_v2 = vmul.f32 %v4167_v42, %v4167_v42  ;;  %v1603_v50 = vmul.f32 %v4171_v33, %v4171_v33  ;;  %v1604_v6 = vmul.f32 %v4175_v45, %v4175_v45  ;;  %v1605_v21 = vmul.f32 %v4179_v48, %v4179_v48 }
 0x206   :  { %v1606_v25 = vmul.f32 %v4187_v3, %v4187_v3  ;;  %v1607_v1 = vmul.f32 %v4193_v15, %v4193_v15  ;;  %v4215_v40 = vsub.f32 %v4051_v47, %v4163_v38  ;;  %v1608_v17 = vmul.f32 %v4201_v58, %v4201_v58 }
 0x207   :  { %v1629_v24 = vsel %vm1516_vm3, %v1602_v2, 0.0  ;;  %v1630_v53 = vsel %vm1516_vm3, %v1603_v50, 0.0  ;;  %v1632_v60 = vsel %vm1516_vm3, %v1604_v6, 0.0  ;;  %v1634_v4 = vsel %vm1516_vm3, %v1605_v21, 0.0 }
 0x208   :  { %v1631_v56 = vadd.f32 %v1630_v53, %v1629_v24  ;;  %v1636_v18 = vsel %vm1516_vm3, %v1606_v25, 0.0  ;;  %v4222_v44 = vsub.f32 %v4057_v52, %v4163_v38  ;;  %v1609_v22 = vmul.f32 %v4208_v31, %v4208_v31 }
 0x209   :  { %v1638_v27 = vsel %vm1516_vm3, %v1607_v1, 0.0  ;;  %v4229_v47 = vsub.f32 %v4064_v63, %v4163_v38  ;;  %v1610_v32 = vmul.f32 %v4215_v40, %v4215_v40  ;;  %v1640_v34 = vsel %vm1516_vm3, %v1608_v17, 0.0 }
 0x20a   :  { %v1633_v16 = vadd.f32 %v1632_v60, %v1631_v56  ;;  %v4236_v52 = vsub.f32 %v4069_v10, %v4163_v38  ;;  %v1611_v61 = vmul.f32 %v4222_v44, %v4222_v44  ;;  %v1642_v37 = vsel %vm1516_vm3, %v1609_v22, 0.0 }
 0x20b   :  { %v4243_v63 = vsub.f32 %v4071_v13, %v4163_v38  ;;  %v1612_v50 = vmul.f32 %v4229_v47, %v4229_v47  ;;  %v1644_v6 = vsel %vm1516_vm3, %v1610_v32, 0.0  ;;  %v4250_v10 = vsub.f32 %v4077_v20, %v4163_v38 }
 0x20c   :  { %v1635_v11 = vadd.f32 %v1634_v4, %v1633_v16  ;;  %v1613_v24 = vmul.f32 %v4236_v52, %v4236_v52  ;;  %v1646_v53 = vsel %vm1516_vm3, %v1611_v61, 0.0  ;;  %v4257_v13 = vsub.f32 %v4084_v35, %v4163_v38 }
 0x20d   :  { %v1614_v25 = vmul.f32 %v4243_v63, %v4243_v63  ;;  %v1648_v60 = vsel %vm1516_vm3, %v1612_v50, 0.0  ;;  %v4264_v20 = vsub.f32 %v4089_v39, %v4163_v38  ;;  %v1615_v1 = vmul.f32 %v4250_v10, %v4250_v10 }
 0x20e   :  { %v1637_v19 = vadd.f32 %v1636_v18, %v1635_v11  ;;  %v1650_v4 = vsel %vm1516_vm3, %v1613_v24, 0.0  ;;  %v4271_v35 = vsub.f32 %v4091_v43, %v4163_v38  ;;  %v1616_v17 = vmul.f32 %v4257_v13, %v4257_v13 }
 0x20f   :  { %v1652_v18 = vsel %vm1516_vm3, %v1614_v25, 0.0  ;;  %v4278_v39 = vsub.f32 %v4097_v49, %v4163_v38  ;;  %v1617_v22 = vmul.f32 %v4264_v20, %v4264_v20  ;;  %v4285_v43 = vsub.f32 %v4104_v62, %v4163_v38 }
 0x210   :  { %v1639_v29 = vadd.f32 %v1638_v27, %v1637_v19  ;;  %v1654_v27 = vsel %vm1516_vm3, %v1615_v1, 0.0  ;;  %v1618_v32 = vmul.f32 %v4271_v35, %v4271_v35  ;;  %v4292_v49 = vsub.f32 %v4109_v8, %v4163_v38 }
 0x211   :  { %v1619_v61 = vmul.f32 %v4278_v39, %v4278_v39  ;;  %v4299_v62 = vsub.f32 %v4111_v14, %v4163_v38  ;;  %v1620_v50 = vmul.f32 %v4285_v43, %v4285_v43  ;;  %v4306_v8 = vsub.f32 %v4117_v26, %v4163_v38 }
 0x212   :  { %v1641_v36 = vadd.f32 %v1640_v34, %v1639_v29  ;;  %v1656_v34 = vsel %vm1516_vm3, %v1616_v17, 0.0  ;;  %v1621_v24 = vmul.f32 %v4292_v49, %v4292_v49  ;;  %v4313_v14 = vsub.f32 %v4124_v41, %v4163_v38 }
 0x213   :  { %5224 = vst [vmem:[#allocation23_spill] sm:$0xff] %v4306_v8  ;;  %v1622_v25 = vmul.f32 %v4299_v62, %v4299_v62  ;;  %v4320_v26 = vsub.f32 %v4129_v46, %v4163_v38  ;;  %v1623_v1 = vmul.f32 %v4306_v8, %v4306_v8  ;;  %v4327_v41 = vsub.f32 %v4131_v51, %v4163_v38 }
 0x214   :  { %v1643_v2 = vadd.f32 %v1642_v37, %v1641_v36  ;;  %v1658_v37 = vsel %vm1516_vm3, %v1617_v22, 0.0  ;;  %v1624_v17 = vmul.f32 %v4313_v14, %v4313_v14  ;;  %v4334_v46 = vsub.f32 %v4137_v59, %v4163_v38 }
 0x215   :  { %5225 = vst [vmem:[#allocation24_spill] sm:$0xff] %v4327_v41  ;;  %v1625_v22 = vmul.f32 %v4320_v26, %v4320_v26  ;;  %v4341_v51 = vsub.f32 %v4142_v12, %v4163_v38 }
 0x216   :  { %v1645_v21 = vadd.f32 %v1644_v6, %v1643_v2  ;;  %v1660_v6 = vsel %vm1516_vm3, %v1618_v32, 0.0  ;;  %5226 = vst [vmem:[#allocation25_spill] sm:$0xff] %v4334_v46  ;;  %v1626_v32 = vmul.f32 %v4327_v41, %v4327_v41  ;;  %v1627_v59 = vmul.f32 %v4334_v46, %v4334_v46 }
 0x217   :  { %5227 = vst [vmem:[#allocation26_spill] sm:$0xff] %v4341_v51  ;;  %v2407_v41 = vstv %s4361_s24  ;;  %s3477_s24 = sld [smem:[#allocation14 + $0x8c]] }
 0x218   :  { %v1647_v56 = vadd.f32 %v1646_v53, %v1645_v21  ;;  %v1662_v53 = vsel %vm1516_vm3, %v1619_v61, 0.0  ;;  %v1674_v61 = vsel %vm1516_vm3, %v1625_v22, 0.0  ;;  %v1678_v12 = vsel %vm1516_vm3, %v1627_v59, 0.0 }
 0x21a   :  { %v1649_v16 = vadd.f32 %v1648_v60, %v1647_v56  ;;  %v1664_v60 = vsel %vm1516_vm3, %v1620_v50, 0.0  ;;  %v1676_v50 = vsel %vm1516_vm3, %v1626_v32, 0.0 }
 0x21c   :  { %v1651_v11 = vadd.f32 %v1650_v4, %v1649_v16  ;;  %v1666_v4 = vsel %vm1516_vm3, %v1621_v24, 0.0 }
 0x21e   :  { %v1653_v19 = vadd.f32 %v1652_v18, %v1651_v11  ;;  %v1668_v18 = vsel %vm1516_vm3, %v1622_v25, 0.0 }
 0x220   :  { %v1655_v29 = vadd.f32 %v1654_v27, %v1653_v19  ;;  %v1670_v27 = vsel %vm1516_vm3, %v1623_v1, 0.0 }
 0x222   :  { %v1657_v36 = vadd.f32 %v1656_v34, %v1655_v29  ;;  %v1672_v34 = vsel %vm1516_vm3, %v1624_v17, 0.0 }
 0x224   :  { %v1659_v2 = vadd.f32 %v1658_v37, %v1657_v36 }
 0x226   :  { %v1661_v21 = vadd.f32 %v1660_v6, %v1659_v2  ;;  %v1628_v2 = vmul.f32 %v4341_v51, %v4341_v51 }
 0x228   :  { %v1663_v56 = vadd.f32 %v1662_v53, %v1661_v21  ;;  %v1680_v21 = vsel %vm1568_vm4, %v1628_v2, 0.0  ;;  %vm2649_vm4 = vcmask 130048  }
 0x22a   :  { %v1665_v16 = vadd.f32 %v1664_v60, %v1663_v56 }
 0x22c   :  { %v1667_v11 = vadd.f32 %v1666_v4, %v1665_v16  ;;  %v3410_v16 = vld [vmem:[#allocation5] ss:$0 sm:$0xff]  ;;  %v3411_v4 = vld [vmem:[#allocation7] ss:$0 sm:$0xff] }
 0x22e   :  { %v1669_v19 = vadd.f32 %v1668_v18, %v1667_v11 }
 0x230   :  { %v1671_v29 = vadd.f32 %v1670_v27, %v1669_v19  ;;  %v1714_v27 = vld [vmem:[#allocation11] sm:$0xff] }
 0x231   :  { %v1733_v32 = vrot.slane %v1714_v27, %v3994_v0  ;;  %v1729_v59 = vrot.slane %v1714_v27, %v3987_v57  ;;  %v1745_v2 = vrot.slane %v1714_v27, %v4010_v9 }
 0x232   :  { %v1673_v36 = vadd.f32 %v1672_v34, %v1671_v29  ;;  %v1884_v29 = vld [vmem:[#allocation13] sm:$0xff] }
 0x233   :  { %v1903_v34 = vrot.slane %v1884_v29, %v3994_v0 }
 0x234   :  { %v1675_v37 = vadd.f32 %v1674_v61, %v1673_v36  ;;  %v3775_v36 = vmov 1966171168   ;;  %v1899_v61 = vrot.slane %v1884_v29, %v3987_v57 }
 0x236   :  { %v1677_v6 = vadd.f32 %v1676_v50, %v1675_v37  ;;  %v1737_v37 = vrot.slane %v1714_v27, %v4001_v5  ;;  %v1725_v50 = vrot.slane %v1714_v27, %v3984_v55 }
 0x238   :  { %v1679_v38 = vadd.f32 %v1678_v12, %v1677_v6  ;;  %v1741_v6 = vrot.slane %v1714_v27, %v4006_v7  ;;  %v1749_v12 = vrot.slane %v1714_v27, %v4026_v23 }
 0x23a   :  { %v1681_v24 = vadd.f32 %v1680_v21, %v1679_v38  ;;  %v1753_v38 = vrot.slane %v1714_v27, %v4033_v28  ;;  %v2391_v21 = vstv %s4355_s10  ;;  %s3788_s10 = smov 72  }
 0x23c   :  { %1682 = vadd.xlane.f32.xlu1 %v1681_v24  ;;  %v1907_v24 = vrot.slane %v1884_v29, %v4001_v5 }
 0x24a   :  { %v247_v53 = vpop.xlane.xlu0 %246 }
 0x24b   :  { %v248_v56 = vmul.f32 0.05, %v247_v53  ;;  %v1915_v53 = vrot.slane %v1884_v29, %v4010_v9 }
 0x24d   :  { %v249_v25 = vadd.f32 1e-05, %v248_v56  ;;  %v1895_v56 = vrot.slane %v1884_v29, %v3984_v55 }
 0x24f   :  { %3590 = vrsqrt.f32 %v249_v25 }
 0x25c   :  { %v3591_v60 = vpop.eup %3590 }
 0x25d   :  { %v251_v1 = vmul.f32 %v3591_v60, %v4147_v30  ;;  %v2113_v30 = vunpack.c.l.s4 %v3775_v36  ;;  %v1911_v60 = vrot.slane %v1884_v29, %v4006_v7 }
 0x25f   :  { %v259_v11 = vmul.f32 %v3410_v16, %v251_v1  ;;  %v1919_v16 = vrot.slane %v1884_v29, %v4026_v23  ;;  %v1923_v1 = vrot.slane %v1884_v29, %v4033_v28 }
 0x261   :  { %v267_v17 = vadd.f32 %v3411_v4, %v259_v11  ;;  %v2114_v4 = vunpack.c.0.s8 %v2113_v30 }
 0x263   :  { %3549 = vmatmul.mubr.msk.f32.vlgmr.msra.gmra.mxu1 %vm2294_vm6, %v267_v17  ;;  %vm2752_vm6 = vcmask 523264  }
 0x2c5   :  { %v1683_v18 = vpop.xlane.xlu1 %1682 }
 0x2c6   :  { %v1684_v19 = vmul.f32 0.00029761906, %v1683_v18 }
 0x2c8   :  { %v1685_v22 = vadd.f32 1e-05, %v1684_v19 }
 0x2ca   :  { %3592 = vrsqrt.f32 %v1685_v22 }
 0x2d7   :  { %v4373_v25 = vpop.eup %3592 }
 0x2d8   :  { %v1689_v11 = vmul.f32 %v4373_v25, %v4175_v45  ;;  %v1688_v17 = vmul.f32 %v4373_v25, %v4171_v33  ;;  %v1690_v18 = vmul.f32 %v4373_v25, %v4179_v48  ;;  %v1692_v19 = vmul.f32 %v4373_v25, %v4193_v15 }
 0x2d9   :  { %v1691_v22 = vmul.f32 %v4373_v25, %v4187_v3  ;;  %v1693_v27 = vmul.f32 %v4373_v25, %v4201_v58  ;;  %v1694_v29 = vmul.f32 %v4373_v25, %v4208_v31  ;;  %v1687_v45 = vmul.f32 %v4373_v25, %v4167_v42 }
 0x2da   :  { %v1859_v33 = vmul.f32 %v1733_v32, %v1689_v11  ;;  %v1858_v36 = vmul.f32 %v1729_v59, %v1688_v17  ;;  %v1860_v30 = vmul.f32 %v1737_v37, %v1690_v18  ;;  %v1862_v48 = vmul.f32 %v1745_v2, %v1692_v19  ;;  %v4449_v17 = vld [vmem:[#allocation13 + $0x8] sm:$0xff] }
 0x2db   :  { %v1861_v15 = vmul.f32 %v1741_v6, %v1691_v22  ;;  %v1863_v8 = vmul.f32 %v1749_v12, %v1693_v27  ;;  %v1864_v46 = vmul.f32 %v1753_v38, %v1694_v29  ;;  %v1857_v3 = vmul.f32 %v1725_v50, %v1687_v45 }
 0x2dc   :  { %v4398_v51 = vadd.f32 %v1903_v34, %v1859_v33  ;;  %v4400_v58 = vadd.f32 %v1899_v61, %v1858_v36  ;;  %v4405_v31 = vadd.f32 %v1907_v24, %v1860_v30  ;;  %v4407_v42 = vadd.f32 %v1915_v53, %v1862_v48 }
 0x2dd   :  { %v4409_v32 = vadd.f32 %v1911_v60, %v1861_v15  ;;  %v4411_v59 = vadd.f32 %v1919_v16, %v1863_v8  ;;  %v4415_v34 = vadd.f32 %v1923_v1, %v1864_v46  ;;  %v4417_v61 = vadd.f32 %v1895_v56, %v1857_v3 }
 0x2de   :  { %v2393_v37 = vmul.f32 %v2391_v21, %v4398_v51  ;;  %v2392_v2 = vmul.f32 %v2391_v21, %v4400_v58  ;;  %v2422_v50 = vstv %s4375_s5  ;;  %v4421_v6 = vsub.s32 %v2114_v4, %v3981_v54  ;;  %v4446_v4 = vld [vmem:[#allocation11 + $0x8] sm:$0xff]  ;;  %s3460_s5 = sld [smem:[#allocation14 + $0x106]] }
 0x2df   :  { %v2408_v8 = vmul.f32 %v2407_v41, %v4400_v58  ;;  %v3427_v46 = vpack.c.bf16 %v4405_v31, %v4398_v51  ;;  %v2423_v12 = vmul.f32 %v2422_v50, %v4400_v58  ;;  %v3428_v38 = vpack.c.bf16 %v4407_v42, %v4409_v32 }
 0x2e0   :  { %2398 = vrot.lane.b32.xlu1 %v2393_v37, %s3776_s25  ;;  %2396 = vrot.lane.b32.xlu0 %v2392_v2, %s3776_s25  ;;  %v3429_v21 = vpack.c.bf16 %v4415_v34, %v4411_v59  ;;  %v3426_v24 = vpack.c.bf16 %v4400_v58, %v4417_v61  ;;  %v2437_v53 = vstv %s4396_s6  ;;  %v2453_v11 = vstv %s4403_s21  ;;  %s3781_s6 = smov 16   ;;  %s4747_s21 = sld [smem:[#allocation14 + $0x7]] }
 0x2e1   :  { %v2125_v56 = vrot.slane %v3427_v46, %v4421_v6  ;;  %v2132_v60 = vrot.slane %v3428_v38, %v4421_v6  ;;  %v2409_v18 = vmul.f32 %v2407_v41, %v4398_v51  ;;  %v2438_v19 = vmul.f32 %v2437_v53, %v4398_v51 }
 0x2e2   :  { %v2139_v16 = vrot.slane %v3429_v21, %v4421_v6  ;;  %v2118_v1 = vrot.slane %v3426_v24, %v4421_v6  ;;  %v1757_v29 = vrot.slane %v4446_v4, %v3984_v55  ;;  %v1761_v45 = vrot.slane %v4446_v4, %v3987_v57 }
 0x2e3   :  { %v1765_v33 = vrot.slane %v4446_v4, %v3994_v0  ;;  %v1769_v36 = vrot.slane %v4446_v4, %v4001_v5  ;;  %v2468_v41 = vstv %s4425_s26  ;;  %v1927_v15 = vrot.slane %v4449_v17, %v3984_v55  ;;  %s4860_s26 = sld [smem:[#allocation14 + $0xd]] }
 0x2e4   :  { %2412 = vrot.lane.b32.xlu1 %v2408_v8, %s3776_s25  ;;  %2427 = vrot.lane.b32.xlu0 %v2423_v12, %s3776_s25  ;;  %v2141_v22 = vcombine.low %v2132_v60, %v2139_v16  ;;  %v2140_v27 = vcombine.low %v2118_v1, %v2125_v56  ;;  %v2424_v3 = vmul.f32 %v2422_v50, %v4398_v51 }
 0x2e5   :  { %v2454_v37 = vmul.f32 %v2453_v11, %v4398_v51  ;;  %v1931_v2 = vrot.slane %v4449_v17, %v3987_v57  ;;  %v1935_v8 = vrot.slane %v4449_v17, %v3994_v0  ;;  %v1695_v12 = vmul.f32 %v4373_v25, %v4215_v40 }
 0x2e6   :  { %v2155_v30 = vrot.slane %v2141_v22, %v4421_v6  ;;  %v2148_v48 = vrot.slane %v2140_v27, %v4421_v6  ;;  %v1696_v38 = vmul.f32 %v4373_v25, %v4222_v44  ;;  %v1697_v21 = vmul.f32 %v4373_v25, %v4229_v47 }
 0x2e7   :  { %v1698_v50 = vmul.f32 %v4373_v25, %v4236_v52  ;;  %v1781_v24 = vrot.slane %v4446_v4, %v4026_v23  ;;  %v1939_v56 = vrot.slane %v4449_v17, %v4001_v5  ;;  %v2483_v40 = vstv %s4441_s7  ;;  %s4862_s7 = sld [smem:[#allocation14]] }
 0x2e8   :  { %2414 = vrot.lane.b32.xlu1 %v2409_v18, %s3776_s25  ;;  %2442 = vrot.lane.b32.xlu0 %v2438_v19, %s3777_s27  ;;  %v2156_v46 = vcombine.low %v2148_v48, %v2155_v30  ;;  %v1865_v44 = vmul.f32 %v1757_v29, %v1695_v12  ;;  %v1866_v47 = vmul.f32 %v1761_v45, %v1696_v38 }
 0x2e9   :  { %v1867_v60 = vmul.f32 %v1765_v33, %v1697_v21  ;;  %v2439_v52 = vmul.f32 %v2437_v53, %v4405_v31  ;;  %v2469_v16 = vmul.f32 %v2468_v41, %v4398_v51  ;;  %v1868_v1 = vmul.f32 %v1769_v36, %v1698_v50 }
 0x2ea   :  { %2282 = vst [vmem:[%s5217_s13] sm:$0xff] %v2156_v46  ;;  %v1777_v18 = vrot.slane %v4446_v4, %v4010_v9  ;;  %v4496_v19 = vadd.f32 %v1927_v15, %v1865_v44  ;;  %v4498_v22 = vadd.f32 %v1931_v2, %v1866_v47  ;;  %v1700_v30 = vmul.f32 %v4373_v25, %v4250_v10 }
 0x2eb   :  { %v4500_v27 = vadd.f32 %v1935_v8, %v1867_v60  ;;  %v4504_v29 = vadd.f32 %v1939_v56, %v1868_v1  ;;  %v1699_v53 = vmul.f32 %v4373_v25, %v4243_v63  ;;  %v1701_v51 = vmul.f32 %v4373_v25, %v4257_v13 }
 0x2ec   :  { %2429 = vrot.lane.b32.xlu1 %v2424_v3, %s3776_s25  ;;  %2458 = vrot.lane.b32.xlu0 %v2454_v37, %s3777_s27  ;;  %v1773_v45 = vrot.slane %v4446_v4, %v4006_v7  ;;  %v2455_v33 = vmul.f32 %v2453_v11, %v4405_v31  ;;  %v2484_v10 = vmul.f32 %v2483_v40, %v4405_v31  ;;  %v2524_v1 = vstv %s3451_s12  ;;  %s3465_s12 = sld [smem:[#allocation14 + $0x88]] }
 0x2ed   :  { %v1785_v36 = vrot.slane %v4446_v4, %v4033_v28  ;;  %v1947_v63 = vrot.slane %v4449_v17, %v4010_v9  ;;  %v3430_v13 = vpack.c.bf16 %v4498_v22, %v4496_v19  ;;  %v3431_v48 = vpack.c.bf16 %v4504_v29, %v4500_v27 }
 0x2ee   :  { %v1870_v15 = vmul.f32 %v1777_v18, %v1700_v30  ;;  %v1702_v3 = vmul.f32 %v4373_v25, %v4264_v20  ;;  %v1951_v11 = vrot.slane %v4449_v17, %v4026_v23  ;;  %v1869_v37 = vmul.f32 %v1773_v45, %v1699_v53 }
 0x2ef   :  { %v1871_v2 = vmul.f32 %v1781_v24, %v1701_v51  ;;  %v1943_v4 = vrot.slane %v4449_v17, %v4006_v7  ;;  %v1955_v8 = vrot.slane %v4449_v17, %v4033_v28  ;;  %v2470_v46 = vmul.f32 %v2468_v41, %v4405_v31 }
 0x2f0   :  { %2444 = vrot.lane.b32.xlu1 %v2439_v52, %s3777_s27  ;;  %2473 = vrot.lane.b32.xlu0 %v2469_v16, %s3777_s27  ;;  %v2486_v20 = vmul.f32 %v2483_v40, %v4407_v42  ;;  %v2167_v12 = vrot.slane %v3430_v13, %v4421_v6  ;;  %v2174_v38 = vrot.slane %v3431_v48, %v4421_v6  ;;  %v2504_v24 = vstv %s3450_s11  ;;  %s3782_s11 = smov 104  }
 0x2f1   :  { %v4538_v21 = vadd.f32 %v1947_v63, %v1870_v15  ;;  %v1872_v50 = vmul.f32 %v1785_v36, %v1702_v3  ;;  %v4540_v56 = vadd.f32 %v1943_v4, %v1869_v37  ;;  %v4542_v44 = vadd.f32 %v1951_v11, %v1871_v2 }
 0x2f2   :  { %v2485_v47 = vmul.f32 %v2483_v40, %v4409_v32  ;;  %v2506_v60 = vmul.f32 %v2504_v24, %v4409_v32  ;;  %v2189_v52 = vcombine.low %v2167_v12, %v2174_v38  ;;  %v2505_v30 = vmul.f32 %v2504_v24, %v4405_v31 }
 0x2f3   :  { %v4546_v17 = vadd.f32 %v1955_v8, %v1872_v50  ;;  %v3432_v41 = vpack.c.bf16 %v4538_v21, %v4540_v56  ;;  %v2525_v53 = vmul.f32 %v2524_v1, %v4405_v31  ;;  %v2507_v36 = vmul.f32 %v2504_v24, %v4407_v42  ;;  %v4575_v31 = vld [vmem:[#allocation13 + $0x10] sm:$0xff] }
 0x2f4   :  { %2460 = vrot.lane.b32.xlu1 %v2455_v33, %s3777_s27  ;;  %2490 = vrot.lane.b32.xlu0 %v2484_v10, %s3778_s29  ;;  %v2197_v51 = vrot.slane %v2189_v52, %v4421_v6  ;;  %v4570_v10 = vld [vmem:[#allocation11 + $0x10] sm:$0xff]  ;;  %v2527_v63 = vmul.f32 %v2524_v1, %v4407_v42  ;;  %v2544_v48 = vstv %s4554_s30  ;;  %v2560_v15 = vstv %s4559_s8  ;;  %s3466_s30 = sld [smem:[#allocation14 + $0x108]] }
 0x2f5   :  { %v3433_v16 = vpack.c.bf16 %v4546_v17, %v4542_v44  ;;  %v2181_v18 = vrot.slane %v3432_v41, %v4421_v6  ;;  %v1789_v3 = vrot.slane %v4570_v10, %v3984_v55  ;;  %v1793_v11 = vrot.slane %v4570_v10, %v3987_v57  ;;  %s3467_s8 = sld [smem:[#allocation14 + $0x9]] }
 0x2f6   :  { %v1797_v37 = vrot.slane %v4570_v10, %v3994_v0  ;;  %v1703_v2 = vmul.f32 %v4373_v25, %v4271_v35  ;;  %v1704_v4 = vmul.f32 %v4373_v25, %v4278_v39  ;;  %v1705_v8 = vmul.f32 %v4373_v25, %v4285_v43 }
 0x2f7   :  { %v2188_v40 = vrot.slane %v3433_v16, %v4421_v6  ;;  %v2546_v12 = vmul.f32 %v2544_v48, %v4411_v59  ;;  %v1706_v38 = vmul.f32 %v4373_v25, %v4292_v49  ;;  %v1959_v50 = vrot.slane %v4575_v31, %v3984_v55 }
 0x2f8   :  { %2475 = vrot.lane.b32.xlu1 %v2470_v46, %s3777_s27  ;;  %2494 = vrot.lane.b32.xlu0 %v2486_v20, %s3778_s29  ;;  %v1801_v46 = vrot.slane %v4570_v10, %v4001_v5  ;;  %v2526_v20 = vmul.f32 %v2524_v1, %v4409_v32  ;;  %v1963_v35 = vrot.slane %v4575_v31, %v3987_v57  ;;  %v2575_v49 = vstv %s4567_s16  ;;  %s3783_s16 = smov 64  }
 0x2f9   :  { %v2190_v45 = vcombine.low %v2181_v18, %v2188_v40  ;;  %v1967_v39 = vrot.slane %v4575_v31, %v3994_v0  ;;  %v1971_v43 = vrot.slane %v4575_v31, %v4001_v5  ;;  %v1805_v32 = vrot.slane %v4570_v10, %v4006_v7 }
 0x2fa   :  { %v1975_v24 = vrot.slane %v4575_v31, %v4006_v7  ;;  %v1813_v41 = vrot.slane %v4570_v10, %v4026_v23  ;;  %v1817_v5 = vrot.slane %v4570_v10, %v4033_v28  ;;  %v1874_v52 = vmul.f32 %v1793_v11, %v1704_v4  ;;  %v5229_v4 = vld [vmem:[#allocation26_spill] sm:$0xff] }
 0x2fb   :  { %v2204_v33 = vrot.slane %v2190_v45, %v4421_v6  ;;  %v1875_v16 = vmul.f32 %v1797_v37, %v1705_v8  ;;  %v1983_v1 = vrot.slane %v4575_v31, %v4026_v23  ;;  %v2545_v18 = vmul.f32 %v2544_v48, %v4407_v42 }
 0x2fc   :  { %2492 = vrot.lane.b32.xlu1 %v2485_v47, %s3778_s29  ;;  %2513 = vrot.lane.b32.xlu0 %v2506_v60, %s3778_s29  ;;  %v1717_v47 = vld [vmem:[#allocation11 + $0x18] sm:$0x7]  ;;  %v1873_v60 = vmul.f32 %v1789_v3, %v1703_v2  ;;  %v2562_v40 = vmul.f32 %v2560_v15, %v4411_v59  ;;  %v1710_v45 = vmul.f32 %v4373_v25, %v4320_v26 }
 0x2fd   :  { %v2205_v13 = vcombine.low %v2197_v51, %v2204_v33  ;;  %v1709_v51 = vmul.f32 %v4373_v25, %v4313_v14  ;;  %v1821_v33 = vrot.slane %v1717_v47, %v3984_v55  ;;  %v2561_v23 = vmul.f32 %v2560_v15, %v4407_v42  ;;  %v5228_v15 = vld [vmem:[#allocation24_spill] sm:$0xff] }
 0x2fe   :  { %v1825_v14 = vrot.slane %v1717_v47, %v3987_v57  ;;  %v4644_v26 = vadd.f32 %v1959_v50, %v1873_v60  ;;  %v4646_v48 = vadd.f32 %v1963_v35, %v1874_v52  ;;  %v4648_v3 = vadd.f32 %v1967_v39, %v1875_v16  ;;  %v5231_v52 = vld [vmem:[#allocation23_spill] sm:$0xff] }
 0x2ff   :  { %2283 = vst [vmem:[%s5217_s13 + $0x8] sm:$0xff] %v2205_v13  ;;  %v2590_v13 = vstv %s4580_s17  ;;  %v1707_v11 = vmul.f32 %v4373_v25, %v4299_v62  ;;  %v1711_v2 = vmul.f32 %v4373_v25, %v5228_v15  ;;  %v1713_v8 = vmul.f32 %v4373_v25, %v5229_v4  ;;  %s3468_s17 = sld [smem:[#allocation14 + $0x89]] }
 0x300   :  { %2511 = vrot.lane.b32.xlu1 %v2505_v30, %s3778_s29  ;;  %2531 = vrot.lane.b32.xlu0 %v2525_v53, %s3778_s29  ;;  %v1876_v30 = vmul.f32 %v1801_v46, %v1706_v38  ;;  %v1987_v53 = vrot.slane %v4575_v31, %v4033_v28  ;;  %v1887_v28 = vld [vmem:[#allocation13 + $0x18] sm:$0x7]  ;;  %v5230_v46 = vld [vmem:[#allocation25_spill] sm:$0xff]  ;;  %v1880_v38 = vmul.f32 %v1817_v5, %v1710_v45  ;;  %v2606_v39 = vstv %s4616_s20  ;;  %s4795_s20 = sld [smem:[#allocation14 + $0x8a]] }
 0x301   :  { %v1991_v50 = vrot.slane %v1887_v28, %v3984_v55  ;;  %v1999_v35 = vrot.slane %v1887_v28, %v3994_v0  ;;  %v2576_v62 = vmul.f32 %v2575_v49, %v4407_v42  ;;  %v1881_v60 = vmul.f32 %v1821_v33, %v1711_v2 }
 0x302   :  { %v4652_v37 = vadd.f32 %v1971_v43, %v1876_v30  ;;  %v1995_v43 = vrot.slane %v1887_v28, %v3987_v57  ;;  %v1708_v55 = vmul.f32 %v4373_v25, %v5231_v52  ;;  %v3434_v16 = vpack.c.bf16 %v4646_v48, %v4644_v26 }
 0x303   :  { %v2607_v7 = vmul.f32 %v2606_v39, %v4411_v59  ;;  %v2636_v15 = vstv %s4676_s1  ;;  %s4815_s1 = sld [smem:[#allocation14 + $0xb]] }
 0x304   :  { %2515 = vrot.lane.b32.xlu1 %v2507_v36, %s3778_s29  ;;  %2535 = vrot.lane.b32.xlu0 %v2527_v63, %s3778_s29  ;;  %v1829_v36 = vrot.slane %v1717_v47, %v3994_v0  ;;  %v2577_v63 = vmul.f32 %v2575_v49, %v4411_v59  ;;  %v1809_v47 = vrot.slane %v4570_v10, %v4010_v9 }
 0x305   :  { %v2592_v0 = vmul.f32 %v2590_v13, %v4415_v34  ;;  %v3435_v42 = vpack.c.bf16 %v4652_v37, %v4648_v3  ;;  %v1877_v49 = vmul.f32 %v1805_v32, %v1707_v11  ;;  %v4680_v10 = vadd.f32 %v1987_v53, %v1880_v38 }
 0x306   :  { %v1878_v32 = vmul.f32 %v1809_v47, %v1708_v55  ;;  %v2591_v53 = vmul.f32 %v2590_v13, %v4411_v59 }
 0x308   :  { %2533 = vrot.lane.b32.xlu1 %v2526_v20, %s3778_s29  ;;  %2551 = vrot.lane.b32.xlu0 %v2546_v12, %s3779_s2  ;;  %v1712_v20 = vmul.f32 %v4373_v25, %v5230_v46  ;;  %v1879_v12 = vmul.f32 %v1813_v41, %v1709_v51  ;;  %v1883_v41 = vmul.f32 %v1829_v36, %v1713_v8  ;;  %v2621_v25 = vstv %s4641_s0  ;;  %s3472_s0 = sld [smem:[#allocation14 + $0x10a]] }
 0x309   :  { %v2608_v51 = vmul.f32 %v2606_v39, %v4415_v34  ;;  %v2216_v36 = vrot.slane %v3434_v16, %v4421_v6  ;;  %v2622_v38 = vmul.f32 %v2621_v25, %v4411_v59  ;;  %v2637_v59 = vmul.f32 %v2636_v15, %v4415_v34 }
 0x30a   :  { %v1882_v5 = vmul.f32 %v1825_v14, %v1712_v20  ;;  %v4678_v57 = vadd.f32 %v1983_v1, %v1879_v12  ;;  %v1979_v1 = vrot.slane %v4575_v31, %v4010_v9  ;;  %v4706_v9 = vadd.f32 %v1975_v24, %v1877_v49 }
 0x30b   :  { %v2623_v31 = vmul.f32 %v2621_v25, %v4415_v34  ;;  %v2713_v49 = vstv %s3462_s28  ;;  %s4866_s28 = sld [smem:[#allocation14 + $0x100]] }
 0x30c   :  { %2549 = vrot.lane.b32.xlu1 %v2545_v18, %s3779_s2  ;;  %2567 = vrot.lane.b32.xlu0 %v2562_v40, %s3779_s2  ;;  %v4682_v18 = vadd.f32 %v1991_v50, %v1881_v60  ;;  %v4684_v40 = vadd.f32 %v1999_v35, %v1883_v41  ;;  %v4689_v30 = vadd.f32 %v1995_v43, %v1882_v5  ;;  %v2657_v35 = vstv %s4699_s19  ;;  %s3474_s19 = sld [smem:[#allocation14 + $0x8b]] }
 0x30d   :  { %v4716_v14 = vadd.f32 %v1979_v1, %v1878_v32  ;;  %v2638_v50 = vmul.f32 %v2636_v15, %v4496_v19  ;;  %v2658_v47 = vmul.f32 %v2657_v35, %v4415_v34  ;;  %v2639_v41 = vmul.f32 %v2636_v15, %v4498_v22 }
 0x30e   :  { %v2080_v45 = vpack.c.bf16 %v4684_v40, %v4684_v40  ;;  %v3438_v33 = vpack.c.bf16 %v4689_v30, %v4682_v18  ;;  %v2677_v5 = vstv %s3460_s5  ;;  %v2659_v52 = vmul.f32 %v2657_v35, %v4496_v19  ;;  %s3478_s5 = sld [smem:[#allocation14 + $0x10c]] }
 0x30f   :  { %v3436_v4 = vpack.c.bf16 %v4716_v14, %v4706_v9  ;;  %v2679_v55 = vmul.f32 %v2677_v5, %v4496_v19  ;;  %v2678_v16 = vmul.f32 %v2677_v5, %v4415_v34  ;;  %v2680_v25 = vmul.f32 %v2677_v5, %v4498_v22 }
 0x310   :  { %2565 = vrot.lane.b32.xlu1 %v2561_v23, %s3779_s2  ;;  %2582 = vrot.lane.b32.xlu0 %v2577_v63, %s3779_s2  ;;  %v2223_v23 = vrot.slane %v3435_v42, %v4421_v6  ;;  %v3437_v63 = vpack.c.bf16 %v4680_v10, %v4678_v57  ;;  %v2269_v13 = vrot.slane %v2080_v45, %v4421_v6  ;;  %v2728_v32 = vstv %s3463_s9  ;;  %s4874_s9 = sld [smem:[#allocation14 + $0x8d]] }
 0x311   :  { %v2262_v28 = vrot.slane %v3438_v33, %v4421_v6  ;;  %v2230_v12 = vrot.slane %v3436_v4, %v4421_v6  ;;  %v2714_v19 = vmul.f32 %v2713_v49, %v4498_v22  ;;  %v2729_v34 = vmul.f32 %v2728_v32, %v4498_v22 }
 0x312   :  { %v2238_v2 = vcombine.low %v2216_v36, %v2223_v23  ;;  %v2237_v8 = vrot.slane %v3437_v63, %v4421_v6  ;;  %v2759_v33 = vstv %s3465_s12  ;;  %v2730_v36 = vmul.f32 %v2728_v32, %v4500_v27  ;;  %s4882_s12 = sld [smem:[#allocation14 + $0x8e]] }
 0x313   :  { %v2270_v11 = vcombine.low %v2262_v28, %v2269_v13  ;;  %v2760_v23 = vmul.f32 %v2759_v33, %v4500_v27  ;;  %v2774_v63 = vstv %s3466_s30  ;;  %v2789_v28 = vstv %s3467_s8  ;;  %s3790_s30 = smov 120   ;;  %s4948_s8 = sld [smem:[#allocation14 + $0x10e]] }
 0x314   :  { %2580 = vrot.lane.b32.xlu1 %v2576_v62, %s3779_s2  ;;  %2597 = vrot.lane.b32.xlu0 %v2592_v0, %s3780_s4  ;;  %v2246_v62 = vrot.slane %v2238_v2, %v4421_v6  ;;  %v2239_v39 = vcombine.low %v2230_v12, %v2237_v8  ;;  %v2697_v0 = vstv %s4747_s21  ;;  %v2775_v13 = vmul.f32 %v2774_v63, %v4500_v27  ;;  %s4785_s2 = sld [smem:[#allocation14 + $0xa]] }
 0x315   :  { %v2277_v20 = vrot.slane %v2270_v11, %v4421_v6  ;;  %v2698_v42 = vmul.f32 %v2697_v0, %v4498_v22  ;;  %v2699_v1 = vmul.f32 %v2697_v0, %v4500_v27  ;;  %v2776_v11 = vmul.f32 %v2774_v63, %v4504_v29  ;;  %s4856_s21 = sld [smem:[#allocation14 + $0x80]] }
 0x316   :  { %v2253_v43 = vrot.slane %v2239_v39, %v4421_v6  ;;  %v2660_v6 = vmul.f32 %v2657_v35, %v4498_v22  ;;  %v2792_v15 = vmul.f32 %v2789_v28, %v4538_v21  ;;  %v2810_v2 = vstv %s3468_s17  ;;  %s3791_s17 = smov 80  }
 0x317   :  { %2290 = vst.msk [vmem:[%s5217_s13 + $0x18] sm:$0x7] %vm2289_vm12, %v2277_v20  ;;  %v2812_v4 = vmul.f32 %v2810_v2, %v4540_v56  ;;  %v2830_v8 = vstv %s3469_s18  ;;  %v3786_v35 = vmov 4   ;;  %v2866_v5 = vstv %s4795_s20  ;;  %s4993_s18 = sld [smem:[#allocation14 + $0x8f]]  ;;  %s3792_s20 = smov 40  }
 0x318   :  { %2595 = vrot.lane.b32.xlu1 %v2591_v53, %s3780_s4  ;;  %2613 = vrot.lane.b32.xlu0 %v2608_v51, %s3780_s4  ;;  %v2254_v60 = vcombine.low %v2246_v62, %v2253_v43  ;;  %v2715_v51 = vmul.f32 %v2713_v49, %v4500_v27  ;;  %v2813_v43 = vmul.f32 %v2810_v2, %v4538_v21  ;;  %v2896_v32 = vstv %s4815_s1  ;;  %s5034_s1 = sld [smem:[#allocation14 + $0x111]] }
 0x319   :  { %3587 = vset.pattern.permute.xlu1 %v3786_v35  ;;  %vm3057_vm12 = vcmask 654336  }
 0x31a   :  { %2284 = vst [vmem:[%s5217_s13 + $0x10] sm:$0xff] %v2254_v60  ;;  %s3464_s13 = sld [smem:[#allocation14 + $0x8]] }
 0x31c   :  { %2611 = vrot.lane.b32.xlu1 %v2607_v7, %s3780_s4  ;;  %2628 = vrot.lane.b32.xlu0 %v2623_v31, %s3780_s4  ;;  %v2761_v7 = vmul.f32 %v2759_v33, %v4504_v29  ;;  %v2790_v31 = vmul.f32 %v2789_v28, %v4504_v29 }
 0x320   :  { %2626 = vrot.lane.b32.xlu1 %v2622_v38, %s3780_s4  ;;  %2645 = vrot.lane.b32.xlu0 %v2638_v50, %s3781_s6  ;;  %v2743_v53 = vstv %s3464_s13  ;;  %v2811_v38 = vmul.f32 %v2810_v2, %v4504_v29  ;;  %v2831_v50 = vmul.f32 %v2830_v8, %v4504_v29  ;;  %s3787_s4 = smov 112   ;;  %s4876_s13 = sld [smem:[#allocation14 + $0x10d]] }
 0x321   :  { %v2744_v45 = vmul.f32 %v2743_v53, %v4500_v27  ;;  %v2745_v22 = vmul.f32 %v2743_v53, %v4504_v29  ;;  %v2791_v27 = vmul.f32 %v2789_v28, %v4540_v56 }
 0x323   :  { %v4720_v24 = vpop.f32.mrf.mxu1 }
 0x324   :  { %3308 = vst.msk [vmem:[%s5218_s14] sm:$0x3] %vm3307_vm11, %v4720_v24  ;;  %2643 = vrot.lane.b32.xlu1 %v2637_v59, %s3781_s6  ;;  %2664 = vrot.lane.b32.xlu0 %v2658_v47, %s3781_s6  ;;  %v2833_v59 = vmul.f32 %v2830_v8, %v4538_v21  ;;  %v2850_v47 = vstv %s4785_s2  ;;  %s5016_s2 = sld [smem:[#allocation14 + $0x11]] }
 0x325   :  { %v3550_v46 = vpop.f32.mrf.mxu1  ;;  %v2851_v0 = vmul.f32 %v2850_v47, %v4538_v21 }
 0x326   :  { %v3785_v46 = vmov 3  }
 0x327   :  { %3586 = vset.pattern.permute.xlu0 %v3785_v46 }
 0x328   :  { %2647 = vrot.lane.b32.xlu1 %v2639_v41, %s3781_s6  ;;  %2668 = vrot.lane.b32.xlu0 %v2660_v6, %s3781_s6  ;;  %v2832_v41 = vmul.f32 %v2830_v8, %v4540_v56  ;;  %v2852_v6 = vmul.f32 %v2850_v47, %v4542_v44  ;;  %v2982_v47 = vstv %s3478_s5  ;;  %s5127_s5 = sld [smem:[#allocation14 + $0x90]] }
 0x32c   :  { %2666 = vrot.lane.b32.xlu1 %v2659_v52, %s3781_s6  ;;  %2686 = vrot.lane.b32.xlu0 %v2679_v55, %s3781_s6 }
 0x330   :  { %2684 = vrot.lane.b32.xlu1 %v2678_v16, %s3781_s6  ;;  %2702 = vrot.lane.b32.xlu0 %v2698_v42, %s3782_s11  ;;  %v2868_v16 = vmul.f32 %v2866_v5, %v4542_v44  ;;  %v2881_v42 = vstv %s3472_s0  ;;  %s5025_s0 = sld [smem:[#allocation14 + $0x91]] }
 0x331   :  { %v2882_v53 = vmul.f32 %v2881_v42, %v4538_v21 }
 0x334   :  { %2688 = vrot.lane.b32.xlu1 %v2680_v25, %s3781_s6  ;;  %2718 = vrot.lane.b32.xlu0 %v2714_v19, %s3782_s11  ;;  %v2867_v25 = vmul.f32 %v2866_v5, %v4538_v21  ;;  %v2883_v19 = vmul.f32 %v2881_v42, %v4542_v44  ;;  %s3789_s6 = smov 32   ;;  %v3002_v42 = vstv %s4860_s26  ;;  %s5160_s26 = sld [smem:[#allocation15 + $0x1]] }
 0x338   :  { %2704 = vrot.lane.b32.xlu1 %v2699_v1, %s3782_s11  ;;  %2733 = vrot.lane.b32.xlu0 %v2729_v34, %s3782_s11 }
 0x33c   :  { %2720 = vrot.lane.b32.xlu1 %v2715_v51, %s3782_s11  ;;  %2748 = vrot.lane.b32.xlu0 %v2744_v45, %s3783_s16  ;;  %v2898_v51 = vmul.f32 %v2896_v32, %v4546_v17  ;;  %v2912_v45 = vstv %s3474_s19  ;;  %s5051_s19 = sld [smem:[#allocation14 + $0x92]] }
 0x33d   :  { %v2914_v63 = vmul.f32 %v2912_v45, %v4546_v17  ;;  %v2913_v28 = vmul.f32 %v2912_v45, %v4542_v44  ;;  %v3003_v45 = vmul.f32 %v3002_v42, %v4646_v48 }
 0x340   :  { %2735 = vrot.lane.b32.xlu1 %v2730_v36, %s3782_s11  ;;  %2764 = vrot.lane.b32.xlu0 %v2760_v23, %s3783_s16  ;;  %v2897_v23 = vmul.f32 %v2896_v32, %v4542_v44  ;;  %s4880_s11 = sld [smem:[#allocation14 + $0xe]] }
 0x344   :  { %2750 = vrot.lane.b32.xlu1 %v2745_v22, %s3783_s16  ;;  %2779 = vrot.lane.b32.xlu0 %v2775_v13, %s3783_s16  ;;  %v2927_v22 = vstv %s3475_s22  ;;  %s5059_s22 = sld [smem:[#allocation14 + $0x112]] }
 0x345   :  { %v2928_v2 = vmul.f32 %v2927_v22, %v4542_v44 }
 0x348   :  { %2766 = vrot.lane.b32.xlu1 %v2761_v7, %s3783_s16  ;;  %2796 = vrot.lane.b32.xlu0 %v2790_v31, %s3784_s3  ;;  %v2929_v7 = vmul.f32 %v2927_v22, %v4546_v17  ;;  %v2942_v31 = vstv %s3476_s23  ;;  %s3497_s23 = sld [smem:[#allocation14 + $0x13]] }
 0x34c   :  { %2781 = vrot.lane.b32.xlu1 %v2776_v11, %s3783_s16  ;;  %2800 = vrot.lane.b32.xlu0 %v2792_v15, %s3784_s3  ;;  %s4972_s16 = sld [smem:[#allocation14 + $0xf]] }
 0x350   :  { %2798 = vrot.lane.b32.xlu1 %v2791_v27, %s3784_s3  ;;  %2819 = vrot.lane.b32.xlu0 %v2812_v4, %s3784_s3  ;;  %v2944_v27 = vmul.f32 %v2942_v31, %v4644_v26  ;;  %v2962_v4 = vstv %s3477_s24  ;;  %s3795_s24 = smov 127  }
 0x352   :  { %v4789_v20 = vpop.permute.xlu1 %2398  ;;  %v4791_v12 = vpop.permute.xlu0 %2396 }
 0x354   :  { %2817 = vrot.lane.b32.xlu1 %v2811_v38, %s3784_s3  ;;  %2837 = vrot.lane.b32.xlu0 %v2831_v50, %s3784_s3  ;;  %v2943_v38 = vmul.f32 %v2942_v31, %v4546_v17  ;;  %v2963_v50 = vmul.f32 %v2962_v4, %v4546_v17 }
 0x356   :  { %v4799_v62 = vpop.permute.xlu1 %2412  ;;  %v4801_v39 = vpop.permute.xlu0 %2427 }
 0x358   :  { %2821 = vrot.lane.b32.xlu1 %v2813_v43, %s3784_s3  ;;  %2841 = vrot.lane.b32.xlu0 %v2833_v59, %s3784_s3  ;;  %v2945_v43 = vmul.f32 %v2942_v31, %v4646_v48  ;;  %v2965_v59 = vmul.f32 %v2962_v4, %v4646_v48 }
 0x35a   :  { %v4808_v29 = vpop.permute.xlu1 %2414  ;;  %v4810_v60 = vpop.permute.xlu0 %2442 }
 0x35c   :  { %2839 = vrot.lane.b32.xlu1 %v2832_v41, %s3784_s3  ;;  %2857 = vrot.lane.b32.xlu0 %v2852_v6, %s3787_s4  ;;  %v2379_v41 = vstv %s4856_s21  ;;  %s5004_s3 = sld [smem:[#allocation14 + $0x10f]] }
 0x35d   :  { %s5154_s21 = sld [smem:[#allocation15]] }
 0x35e   :  { %v4818_v52 = vpop.permute.xlu1 %2429  ;;  %v4820_v55 = vpop.permute.xlu0 %2458 }
 0x360   :  { %2855 = vrot.lane.b32.xlu1 %v2851_v0, %s3787_s4  ;;  %2873 = vrot.lane.b32.xlu0 %v2868_v16, %s3787_s4  ;;  %v2964_v0 = vmul.f32 %v2962_v4, %v4644_v26  ;;  %v2984_v16 = vmul.f32 %v2982_v47, %v4644_v26  ;;  %v2380_v4 = vmul.f32 %v2379_v41, %v4417_v61 }
 0x362   :  { %v4824_v56 = vpop.permute.xlu1 %2444  ;;  %v4826_v49 = vpop.permute.xlu0 %2473 }
 0x364   :  { %2871 = vrot.lane.b32.xlu1 %v2867_v25, %s3787_s4  ;;  %2888 = vrot.lane.b32.xlu0 %v2883_v19, %s3787_s4  ;;  %v2381_v25 = vmul.f32 %v2379_v41, %v4400_v58  ;;  %v2385_v19 = vstv %s4866_s28 }
 0x365   :  { %v2387_v31 = vmul.f32 %v2385_v19, %v4400_v58  ;;  %v2386_v41 = vmul.f32 %v2385_v19, %v4417_v61 }
 0x366   :  { %v4831_v1 = vpop.permute.xlu1 %2460  ;;  %v4833_v34 = vpop.permute.xlu0 %2490  ;;  %v2420_v26 = vadd.f32 %v4808_v29, %v2381_v25 }
 0x368   :  { %2886 = vrot.lane.b32.xlu1 %v2882_v53, %s3787_s4  ;;  %2903 = vrot.lane.b32.xlu0 %v2898_v51, %s3788_s10  ;;  %v2983_v51 = vmul.f32 %v2982_v47, %v4546_v17  ;;  %v2416_v17 = vsel %vm2400_vm14, %v4799_v62, %v4808_v29  ;;  %v2462_v62 = vsel %vm2446_vm15, %v4820_v55, %v4831_v1  ;;  %s5042_s4 = sld [smem:[#allocation14 + $0x12]] }
 0x36a   :  { %v4837_v33 = vpop.permute.xlu1 %2475  ;;  %v4839_v36 = vpop.permute.xlu0 %2494 }
 0x36c   :  { %2901 = vrot.lane.b32.xlu1 %v2897_v23, %s3788_s10  ;;  %2919 = vrot.lane.b32.xlu0 %v2914_v63, %s3788_s10  ;;  %v2373_v23 = vstv %s4862_s7  ;;  %v3018_v63 = vstv %s4874_s9  ;;  %s3504_s7 = sld [smem:[#allocation15 + $0x2]] }
 0x36e   :  { %v4843_v21 = vpop.permute.xlu1 %2492  ;;  %v4845_v13 = vpop.permute.xlu0 %2513 }
 0x370   :  { %2917 = vrot.lane.b32.xlu1 %v2913_v28, %s3788_s10  ;;  %2934 = vrot.lane.b32.xlu0 %v2929_v7, %s3788_s10  ;;  %v3033_v28 = vstv %s4876_s13  ;;  %v3048_v7 = vstv %s4880_s11 }
 0x372   :  { %v4849_v11 = vpop.permute.xlu1 %2511  ;;  %v4851_v15 = vpop.permute.xlu0 %2531 }
 0x373   :  { %v2517_v55 = vsel %vm2496_vm13, %v4849_v11, %v4845_v13 }
 0x374   :  { %2932 = vrot.lane.b32.xlu1 %v2928_v2, %s3788_s10  ;;  %2951 = vrot.lane.b32.xlu0 %v2944_v27, %s3789_s6  ;;  %v2466_v2 = vadd.f32 %v4831_v1, %v2420_v26  ;;  %v3064_v27 = vstv %s4882_s12  ;;  %v3004_v26 = vmul.f32 %v3002_v42, %v4648_v3  ;;  %s3498_s10 = sld [smem:[#allocation14 + $0x93]] }
 0x376   :  { %v2516_v8 = vpop.permute.xlu1 %2515  ;;  %v2536_v46 = vpop.permute.xlu0 %2535 }
 0x377   :  { %v2518_v22 = vsel %vm2496_vm13, %v4845_v13, %v2516_v8 }
 0x378   :  { %2949 = vrot.lane.b32.xlu1 %v2943_v38, %s3789_s6  ;;  %2969 = vrot.lane.b32.xlu0 %v2963_v50, %s3789_s6  ;;  %v2985_v50 = vmul.f32 %v2982_v47, %v4646_v48  ;;  %v2522_v29 = vadd.f32 %v2518_v22, %v2466_v2  ;;  %v3034_v22 = vmul.f32 %v3033_v28, %v4646_v48 }
 0x37a   :  { %v4868_v44 = vpop.permute.xlu1 %2533  ;;  %v4870_v35 = vpop.permute.xlu0 %2551 }
 0x37b   :  { %v2538_v25 = vsel %vm2496_vm13, %v4868_v44, %v2536_v46  ;;  %v2401_v46 = vsel %vm2400_vm14, %v4791_v12, %v4789_v20  ;;  %v2374_v12 = vmul.f32 %v2373_v23, %v4417_v61 }
 0x37c   :  { %2953 = vrot.lane.b32.xlu1 %v2945_v43, %s3789_s6  ;;  %2973 = vrot.lane.b32.xlu0 %v2965_v59, %s3789_s6  ;;  %v3019_v43 = vmul.f32 %v3018_v63, %v4646_v48  ;;  %v2375_v59 = vmul.f32 %v2373_v23, %v4400_v58  ;;  %v2431_v58 = vsel %vm2400_vm14, %v4801_v39, %v4818_v52 }
 0x37d   :  { %v2477_v39 = vsel %vm2446_vm15, %v4826_v49, %v4837_v33  ;;  %v2447_v48 = vsel %vm2446_vm15, %v4810_v60, %v4824_v56  ;;  %v2537_v49 = vsel %vm2496_vm13, %v4851_v15, %v4868_v44  ;;  %v2404_v61 = vadd.f32 %v2401_v46, %v2374_v12 }
 0x37e   :  { %v4885_v6 = vpop.permute.xlu1 %2549  ;;  %v2568_v5 = vpop.permute.xlu0 %2567  ;;  %v2497_v60 = vsel %vm2496_vm13, %v4833_v34, %v4843_v21 }
 0x37f   :  { %v2573_v1 = vadd.f32 %v2568_v5, %v2522_v29  ;;  %v2554_v34 = vsel %vm2553_vm0, %v4885_v6, %v4870_v35 }
 0x380   :  { %2971 = vrot.lane.b32.xlu1 %v2964_v0, %s3789_s6  ;;  %2991 = vrot.lane.b32.xlu0 %v2984_v16, %s3789_s6  ;;  %v2435_v0 = vadd.f32 %v4818_v52, %v2387_v31  ;;  %v2419_v16 = vadd.f32 %v2416_v17, %v2380_v4  ;;  %v2434_v17 = vadd.f32 %v2431_v58, %v2386_v41 }
 0x381   :  { %v3049_v4 = vmul.f32 %v3048_v7, %v4648_v3  ;;  %v2498_v58 = vsel %vm2496_vm13, %v4843_v21, %v4839_v36 }
 0x382   :  { %v2566_v32 = vpop.permute.xlu1 %2565  ;;  %v4894_v53 = vpop.permute.xlu0 %2582  ;;  %v2481_v47 = vadd.f32 %v4837_v33, %v2435_v0  ;;  %v2465_v19 = vadd.f32 %v2462_v62, %v2419_v16  ;;  %v2480_v42 = vadd.f32 %v2477_v39, %v2434_v17  ;;  %v3110_v17 = vstv %s4993_s18 }
 0x383   :  { %v2569_v13 = vsel %vm2553_vm0, %v2566_v32, %v2568_v5  ;;  %v3020_v5 = vmul.f32 %v3018_v63, %v4648_v3 }
 0x384   :  { %2989 = vrot.lane.b32.xlu1 %v2983_v51, %s3789_s6  ;;  %3007 = vrot.lane.b32.xlu0 %v3003_v45, %s3790_s30  ;;  %v2542_v52 = vadd.f32 %v2538_v25, %v2481_v47  ;;  %v2521_v31 = vadd.f32 %v2517_v55, %v2465_v19  ;;  %v3065_v25 = vmul.f32 %v3064_v27, %v4648_v3 }
 0x385   :  { %v3050_v19 = vmul.f32 %v3048_v7, %v4652_v37 }
 0x386   :  { %v2581_v8 = vpop.permute.xlu1 %2580  ;;  %v4914_v38 = vpop.permute.xlu0 %2597  ;;  %v2588_v33 = vadd.f32 %v4894_v53, %v2542_v52  ;;  %v2572_v32 = vadd.f32 %v2569_v13, %v2521_v31  ;;  %v3066_v52 = vmul.f32 %v3064_v27, %v4652_v37 }
 0x387   :  { %v2584_v15 = vsel %vm2553_vm0, %v2581_v8, %v4894_v53  ;;  %v3035_v53 = vmul.f32 %v3033_v28, %v4648_v3  ;;  %v2405_v8 = vadd.f32 %v4789_v20, %v2375_v59  ;;  %v3079_v28 = vstv %s4948_s8 }
 0x388   :  { %2993 = vrot.lane.b32.xlu1 %v2985_v50, %s3789_s6  ;;  %3023 = vrot.lane.b32.xlu0 %v3019_v43, %s3790_s30  ;;  %v2450_v50 = vadd.f32 %v2447_v48, %v2404_v61  ;;  %v2541_v43 = vadd.f32 %v2537_v49, %v2480_v42  ;;  %v3111_v48 = vmul.f32 %v3110_v17, %v4652_v37  ;;  %s5131_s6 = sld [smem:[#allocation14 + $0x110]]  ;;  %vm3331_vm0 = vcmask 322562  }
 0x389   :  { %v2451_v20 = vadd.f32 %v4824_v56, %v2405_v8 }
 0x38a   :  { %v2596_v51 = vpop.permute.xlu1 %2595  ;;  %v2614_v45 = vpop.permute.xlu0 %2613  ;;  %v2501_v62 = vadd.f32 %v2497_v60, %v2450_v50  ;;  %v2587_v29 = vadd.f32 %v2584_v15, %v2541_v43  ;;  %v3158_v15 = vstv %s5016_s2  ;;  %v3112_v43 = vmul.f32 %v3110_v17, %v4706_v9 }
 0x38b   :  { %v4946_v11 = vadd.f32 %v2614_v45, %v2573_v1  ;;  %v2600_v6 = vsel %vm2599_vm2, %v2596_v51, %v4914_v38  ;;  %v2502_v36 = vadd.f32 %v2498_v58, %v2451_v20  ;;  %v3080_v51 = vmul.f32 %v3079_v28, %v4648_v3 }
 0x38c   :  { %3009 = vrot.lane.b32.xlu1 %v3004_v26, %s3790_s30  ;;  %3038 = vrot.lane.b32.xlu0 %v3034_v22, %s3790_s30  ;;  %v2557_v59 = vadd.f32 %v2554_v34, %v2501_v62  ;;  %v3188_v58 = vstv %s5034_s1 }
 0x38d   :  { %v2558_v26 = vadd.f32 %v4870_v35, %v2502_v36 }
 0x38e   :  { %v2612_v23 = vpop.permute.xlu1 %2611  ;;  %v2629_v2 = vpop.permute.xlu0 %2628  ;;  %v2603_v21 = vadd.f32 %v2600_v6, %v2557_v59 }
 0x38f   :  { %v2615_v44 = vsel %vm2599_vm2, %v2612_v23, %v2614_v45  ;;  %v4970_v63 = vadd.f32 %v2629_v2, %v2588_v33  ;;  %v3094_v45 = vstv %s4972_s16  ;;  %v2604_v39 = vadd.f32 %v4914_v38, %v2558_v26 }
 0x390   :  { %v2618_v0 = vadd.f32 %v2615_v44, %v2572_v32  ;;  %3025 = vrot.lane.b32.xlu1 %v3020_v5, %s3790_s30  ;;  %3053 = vrot.lane.b32.xlu0 %v3049_v4, %s3791_s17  ;;  %v3095_v13 = vmul.f32 %v3094_v45, %v4652_v37  ;;  %v3081_v38 = vmul.f32 %v3079_v28, %v4652_v37  ;;  %v3125_v5 = vstv %s5004_s3 }
 0x391   :  { %v3126_v4 = vmul.f32 %v3125_v5, %v4652_v37  ;;  %v3173_v37 = vstv %s5025_s0  ;;  %v3160_v28 = vmul.f32 %v3158_v15, %v4680_v10 }
 0x392   :  { %v2627_v16 = vpop.permute.xlu1 %2626  ;;  %v2646_v41 = vpop.permute.xlu0 %2645 }
 0x393   :  { %v2630_v47 = vsel %vm2599_vm2, %v2627_v16, %v2629_v2  ;;  %v3096_v2 = vmul.f32 %v3094_v45, %v4706_v9  ;;  %v3174_v16 = vmul.f32 %v3173_v37, %v4678_v57  ;;  %v3218_v45 = vstv %s5051_s19  ;;  %vm5169_vm2 = vmor %vm3331_vm0, %vm1516_vm3 }
 0x394   :  { %v2633_v55 = vadd.f32 %v2630_v47, %v2587_v29  ;;  %3040 = vrot.lane.b32.xlu1 %v3035_v53, %s3790_s30  ;;  %3069 = vrot.lane.b32.xlu0 %v3065_v25, %s3791_s17  ;;  %v3127_v29 = vmul.f32 %v3125_v5, %v4706_v9  ;;  %v3189_v9 = vmul.f32 %v3188_v58, %v4678_v57 }
 0x396   :  { %v2644_v1 = vpop.permute.xlu1 %2643  ;;  %v2665_v46 = vpop.permute.xlu0 %2664 }
 0x397   :  { %v2650_v56 = vsel %vm2649_vm4, %v2644_v1, %v2646_v41 }
 0x398   :  { %v2654_v22 = vadd.f32 %v2650_v56, %v2603_v21  ;;  %3055 = vrot.lane.b32.xlu1 %v3050_v19, %s3791_s17  ;;  %3084 = vrot.lane.b32.xlu0 %v3080_v51, %s3791_s17 }
 0x39a   :  { %v2648_v7 = vpop.permute.xlu1 %2647  ;;  %v2669_v3 = vpop.permute.xlu0 %2668 }
 0x39b   :  { %v2651_v12 = vsel %vm2649_vm4, %v2646_v41, %v2648_v7  ;;  %v3219_v7 = vmul.f32 %v3218_v45, %v4680_v10 }
 0x39c   :  { %v2655_v35 = vadd.f32 %v2651_v12, %v2604_v39  ;;  %3071 = vrot.lane.b32.xlu1 %v3066_v52, %s3791_s17  ;;  %3099 = vrot.lane.b32.xlu0 %v3095_v13, %s3792_s20  ;;  %v3190_v52 = vmul.f32 %v3188_v58, %v4680_v10  ;;  %v3233_v12 = vstv %s5059_s22 }
 0x39e   :  { %v2667_v31 = vpop.permute.xlu1 %2666  ;;  %v2687_v27 = vpop.permute.xlu0 %2686 }
 0x39f   :  { %v2670_v49 = vsel %vm2649_vm4, %v2665_v46, %v2667_v31  ;;  %v2671_v33 = vsel %vm2649_vm4, %v2667_v31, %v2669_v3  ;;  %v3175_v46 = vmul.f32 %v3173_v37, %v4680_v10 }
 0x3a0   :  { %v2674_v61 = vadd.f32 %v2670_v49, %v2618_v0  ;;  %v2675_v42 = vadd.f32 %v2671_v33, %v4946_v11  ;;  %3086 = vrot.lane.b32.xlu1 %v3081_v38, %s3791_s17  ;;  %3115 = vrot.lane.b32.xlu0 %v3111_v48, %s3792_s20  ;;  %v3159_v0 = vmul.f32 %v3158_v15, %v4678_v57  ;;  %v3248_v33 = vstv %s3497_s23 }
 0x3a2   :  { %v2685_v32 = vpop.permute.xlu1 %2684  ;;  %v2703_v23 = vpop.permute.xlu0 %2702 }
 0x3a3   :  { %v2690_v60 = vsel %vm2649_vm4, %v2685_v32, %v2687_v27  ;;  %v3220_v32 = vmul.f32 %v3218_v45, %v4682_v18 }
 0x3a4   :  { %v2694_v44 = vadd.f32 %v2690_v60, %v2633_v55  ;;  %3101 = vrot.lane.b32.xlu1 %v3096_v2, %s3792_s20  ;;  %3130 = vrot.lane.b32.xlu0 %v3126_v4, %s3792_s20  ;;  %v3203_v55 = vstv %s5042_s4 }
 0x3a5   :  { %v3204_v19 = vmul.f32 %v3203_v55, %v4680_v10  ;;  %v3205_v31 = vmul.f32 %v3203_v55, %v4682_v18 }
 0x3a6   :  { %v2689_v11 = vpop.permute.xlu1 %2688  ;;  %v2719_v50 = vpop.permute.xlu0 %2718 }
 0x3a7   :  { %v2691_v34 = vsel %vm2649_vm4, %v2687_v27, %v2689_v11  ;;  %v3234_v27 = vmul.f32 %v3233_v12, %v4680_v10  ;;  %v3251_v11 = vmul.f32 %v3248_v33, %v4684_v40 }
 0x3a8   :  { %v2695_v53 = vadd.f32 %v2691_v34, %v4970_v63  ;;  %3117 = vrot.lane.b32.xlu1 %v3112_v43, %s3792_s20  ;;  %3163 = vrot.lane.b32.xlu0 %v3159_v0, %s3776_s25  ;;  %v3268_v0 = vstv %s3498_s10 }
 0x3a9   :  { %v3271_v55 = vmul.f32 %v3268_v0, %v4684_v40 }
 0x3aa   :  { %v2705_v8 = vpop.permute.xlu1 %2704  ;;  %v2734_v62 = vpop.permute.xlu0 %2733 }
 0x3ab   :  { %v2707_v41 = vsel %vm2706_vm5, %v2703_v23, %v2705_v8  ;;  %v2711_v25 = vadd.f32 %v2705_v8, %v2655_v35  ;;  %v3249_v23 = vmul.f32 %v3248_v33, %v4682_v18 }
 0x3ac   :  { %v2710_v6 = vadd.f32 %v2707_v41, %v2654_v22  ;;  %3132 = vrot.lane.b32.xlu1 %v3127_v29, %s3792_s20  ;;  %3178 = vrot.lane.b32.xlu0 %v3174_v16, %s3776_s25  ;;  %v3270_v29 = vmul.f32 %v3268_v0, %v4689_v30 }
 0x3ae   :  { %v2721_v63 = vpop.permute.xlu1 %2720  ;;  %v2749_v47 = vpop.permute.xlu0 %2748 }
 0x3af   :  { %v2722_v20 = vsel %vm2706_vm5, %v2719_v50, %v2721_v63  ;;  %v2726_v59 = vadd.f32 %v2721_v63, %v2675_v42  ;;  %v3269_v63 = vmul.f32 %v3268_v0, %v4682_v18 }
 0x3b0   :  { %v2725_v36 = vadd.f32 %v2722_v20, %v2674_v61  ;;  %3165 = vrot.lane.b32.xlu1 %v3160_v28, %s3776_s25  ;;  %3193 = vrot.lane.b32.xlu0 %v3189_v9, %s3776_s25 }
 0x3b2   :  { %v2736_v21 = vpop.permute.xlu1 %2735  ;;  %v2765_v1 = vpop.permute.xlu0 %2764 }
 0x3b3   :  { %v2737_v51 = vsel %vm2706_vm5, %v2734_v62, %v2736_v21  ;;  %v2741_v56 = vadd.f32 %v2736_v21, %v2695_v53  ;;  %v3250_v62 = vmul.f32 %v3248_v33, %v4689_v30 }
 0x3b4   :  { %v2740_v26 = vadd.f32 %v2737_v51, %v2694_v44  ;;  %3180 = vrot.lane.b32.xlu1 %v3175_v46, %s3776_s25  ;;  %3208 = vrot.lane.b32.xlu0 %v3204_v19, %s3777_s27  ;;  %v3235_v44 = vmul.f32 %v3233_v12, %v4682_v18 }
 0x3b6   :  { %v2751_v22 = vpop.permute.xlu1 %2750  ;;  %v2780_v39 = vpop.permute.xlu0 %2779 }
 0x3b7   :  { %v2753_v3 = vsel %vm2752_vm6, %v2749_v47, %v2751_v22  ;;  %v2757_v13 = vadd.f32 %v2751_v22, %v2711_v25 }
 0x3b8   :  { %v2756_v17 = vadd.f32 %v2753_v3, %v2710_v6  ;;  %3195 = vrot.lane.b32.xlu1 %v3190_v52, %s3776_s25  ;;  %3223 = vrot.lane.b32.xlu0 %v3219_v7, %s3777_s27  ;;  %s3499_s25 = sld [smem:[#allocation14 + $0x113]] }
 0x3ba   :  { %v2767_v35 = vpop.permute.xlu1 %2766  ;;  %v2797_v38 = vpop.permute.xlu0 %2796 }
 0x3bb   :  { %v2768_v48 = vsel %vm2752_vm6, %v2765_v1, %v2767_v35  ;;  %v2772_v49 = vadd.f32 %v2767_v35, %v2726_v59 }
 0x3bc   :  { %v2771_v5 = vadd.f32 %v2768_v48, %v2725_v36  ;;  %3210 = vrot.lane.b32.xlu1 %v3205_v31, %s3777_s27  ;;  %3238 = vrot.lane.b32.xlu0 %v3234_v27, %s3777_s27 }
 0x3be   :  { %v2782_v61 = vpop.permute.xlu1 %2781  ;;  %v2801_v42 = vpop.permute.xlu0 %2800  ;;  %v3288_v41 = vstv %s3499_s25 }
 0x3bf   :  { %v2783_v2 = vsel %vm2752_vm6, %v2780_v39, %v2782_v61  ;;  %v2787_v4 = vadd.f32 %v2782_v61, %v2741_v56  ;;  %v3289_v47 = vmul.f32 %v3288_v41, %v4682_v18  ;;  %v3291_v56 = vmul.f32 %v3288_v41, %v4684_v40 }
 0x3c0   :  { %v2786_v10 = vadd.f32 %v2783_v2, %v2740_v26  ;;  %3225 = vrot.lane.b32.xlu1 %v3220_v32, %s3777_s27  ;;  %3255 = vrot.lane.b32.xlu0 %v3249_v23, %s3778_s29  ;;  %v3793_v39 = vmov 5   ;;  %v3290_v31 = vmul.f32 %v3288_v41, %v4689_v30 }
 0x3c2   :  { %v2799_v60 = vpop.permute.xlu1 %2798  ;;  %v2820_v15 = vpop.permute.xlu0 %2819 }
 0x3c3   :  { %v2803_v50 = vsel %vm2802_vm7, %v2797_v38, %v2799_v60  ;;  %v2804_v43 = vsel %vm2802_vm7, %v2799_v60, %v2801_v42 }
 0x3c4   :  { %v2807_v34 = vadd.f32 %v2803_v50, %v2756_v17  ;;  %v2808_v37 = vadd.f32 %v2804_v43, %v2757_v13  ;;  %3240 = vrot.lane.b32.xlu1 %v3235_v44, %s3777_s27  ;;  %3259 = vrot.lane.b32.xlu0 %v3251_v11, %s3778_s29  ;;  %s3794_s27 = smov 126  }
 0x3c6   :  { %v2818_v53 = vpop.permute.xlu1 %2817  ;;  %v2838_v8 = vpop.permute.xlu0 %2837 }
 0x3c7   :  { %v2823_v16 = vsel %vm2802_vm7, %v2818_v53, %v2820_v15 }
 0x3c8   :  { %v2827_v25 = vadd.f32 %v2823_v16, %v2771_v5  ;;  %3257 = vrot.lane.b32.xlu1 %v3250_v62, %s3778_s29  ;;  %3277 = vrot.lane.b32.xlu0 %v3270_v29, %s3778_s29 }
 0x3ca   :  { %v2822_v58 = vpop.permute.xlu1 %2821  ;;  %v2842_v6 = vpop.permute.xlu0 %2841 }
 0x3cb   :  { %v2824_v28 = vsel %vm2802_vm7, %v2820_v15, %v2822_v58 }
 0x3cc   :  { %v2828_v9 = vadd.f32 %v2824_v28, %v2772_v49  ;;  %3275 = vrot.lane.b32.xlu1 %v3269_v63, %s3778_s29  ;;  %3295 = vrot.lane.b32.xlu0 %v3289_v47, %s3778_s29 }
 0x3ce   :  { %v2840_v20 = vpop.permute.xlu1 %2839  ;;  %v2858_v59 = vpop.permute.xlu0 %2857 }
 0x3cf   :  { %v2843_v36 = vsel %vm2802_vm7, %v2838_v8, %v2840_v20  ;;  %v2844_v21 = vsel %vm2802_vm7, %v2840_v20, %v2842_v6  ;;  %v2864_v1 = vadd.f32 %v2858_v59, %v2808_v37 }
 0x3d0   :  { %v2847_v46 = vadd.f32 %v2843_v36, %v2786_v10  ;;  %v2848_v19 = vadd.f32 %v2844_v21, %v2787_v4  ;;  %3279 = vrot.lane.b32.xlu1 %v3271_v55, %s3778_s29  ;;  %3311 = vperm.xlu0 %3586, %v4720_v24  }
 0x3d2   :  { %v2856_v18 = vpop.permute.xlu1 %2855  ;;  %v2874_v51 = vpop.permute.xlu0 %2873 }
 0x3d3   :  { %v2860_v45 = vsel %vm2859_vm8, %v2856_v18, %v2858_v59  ;;  %v2879_v26 = vadd.f32 %v2874_v51, %v2828_v9 }
 0x3d4   :  { %v2863_v22 = vadd.f32 %v2860_v45, %v2807_v34  ;;  %3340 = vperm.xlu1 %3587, %v4720_v24   ;;  %3299 = vrot.lane.b32.xlu0 %v3291_v56, %s3778_s29 }
 0x3d5   :  { %3589 = vset.pattern.permute.xlu0 %v3793_v39 }
 0x3d6   :  { %v2872_v52 = vpop.permute.xlu1 %2871  ;;  %v2889_v7 = vpop.permute.xlu0 %2888 }
 0x3d7   :  { %v2875_v3 = vsel %vm2859_vm8, %v2872_v52, %v2874_v51  ;;  %v2894_v13 = vadd.f32 %v2889_v7, %v2848_v19 }
 0x3d8   :  { %v2878_v12 = vadd.f32 %v2875_v3, %v2827_v25  ;;  %3588 = vset.pattern.permute.xlu1 %v3793_v39  ;;  %3362 = vrot.lane.b32.xlu0 %v4720_v24, %s3794_s27 }
 0x3d9   :  { %3368 = vperm.xlu1 %3588, %v4720_v24  }
 0x3da   :  { %v2887_v40 = vpop.permute.xlu1 %2886  ;;  %v2904_v17 = vpop.permute.xlu0 %2903 }
 0x3db   :  { %v2890_v35 = vsel %vm2859_vm8, %v2887_v40, %v2889_v7  ;;  %v2910_v38 = vadd.f32 %v2904_v17, %v2864_v1 }
 0x3dc   :  { %v2893_v27 = vadd.f32 %v2890_v35, %v2847_v46 }
 0x3dd   :  { %3297 = vrot.lane.b32.xlu1 %v3290_v31, %s3778_s29  ;;  %s3488_s29 = sld [smem:[#allocation14 + $0x10]] }
 0x3de   :  { %v2902_v48 = vpop.permute.xlu1 %2901  ;;  %v2920_v49 = vpop.permute.xlu0 %2919 }
 0x3df   :  { %v2906_v33 = vsel %vm2905_vm9, %v2902_v48, %v2904_v17  ;;  %v2925_v5 = vadd.f32 %v2920_v49, %v2879_v26  ;;  %v3146_v48 = vstv %s5127_s5 }
 0x3e0   :  { %v2909_v61 = vadd.f32 %v2906_v33, %v2863_v22 }
 0x3e1   :  { %3334 = vrot.lane.b32.xlu1 %v4720_v24, %s3795_s24 }
 0x3e2   :  { %v2918_v42 = vpop.permute.xlu1 %2917  ;;  %v2935_v32 = vpop.permute.xlu0 %2934 }
 0x3e3   :  { %v2921_v23 = vsel %vm2905_vm9, %v2918_v42, %v2920_v49  ;;  %v2940_v2 = vadd.f32 %v2935_v32, %v2894_v13  ;;  %v3140_v13 = vstv %s3488_s29 }
 0x3e4   :  { %v2924_v4 = vadd.f32 %v2921_v23, %v2878_v12  ;;  %v3141_v23 = vmul.f32 %v3140_v13, %v4716_v14 }
 0x3e6   :  { %v2933_v30 = vpop.permute.xlu1 %2932  ;;  %v2952_v10 = vpop.permute.xlu0 %2951 }
 0x3e7   :  { %v2936_v60 = vsel %vm2905_vm9, %v2933_v30, %v2935_v32 }
 0x3e8   :  { %v2939_v15 = vadd.f32 %v2936_v60, %v2893_v27  ;;  %v3142_v27 = vmul.f32 %v3140_v13, %v4678_v57 }
 0x3ea   :  { %v2950_v44 = vpop.permute.xlu1 %2949  ;;  %v2970_v11 = vpop.permute.xlu0 %2969 }
 0x3eb   :  { %v2955_v50 = vsel %vm163_vm1, %v2950_v44, %v2952_v10  ;;  %v3148_v44 = vmul.f32 %v3146_v48, %v4678_v57 }
 0x3ec   :  { %v2959_v43 = vadd.f32 %v2955_v50, %v2909_v61 }
 0x3ee   :  { %v2954_v0 = vpop.permute.xlu1 %2953  ;;  %v2974_v34 = vpop.permute.xlu0 %2973 }
 0x3ef   :  { %v2956_v24 = vsel %vm163_vm1, %v2952_v10, %v2954_v0 }
 0x3f0   :  { %v2960_v37 = vadd.f32 %v2956_v24, %v2910_v38  ;;  %v3147_v24 = vmul.f32 %v3146_v48, %v4716_v14 }
 0x3f2   :  { %v2972_v53 = vpop.permute.xlu1 %2971  ;;  %v2992_v8 = vpop.permute.xlu0 %2991 }
 0x3f3   :  { %v2975_v62 = vsel %vm163_vm1, %v2970_v11, %v2972_v53  ;;  %v2976_v29 = vsel %vm163_vm1, %v2972_v53, %v2974_v34 }
 0x3f4   :  { %v2979_v16 = vadd.f32 %v2975_v62, %v2924_v4  ;;  %v2980_v41 = vadd.f32 %v2976_v29, %v2925_v5 }
 0x3f6   :  { %v2990_v25 = vpop.permute.xlu1 %2989  ;;  %v3008_v58 = vpop.permute.xlu0 %3007 }
 0x3f7   :  { %v2995_v6 = vsel %vm163_vm1, %v2990_v25, %v2992_v8 }
 0x3f8   :  { %v2999_v63 = vadd.f32 %v2995_v6, %v2939_v15 }
 0x3fa   :  { %v2994_v47 = vpop.permute.xlu1 %2993  ;;  %v3024_v28 = vpop.permute.xlu0 %3023 }
 0x3fb   :  { %v2996_v9 = vsel %vm163_vm1, %v2992_v8, %v2994_v47  ;;  %vm3103_vm1 = vcmask 326656  }
 0x3fc   :  { %v3000_v20 = vadd.f32 %v2996_v9, %v2940_v2 }
 0x3fe   :  { %v3010_v59 = vpop.permute.xlu1 %3009  ;;  %v3039_v55 = vpop.permute.xlu0 %3038 }
 0x3ff   :  { %v3012_v22 = vsel %vm3011_vm10, %v3008_v58, %v3010_v59  ;;  %v3016_v7 = vadd.f32 %v3010_v59, %v2960_v37  ;;  %v3152_v37 = vstv %s5131_s6 }
 0x400   :  { %v3015_v12 = vadd.f32 %v3012_v22, %v2959_v43  ;;  %v3154_v6 = vmul.f32 %v3152_v37, %v4678_v57  ;;  %v3153_v47 = vmul.f32 %v3152_v37, %v4716_v14 }
 0x402   :  { %v3026_v36 = vpop.permute.xlu1 %3025  ;;  %v3054_v21 = vpop.permute.xlu0 %3053 }
 0x403   :  { %v3027_v40 = vsel %vm3011_vm10, %v3024_v28, %v3026_v36  ;;  %v3031_v49 = vadd.f32 %v3026_v36, %v2980_v41 }
 0x404   :  { %v3030_v42 = vadd.f32 %v3027_v40, %v2979_v16 }
 0x406   :  { %v3041_v1 = vpop.permute.xlu1 %3040  ;;  %v3070_v46 = vpop.permute.xlu0 %3069 }
 0x407   :  { %v3042_v19 = vsel %vm3011_vm10, %v3039_v55, %v3041_v1  ;;  %v3046_v11 = vadd.f32 %v3041_v1, %v3000_v20 }
 0x408   :  { %v3045_v18 = vadd.f32 %v3042_v19, %v2999_v63 }
 0x40a   :  { %v3056_v51 = vpop.permute.xlu1 %3055  ;;  %v3085_v56 = vpop.permute.xlu0 %3084 }
 0x40b   :  { %v3058_v3 = vsel %vm3057_vm12, %v3054_v21, %v3056_v51  ;;  %v3062_v17 = vadd.f32 %v3056_v51, %v3016_v7 }
 0x40c   :  { %v3061_v35 = vadd.f32 %v3058_v3, %v3015_v12 }
 0x40e   :  { %v3072_v45 = vpop.permute.xlu1 %3071  ;;  %v3100_v26 = vpop.permute.xlu0 %3099 }
 0x40f   :  { %v3073_v33 = vsel %vm3057_vm12, %v3070_v46, %v3072_v45  ;;  %v3077_v2 = vadd.f32 %v3072_v45, %v3031_v49 }
 0x410   :  { %v3076_v30 = vadd.f32 %v3073_v33, %v3030_v42 }
 0x412   :  { %v3087_v39 = vpop.permute.xlu1 %3086  ;;  %v3116_v52 = vpop.permute.xlu0 %3115 }
 0x413   :  { %v3088_v50 = vsel %vm3057_vm12, %v3085_v56, %v3087_v39  ;;  %v3092_v53 = vadd.f32 %v3087_v39, %v3046_v11 }
 0x414   :  { %v3091_v62 = vadd.f32 %v3088_v50, %v3045_v18 }
 0x416   :  { %v3102_v38 = vpop.permute.xlu1 %3101  ;;  %v3131_v31 = vpop.permute.xlu0 %3130 }
 0x417   :  { %v3104_v5 = vsel %vm3103_vm1, %v3100_v26, %v3102_v38  ;;  %v3108_v61 = vadd.f32 %v3102_v38, %v3062_v17 }
 0x418   :  { %v3107_v32 = vadd.f32 %v3104_v5, %v3061_v35 }
 0x419   :  { %v3144_v4 = vadd.f32 %v3142_v27, %v3108_v61 }
 0x41a   :  { %v3118_v10 = vpop.permute.xlu1 %3117  ;;  %v3164_v60 = vpop.permute.xlu0 %3163  ;;  %v3143_v15 = vadd.f32 %v3141_v23, %v3107_v32 }
 0x41b   :  { %v3119_v43 = vsel %vm3103_vm1, %v3116_v52, %v3118_v10  ;;  %v3123_v0 = vadd.f32 %v3118_v10, %v3077_v2  ;;  %v3796_v52 = vmov 1983009808   ;;  %v3317_v2 = vstv %s5154_s21 }
 0x41c   :  { %v3122_v34 = vadd.f32 %v3119_v43, %v3076_v30  ;;  %v3324_v7 = vunpack.c.l.s4 %v3796_v52 }
 0x41d   :  { %v3150_v8 = vadd.f32 %v3148_v44, %v3123_v0 }
 0x41e   :  { %v3133_v29 = vpop.permute.xlu1 %3132  ;;  %v3179_v16 = vpop.permute.xlu0 %3178  ;;  %v3149_v41 = vadd.f32 %v3147_v24, %v3122_v34  ;;  %v3325_v49 = vunpack.c.0.s8 %v3324_v7  ;;  %v3346_v34 = vstv %s5160_s26 }
 0x41f   :  { %v3134_v25 = vsel %vm3103_vm1, %v3131_v31, %v3133_v29  ;;  %v3138_v58 = vadd.f32 %v3133_v29, %v3092_v53 }
 0x420   :  { %v3137_v63 = vadd.f32 %v3134_v25, %v3091_v62  ;;  %v3328_v44 = vsub.s32 %v3325_v49, %v3981_v54 }
 0x421   :  { %v5147_v28 = vadd.f32 %v3154_v6, %v3138_v58 }
 0x422   :  { %v3166_v9 = vpop.permute.xlu1 %3165  ;;  %v3194_v20 = vpop.permute.xlu0 %3193  ;;  %v5149_v59 = vadd.f32 %v3153_v47, %v3137_v63 }
 0x423   :  { %v3167_v22 = vsel %vm2400_vm14, %v3164_v60, %v3166_v9  ;;  %v3171_v13 = vadd.f32 %v3166_v9, %v3144_v4 }
 0x424   :  { %v3170_v3 = vadd.f32 %v3167_v22, %v3143_v15 }
 0x426   :  { %v3181_v55 = vpop.permute.xlu1 %3180  ;;  %v3209_v36 = vpop.permute.xlu0 %3208 }
 0x427   :  { %v3182_v12 = vsel %vm2400_vm14, %v3179_v16, %v3181_v55  ;;  %v3186_v5 = vadd.f32 %v3181_v55, %v3150_v8 }
 0x428   :  { %v3185_v33 = vadd.f32 %v3182_v12, %v3149_v41 }
 0x42a   :  { %v5151_v21 = vpop.permute.xlu1 %3195  ;;  %v3224_v1 = vpop.permute.xlu0 %3223 }
 0x42b   :  { %v3197_v54 = vsel %vm2400_vm14, %v3194_v20, %v5151_v21  ;;  %v3201_v20 = vadd.f32 %v5151_v21, %v5147_v28 }
 0x42c   :  { %v3200_v9 = vadd.f32 %v3197_v54, %v5149_v59  ;;  %v3374_v59 = vstv %s3504_s7 }
 0x42e   :  { %v3211_v46 = vpop.permute.xlu1 %3210  ;;  %v3239_v19 = vpop.permute.xlu0 %3238 }
 0x42f   :  { %v3212_v39 = vsel %vm2446_vm15, %v3209_v36, %v3211_v46  ;;  %v3216_v31 = vadd.f32 %v3211_v46, %v3171_v13 }
 0x430   :  { %v3215_v38 = vadd.f32 %v3212_v39, %v3170_v3 }
 0x432   :  { %v3226_v18 = vpop.permute.xlu1 %3225  ;;  %v3256_v51 = vpop.permute.xlu0 %3255 }
 0x433   :  { %v3227_v48 = vsel %vm2446_vm15, %v3224_v1, %v3226_v18  ;;  %v3231_v10 = vadd.f32 %v3226_v18, %v3186_v5 }
 0x434   :  { %v3230_v30 = vadd.f32 %v3227_v48, %v3185_v33 }
 0x436   :  { %v3241_v56 = vpop.permute.xlu1 %3240  ;;  %v3260_v57 = vpop.permute.xlu0 %3259 }
 0x437   :  { %v3242_v47 = vsel %vm2446_vm15, %v3239_v19, %v3241_v56  ;;  %v3246_v1 = vadd.f32 %v3241_v56, %v3201_v20 }
 0x438   :  { %v3245_v36 = vadd.f32 %v3242_v47, %v3200_v9 }
 0x43a   :  { %v3258_v45 = vpop.permute.xlu1 %3257  ;;  %v3278_v26 = vpop.permute.xlu0 %3277 }
 0x43b   :  { %v3261_v40 = vsel %vm2496_vm13, %v3256_v51, %v3258_v45  ;;  %v3262_v17 = vsel %vm2496_vm13, %v3258_v45, %v3260_v57 }
 0x43c   :  { %v3265_v61 = vadd.f32 %v3261_v40, %v3215_v38  ;;  %v3266_v42 = vadd.f32 %v3262_v17, %v3216_v31 }
 0x43e   :  { %v3276_v14 = vpop.permute.xlu1 %3275  ;;  %v3296_v35 = vpop.permute.xlu0 %3295 }
 0x43f   :  { %v3281_v32 = vsel %vm2496_vm13, %v3276_v14, %v3278_v26 }
 0x440   :  { %v3285_v11 = vadd.f32 %v3281_v32, %v3230_v30 }
 0x442   :  { %v3280_v27 = vpop.permute.xlu1 %3279 }
 0x443   :  { %v3282_v23 = vsel %vm2496_vm13, %v3278_v26, %v3280_v27 }
 0x444   :  { %v3286_v50 = vadd.f32 %v3282_v23, %v3231_v10 }
 0x44b   :  { %v3312_v4 = vpop.permute.xlu0 %3311 }
 0x44c   :  { %v3314_v60 = vadd.f32 %v3312_v4, %v3265_v61  ;;  %v3315_v15 = vadd.f32 %v3312_v4, %v3266_v42 }
 0x44e   :  { %v3318_v43 = vadd.f32 %v3317_v2, %v3314_v60  ;;  %v3319_v0 = vadd.f32 %v3317_v2, %v3315_v15 }
 0x44f   :  { %v3341_v24 = vpop.permute.xlu1 %3340  ;;  %v3300_v37 = vpop.permute.xlu0 %3299 }
 0x450   :  { %v3322_v53 = vcombine.low %v3318_v43, %v3319_v0  ;;  %v3343_v8 = vadd.f32 %v3341_v24, %v3285_v11  ;;  %v3344_v62 = vadd.f32 %v3341_v24, %v3286_v50 }
 0x452   :  { %v3329_v16 = vrot.slane %v3322_v53, %v3328_v44  ;;  %v3347_v41 = vadd.f32 %v3346_v34, %v3343_v8  ;;  %v3348_v25 = vadd.f32 %v3346_v34, %v3344_v62 }
 0x453   :  { %v3363_v58 = vpop.permute.xlu0 %3362 }
 0x454   :  { %3333 = vst.msk [vmem:[%s5219_s15] sm:$0xf] %vm5169_vm2, %v3329_v16  ;;  %v3351_v6 = vcombine.low %v3347_v41, %v3348_v25  ;;  %v3369_v63 = vpop.permute.xlu1 %3368 }
 0x455   :  { %3503 = vst.msk [vmem:[%s5218_s14 + $0x4] sm:$0x3] %vm3307_vm11, %v3363_v58 }
 0x456   :  { %v3358_v55 = vrot.slane %v3351_v6, %v3328_v44 }
 0x458   :  { %3502 = vst.msk [vmem:[%s5219_s15 + $0x4] sm:$0xf] %vm5169_vm2, %v3358_v55  ;;  %v3298_v46 = vpop.permute.xlu1 %3297 }
 0x459   :  { %v3301_v18 = vsel %vm2496_vm13, %v3296_v35, %v3298_v46  ;;  %v3302_v51 = vsel %vm2496_vm13, %v3298_v46, %v3300_v37 }
 0x45a   :  { %v3305_v19 = vadd.f32 %v3301_v18, %v3245_v36  ;;  %v3306_v57 = vadd.f32 %v3302_v51, %v3246_v1 }
 0x45c   :  { %v3371_v45 = vadd.f32 %v3369_v63, %v3305_v19  ;;  %v3372_v26 = vadd.f32 %v3369_v63, %v3306_v57  ;;  %v3335_v28 = vpop.permute.xlu1 %3334 }
 0x45d   :  { %3500 = vst.msk [vmem:[%s5218_s14 + $0x2] sm:$0x3] %vm3307_vm11, %v3335_v28 }
 0x45e   :  { %v3375_v21 = vadd.f32 %v3374_v59, %v3371_v45  ;;  %v3376_v56 = vadd.f32 %v3374_v59, %v3372_v26 }
 0x460   :  { %v3379_v14 = vcombine.low %v3375_v21, %v3376_v56 }
 0x462   :  { %v3386_v22 = vrot.slane %v3379_v14, %v3328_v44 }
 0x464   :  { %3505 = vst.msk [vmem:[%s5219_s15 + $0x8] sm:$0xf] %vm5169_vm2, %v3386_v22 }
 0x465   :  { %3402 = vsyncpa [#allocation3], 1 }
 0x466   :  { %3403 = vsyncpa [#allocation6], 1 }
 0x467   :  { %3404 = vsyncpa [#allocation9], 1 }
 0x468   :  { %3405 = vsyncpa [#allocation12], 1 }
 0x469   :  { %3406 = vsyncpa [#allocation4], 1 }
 0x46a   :  { %3407 = vsyncpa [#allocation16], 1 }

// kernel: generator_p_wm_sum.4
= control target key start
LH: loop header
LB: loop body
LE: loop exit
PB: predicated region body
PF: predicated region fallthrough
CT: control target
= control target key end

     0   :  { %s8024_s27 = smov 0   ;;  %s8959_s0 = inlined_call_operand.vmem [shape: bf16[2,3360], index: 0, kind: input, shape index: {}]   ;;  %s8960_s1 = inlined_call_operand.vmem [shape: f32[3,2,1], index: 1, kind: input, shape index: {}]   ;;  %s8961_s2 = inlined_call_operand.vmem [shape: f32[3,2,168], index: 2, kind: input, shape index: {}]   ;;  %s8962_s3 = inlined_call_operand.vmem [shape: bf16[3,3360,168], index: 3, kind: input, shape index: {}]   ;;  %s8963_s4 = inlined_call_operand.vmem [shape: bf16[3,5,168,168], index: 4, kind: input, shape index: {}]   ;;  %s8964_s5 = inlined_call_operand.vmem [shape: bf16[3,6,168,168], index: 5, kind: input, shape index: {}]   ;;  %s8965_s6 = inlined_call_operand.vmem [shape: f32[3,6,168], index: 6, kind: input, shape index: {}]   ;;  %s8966_s7 = inlined_call_operand.vmem [shape: f32[3,6,168], index: 7, kind: input, shape index: {}]   ;;  %s8967_s8 = inlined_call_operand.vmem [shape: f32[3,2,168], index: 8, kind: output, shape index: {}]  }
   0x1 LB: > { %s6059_s28 = sadd.s32 4294967295, %s7974_s27   ;;  %p6063_p0 = scmp.ge.s32.totalorder %s7974_s27, 1  ;;  %s7974_s27 = sphi %s8024_s27, %s18_s27  }
   0x2   : > { %p321_p1 = scmp.lt.s32.totalorder %s7974_s27, 4 }
   0x4   : > { %p322_p2 = pnand %p6063_p0, %p321_p1 }
   0x5   : > { %p384_p3 = scmp.lt.s32.totalorder (!%p322_p2), %s6059_s28, 2 }
   0x6   : > { %325 = sbr.rel (%p322_p2) target bundleno = 2918 (0xb66), region = 52 }
   0xb   : > { %v862_v0 = vlaneseq  ;;  %v7976_v1 = vmov 1966171168   ;;  %s8969_s28 = smov (!%p384_p3, %s6059_s28), 2  ;;  %v8040_v5 = vld [vmem:[%s8959_s0] sm:$0xff]  ;;  %v7977_v22 = vmov 0   ;;  %vm3154_vm0 = vcmask 261120  }
   0xc   : > { %v860_v2 = vunpack.c.l.s4 %v7976_v1  ;;  %s6968_s29 = smul.u32 3360, %s8969_s28  ;;  %6982 = vset.pattern.permute.xlu0 %v7977_v22  ;;  %v858_v1 = vcombine.high %v8040_v5, %v8040_v5  ;;  %s6064_s13 = sshll.u32 %s8969_s28, 1  ;;  %vm3892_vm1 = vcmask 1043456   ;;  %vm3888_vm2 = vcmask 326656  }
   0xd   : > { %v8034_v3 = vshrl.u32 %v862_v0, 7  ;;  %s387_s16 = scalar_lea.vmem %s8960_s1, %s6064_s13  ;;  %s6970_s23 = smul.u32 1008, %s8969_s28  ;;  %vm5928_vm3 = vcmask 1041408   ;;  %vm5929_vm4 = vcmask 322562  }
   0xe   : > { %v861_v4 = vunpack.c.0.s8 %v860_v2  ;;  %s8048_s12 = scalar_lea.vmem %s8962_s3, %s6968_s29  ;;  %s6969_s29 = smul.u32 840, %s8969_s28  ;;  %vm5930_vm5 = vmor %vm5929_vm4, %vm5928_vm3 }
   0xf   : > { %v6983_v7 = vld [vmem:[%s8048_s12 + $0x74] ss:$8 sps:$4 sm:$0xff]   ;;  %v6985_v9 = vld [vmem:[%s8048_s12 + $0x70] ss:$8 sps:$4 sm:$0xff]   ;;  %v6989_v13 = vld [vmem:[%s8048_s12 + $0x64] ss:$8 sps:$4 sm:$0xff]   ;;  %s8575_s26 = scalar_lea.vmem %s8964_s5, %s6970_s23 }
  0x10   : > { %v8043_v6 = vsub.s32 %v861_v4, %v8034_v3  ;;  %3158 = vmatprep.subr.bf16.mxu0 %v6983_v7  ;;  %v6986_v10 = vld [vmem:[%s8048_s12 + $0x174] ss:$8 sps:$4 sm:$0xff]   ;;  %v6988_v11 = vld [vmem:[%s8048_s12 + $0x170] ss:$8 sps:$4 sm:$0xff]   ;;  %v6991_v14 = vld [vmem:[%s8048_s12 + $0x60] ss:$8 sps:$4 sm:$0xff]   ;;  %s8604_s10 = scalar_lea.vmem %s8963_s4, %s6969_s29 }
  0x11   : > { %3159 = vmatpush1.bf16.msra.mxu0 %v6985_v9  ;;  %3199 = vmatprep.subr.bf16.mxu1 %v6986_v10  ;;  %v6992_v15 = vld [vmem:[%s8048_s12 + $0x164] ss:$8 sps:$4 sm:$0xff]   ;;  %v6994_v17 = vld [vmem:[%s8048_s12 + $0x160] ss:$8 sps:$4 sm:$0xff]   ;;  %v6995_v18 = vld [vmem:[%s8048_s12 + $0x54] ss:$8 sps:$4 sm:$0xff]  }
  0x12   : > { %v8053_v8 = vrot.slane %v8040_v5, %v8043_v6  ;;  %3200 = vmatpush1.bf16.msra.mxu1 %v6988_v11  ;;  %3160 = vmatprep.subr.bf16.mxu0 %v6989_v13  ;;  %v6997_v20 = vld [vmem:[%s8048_s12 + $0x50] ss:$8 sps:$4 sm:$0xff]   ;;  %v6998_v21 = vld [vmem:[%s8048_s12 + $0x154] ss:$8 sps:$4 sm:$0xff]   ;;  %v7001_v23 = vld [vmem:[%s8048_s12 + $0x44] ss:$8 sps:$4 sm:$0xff]   ;;  %v8118_v10 = vrot.slane %v858_v1, %v8043_v6 }
  0x13   : > { %3201 = vmatprep.subr.bf16.mxu1 %v6992_v15  ;;  %v7000_v24 = vld [vmem:[%s8048_s12 + $0x150] ss:$8 sps:$4 sm:$0xff]   ;;  %v7004_v25 = vld [vmem:[%s8048_s12 + $0x144] ss:$8 sps:$4 sm:$0xff]   ;;  %v7003_v26 = vld [vmem:[%s8048_s12 + $0x40] ss:$8 sps:$4 sm:$0xff]  }
  0x14   : > { %v873_v12 = vcombine.high %v8053_v8, %v8053_v8  ;;  %v7007_v27 = vld [vmem:[%s8048_s12 + $0x34] ss:$8 sps:$4 sm:$0xff]   ;;  %v7006_v28 = vld [vmem:[%s8048_s12 + $0x140] ss:$8 sps:$4 sm:$0xff]   ;;  %v7009_v30 = vld [vmem:[%s8048_s12 + $0x30] ss:$8 sps:$4 sm:$0xff]  }
  0x15   : > { %3161 = vmatpush1.bf16.msra.mxu0 %v6991_v14  ;;  %v7010_v29 = vld [vmem:[%s8048_s12 + $0x134] ss:$8 sps:$4 sm:$0xff]   ;;  %v7013_v31 = vld [vmem:[%s8048_s12 + $0x24] ss:$8 sps:$4 sm:$0xff]   ;;  %v7012_v32 = vld [vmem:[%s8048_s12 + $0x130] ss:$8 sps:$4 sm:$0xff]   ;;  %v874_v14 = vcombine.high %v8118_v10, %v8118_v10 }
  0x16   : > { %v895_v16 = vrot.slane %v873_v12, %v8043_v6  ;;  %3162 = vmatprep.subr.bf16.mxu0 %v6995_v18  ;;  %3202 = vmatpush1.bf16.msra.mxu1 %v6994_v17  ;;  %v7016_v33 = vld [vmem:[%s8048_s12 + $0x124] ss:$8 sps:$4 sm:$0xff]   ;;  %v7015_v34 = vld [vmem:[%s8048_s12 + $0x20] ss:$8 sps:$4 sm:$0xff]   ;;  %v7019_v35 = vld [vmem:[%s8048_s12 + $0x14] ss:$8 sps:$4 sm:$0xff]   ;;  %v881_v17 = vrot.slane %v8053_v8, %v8043_v6 }
  0x17   : > { %3203 = vmatprep.subr.bf16.mxu1 %v6998_v21  ;;  %v7018_v36 = vld [vmem:[%s8048_s12 + $0x120] ss:$8 sps:$4 sm:$0xff]   ;;  %v7022_v37 = vld [vmem:[%s8048_s12 + $0x114] ss:$8 sps:$4 sm:$0xff]   ;;  %v7021_v38 = vld [vmem:[%s8048_s12 + $0x10] ss:$8 sps:$4 sm:$0xff]  }
  0x18   : > { %3190 = vmatprep.mubr.bf16.mxu0 %v895_v16  ;;  %v905_v19 = vcombine.high %v895_v16, %v895_v16  ;;  %v7025_v39 = vld [vmem:[%s8048_s12 + $0x4] ss:$8 sps:$4 sm:$0xff]   ;;  %v7024_v40 = vld [vmem:[%s8048_s12 + $0x110] ss:$8 sps:$4 sm:$0xff]   ;;  %v7027_v42 = vld [vmem:[%s8048_s12] ss:$8 sps:$4 sm:$0xff]  }
  0x19   : > { %3163 = vmatpush1.bf16.msra.mxu0 %v6997_v20  ;;  %v7028_v41 = vld [vmem:[%s8048_s12 + $0x104] ss:$8 sps:$4 sm:$0xff]   ;;  %v7031_v43 = vld [vmem:[%s8048_s12 + $0xf4] ss:$8 sps:$4 sm:$0xff]   ;;  %v7030_v44 = vld [vmem:[%s8048_s12 + $0x100] ss:$8 sps:$4 sm:$0xff]   ;;  %v902_v20 = vrot.slane %v874_v14, %v8043_v6 }
  0x1a   : > { %3231 = vmatprep.mubr.bf16.mxu1 %v905_v19  ;;  %3164 = vmatprep.subr.bf16.mxu0 %v7001_v23  ;;  %v7034_v45 = vld [vmem:[%s8048_s12 + $0x1f4] ss:$8 sps:$4 sm:$0xff]   ;;  %v7033_v46 = vld [vmem:[%s8048_s12 + $0xf0] ss:$8 sps:$4 sm:$0xff]   ;;  %v7037_v47 = vld [vmem:[%s8048_s12 + $0xe4] ss:$8 sps:$4 sm:$0xff]  }
  0x1b   : > { %3204 = vmatpush1.bf16.msra.mxu1 %v7000_v24  ;;  %v7036_v48 = vld [vmem:[%s8048_s12 + $0x1f0] ss:$8 sps:$4 sm:$0xff]   ;;  %v7040_v49 = vld [vmem:[%s8048_s12 + $0x1e4] ss:$8 sps:$4 sm:$0xff]   ;;  %v7039_v50 = vld [vmem:[%s8048_s12 + $0xe0] ss:$8 sps:$4 sm:$0xff]   ;;  %v903_v24 = vcombine.high %v881_v17, %v881_v17  ;;  %v906_v8 = vcombine.high %v902_v20, %v902_v20 }
  0x1c   : > { %3205 = vmatprep.subr.bf16.mxu1 %v7004_v25  ;;  %v7043_v51 = vld [vmem:[%s8048_s12 + $0xd4] ss:$8 sps:$4 sm:$0xff]   ;;  %v7042_v52 = vld [vmem:[%s8048_s12 + $0x1e0] ss:$8 sps:$4 sm:$0xff]   ;;  %v7045_v54 = vld [vmem:[%s8048_s12 + $0xd0] ss:$8 sps:$4 sm:$0xff]  }
  0x1d   : > { %3165 = vmatpush1.bf16.msra.mxu0 %v7003_v26  ;;  %v7046_v53 = vld [vmem:[%s8048_s12 + $0x1d4] ss:$8 sps:$4 sm:$0xff]   ;;  %v7049_v55 = vld [vmem:[%s8048_s12 + $0xc4] ss:$8 sps:$4 sm:$0xff]   ;;  %v7048_v56 = vld [vmem:[%s8048_s12 + $0x1d0] ss:$8 sps:$4 sm:$0xff]  }
  0x1e   : > { %3166 = vmatprep.subr.bf16.mxu0 %v7007_v27  ;;  %v7052_v57 = vld [vmem:[%s8048_s12 + $0x1c4] ss:$8 sps:$4 sm:$0xff]   ;;  %v7051_v58 = vld [vmem:[%s8048_s12 + $0xc0] ss:$8 sps:$4 sm:$0xff]   ;;  %v7055_v59 = vld [vmem:[%s8048_s12 + $0xb4] ss:$8 sps:$4 sm:$0xff]  }
  0x1f   : > { %3206 = vmatpush1.bf16.msra.mxu1 %v7006_v28  ;;  %v7054_v60 = vld [vmem:[%s8048_s12 + $0x1c0] ss:$8 sps:$4 sm:$0xff]   ;;  %v7058_v61 = vld [vmem:[%s8048_s12 + $0x1b4] ss:$8 sps:$4 sm:$0xff]   ;;  %v7057_v62 = vld [vmem:[%s8048_s12 + $0xb0] ss:$8 sps:$4 sm:$0xff]  }
  0x20   : > { %3207 = vmatprep.subr.bf16.mxu1 %v7010_v29  ;;  %v7061_v63 = vld [vmem:[%s8048_s12 + $0xa4] ss:$8 sps:$4 sm:$0xff]   ;;  %v7060_v0 = vld [vmem:[%s8048_s12 + $0x1b0] ss:$8 sps:$4 sm:$0xff]   ;;  %v7063_v4 = vld [vmem:[%s8048_s12 + $0xa0] ss:$8 sps:$4 sm:$0xff]  }
  0x21   : > { %3167 = vmatpush1.bf16.msra.mxu0 %v7009_v30  ;;  %v7064_v2 = vld [vmem:[%s8048_s12 + $0x1a4] ss:$8 sps:$4 sm:$0xff]   ;;  %v7067_v7 = vld [vmem:[%s8048_s12 + $0x94] ss:$8 sps:$4 sm:$0xff]   ;;  %v7066_v9 = vld [vmem:[%s8048_s12 + $0x1a0] ss:$8 sps:$4 sm:$0xff]  }
  0x22   : > { %3168 = vmatprep.subr.bf16.mxu0 %v7013_v31  ;;  %v7070_v11 = vld [vmem:[%s8048_s12 + $0x194] ss:$8 sps:$4 sm:$0xff]   ;;  %v7069_v5 = vld [vmem:[%s8048_s12 + $0x90] ss:$8 sps:$4 sm:$0xff]   ;;  %v7073_v12 = vld [vmem:[%s8048_s12 + $0x84] ss:$8 sps:$4 sm:$0xff]  }
  0x23   : > { %3208 = vmatpush1.bf16.msra.mxu1 %v7012_v32  ;;  %v7072_v13 = vld [vmem:[%s8048_s12 + $0x190] ss:$8 sps:$4 sm:$0xff]   ;;  %v7076_v15 = vld [vmem:[%s8048_s12 + $0x184] ss:$8 sps:$4 sm:$0xff]   ;;  %v7075_v16 = vld [vmem:[%s8048_s12 + $0x80] ss:$8 sps:$4 sm:$0xff]  }
  0x24   : > { %3209 = vmatprep.subr.bf16.mxu1 %v7016_v33  ;;  %v7082_v18 = vld [vmem:[%s8048_s12 + $0x274] ss:$8 sps:$4 sm:$0xff]   ;;  %v7079_v19 = vld [vmem:[%s8048_s12 + $0x180] ss:$8 sps:$4 sm:$0xff]   ;;  %v7080_v23 = vld [vmem:[%s8048_s12 + $0x270] ss:$8 sps:$4 sm:$0xff]  }
  0x25   : > { %3169 = vmatpush1.bf16.msra.mxu0 %v7015_v34  ;;  %v7085_v21 = vld [vmem:[%s8048_s12 + $0x374] ss:$8 sps:$4 sm:$0xff]   ;;  %v7088_v25 = vld [vmem:[%s8048_s12 + $0x264] ss:$8 sps:$4 sm:$0xff]   ;;  %v7083_v26 = vld [vmem:[%s8048_s12 + $0x370] ss:$8 sps:$4 sm:$0xff]  }
  0x26   : > { %3170 = vmatprep.subr.bf16.mxu0 %v7019_v35  ;;  %v7091_v27 = vld [vmem:[%s8048_s12 + $0x364] ss:$8 sps:$4 sm:$0xff]   ;;  %v7086_v28 = vld [vmem:[%s8048_s12 + $0x260] ss:$8 sps:$4 sm:$0xff]   ;;  %v7094_v29 = vld [vmem:[%s8048_s12 + $0x254] ss:$8 sps:$4 sm:$0xff]  }
  0x27   : > { %3210 = vmatpush1.bf16.msra.mxu1 %v7018_v36  ;;  %v7089_v30 = vld [vmem:[%s8048_s12 + $0x360] ss:$8 sps:$4 sm:$0xff]   ;;  %v7097_v31 = vld [vmem:[%s8048_s12 + $0x354] ss:$8 sps:$4 sm:$0xff]   ;;  %v7092_v32 = vld [vmem:[%s8048_s12 + $0x250] ss:$8 sps:$4 sm:$0xff]  }
  0x28   : > { %3211 = vmatprep.subr.bf16.mxu1 %v7022_v37  ;;  %v7100_v33 = vld [vmem:[%s8048_s12 + $0x244] ss:$8 sps:$4 sm:$0xff]   ;;  %v7095_v34 = vld [vmem:[%s8048_s12 + $0x350] ss:$8 sps:$4 sm:$0xff]   ;;  %v7098_v36 = vld [vmem:[%s8048_s12 + $0x240] ss:$8 sps:$4 sm:$0xff]  }
  0x29   : > { %3171 = vmatpush1.bf16.msra.mxu0 %v7021_v38  ;;  %v7103_v35 = vld [vmem:[%s8048_s12 + $0x344] ss:$8 sps:$4 sm:$0xff]   ;;  %v7106_v37 = vld [vmem:[%s8048_s12 + $0x234] ss:$8 sps:$4 sm:$0xff]   ;;  %v7101_v38 = vld [vmem:[%s8048_s12 + $0x340] ss:$8 sps:$4 sm:$0xff]  }
  0x2a   : > { %3172 = vmatprep.subr.bf16.mxu0 %v7025_v39  ;;  %v7109_v39 = vld [vmem:[%s8048_s12 + $0x334] ss:$8 sps:$4 sm:$0xff]   ;;  %v7140_v1 = vld [vmem:[%s8048_s12 + $0x2d0] ss:$8 sps:$4 sm:$0xff]   ;;  %v7160_v14 = vld [vmem:[%s8048_s12 + $0x2a4] ss:$8 sps:$4 sm:$0xff]  }
  0x2b   : > { %3212 = vmatpush1.bf16.msra.mxu1 %v7024_v40  ;;  %v7104_v40 = vld [vmem:[%s8048_s12 + $0x230] ss:$8 sps:$4 sm:$0xff]   ;;  %s6965_s11 = sshll.u32 %s8969_s28, 4  ;;  %s6964_s18 = sshll.u32 %s8969_s28, 2 }
  0x2c   : > { %3213 = vmatprep.subr.bf16.mxu1 %v7028_v41  ;;  %v7112_v41 = vld [vmem:[%s8048_s12 + $0x224] ss:$8 sps:$4 sm:$0xff]   ;;  %s8613_s14 = scalar_lea.vmem %s8965_s6, %s6965_s11  ;;  %s8671_s17 = scalar_lea.vmem %s8966_s7, %s6965_s11 }
  0x2d   : > { %3173 = vmatpush1.bf16.msra.mxu0 %v7027_v42  ;;  %v7107_v42 = vld [vmem:[%s8048_s12 + $0x330] ss:$8 sps:$4 sm:$0xff]   ;;  %s392_s21 = scalar_lea.vmem %s8961_s2, %s6964_s18  ;;  %s422_s24 = scalar_lea.vmem %s8967_s8, %s6964_s18 }
  0x2e   : > { %3174 = vmatprep.subr.bf16.mxu0 %v7031_v43  ;;  %v7115_v43 = vld [vmem:[%s8048_s12 + $0x324] ss:$8 sps:$4 sm:$0xff]  }
  0x2f   : > { %3214 = vmatpush1.bf16.msra.mxu1 %v7030_v44  ;;  %v7110_v44 = vld [vmem:[%s8048_s12 + $0x220] ss:$8 sps:$4 sm:$0xff]  }
  0x30   : > { %3215 = vmatprep.subr.bf16.mxu1 %v7034_v45  ;;  %v7118_v45 = vld [vmem:[%s8048_s12 + $0x214] ss:$8 sps:$4 sm:$0xff]  }
  0x31   : > { %3175 = vmatpush2.bf16.msra.mxu0 %v7033_v46  ;;  %v7113_v46 = vld [vmem:[%s8048_s12 + $0x320] ss:$8 sps:$4 sm:$0xff]  }
  0x32   : > { %3176 = vmatprep.subr.bf16.mxu0 %v7037_v47  ;;  %v7121_v47 = vld [vmem:[%s8048_s12 + $0x314] ss:$8 sps:$4 sm:$0xff]  }
  0x33   : > { %3216 = vmatpush2.bf16.msra.mxu1 %v7036_v48  ;;  %v7116_v48 = vld [vmem:[%s8048_s12 + $0x210] ss:$8 sps:$4 sm:$0xff]  }
  0x34   : > { %3217 = vmatprep.subr.bf16.mxu1 %v7040_v49  ;;  %v7124_v49 = vld [vmem:[%s8048_s12 + $0x204] ss:$8 sps:$4 sm:$0xff]  }
  0x35   : > { %3177 = vmatpush2.bf16.msra.mxu0 %v7039_v50  ;;  %v7119_v50 = vld [vmem:[%s8048_s12 + $0x310] ss:$8 sps:$4 sm:$0xff]  }
  0x36   : > { %3178 = vmatprep.subr.bf16.mxu0 %v7043_v51  ;;  %v7127_v51 = vld [vmem:[%s8048_s12 + $0x304] ss:$8 sps:$4 sm:$0xff]  }
  0x37   : > { %3218 = vmatpush2.bf16.msra.mxu1 %v7042_v52  ;;  %v848_v52 = vld [vmem:[%s387_s16] sm:$0x3] }
  0x38   : > { %3219 = vmatprep.subr.bf16.mxu1 %v7046_v53  ;;  %v7122_v53 = vld [vmem:[%s8048_s12 + $0x200] ss:$8 sps:$4 sm:$0xff]   ;;  %851 = vperm.xlu0 %6982, %v848_v52   ;;  %v7208_v52 = vld [vmem:[%s8048_s12 + $0x424] ss:$8 sps:$4 sm:$0xff]  }
  0x39   : > { %3179 = vmatpush2.bf16.msra.mxu0 %v7045_v54  ;;  %v7130_v54 = vld [vmem:[%s8048_s12 + $0x2f4] ss:$8 sps:$4 sm:$0xff]  }
  0x3a   : > { %3180 = vmatprep.subr.bf16.mxu0 %v7049_v55  ;;  %v7125_v55 = vld [vmem:[%s8048_s12 + $0x300] ss:$8 sps:$4 sm:$0xff]  }
  0x3b   : > { %3220 = vmatpush2.bf16.msra.mxu1 %v7048_v56  ;;  %v7133_v56 = vld [vmem:[%s8048_s12 + $0x3f4] ss:$8 sps:$4 sm:$0xff]  }
  0x3c   : > { %3221 = vmatprep.subr.bf16.mxu1 %v7052_v57  ;;  %v7128_v57 = vld [vmem:[%s8048_s12 + $0x2f0] ss:$8 sps:$4 sm:$0xff]  }
  0x3d   : > { %3181 = vmatpush2.bf16.msra.mxu0 %v7051_v58  ;;  %v7136_v58 = vld [vmem:[%s8048_s12 + $0x2e4] ss:$8 sps:$4 sm:$0xff]  }
  0x3e   : > { %3182 = vmatprep.subr.bf16.mxu0 %v7055_v59  ;;  %v7131_v59 = vld [vmem:[%s8048_s12 + $0x3f0] ss:$8 sps:$4 sm:$0xff]  }
  0x3f   : > { %3222 = vmatpush2.bf16.msra.mxu1 %v7054_v60  ;;  %v7139_v60 = vld [vmem:[%s8048_s12 + $0x3e4] ss:$8 sps:$4 sm:$0xff]  }
  0x40   : > { %3223 = vmatprep.subr.bf16.mxu1 %v7058_v61  ;;  %v7134_v61 = vld [vmem:[%s8048_s12 + $0x2e0] ss:$8 sps:$4 sm:$0xff]  }
  0x41   : > { %3183 = vmatpush2.bf16.msra.mxu0 %v7057_v62  ;;  %v7142_v62 = vld [vmem:[%s8048_s12 + $0x2d4] ss:$8 sps:$4 sm:$0xff]  }
  0x42   : > { %3184 = vmatprep.subr.bf16.mxu0 %v7061_v63  ;;  %v7137_v63 = vld [vmem:[%s8048_s12 + $0x3e0] ss:$8 sps:$4 sm:$0xff]  }
  0x43   : > { %3224 = vmatpush2.bf16.msra.mxu1 %v7060_v0  ;;  %v7145_v0 = vld [vmem:[%s8048_s12 + $0x3d4] ss:$8 sps:$4 sm:$0xff]  }
  0x44   : > { %3225 = vmatprep.subr.bf16.mxu1 %v7064_v2  ;;  %v7148_v2 = vld [vmem:[%s8048_s12 + $0x2c4] ss:$8 sps:$4 sm:$0xff]  }
  0x45   : > { %3185 = vmatpush2.bf16.msra.mxu0 %v7063_v4  ;;  %v7143_v4 = vld [vmem:[%s8048_s12 + $0x3d0] ss:$8 sps:$4 sm:$0xff]  }
  0x46   : > { %3186 = vmatprep.subr.bf16.mxu0 %v7067_v7  ;;  %v7151_v7 = vld [vmem:[%s8048_s12 + $0x3c4] ss:$8 sps:$4 sm:$0xff]  }
  0x47   : > { %3226 = vmatpush2.bf16.msra.mxu1 %v7066_v9  ;;  %v7146_v9 = vld [vmem:[%s8048_s12 + $0x2c0] ss:$8 sps:$4 sm:$0xff]  }
  0x48   : > { %3227 = vmatprep.subr.bf16.mxu1 %v7070_v11  ;;  %v7154_v11 = vld [vmem:[%s8048_s12 + $0x2b4] ss:$8 sps:$4 sm:$0xff]  }
  0x49   : > { %3187 = vmatpush2.bf16.msra.mxu0 %v7069_v5  ;;  %v7149_v5 = vld [vmem:[%s8048_s12 + $0x3c0] ss:$8 sps:$4 sm:$0xff]  }
  0x4a   : > { %3188 = vmatprep.subr.bf16.mxu0 %v7073_v12  ;;  %v7157_v12 = vld [vmem:[%s8048_s12 + $0x3b4] ss:$8 sps:$4 sm:$0xff]  }
  0x4b   : > { %3228 = vmatpush2.bf16.msra.mxu1 %v7072_v13  ;;  %v7152_v13 = vld [vmem:[%s8048_s12 + $0x2b0] ss:$8 sps:$4 sm:$0xff]  }
  0x4c   : > { %3229 = vmatprep.subr.bf16.mxu1 %v7076_v15  ;;  %v7155_v15 = vld [vmem:[%s8048_s12 + $0x3b0] ss:$8 sps:$4 sm:$0xff]  }
  0x4d   : > { %3189 = vmatpush2.bf16.msra.mxu0 %v7075_v16  ;;  %v7163_v16 = vld [vmem:[%s8048_s12 + $0x3a4] ss:$8 sps:$4 sm:$0xff]  }
  0x4e   : > { %3240 = vmatprep.subr.bf16.mxu0 %v7082_v18  ;;  %v7166_v18 = vld [vmem:[%s8048_s12 + $0x294] ss:$8 sps:$4 sm:$0xff]  }
  0x4f   : > { %3230 = vmatpush2.bf16.msra.mxu1 %v7079_v19  ;;  %v7161_v19 = vld [vmem:[%s8048_s12 + $0x3a0] ss:$8 sps:$4 sm:$0xff]  }
  0x50   : > { %3191 = vmatmul.mubr.bf16.vlgmr.msra.gmra.mxu0 %v881_v17  ;;  %3281 = vmatprep.subr.bf16.mxu1 %v7085_v21  ;;  %v7158_v17 = vld [vmem:[%s8048_s12 + $0x2a0] ss:$8 sps:$4 sm:$0xff]   ;;  %v7164_v21 = vld [vmem:[%s8048_s12 + $0x290] ss:$8 sps:$4 sm:$0xff]  }
  0x51   : > { %3241 = vmatpush1.bf16.msra.mxu0 %v7080_v23  ;;  %3272 = vmatprep.mubr.bf16.mxu0 %v902_v20  ;;  %v7169_v20 = vld [vmem:[%s8048_s12 + $0x394] ss:$8 sps:$4 sm:$0xff]   ;;  %v7172_v23 = vld [vmem:[%s8048_s12 + $0x284] ss:$8 sps:$4 sm:$0xff]  }
  0x52   : > { %3232 = vmatmul.mubr.bf16.vlgmr.msra.gmra.mxu1 %v903_v24  ;;  %3242 = vmatprep.subr.bf16.mxu0 %v7088_v25  ;;  %v7167_v24 = vld [vmem:[%s8048_s12 + $0x390] ss:$8 sps:$4 sm:$0xff]   ;;  %v7175_v25 = vld [vmem:[%s8048_s12 + $0x384] ss:$8 sps:$4 sm:$0xff]  }
  0x53   : > { %3282 = vmatpush1.bf16.msra.mxu1 %v7083_v26  ;;  %3313 = vmatprep.mubr.bf16.mxu1 %v906_v8  ;;  %v7170_v26 = vld [vmem:[%s8048_s12 + $0x280] ss:$8 sps:$4 sm:$0xff]   ;;  %v888_v8 = vrot.slane %v8118_v10, %v8043_v6  ;;  %v7179_v10 = vld [vmem:[%s8048_s12 + $0x570] ss:$8 sps:$4 sm:$0xff]  }
  0x54   : > { %3283 = vmatprep.subr.bf16.mxu1 %v7091_v27  ;;  %v7178_v27 = vld [vmem:[%s8048_s12 + $0x474] ss:$8 sps:$4 sm:$0xff]  }
  0x55   : > { %3243 = vmatpush1.bf16.msra.mxu0 %v7086_v28  ;;  %v7173_v28 = vld [vmem:[%s8048_s12 + $0x380] ss:$8 sps:$4 sm:$0xff]  }
  0x56   : > { %3244 = vmatprep.subr.bf16.mxu0 %v7094_v29  ;;  %v7181_v29 = vld [vmem:[%s8048_s12 + $0x574] ss:$8 sps:$4 sm:$0xff]  }
  0x57   : > { %3284 = vmatpush1.bf16.msra.mxu1 %v7089_v30  ;;  %v7176_v30 = vld [vmem:[%s8048_s12 + $0x470] ss:$8 sps:$4 sm:$0xff]  }
  0x58   : > { %3285 = vmatprep.subr.bf16.mxu1 %v7097_v31  ;;  %v904_v31 = vcombine.high %v888_v8, %v888_v8 }
  0x59   : > { %3245 = vmatpush1.bf16.msra.mxu0 %v7092_v32  ;;  %v7184_v32 = vld [vmem:[%s8048_s12 + $0x464] ss:$8 sps:$4 sm:$0xff]  }
  0x5a   : > { %3246 = vmatprep.subr.bf16.mxu0 %v7100_v33  ;;  %v8209_v33 = vld [vmem:[%s8959_s0 + $0x8] sm:$0xff] }
  0x5b   : > { %3286 = vmatpush1.bf16.msra.mxu1 %v7095_v34  ;;  %v8214_v34 = vrot.slane %v8209_v33, %v8043_v6 }
  0x5c   : > { %3287 = vmatprep.subr.bf16.mxu1 %v7103_v35  ;;  %v7187_v35 = vld [vmem:[%s8048_s12 + $0x564] ss:$8 sps:$4 sm:$0xff]  }
  0x5d   : > { %3247 = vmatpush1.bf16.msra.mxu0 %v7098_v36  ;;  %v7182_v36 = vld [vmem:[%s8048_s12 + $0x460] ss:$8 sps:$4 sm:$0xff]  }
  0x5e   : > { %3248 = vmatprep.subr.bf16.mxu0 %v7106_v37  ;;  %v922_v37 = vcombine.high %v8214_v34, %v8214_v34 }
  0x5f   : > { %3288 = vmatpush1.bf16.msra.mxu1 %v7101_v38  ;;  %v7190_v38 = vld [vmem:[%s8048_s12 + $0x454] ss:$8 sps:$4 sm:$0xff]  }
  0x60   : > { %3289 = vmatprep.subr.bf16.mxu1 %v7109_v39  ;;  %v7185_v39 = vld [vmem:[%s8048_s12 + $0x560] ss:$8 sps:$4 sm:$0xff]  }
  0x61   : > { %3249 = vmatpush1.bf16.msra.mxu0 %v7104_v40  ;;  %v944_v40 = vrot.slane %v922_v37, %v8043_v6  ;;  %v7271_v37 = vld [vmem:[%s8048_s12 + $0x584] ss:$8 sps:$4 sm:$0xff]  }
  0x62   : > { %3250 = vmatprep.subr.bf16.mxu0 %v7112_v41  ;;  %v7193_v41 = vld [vmem:[%s8048_s12 + $0x554] ss:$8 sps:$4 sm:$0xff]  }
  0x63   : > { %3290 = vmatpush1.bf16.msra.mxu1 %v7107_v42  ;;  %v7188_v42 = vld [vmem:[%s8048_s12 + $0x450] ss:$8 sps:$4 sm:$0xff]  }
  0x64   : > { %3291 = vmatprep.subr.bf16.mxu1 %v7115_v43  ;;  %v954_v43 = vcombine.high %v944_v40, %v944_v40 }
  0x65   : > { %3251 = vmatpush1.bf16.msra.mxu0 %v7110_v44  ;;  %v7196_v44 = vld [vmem:[%s8048_s12 + $0x444] ss:$8 sps:$4 sm:$0xff]  }
  0x66   : > { %3252 = vmatprep.subr.bf16.mxu0 %v7118_v45  ;;  %v7191_v45 = vld [vmem:[%s8048_s12 + $0x550] ss:$8 sps:$4 sm:$0xff]  }
  0x67   : > { %3292 = vmatpush1.bf16.msra.mxu1 %v7113_v46  ;;  %v7199_v46 = vld [vmem:[%s8048_s12 + $0x544] ss:$8 sps:$4 sm:$0xff]  }
  0x68   : > { %3293 = vmatprep.subr.bf16.mxu1 %v7121_v47  ;;  %v7194_v47 = vld [vmem:[%s8048_s12 + $0x440] ss:$8 sps:$4 sm:$0xff]  }
  0x69   : > { %3253 = vmatpush1.bf16.msra.mxu0 %v7116_v48  ;;  %v7202_v48 = vld [vmem:[%s8048_s12 + $0x434] ss:$8 sps:$4 sm:$0xff]  }
  0x6a   : > { %3254 = vmatprep.subr.bf16.mxu0 %v7124_v49  ;;  %v7197_v49 = vld [vmem:[%s8048_s12 + $0x540] ss:$8 sps:$4 sm:$0xff]  }
  0x6b   : > { %3294 = vmatpush1.bf16.msra.mxu1 %v7119_v50  ;;  %v7205_v50 = vld [vmem:[%s8048_s12 + $0x534] ss:$8 sps:$4 sm:$0xff]  }
  0x6c   : > { %3295 = vmatprep.subr.bf16.mxu1 %v7127_v51  ;;  %v7200_v51 = vld [vmem:[%s8048_s12 + $0x430] ss:$8 sps:$4 sm:$0xff]  }
  0x6d   : > { %3255 = vmatpush1.bf16.msra.mxu0 %v7122_v53  ;;  %v7203_v53 = vld [vmem:[%s8048_s12 + $0x530] ss:$8 sps:$4 sm:$0xff]  }
  0x6e   : > { %3256 = vmatprep.subr.bf16.mxu0 %v7130_v54  ;;  %v7211_v54 = vld [vmem:[%s8048_s12 + $0x524] ss:$8 sps:$4 sm:$0xff]  }
  0x6f   : > { %3296 = vmatpush1.bf16.msra.mxu1 %v7125_v55  ;;  %v7206_v55 = vld [vmem:[%s8048_s12 + $0x420] ss:$8 sps:$4 sm:$0xff]  }
  0x70   : > { %3297 = vmatprep.subr.bf16.mxu1 %v7133_v56  ;;  %v7214_v56 = vld [vmem:[%s8048_s12 + $0x414] ss:$8 sps:$4 sm:$0xff]  }
  0x71   : > { %3257 = vmatpush2.bf16.msra.mxu0 %v7128_v57  ;;  %v7209_v57 = vld [vmem:[%s8048_s12 + $0x520] ss:$8 sps:$4 sm:$0xff]  }
  0x72   : > { %3258 = vmatprep.subr.bf16.mxu0 %v7136_v58  ;;  %v7217_v58 = vld [vmem:[%s8048_s12 + $0x514] ss:$8 sps:$4 sm:$0xff]  }
  0x73   : > { %3298 = vmatpush2.bf16.msra.mxu1 %v7131_v59  ;;  %v7212_v59 = vld [vmem:[%s8048_s12 + $0x410] ss:$8 sps:$4 sm:$0xff]  }
  0x74   : > { %3299 = vmatprep.subr.bf16.mxu1 %v7139_v60  ;;  %v7220_v60 = vld [vmem:[%s8048_s12 + $0x404] ss:$8 sps:$4 sm:$0xff]  }
  0x75   : > { %3259 = vmatpush2.bf16.msra.mxu0 %v7134_v61  ;;  %v7215_v61 = vld [vmem:[%s8048_s12 + $0x510] ss:$8 sps:$4 sm:$0xff]  }
  0x76   : > { %3260 = vmatprep.subr.bf16.mxu0 %v7142_v62  ;;  %v7223_v62 = vld [vmem:[%s8048_s12 + $0x504] ss:$8 sps:$4 sm:$0xff]  }
  0x77   : > { %3300 = vmatpush2.bf16.msra.mxu1 %v7137_v63  ;;  %v7218_v63 = vld [vmem:[%s8048_s12 + $0x400] ss:$8 sps:$4 sm:$0xff]  }
  0x78   : > { %3301 = vmatprep.subr.bf16.mxu1 %v7145_v0  ;;  %v7226_v0 = vld [vmem:[%s8048_s12 + $0x4f4] ss:$8 sps:$4 sm:$0xff]  }
  0x79   : > { %3261 = vmatpush2.bf16.msra.mxu0 %v7140_v1  ;;  %v7221_v1 = vld [vmem:[%s8048_s12 + $0x500] ss:$8 sps:$4 sm:$0xff]  }
  0x7a   : > { %3262 = vmatprep.subr.bf16.mxu0 %v7148_v2  ;;  %v7229_v2 = vld [vmem:[%s8048_s12 + $0x5f4] ss:$8 sps:$4 sm:$0xff]  }
  0x7b   : > { %3302 = vmatpush2.bf16.msra.mxu1 %v7143_v4  ;;  %v7224_v4 = vld [vmem:[%s8048_s12 + $0x4f0] ss:$8 sps:$4 sm:$0xff]  }
  0x7c   : > { %3303 = vmatprep.subr.bf16.mxu1 %v7151_v7  ;;  %v7232_v7 = vld [vmem:[%s8048_s12 + $0x4e4] ss:$8 sps:$4 sm:$0xff]  }
  0x7d   : > { %3263 = vmatpush2.bf16.msra.mxu0 %v7146_v9  ;;  %v7227_v9 = vld [vmem:[%s8048_s12 + $0x5f0] ss:$8 sps:$4 sm:$0xff]  }
  0x7e   : > { %3264 = vmatprep.subr.bf16.mxu0 %v7154_v11  ;;  %v7235_v11 = vld [vmem:[%s8048_s12 + $0x5e4] ss:$8 sps:$4 sm:$0xff]  }
  0x7f   : > { %3304 = vmatpush2.bf16.msra.mxu1 %v7149_v5  ;;  %v7230_v5 = vld [vmem:[%s8048_s12 + $0x4e0] ss:$8 sps:$4 sm:$0xff]  }
  0x80   : > { %3305 = vmatprep.subr.bf16.mxu1 %v7157_v12  ;;  %v7238_v12 = vld [vmem:[%s8048_s12 + $0x4d4] ss:$8 sps:$4 sm:$0xff]  }
  0x81   : > { %3265 = vmatpush2.bf16.msra.mxu0 %v7152_v13  ;;  %v7233_v13 = vld [vmem:[%s8048_s12 + $0x5e0] ss:$8 sps:$4 sm:$0xff]  }
  0x82   : > { %3266 = vmatprep.subr.bf16.mxu0 %v7160_v14  ;;  %v7241_v14 = vld [vmem:[%s8048_s12 + $0x5d4] ss:$8 sps:$4 sm:$0xff]  }
  0x83   : > { %3306 = vmatpush2.bf16.msra.mxu1 %v7155_v15  ;;  %v7236_v15 = vld [vmem:[%s8048_s12 + $0x4d0] ss:$8 sps:$4 sm:$0xff]  }
  0x84   : > { %3307 = vmatprep.subr.bf16.mxu1 %v7163_v16  ;;  %v7244_v16 = vld [vmem:[%s8048_s12 + $0x4c4] ss:$8 sps:$4 sm:$0xff]  }
  0x85   : > { %3267 = vmatpush2.bf16.msra.mxu0 %v7158_v17  ;;  %v7239_v17 = vld [vmem:[%s8048_s12 + $0x5d0] ss:$8 sps:$4 sm:$0xff]  }
  0x86   : > { %3268 = vmatprep.subr.bf16.mxu0 %v7166_v18  ;;  %v7247_v18 = vld [vmem:[%s8048_s12 + $0x5c4] ss:$8 sps:$4 sm:$0xff]  }
  0x87   : > { %3308 = vmatpush2.bf16.msra.mxu1 %v7161_v19  ;;  %v7242_v19 = vld [vmem:[%s8048_s12 + $0x4c0] ss:$8 sps:$4 sm:$0xff]  }
  0x88   : > { %3309 = vmatprep.subr.bf16.mxu1 %v7169_v20  ;;  %v7250_v20 = vld [vmem:[%s8048_s12 + $0x4b4] ss:$8 sps:$4 sm:$0xff]  }
  0x89   : > { %3269 = vmatpush2.bf16.msra.mxu0 %v7164_v21  ;;  %v7245_v21 = vld [vmem:[%s8048_s12 + $0x5c0] ss:$8 sps:$4 sm:$0xff]  }
  0x8a   : > { %3270 = vmatprep.subr.bf16.mxu0 %v7172_v23  ;;  %v7253_v23 = vld [vmem:[%s8048_s12 + $0x5b4] ss:$8 sps:$4 sm:$0xff]  }
  0x8b   : > { %3310 = vmatpush2.bf16.msra.mxu1 %v7167_v24  ;;  %v7248_v24 = vld [vmem:[%s8048_s12 + $0x4b0] ss:$8 sps:$4 sm:$0xff]  }
  0x8c   : > { %3311 = vmatprep.subr.bf16.mxu1 %v7175_v25  ;;  %v7256_v25 = vld [vmem:[%s8048_s12 + $0x4a4] ss:$8 sps:$4 sm:$0xff]  }
  0x8d   : > { %3271 = vmatpush2.bf16.msra.mxu0 %v7170_v26  ;;  %v7251_v26 = vld [vmem:[%s8048_s12 + $0x5b0] ss:$8 sps:$4 sm:$0xff]  }
  0x8e   : > { %3322 = vmatprep.subr.bf16.mxu0 %v7178_v27  ;;  %v7259_v27 = vld [vmem:[%s8048_s12 + $0x5a4] ss:$8 sps:$4 sm:$0xff]  }
  0x8f   : > { %3312 = vmatpush2.bf16.msra.mxu1 %v7173_v28  ;;  %v7254_v28 = vld [vmem:[%s8048_s12 + $0x4a0] ss:$8 sps:$4 sm:$0xff]  }
  0x90   : > { %3273 = vmatmul.mubr.bf16.vlgmr.msra.gmra.mxu0 %v888_v8  ;;  %3363 = vmatprep.subr.bf16.mxu1 %v7181_v29  ;;  %v907_v8 = vcombine.high %v8209_v33, %v8209_v33  ;;  %v7262_v29 = vld [vmem:[%s8048_s12 + $0x494] ss:$8 sps:$4 sm:$0xff]   ;;  %v7260_v33 = vld [vmem:[%s8048_s12 + $0x490] ss:$8 sps:$4 sm:$0xff]  }
  0x91   : > { %3323 = vmatpush1.bf16.msra.mxu0 %v7176_v30  ;;  %3354 = vmatprep.mubr.bf16.mxu0 %v944_v40  ;;  %v7257_v30 = vld [vmem:[%s8048_s12 + $0x5a0] ss:$8 sps:$4 sm:$0xff]   ;;  %v7274_v40 = vld [vmem:[%s8048_s12 + $0x674] ss:$8 sps:$4 sm:$0xff]  }
  0x92   : > { %3314 = vmatmul.mubr.bf16.vlgmr.msra.gmra.mxu1 %v904_v31  ;;  %3324 = vmatprep.subr.bf16.mxu0 %v7184_v32  ;;  %v8274_v31 = vrot.slane %v907_v8, %v8043_v6  ;;  %v7265_v32 = vld [vmem:[%s8048_s12 + $0x594] ss:$8 sps:$4 sm:$0xff]   ;;  %v7340_v8 = vld [vmem:[%s8048_s12 + $0x6c4] ss:$8 sps:$4 sm:$0xff]  }
  0x93   : > { %3364 = vmatpush1.bf16.msra.mxu1 %v7179_v10  ;;  %3395 = vmatprep.mubr.bf16.mxu1 %v954_v43  ;;  %v7268_v10 = vld [vmem:[%s8048_s12 + $0x484] ss:$8 sps:$4 sm:$0xff]   ;;  %v7277_v43 = vld [vmem:[%s8048_s12 + $0x774] ss:$8 sps:$4 sm:$0xff]  }
  0x94   : > { %3365 = vmatprep.subr.bf16.mxu1 %v7187_v35  ;;  %v7263_v35 = vld [vmem:[%s8048_s12 + $0x590] ss:$8 sps:$4 sm:$0xff]  }
  0x95   : > { %3325 = vmatpush1.bf16.msra.mxu0 %v7182_v36  ;;  %v923_v36 = vcombine.high %v8274_v31, %v8274_v31 }
  0x96   : > { %3326 = vmatprep.subr.bf16.mxu0 %v7190_v38  ;;  %v7266_v38 = vld [vmem:[%s8048_s12 + $0x480] ss:$8 sps:$4 sm:$0xff]  }
  0x97   : > { %3366 = vmatpush1.bf16.msra.mxu1 %v7185_v39  ;;  %v930_v39 = vrot.slane %v8214_v34, %v8043_v6 }
  0x98   : > { %3367 = vmatprep.subr.bf16.mxu1 %v7193_v41  ;;  %v7269_v41 = vld [vmem:[%s8048_s12 + $0x580] ss:$8 sps:$4 sm:$0xff]  }
  0x99   : > { %3327 = vmatpush1.bf16.msra.mxu0 %v7188_v42  ;;  %v951_v42 = vrot.slane %v923_v36, %v8043_v6  ;;  %v7352_v36 = vld [vmem:[%s8048_s12 + $0x6a4] ss:$8 sps:$4 sm:$0xff]  }
  0x9a   : > { %3328 = vmatprep.subr.bf16.mxu0 %v7196_v44  ;;  %v7272_v44 = vld [vmem:[%s8048_s12 + $0x670] ss:$8 sps:$4 sm:$0xff]  }
  0x9b   : > { %3368 = vmatpush1.bf16.msra.mxu1 %v7191_v45  ;;  %v952_v45 = vcombine.high %v930_v39, %v930_v39  ;;  %v955_v34 = vcombine.high %v951_v42, %v951_v42 }
  0x9c   : > { %3369 = vmatprep.subr.bf16.mxu1 %v7199_v46  ;;  %v7280_v46 = vld [vmem:[%s8048_s12 + $0x664] ss:$8 sps:$4 sm:$0xff]  }
  0x9d   : > { %3329 = vmatpush1.bf16.msra.mxu0 %v7194_v47  ;;  %v7275_v47 = vld [vmem:[%s8048_s12 + $0x770] ss:$8 sps:$4 sm:$0xff]  }
  0x9e   : > { %3330 = vmatprep.subr.bf16.mxu0 %v7202_v48  ;;  %v7283_v48 = vld [vmem:[%s8048_s12 + $0x764] ss:$8 sps:$4 sm:$0xff]  }
  0x9f   : > { %3370 = vmatpush1.bf16.msra.mxu1 %v7197_v49  ;;  %v7278_v49 = vld [vmem:[%s8048_s12 + $0x660] ss:$8 sps:$4 sm:$0xff]  }
  0xa0   : > { %3371 = vmatprep.subr.bf16.mxu1 %v7205_v50  ;;  %v7286_v50 = vld [vmem:[%s8048_s12 + $0x654] ss:$8 sps:$4 sm:$0xff]  }
  0xa1   : > { %3331 = vmatpush1.bf16.msra.mxu0 %v7200_v51  ;;  %v7281_v51 = vld [vmem:[%s8048_s12 + $0x760] ss:$8 sps:$4 sm:$0xff]  }
  0xa2   : > { %3332 = vmatprep.subr.bf16.mxu0 %v7208_v52  ;;  %v7289_v52 = vld [vmem:[%s8048_s12 + $0x754] ss:$8 sps:$4 sm:$0xff]  }
  0xa3   : > { %3372 = vmatpush1.bf16.msra.mxu1 %v7203_v53  ;;  %v7284_v53 = vld [vmem:[%s8048_s12 + $0x650] ss:$8 sps:$4 sm:$0xff]  }
  0xa4   : > { %3373 = vmatprep.subr.bf16.mxu1 %v7211_v54  ;;  %v7292_v54 = vld [vmem:[%s8048_s12 + $0x644] ss:$8 sps:$4 sm:$0xff]  }
  0xa5   : > { %3333 = vmatpush1.bf16.msra.mxu0 %v7206_v55  ;;  %v7287_v55 = vld [vmem:[%s8048_s12 + $0x750] ss:$8 sps:$4 sm:$0xff]  }
  0xa6   : > { %3334 = vmatprep.subr.bf16.mxu0 %v7214_v56  ;;  %v7295_v56 = vld [vmem:[%s8048_s12 + $0x744] ss:$8 sps:$4 sm:$0xff]  }
  0xa7   : > { %3374 = vmatpush1.bf16.msra.mxu1 %v7209_v57  ;;  %v7290_v57 = vld [vmem:[%s8048_s12 + $0x640] ss:$8 sps:$4 sm:$0xff]  }
  0xa8   : > { %3375 = vmatprep.subr.bf16.mxu1 %v7217_v58  ;;  %v7298_v58 = vld [vmem:[%s8048_s12 + $0x634] ss:$8 sps:$4 sm:$0xff]  }
  0xa9   : > { %3335 = vmatpush1.bf16.msra.mxu0 %v7212_v59  ;;  %v7293_v59 = vld [vmem:[%s8048_s12 + $0x740] ss:$8 sps:$4 sm:$0xff]  }
  0xaa   : > { %3336 = vmatprep.subr.bf16.mxu0 %v7220_v60  ;;  %v7301_v60 = vld [vmem:[%s8048_s12 + $0x734] ss:$8 sps:$4 sm:$0xff]  }
  0xab   : > { %3376 = vmatpush1.bf16.msra.mxu1 %v7215_v61  ;;  %v7296_v61 = vld [vmem:[%s8048_s12 + $0x630] ss:$8 sps:$4 sm:$0xff]  }
  0xac   : > { %3377 = vmatprep.subr.bf16.mxu1 %v7223_v62  ;;  %v7304_v62 = vld [vmem:[%s8048_s12 + $0x624] ss:$8 sps:$4 sm:$0xff]  }
  0xad   : > { %3337 = vmatpush1.bf16.msra.mxu0 %v7218_v63  ;;  %v7299_v63 = vld [vmem:[%s8048_s12 + $0x730] ss:$8 sps:$4 sm:$0xff]  }
  0xae   : > { %3338 = vmatprep.subr.bf16.mxu0 %v7226_v0  ;;  %v7307_v0 = vld [vmem:[%s8048_s12 + $0x724] ss:$8 sps:$4 sm:$0xff]  }
  0xaf   : > { %3378 = vmatpush1.bf16.msra.mxu1 %v7221_v1  ;;  %v7302_v1 = vld [vmem:[%s8048_s12 + $0x620] ss:$8 sps:$4 sm:$0xff]  }
  0xb0   : > { %3379 = vmatprep.subr.bf16.mxu1 %v7229_v2  ;;  %v7310_v2 = vld [vmem:[%s8048_s12 + $0x614] ss:$8 sps:$4 sm:$0xff]  }
  0xb1   : > { %3339 = vmatpush2.bf16.msra.mxu0 %v7224_v4  ;;  %v7305_v4 = vld [vmem:[%s8048_s12 + $0x720] ss:$8 sps:$4 sm:$0xff]  }
  0xb2   : > { %3340 = vmatprep.subr.bf16.mxu0 %v7232_v7  ;;  %v7313_v7 = vld [vmem:[%s8048_s12 + $0x714] ss:$8 sps:$4 sm:$0xff]  }
  0xb3   : > { %3380 = vmatpush2.bf16.msra.mxu1 %v7227_v9  ;;  %v7308_v9 = vld [vmem:[%s8048_s12 + $0x610] ss:$8 sps:$4 sm:$0xff]  }
  0xb4   : > { %3381 = vmatprep.subr.bf16.mxu1 %v7235_v11  ;;  %v7316_v11 = vld [vmem:[%s8048_s12 + $0x604] ss:$8 sps:$4 sm:$0xff]  }
  0xb5   : > { %3341 = vmatpush2.bf16.msra.mxu0 %v7230_v5  ;;  %v7311_v5 = vld [vmem:[%s8048_s12 + $0x710] ss:$8 sps:$4 sm:$0xff]  }
  0xb6   : > { %3342 = vmatprep.subr.bf16.mxu0 %v7238_v12  ;;  %v7319_v12 = vld [vmem:[%s8048_s12 + $0x704] ss:$8 sps:$4 sm:$0xff]  }
  0xb7   : > { %3382 = vmatpush2.bf16.msra.mxu1 %v7233_v13  ;;  %v7314_v13 = vld [vmem:[%s8048_s12 + $0x600] ss:$8 sps:$4 sm:$0xff]  }
  0xb8   : > { %3383 = vmatprep.subr.bf16.mxu1 %v7241_v14  ;;  %v7322_v14 = vld [vmem:[%s8048_s12 + $0x6f4] ss:$8 sps:$4 sm:$0xff]  }
  0xb9   : > { %3343 = vmatpush2.bf16.msra.mxu0 %v7236_v15  ;;  %v7317_v15 = vld [vmem:[%s8048_s12 + $0x700] ss:$8 sps:$4 sm:$0xff]  }
  0xba   : > { %3344 = vmatprep.subr.bf16.mxu0 %v7244_v16  ;;  %v7325_v16 = vld [vmem:[%s8048_s12 + $0x7f4] ss:$8 sps:$4 sm:$0xff]  }
  0xbb   : > { %3384 = vmatpush2.bf16.msra.mxu1 %v7239_v17  ;;  %v7320_v17 = vld [vmem:[%s8048_s12 + $0x6f0] ss:$8 sps:$4 sm:$0xff]  }
  0xbc   : > { %3385 = vmatprep.subr.bf16.mxu1 %v7247_v18  ;;  %v7328_v18 = vld [vmem:[%s8048_s12 + $0x6e4] ss:$8 sps:$4 sm:$0xff]  }
  0xbd   : > { %3345 = vmatpush2.bf16.msra.mxu0 %v7242_v19  ;;  %v7323_v19 = vld [vmem:[%s8048_s12 + $0x7f0] ss:$8 sps:$4 sm:$0xff]  }
  0xbe   : > { %3346 = vmatprep.subr.bf16.mxu0 %v7250_v20  ;;  %v7331_v20 = vld [vmem:[%s8048_s12 + $0x7e4] ss:$8 sps:$4 sm:$0xff]  }
  0xbf   : > { %3386 = vmatpush2.bf16.msra.mxu1 %v7245_v21  ;;  %v7326_v21 = vld [vmem:[%s8048_s12 + $0x6e0] ss:$8 sps:$4 sm:$0xff]  }
  0xc0   : > { %3387 = vmatprep.subr.bf16.mxu1 %v7253_v23  ;;  %v7334_v23 = vld [vmem:[%s8048_s12 + $0x6d4] ss:$8 sps:$4 sm:$0xff]  }
  0xc1   : > { %3347 = vmatpush2.bf16.msra.mxu0 %v7248_v24  ;;  %v7329_v24 = vld [vmem:[%s8048_s12 + $0x7e0] ss:$8 sps:$4 sm:$0xff]  }
  0xc2   : > { %3348 = vmatprep.subr.bf16.mxu0 %v7256_v25  ;;  %v7337_v25 = vld [vmem:[%s8048_s12 + $0x7d4] ss:$8 sps:$4 sm:$0xff]  }
  0xc3   : > { %3388 = vmatpush2.bf16.msra.mxu1 %v7251_v26  ;;  %v7332_v26 = vld [vmem:[%s8048_s12 + $0x6d0] ss:$8 sps:$4 sm:$0xff]  }
  0xc4   : > { %3389 = vmatprep.subr.bf16.mxu1 %v7259_v27  ;;  %v7335_v27 = vld [vmem:[%s8048_s12 + $0x7d0] ss:$8 sps:$4 sm:$0xff]  }
  0xc5   : > { %3349 = vmatpush2.bf16.msra.mxu0 %v7254_v28  ;;  %v7343_v28 = vld [vmem:[%s8048_s12 + $0x7c4] ss:$8 sps:$4 sm:$0xff]  }
  0xc6   : > { %3350 = vmatprep.subr.bf16.mxu0 %v7262_v29  ;;  %v7338_v29 = vld [vmem:[%s8048_s12 + $0x6c0] ss:$8 sps:$4 sm:$0xff]  }
  0xc7   : > { %3390 = vmatpush2.bf16.msra.mxu1 %v7257_v30  ;;  %v7346_v30 = vld [vmem:[%s8048_s12 + $0x6b4] ss:$8 sps:$4 sm:$0xff]  }
  0xc8   : > { %3391 = vmatprep.subr.bf16.mxu1 %v7265_v32  ;;  %v7341_v32 = vld [vmem:[%s8048_s12 + $0x7c0] ss:$8 sps:$4 sm:$0xff]  }
  0xc9   : > { %3351 = vmatpush2.bf16.msra.mxu0 %v7260_v33  ;;  %v7349_v33 = vld [vmem:[%s8048_s12 + $0x7b4] ss:$8 sps:$4 sm:$0xff]  }
  0xca   : > { %3352 = vmatprep.subr.bf16.mxu0 %v7268_v10  ;;  %v7344_v10 = vld [vmem:[%s8048_s12 + $0x6b0] ss:$8 sps:$4 sm:$0xff]  }
  0xcb   : > { %3392 = vmatpush2.bf16.msra.mxu1 %v7263_v35  ;;  %v7347_v35 = vld [vmem:[%s8048_s12 + $0x7b0] ss:$8 sps:$4 sm:$0xff]  }
  0xcc   : > { %3393 = vmatprep.subr.bf16.mxu1 %v7271_v37  ;;  %v7355_v37 = vld [vmem:[%s8048_s12 + $0x7a4] ss:$8 sps:$4 sm:$0xff]  }
  0xcd   : > { %3353 = vmatpush2.bf16.msra.mxu0 %v7266_v38  ;;  %v8345_v38 = vld [vmem:[%s8959_s0 + $0x10] sm:$0xff] }
  0xce   : > { %3404 = vmatprep.subr.bf16.mxu0 %v7274_v40  ;;  %v7358_v40 = vld [vmem:[%s8048_s12 + $0x694] ss:$8 sps:$4 sm:$0xff]  }
  0xcf   : > { %3394 = vmatpush2.bf16.msra.mxu1 %v7269_v41  ;;  %v7353_v41 = vld [vmem:[%s8048_s12 + $0x7a0] ss:$8 sps:$4 sm:$0xff]  }
  0xd0   : > { %3355 = vmatmul.mubr.bf16.vlgmr.msra.gmra.mxu0 %v930_v39  ;;  %3445 = vmatprep.subr.bf16.mxu1 %v7277_v43  ;;  %v7350_v39 = vld [vmem:[%s8048_s12 + $0x6a0] ss:$8 sps:$4 sm:$0xff]   ;;  %v7361_v43 = vld [vmem:[%s8048_s12 + $0x794] ss:$8 sps:$4 sm:$0xff]  }
  0xd1   : > { %3405 = vmatpush1.bf16.msra.mxu0 %v7272_v44  ;;  %3436 = vmatprep.mubr.bf16.mxu0 %v951_v42  ;;  %v8352_v42 = vrot.slane %v8345_v38, %v8043_v6  ;;  %v7356_v44 = vld [vmem:[%s8048_s12 + $0x690] ss:$8 sps:$4 sm:$0xff]  }
  0xd2   : > { %3396 = vmatmul.mubr.bf16.vlgmr.msra.gmra.mxu1 %v952_v45  ;;  %3406 = vmatprep.subr.bf16.mxu0 %v7280_v46  ;;  %v7364_v45 = vld [vmem:[%s8048_s12 + $0x684] ss:$8 sps:$4 sm:$0xff]   ;;  %v7359_v46 = vld [vmem:[%s8048_s12 + $0x790] ss:$8 sps:$4 sm:$0xff]  }
  0xd3   : > { %3446 = vmatpush1.bf16.msra.mxu1 %v7275_v47  ;;  %3477 = vmatprep.mubr.bf16.mxu1 %v955_v34  ;;  %v971_v47 = vcombine.high %v8352_v42, %v8352_v42  ;;  %v7367_v34 = vld [vmem:[%s8048_s12 + $0x784] ss:$8 sps:$4 sm:$0xff]  }
  0xd4   : > { %3447 = vmatprep.subr.bf16.mxu1 %v7283_v48  ;;  %v7362_v48 = vld [vmem:[%s8048_s12 + $0x680] ss:$8 sps:$4 sm:$0xff]  }
  0xd5   : > { %3407 = vmatpush1.bf16.msra.mxu0 %v7278_v49  ;;  %v937_v49 = vrot.slane %v8274_v31, %v8043_v6 }
  0xd6   : > { %3408 = vmatprep.subr.bf16.mxu0 %v7286_v50  ;;  %v7371_v50 = vld [vmem:[%s8048_s12 + $0x874] ss:$8 sps:$4 sm:$0xff]  }
  0xd7   : > { %3448 = vmatpush1.bf16.msra.mxu1 %v7281_v51  ;;  %v7365_v51 = vld [vmem:[%s8048_s12 + $0x780] ss:$8 sps:$4 sm:$0xff]  }
  0xd8   : > { %3449 = vmatprep.subr.bf16.mxu1 %v7289_v52  ;;  %v993_v52 = vrot.slane %v971_v47, %v8043_v6  ;;  %v7423_v47 = vld [vmem:[%s8048_s12 + $0x8e0] ss:$8 sps:$4 sm:$0xff]  }
  0xd9   : > { %3409 = vmatpush1.bf16.msra.mxu0 %v7284_v53  ;;  %v7374_v53 = vld [vmem:[%s8048_s12 + $0x974] ss:$8 sps:$4 sm:$0xff]  }
  0xda   : > { %3410 = vmatprep.subr.bf16.mxu0 %v7292_v54  ;;  %v7369_v54 = vld [vmem:[%s8048_s12 + $0x870] ss:$8 sps:$4 sm:$0xff]   ;;  %v1003_v31 = vcombine.high %v993_v52, %v993_v52 }
  0xdb   : > { %3450 = vmatpush1.bf16.msra.mxu1 %v7287_v55  ;;  %v852_v55 = vpop.permute.xlu0 %851 }
  0xdc   : > { %3451 = vmatprep.subr.bf16.mxu1 %v7295_v56  ;;  %v953_v56 = vcombine.high %v937_v49, %v937_v49 }
  0xdd   : > { %3411 = vmatpush1.bf16.msra.mxu0 %v7290_v57  ;;  %v7372_v57 = vld [vmem:[%s8048_s12 + $0x970] ss:$8 sps:$4 sm:$0xff]  }
  0xde   : > { %3412 = vmatprep.subr.bf16.mxu0 %v7298_v58  ;;  %v7377_v58 = vld [vmem:[%s8048_s12 + $0x864] ss:$8 sps:$4 sm:$0xff]  }
  0xdf   : > { %3452 = vmatpush1.bf16.msra.mxu1 %v7293_v59  ;;  %v7375_v59 = vld [vmem:[%s8048_s12 + $0x860] ss:$8 sps:$4 sm:$0xff]  }
  0xe0   : > { %3453 = vmatprep.subr.bf16.mxu1 %v7301_v60 }
  0xe1   : > { %3413 = vmatpush1.bf16.msra.mxu0 %v7296_v61  ;;  %v7380_v61 = vld [vmem:[%s8048_s12 + $0x964] ss:$8 sps:$4 sm:$0xff]  }
  0xe2   : > { %3414 = vmatprep.subr.bf16.mxu0 %v7304_v62 }
  0xe3   : > { %3454 = vmatpush1.bf16.msra.mxu1 %v7299_v63  ;;  %v7378_v63 = vld [vmem:[%s8048_s12 + $0x960] ss:$8 sps:$4 sm:$0xff]  }
  0xe4   : > { %3455 = vmatprep.subr.bf16.mxu1 %v7307_v0 }
  0xe5   : > { %3415 = vmatpush1.bf16.msra.mxu0 %v7302_v1 }
  0xe6   : > { %3416 = vmatprep.subr.bf16.mxu0 %v7310_v2  ;;  %v7383_v2 = vld [vmem:[%s8048_s12 + $0x854] ss:$8 sps:$4 sm:$0xff]  }
  0xe7   : > { %3456 = vmatpush1.bf16.msra.mxu1 %v7305_v4 }
  0xe8   : > { %3457 = vmatprep.subr.bf16.mxu1 %v7313_v7 }
  0xe9   : > { %3417 = vmatpush1.bf16.msra.mxu0 %v7308_v9  ;;  %v7381_v9 = vld [vmem:[%s8048_s12 + $0x850] ss:$8 sps:$4 sm:$0xff]  }
  0xea   : > { %3418 = vmatprep.subr.bf16.mxu0 %v7316_v11  ;;  %v7386_v11 = vld [vmem:[%s8048_s12 + $0x954] ss:$8 sps:$4 sm:$0xff]  }
  0xeb   : > { %3458 = vmatpush1.bf16.msra.mxu1 %v7311_v5 }
  0xec   : > { %3459 = vmatprep.subr.bf16.mxu1 %v7319_v12 }
  0xed   : > { %3419 = vmatpush1.bf16.msra.mxu0 %v7314_v13 }
  0xee   : > { %3420 = vmatprep.subr.bf16.mxu0 %v7322_v14  ;;  %v7384_v14 = vld [vmem:[%s8048_s12 + $0x950] ss:$8 sps:$4 sm:$0xff]  }
  0xef   : > { %3460 = vmatpush1.bf16.msra.mxu1 %v7317_v15 }
  0xf0   : > { %3461 = vmatprep.subr.bf16.mxu1 %v7325_v16  ;;  %v7389_v16 = vld [vmem:[%s8048_s12 + $0x844] ss:$8 sps:$4 sm:$0xff]  }
  0xf1   : > { %3421 = vmatpush2.bf16.msra.mxu0 %v7320_v17  ;;  %v7392_v17 = vld [vmem:[%s8048_s12 + $0x944] ss:$8 sps:$4 sm:$0xff]  }
  0xf2   : > { %3422 = vmatprep.subr.bf16.mxu0 %v7328_v18 }
  0xf3   : > { %3462 = vmatpush2.bf16.msra.mxu1 %v7323_v19  ;;  %v7387_v19 = vld [vmem:[%s8048_s12 + $0x840] ss:$8 sps:$4 sm:$0xff]  }
  0xf4   : > { %3463 = vmatprep.subr.bf16.mxu1 %v7331_v20 }
  0xf5   : > { %3423 = vmatpush2.bf16.msra.mxu0 %v7326_v21  ;;  %v7390_v21 = vld [vmem:[%s8048_s12 + $0x940] ss:$8 sps:$4 sm:$0xff]  }
  0xf6   : > { %3424 = vmatprep.subr.bf16.mxu0 %v7334_v23  ;;  %v7395_v23 = vld [vmem:[%s8048_s12 + $0x834] ss:$8 sps:$4 sm:$0xff]  }
  0xf7   : > { %3464 = vmatpush2.bf16.msra.mxu1 %v7329_v24  ;;  %v7398_v24 = vld [vmem:[%s8048_s12 + $0x934] ss:$8 sps:$4 sm:$0xff]  }
  0xf8   : > { %3465 = vmatprep.subr.bf16.mxu1 %v7337_v25  ;;  %v7393_v25 = vld [vmem:[%s8048_s12 + $0x830] ss:$8 sps:$4 sm:$0xff]  }
  0xf9   : > { %3425 = vmatpush2.bf16.msra.mxu0 %v7332_v26  ;;  %v7401_v26 = vld [vmem:[%s8048_s12 + $0x824] ss:$8 sps:$4 sm:$0xff]  }
  0xfa   : > { %3426 = vmatprep.subr.bf16.mxu0 %v7340_v8  ;;  %v7396_v8 = vld [vmem:[%s8048_s12 + $0x930] ss:$8 sps:$4 sm:$0xff]  }
  0xfb   : > { %3466 = vmatpush2.bf16.msra.mxu1 %v7335_v27  ;;  %v7404_v27 = vld [vmem:[%s8048_s12 + $0x924] ss:$8 sps:$4 sm:$0xff]  }
  0xfc   : > { %3467 = vmatprep.subr.bf16.mxu1 %v7343_v28  ;;  %v7399_v28 = vld [vmem:[%s8048_s12 + $0x820] ss:$8 sps:$4 sm:$0xff]  }
  0xfd   : > { %3427 = vmatpush2.bf16.msra.mxu0 %v7338_v29  ;;  %v7407_v29 = vld [vmem:[%s8048_s12 + $0x814] ss:$8 sps:$4 sm:$0xff]  }
  0xfe   : > { %3428 = vmatprep.subr.bf16.mxu0 %v7346_v30  ;;  %v7402_v30 = vld [vmem:[%s8048_s12 + $0x920] ss:$8 sps:$4 sm:$0xff]  }
  0xff   : > { %3468 = vmatpush2.bf16.msra.mxu1 %v7341_v32  ;;  %v7410_v32 = vld [vmem:[%s8048_s12 + $0x914] ss:$8 sps:$4 sm:$0xff]  }
 0x100   : > { %3469 = vmatprep.subr.bf16.mxu1 %v7349_v33  ;;  %v7405_v33 = vld [vmem:[%s8048_s12 + $0x810] ss:$8 sps:$4 sm:$0xff]  }
 0x101   : > { %3429 = vmatpush2.bf16.msra.mxu0 %v7344_v10  ;;  %v7413_v10 = vld [vmem:[%s8048_s12 + $0x804] ss:$8 sps:$4 sm:$0xff]  }
 0x102   : > { %3430 = vmatprep.subr.bf16.mxu0 %v7352_v36  ;;  %v7416_v36 = vld [vmem:[%s8048_s12 + $0x904] ss:$8 sps:$4 sm:$0xff]  }
 0x103   : > { %3470 = vmatpush2.bf16.msra.mxu1 %v7347_v35  ;;  %v7408_v35 = vld [vmem:[%s8048_s12 + $0x910] ss:$8 sps:$4 sm:$0xff]  }
 0x104   : > { %3471 = vmatprep.subr.bf16.mxu1 %v7355_v37  ;;  %v7411_v37 = vld [vmem:[%s8048_s12 + $0x800] ss:$8 sps:$4 sm:$0xff]  }
 0x105   : > { %3431 = vmatpush2.bf16.msra.mxu0 %v7350_v39  ;;  %v7419_v39 = vld [vmem:[%s8048_s12 + $0x8f4] ss:$8 sps:$4 sm:$0xff]  }
 0x106   : > { %3432 = vmatprep.subr.bf16.mxu0 %v7358_v40  ;;  %v7414_v40 = vld [vmem:[%s8048_s12 + $0x900] ss:$8 sps:$4 sm:$0xff]  }
 0x107   : > { %3472 = vmatpush2.bf16.msra.mxu1 %v7353_v41  ;;  %v7422_v41 = vld [vmem:[%s8048_s12 + $0x9f4] ss:$8 sps:$4 sm:$0xff]  }
 0x108   : > { %3473 = vmatprep.subr.bf16.mxu1 %v7361_v43  ;;  %v7417_v43 = vld [vmem:[%s8048_s12 + $0x8f0] ss:$8 sps:$4 sm:$0xff]  }
 0x109   : > { %3433 = vmatpush2.bf16.msra.mxu0 %v7356_v44  ;;  %v7425_v44 = vld [vmem:[%s8048_s12 + $0x8e4] ss:$8 sps:$4 sm:$0xff]  }
 0x10a   : > { %3434 = vmatprep.subr.bf16.mxu0 %v7364_v45  ;;  %v7420_v45 = vld [vmem:[%s8048_s12 + $0x9f0] ss:$8 sps:$4 sm:$0xff]  }
 0x10b   : > { %3474 = vmatpush2.bf16.msra.mxu1 %v7359_v46  ;;  %v7428_v46 = vld [vmem:[%s8048_s12 + $0x9e4] ss:$8 sps:$4 sm:$0xff]  }
 0x10c   : > { %3475 = vmatprep.subr.bf16.mxu1 %v7367_v34  ;;  %v7431_v34 = vld [vmem:[%s8048_s12 + $0x8d4] ss:$8 sps:$4 sm:$0xff]  }
 0x10d   : > { %3435 = vmatpush2.bf16.msra.mxu0 %v7362_v48  ;;  %v7426_v48 = vld [vmem:[%s8048_s12 + $0x9e0] ss:$8 sps:$4 sm:$0xff]  }
 0x10e   : > { %3486 = vmatprep.subr.bf16.mxu0 %v7371_v50  ;;  %v7429_v50 = vld [vmem:[%s8048_s12 + $0x8d0] ss:$8 sps:$4 sm:$0xff]  }
 0x10f   : > { %3476 = vmatpush2.bf16.msra.mxu1 %v7365_v51  ;;  %v7437_v51 = vld [vmem:[%s8048_s12 + $0x8c4] ss:$8 sps:$4 sm:$0xff]  }
 0x110   : > { %v3192_v60 = vpop.f32.mrf.mxu0  ;;  %3437 = vmatmul.mubr.bf16.vlgmr.msra.gmra.mxu0 %v937_v49  ;;  %3527 = vmatprep.subr.bf16.mxu1 %v7374_v53  ;;  %v7434_v49 = vld [vmem:[%s8048_s12 + $0x9d4] ss:$8 sps:$4 sm:$0xff]   ;;  %v7440_v53 = vld [vmem:[%s8048_s12 + $0x9c4] ss:$8 sps:$4 sm:$0xff]  }
 0x111   : > { %3487 = vmatpush1.bf16.msra.mxu0 %v7369_v54  ;;  %v3193_v62 = vadd.f32 %v3192_v60, %v852_v55  ;;  %3518 = vmatprep.mubr.bf16.mxu0 %v993_v52  ;;  %v7432_v52 = vld [vmem:[%s8048_s12 + $0x9d0] ss:$8 sps:$4 sm:$0xff]   ;;  %v7435_v54 = vld [vmem:[%s8048_s12 + $0x8c0] ss:$8 sps:$4 sm:$0xff]   ;;  %v956_v60 = vcombine.high %v8345_v38, %v8345_v38 }
 0x112   : > { %v3194_v0 = vpop.f32.mrf.mxu0  ;;  %v3233_v1 = vpop.f32.mrf.mxu1  ;;  %3478 = vmatmul.mubr.bf16.vlgmr.msra.gmra.mxu1 %v953_v56  ;;  %3488 = vmatprep.subr.bf16.mxu0 %v7377_v58  ;;  %v7438_v56 = vld [vmem:[%s8048_s12 + $0x9c0] ss:$8 sps:$4 sm:$0xff]   ;;  %v7441_v58 = vld [vmem:[%s8048_s12 + $0x8b0] ss:$8 sps:$4 sm:$0xff]  }
 0x113   : > { %v3195_v4 = vadd.f32 %v3194_v0, %v852_v55  ;;  %v8375_v7 = vadd.f32 %v3233_v1, %v3193_v62  ;;  %3528 = vmatpush1.bf16.msra.mxu1 %v7372_v57  ;;  %3559 = vmatprep.mubr.bf16.mxu1 %v1003_v31  ;;  %v7443_v55 = vld [vmem:[%s8048_s12 + $0x8b4] ss:$8 sps:$4 sm:$0xff]   ;;  %v7444_v31 = vld [vmem:[%s8048_s12 + $0x9b0] ss:$8 sps:$4 sm:$0xff]   ;;  %v7447_v62 = vld [vmem:[%s8048_s12 + $0x8a0] ss:$8 sps:$4 sm:$0xff]   ;;  %v8430_v1 = vrot.slane %v956_v60, %v8043_v6 }
 0x114   : > { %v3196_v5 = vpop.f32.mrf.mxu0  ;;  %v3235_v12 = vpop.f32.mrf.mxu1  ;;  %3529 = vmatprep.subr.bf16.mxu1 %v7380_v61  ;;  %v7446_v57 = vld [vmem:[%s8048_s12 + $0x9b4] ss:$8 sps:$4 sm:$0xff]   ;;  %v7452_v61 = vld [vmem:[%s8048_s12 + $0x9a4] ss:$8 sps:$4 sm:$0xff]   ;;  %v7450_v0 = vld [vmem:[%s8048_s12 + $0x9a0] ss:$8 sps:$4 sm:$0xff]  }
 0x115   : > { %v8379_v13 = vadd.f32 %v3235_v12, %v3195_v4  ;;  %3489 = vmatpush1.bf16.msra.mxu0 %v7375_v59  ;;  %v7449_v59 = vld [vmem:[%s8048_s12 + $0x8a4] ss:$8 sps:$4 sm:$0xff]   ;;  %v7453_v38 = vld [vmem:[%s8048_s12 + $0x890] ss:$8 sps:$4 sm:$0xff]   ;;  %v7459_v12 = vld [vmem:[%s8048_s12 + $0x880] ss:$8 sps:$4 sm:$0xff]  }
 0x116   : > { %v3197_v15 = vpop.f32.mrf.mxu0  ;;  %3490 = vmatprep.subr.bf16.mxu0 %v7383_v2  ;;  %v3237_v18 = vpop.f32.mrf.mxu1  ;;  %v7458_v2 = vld [vmem:[%s8048_s12 + $0x994] ss:$8 sps:$4 sm:$0xff]   ;;  %v7461_v4 = vld [vmem:[%s8048_s12 + $0x884] ss:$8 sps:$4 sm:$0xff]  }
 0x117   : > { %3530 = vmatpush1.bf16.msra.mxu1 %v7378_v63  ;;  %v7455_v63 = vld [vmem:[%s8048_s12 + $0x894] ss:$8 sps:$4 sm:$0xff]   ;;  %v7464_v5 = vld [vmem:[%s8048_s12 + $0x984] ss:$8 sps:$4 sm:$0xff]  }
 0x118   : > { %3531 = vmatprep.subr.bf16.mxu1 %v7386_v11  ;;  %v3238_v20 = vpop.f32.mrf.mxu1  ;;  %v972_v11 = vcombine.high %v8430_v1, %v8430_v1  ;;  %v7467_v15 = vld [vmem:[%s8048_s12 + $0xa74] ss:$8 sps:$4 sm:$0xff]  }
 0x119   : > { %3491 = vmatpush1.bf16.msra.mxu0 %v7381_v9  ;;  %v7456_v9 = vld [vmem:[%s8048_s12 + $0x990] ss:$8 sps:$4 sm:$0xff]   ;;  %v7470_v18 = vld [vmem:[%s8048_s12 + $0xb74] ss:$8 sps:$4 sm:$0xff]  }
 0x11a   : > { %3492 = vmatprep.subr.bf16.mxu0 %v7389_v16  ;;  %v7462_v16 = vld [vmem:[%s8048_s12 + $0x980] ss:$8 sps:$4 sm:$0xff]   ;;  %v7515_v60 = vld [vmem:[%s8048_s12 + $0xaf4] ss:$8 sps:$4 sm:$0xff]  }
 0x11b   : > { %3532 = vmatpush1.bf16.msra.mxu1 %v7384_v14  ;;  %v979_v14 = vrot.slane %v8352_v42, %v8043_v6  ;;  %v7476_v42 = vld [vmem:[%s8048_s12 + $0xb64] ss:$8 sps:$4 sm:$0xff]  }
 0x11c   : > { %3533 = vmatprep.subr.bf16.mxu1 %v7392_v17  ;;  %v1000_v17 = vrot.slane %v972_v11, %v8043_v6  ;;  %v7522_v11 = vld [vmem:[%s8048_s12 + $0xbe0] ss:$8 sps:$4 sm:$0xff]  }
 0x11d   : > { %3493 = vmatpush1.bf16.msra.mxu0 %v7387_v19  ;;  %v7465_v19 = vld [vmem:[%s8048_s12 + $0xa70] ss:$8 sps:$4 sm:$0xff]   ;;  %v1001_v20 = vcombine.high %v979_v14, %v979_v14 }
 0x11e   : > { %3494 = vmatprep.subr.bf16.mxu0 %v7395_v23  ;;  %v7468_v23 = vld [vmem:[%s8048_s12 + $0xb70] ss:$8 sps:$4 sm:$0xff]  }
 0x11f   : > { %3534 = vmatpush1.bf16.msra.mxu1 %v7390_v21  ;;  %v7473_v21 = vld [vmem:[%s8048_s12 + $0xa64] ss:$8 sps:$4 sm:$0xff]  }
 0x120   : > { %3535 = vmatprep.subr.bf16.mxu1 %v7398_v24  ;;  %v1004_v24 = vcombine.high %v1000_v17, %v1000_v17 }
 0x121   : > { %3495 = vmatpush1.bf16.msra.mxu0 %v7393_v25 }
 0x122   : > { %3496 = vmatprep.subr.bf16.mxu0 %v7401_v26 }
 0x123   : > { %3536 = vmatpush1.bf16.msra.mxu1 %v7396_v8  ;;  %v7471_v8 = vld [vmem:[%s8048_s12 + $0xa60] ss:$8 sps:$4 sm:$0xff]  }
 0x124   : > { %3537 = vmatprep.subr.bf16.mxu1 %v7404_v27 }
 0x125   : > { %3497 = vmatpush1.bf16.msra.mxu0 %v7399_v28 }
 0x126   : > { %3498 = vmatprep.subr.bf16.mxu0 %v7407_v29  ;;  %v7479_v29 = vld [vmem:[%s8048_s12 + $0xa54] ss:$8 sps:$4 sm:$0xff]  }
 0x127   : > { %3538 = vmatpush1.bf16.msra.mxu1 %v7402_v30 }
 0x128   : > { %3539 = vmatprep.subr.bf16.mxu1 %v7410_v32 }
 0x129   : > { %3499 = vmatpush1.bf16.msra.mxu0 %v7405_v33  ;;  %v7474_v33 = vld [vmem:[%s8048_s12 + $0xb60] ss:$8 sps:$4 sm:$0xff]  }
 0x12a   : > { %3500 = vmatprep.subr.bf16.mxu0 %v7413_v10 }
 0x12b   : > { %3540 = vmatpush1.bf16.msra.mxu1 %v7408_v35  ;;  %v7482_v35 = vld [vmem:[%s8048_s12 + $0xb54] ss:$8 sps:$4 sm:$0xff]  }
 0x12c   : > { %3541 = vmatprep.subr.bf16.mxu1 %v7416_v36 }
 0x12d   : > { %3501 = vmatpush1.bf16.msra.mxu0 %v7411_v37  ;;  %v7477_v37 = vld [vmem:[%s8048_s12 + $0xa50] ss:$8 sps:$4 sm:$0xff]  }
 0x12e   : > { %3502 = vmatprep.subr.bf16.mxu0 %v7419_v39 }
 0x12f   : > { %3542 = vmatpush1.bf16.msra.mxu1 %v7414_v40 }
 0x130   : > { %3543 = vmatprep.subr.bf16.mxu1 %v7422_v41  ;;  %v7480_v41 = vld [vmem:[%s8048_s12 + $0xb50] ss:$8 sps:$4 sm:$0xff]  }
 0x131   : > { %3503 = vmatpush2.bf16.msra.mxu0 %v7417_v43  ;;  %v7488_v43 = vld [vmem:[%s8048_s12 + $0xb44] ss:$8 sps:$4 sm:$0xff]  }
 0x132   : > { %3504 = vmatprep.subr.bf16.mxu0 %v7425_v44 }
 0x133   : > { %3544 = vmatpush2.bf16.msra.mxu1 %v7420_v45  ;;  %v7483_v45 = vld [vmem:[%s8048_s12 + $0xa40] ss:$8 sps:$4 sm:$0xff]  }
 0x134   : > { %3545 = vmatprep.subr.bf16.mxu1 %v7428_v46  ;;  %v7491_v46 = vld [vmem:[%s8048_s12 + $0xa34] ss:$8 sps:$4 sm:$0xff]  }
 0x135   : > { %3505 = vmatpush2.bf16.msra.mxu0 %v7423_v47  ;;  %v7486_v47 = vld [vmem:[%s8048_s12 + $0xb40] ss:$8 sps:$4 sm:$0xff]  }
 0x136   : > { %3506 = vmatprep.subr.bf16.mxu0 %v7431_v34  ;;  %v7494_v34 = vld [vmem:[%s8048_s12 + $0xb34] ss:$8 sps:$4 sm:$0xff]  }
 0x137   : > { %3546 = vmatpush2.bf16.msra.mxu1 %v7426_v48  ;;  %v7489_v48 = vld [vmem:[%s8048_s12 + $0xa30] ss:$8 sps:$4 sm:$0xff]  }
 0x138   : > { %3547 = vmatprep.subr.bf16.mxu1 %v7434_v49  ;;  %v7497_v49 = vld [vmem:[%s8048_s12 + $0xa24] ss:$8 sps:$4 sm:$0xff]  }
 0x139   : > { %3507 = vmatpush2.bf16.msra.mxu0 %v7429_v50  ;;  %v7492_v50 = vld [vmem:[%s8048_s12 + $0xb30] ss:$8 sps:$4 sm:$0xff]  }
 0x13a   : > { %3508 = vmatprep.subr.bf16.mxu0 %v7437_v51  ;;  %v7500_v51 = vld [vmem:[%s8048_s12 + $0xb24] ss:$8 sps:$4 sm:$0xff]  }
 0x13b   : > { %3548 = vmatpush2.bf16.msra.mxu1 %v7432_v52  ;;  %v7495_v52 = vld [vmem:[%s8048_s12 + $0xa20] ss:$8 sps:$4 sm:$0xff]  }
 0x13c   : > { %3549 = vmatprep.subr.bf16.mxu1 %v7440_v53  ;;  %v7503_v53 = vld [vmem:[%s8048_s12 + $0xa14] ss:$8 sps:$4 sm:$0xff]  }
 0x13d   : > { %3509 = vmatpush2.bf16.msra.mxu0 %v7435_v54  ;;  %v7498_v54 = vld [vmem:[%s8048_s12 + $0xb20] ss:$8 sps:$4 sm:$0xff]  }
 0x13e   : > { %3510 = vmatprep.subr.bf16.mxu0 %v7443_v55  ;;  %v7506_v55 = vld [vmem:[%s8048_s12 + $0xb14] ss:$8 sps:$4 sm:$0xff]  }
 0x13f   : > { %3550 = vmatpush2.bf16.msra.mxu1 %v7438_v56  ;;  %v7501_v56 = vld [vmem:[%s8048_s12 + $0xa10] ss:$8 sps:$4 sm:$0xff]  }
 0x140   : > { %3551 = vmatprep.subr.bf16.mxu1 %v7446_v57  ;;  %v7509_v57 = vld [vmem:[%s8048_s12 + $0xa04] ss:$8 sps:$4 sm:$0xff]  }
 0x141   : > { %3511 = vmatpush2.bf16.msra.mxu0 %v7441_v58  ;;  %v7504_v58 = vld [vmem:[%s8048_s12 + $0xb10] ss:$8 sps:$4 sm:$0xff]  }
 0x142   : > { %3512 = vmatprep.subr.bf16.mxu0 %v7449_v59  ;;  %v7512_v59 = vld [vmem:[%s8048_s12 + $0xb04] ss:$8 sps:$4 sm:$0xff]  }
 0x143   : > { %3552 = vmatpush2.bf16.msra.mxu1 %v7444_v31  ;;  %v7507_v31 = vld [vmem:[%s8048_s12 + $0xa00] ss:$8 sps:$4 sm:$0xff]  }
 0x144   : > { %3553 = vmatprep.subr.bf16.mxu1 %v7452_v61  ;;  %v7510_v61 = vld [vmem:[%s8048_s12 + $0xb00] ss:$8 sps:$4 sm:$0xff]  }
 0x145   : > { %3513 = vmatpush2.bf16.msra.mxu0 %v7447_v62  ;;  %v7518_v62 = vld [vmem:[%s8048_s12 + $0xbf4] ss:$8 sps:$4 sm:$0xff]  }
 0x146   : > { %3514 = vmatprep.subr.bf16.mxu0 %v7455_v63  ;;  %v7513_v63 = vld [vmem:[%s8048_s12 + $0xaf0] ss:$8 sps:$4 sm:$0xff]  }
 0x147   : > { %3554 = vmatpush2.bf16.msra.mxu1 %v7450_v0  ;;  %v7521_v0 = vld [vmem:[%s8048_s12 + $0xae4] ss:$8 sps:$4 sm:$0xff]  }
 0x148   : > { %3555 = vmatprep.subr.bf16.mxu1 %v7458_v2  ;;  %v7516_v2 = vld [vmem:[%s8048_s12 + $0xbf0] ss:$8 sps:$4 sm:$0xff]  }
 0x149   : > { %3515 = vmatpush2.bf16.msra.mxu0 %v7453_v38  ;;  %v7524_v38 = vld [vmem:[%s8048_s12 + $0xbe4] ss:$8 sps:$4 sm:$0xff]  }
 0x14a   : > { %3516 = vmatprep.subr.bf16.mxu0 %v7461_v4  ;;  %v7519_v4 = vld [vmem:[%s8048_s12 + $0xae0] ss:$8 sps:$4 sm:$0xff]  }
 0x14b   : > { %3556 = vmatpush2.bf16.msra.mxu1 %v7456_v9  ;;  %v7527_v9 = vld [vmem:[%s8048_s12 + $0xad4] ss:$8 sps:$4 sm:$0xff]  }
 0x14c   : > { %3557 = vmatprep.subr.bf16.mxu1 %v7464_v5  ;;  %v7530_v5 = vld [vmem:[%s8048_s12 + $0xbd4] ss:$8 sps:$4 sm:$0xff]  }
 0x14d   : > { %3517 = vmatpush2.bf16.msra.mxu0 %v7459_v12  ;;  %v7525_v12 = vld [vmem:[%s8048_s12 + $0xad0] ss:$8 sps:$4 sm:$0xff]  }
 0x14e   : > { %3568 = vmatprep.subr.bf16.mxu0 %v7467_v15  ;;  %v7528_v15 = vld [vmem:[%s8048_s12 + $0xbd0] ss:$8 sps:$4 sm:$0xff]  }
 0x14f   : > { %3558 = vmatpush2.bf16.msra.mxu1 %v7462_v16  ;;  %v7536_v16 = vld [vmem:[%s8048_s12 + $0xbc4] ss:$8 sps:$4 sm:$0xff]  }
 0x150   : > { %v3274_v25 = vpop.f32.mrf.mxu0  ;;  %3519 = vmatmul.mubr.bf16.vlgmr.msra.gmra.mxu0 %v979_v14  ;;  %3609 = vmatprep.subr.bf16.mxu1 %v7470_v18  ;;  %v7533_v14 = vld [vmem:[%s8048_s12 + $0xac4] ss:$8 sps:$4 sm:$0xff]   ;;  %v7539_v18 = vld [vmem:[%s8048_s12 + $0xab4] ss:$8 sps:$4 sm:$0xff]  }
 0x151   : > { %v3275_v26 = vadd.f32 %v3274_v25, %v8375_v7  ;;  %3569 = vmatpush1.bf16.msra.mxu0 %v7465_v19  ;;  %3600 = vmatprep.mubr.bf16.mxu0 %v1000_v17  ;;  %v7531_v17 = vld [vmem:[%s8048_s12 + $0xac0] ss:$8 sps:$4 sm:$0xff]   ;;  %v7548_v25 = vld [vmem:[%s8048_s12 + $0xba4] ss:$8 sps:$4 sm:$0xff]  }
 0x152   : > { %v3276_v27 = vpop.f32.mrf.mxu0  ;;  %v3315_v28 = vpop.f32.mrf.mxu1  ;;  %3560 = vmatmul.mubr.bf16.vlgmr.msra.gmra.mxu1 %v1001_v20  ;;  %3570 = vmatprep.subr.bf16.mxu0 %v7473_v21  ;;  %v7534_v19 = vld [vmem:[%s8048_s12 + $0xbc0] ss:$8 sps:$4 sm:$0xff]   ;;  %v7542_v20 = vld [vmem:[%s8048_s12 + $0xbb4] ss:$8 sps:$4 sm:$0xff]   ;;  %v7537_v21 = vld [vmem:[%s8048_s12 + $0xab0] ss:$8 sps:$4 sm:$0xff]  }
 0x153   : > { %v3277_v30 = vadd.f32 %v3276_v27, %v8379_v13  ;;  %v8454_v32 = vadd.f32 %v3315_v28, %v3275_v26  ;;  %3610 = vmatpush1.bf16.msra.mxu1 %v7468_v23  ;;  %3641 = vmatprep.mubr.bf16.mxu1 %v1004_v24  ;;  %v7485_v13 = vld [vmem:[%s8048_s12 + $0xa44] ss:$8 sps:$4 sm:$0xff]   ;;  %v7540_v24 = vld [vmem:[%s8048_s12 + $0xbb0] ss:$8 sps:$4 sm:$0xff]   ;;  %v7551_v26 = vld [vmem:[%s8048_s12 + $0xa94] ss:$8 sps:$4 sm:$0xff]  }
 0x154   : > { %v3278_v7 = vpop.f32.mrf.mxu0  ;;  %v3317_v10 = vpop.f32.mrf.mxu1  ;;  %3611 = vmatprep.subr.bf16.mxu1 %v7476_v42  ;;  %v7545_v23 = vld [vmem:[%s8048_s12 + $0xaa4] ss:$8 sps:$4 sm:$0xff]   ;;  %v7543_v42 = vld [vmem:[%s8048_s12 + $0xaa0] ss:$8 sps:$4 sm:$0xff]   ;;  %v7554_v27 = vld [vmem:[%s8048_s12 + $0xb94] ss:$8 sps:$4 sm:$0xff]  }
 0x155   : > { %v8458_v36 = vadd.f32 %v3317_v10, %v3277_v30  ;;  %3571 = vmatpush1.bf16.msra.mxu0 %v7471_v8  ;;  %v7546_v8 = vld [vmem:[%s8048_s12 + $0xba0] ss:$8 sps:$4 sm:$0xff]   ;;  %v7549_v28 = vld [vmem:[%s8048_s12 + $0xa90] ss:$8 sps:$4 sm:$0xff]  }
 0x156   : > { %v3279_v39 = vpop.f32.mrf.mxu0  ;;  %3572 = vmatprep.subr.bf16.mxu0 %v7479_v29  ;;  %v3319_v40 = vpop.f32.mrf.mxu1  ;;  %v7557_v29 = vld [vmem:[%s8048_s12 + $0xa84] ss:$8 sps:$4 sm:$0xff]   ;;  %v7552_v30 = vld [vmem:[%s8048_s12 + $0xb90] ss:$8 sps:$4 sm:$0xff]   ;;  %v7555_v10 = vld [vmem:[%s8048_s12 + $0xa80] ss:$8 sps:$4 sm:$0xff]  }
 0x157   : > { %3612 = vmatpush1.bf16.msra.mxu1 %v7474_v33  ;;  %v7560_v33 = vld [vmem:[%s8048_s12 + $0xb84] ss:$8 sps:$4 sm:$0xff]   ;;  %v6076_v7 = vld.sshfl [vmem:[%s8959_s0 + $0x18] sm:$0x13 pattern:$0x75316420] }
 0x158   : > { %3613 = vmatprep.subr.bf16.mxu1 %v7482_v35  ;;  %v3320_v44 = vpop.f32.mrf.mxu1  ;;  %v1012_v35 = vcombine.high %v6076_v7, %v6076_v7  ;;  %v7564_v39 = vld [vmem:[%s8048_s12 + $0xc74] ss:$8 sps:$4 sm:$0xff]  }
 0x159   : > { %3573 = vmatpush1.bf16.msra.mxu0 %v7477_v37  ;;  %v986_v37 = vrot.slane %v8430_v1, %v8043_v6  ;;  %v7606_v40 = vld [vmem:[%s8048_s12 + $0xd14] ss:$8 sps:$4 sm:$0xff]   ;;  %v7612_v1 = vld [vmem:[%s8048_s12 + $0xd04] ss:$8 sps:$4 sm:$0xff]  }
 0x15a   : > { %3574 = vmatprep.subr.bf16.mxu0 %v7485_v13  ;;  %v7558_v13 = vld [vmem:[%s8048_s12 + $0xb80] ss:$8 sps:$4 sm:$0xff]  }
 0x15b   : > { %3614 = vmatpush1.bf16.msra.mxu1 %v7480_v41  ;;  %v7562_v41 = vld [vmem:[%s8048_s12 + $0xc70] ss:$8 sps:$4 sm:$0xff]   ;;  %v1002_v44 = vcombine.high %v986_v37, %v986_v37 }
 0x15c   : > { %3615 = vmatprep.subr.bf16.mxu1 %v7488_v43  ;;  %v1026_v43 = vrot.slane %v1012_v35, %v8043_v6 }
 0x15d   : > { %3575 = vmatpush1.bf16.msra.mxu0 %v7483_v45  ;;  %v7567_v45 = vld [vmem:[%s8048_s12 + $0xc64] ss:$8 sps:$4 sm:$0xff]  }
 0x15e   : > { %3576 = vmatprep.subr.bf16.mxu0 %v7491_v46  ;;  %v7604_v46 = vld [vmem:[%s8048_s12 + $0xd10] ss:$8 sps:$4 sm:$0xff]  }
 0x15f   : > { %3616 = vmatpush1.bf16.msra.mxu1 %v7486_v47 }
 0x160   : > { %3617 = vmatprep.subr.bf16.mxu1 %v7494_v34 }
 0x161   : > { %3577 = vmatpush1.bf16.msra.mxu0 %v7489_v48  ;;  %v7565_v48 = vld [vmem:[%s8048_s12 + $0xc60] ss:$8 sps:$4 sm:$0xff]  }
 0x162   : > { %3578 = vmatprep.subr.bf16.mxu0 %v7497_v49 }
 0x163   : > { %3618 = vmatpush1.bf16.msra.mxu1 %v7492_v50 }
 0x164   : > { %3619 = vmatprep.subr.bf16.mxu1 %v7500_v51  ;;  %v7570_v51 = vld [vmem:[%s8048_s12 + $0xc54] ss:$8 sps:$4 sm:$0xff]  }
 0x165   : > { %3579 = vmatpush1.bf16.msra.mxu0 %v7495_v52  ;;  %v8530_v52 = vrot.slane %v6076_v7, %v8043_v6 }
 0x166   : > { %3580 = vmatprep.subr.bf16.mxu0 %v7503_v53 }
 0x167   : > { %3620 = vmatpush1.bf16.msra.mxu1 %v7498_v54 }
 0x168   : > { %3621 = vmatprep.subr.bf16.mxu1 %v7506_v55  ;;  %v7610_v55 = vld [vmem:[%s8048_s12 + $0xd00] ss:$8 sps:$4 sm:$0xff]  }
 0x169   : > { %3581 = vmatpush1.bf16.msra.mxu0 %v7501_v56 }
 0x16a   : > { %3582 = vmatprep.subr.bf16.mxu0 %v7509_v57 }
 0x16b   : > { %3622 = vmatpush1.bf16.msra.mxu1 %v7504_v58  ;;  %v7568_v58 = vld [vmem:[%s8048_s12 + $0xc50] ss:$8 sps:$4 sm:$0xff]  }
 0x16c   : > { %3623 = vmatprep.subr.bf16.mxu1 %v7512_v59 }
 0x16d   : > { %3583 = vmatpush1.bf16.msra.mxu0 %v7507_v31  ;;  %v1027_v31 = vcombine.high %v8530_v52, %v8530_v52 }
 0x16e   : > { %3584 = vmatprep.subr.bf16.mxu0 %v7515_v60  ;;  %v7571_v60 = vld [vmem:[%s8048_s12 + $0xc40] ss:$8 sps:$4 sm:$0xff]  }
 0x16f   : > { %3624 = vmatpush1.bf16.msra.mxu1 %v7510_v61  ;;  %v7576_v61 = vld [vmem:[%s8048_s12 + $0xc34] ss:$8 sps:$4 sm:$0xff]  }
 0x170   : > { %3625 = vmatprep.subr.bf16.mxu1 %v7518_v62  ;;  %v7574_v62 = vld [vmem:[%s8048_s12 + $0xc30] ss:$8 sps:$4 sm:$0xff]  }
 0x171   : > { %3585 = vmatpush2.bf16.msra.mxu0 %v7513_v63  ;;  %v7579_v63 = vld [vmem:[%s8048_s12 + $0xc24] ss:$8 sps:$4 sm:$0xff]  }
 0x172   : > { %3586 = vmatprep.subr.bf16.mxu0 %v7521_v0  ;;  %v7577_v0 = vld [vmem:[%s8048_s12 + $0xc20] ss:$8 sps:$4 sm:$0xff]  }
 0x173   : > { %3626 = vmatpush2.bf16.msra.mxu1 %v7516_v2  ;;  %v7582_v2 = vld [vmem:[%s8048_s12 + $0xc14] ss:$8 sps:$4 sm:$0xff]  }
 0x174   : > { %3627 = vmatprep.subr.bf16.mxu1 %v7524_v38  ;;  %v7580_v38 = vld [vmem:[%s8048_s12 + $0xc10] ss:$8 sps:$4 sm:$0xff]  }
 0x175   : > { %3587 = vmatpush2.bf16.msra.mxu0 %v7519_v4  ;;  %v7585_v4 = vld [vmem:[%s8048_s12 + $0xc04] ss:$8 sps:$4 sm:$0xff]  }
 0x176   : > { %3588 = vmatprep.subr.bf16.mxu0 %v7527_v9  ;;  %v7583_v9 = vld [vmem:[%s8048_s12 + $0xc00] ss:$8 sps:$4 sm:$0xff]  }
 0x177   : > { %3628 = vmatpush2.bf16.msra.mxu1 %v7522_v11  ;;  %v7588_v11 = vld [vmem:[%s8048_s12 + $0xcf4] ss:$8 sps:$4 sm:$0xff]  }
 0x178   : > { %3629 = vmatprep.subr.bf16.mxu1 %v7530_v5  ;;  %v7586_v5 = vld [vmem:[%s8048_s12 + $0xcf0] ss:$8 sps:$4 sm:$0xff]  }
 0x179   : > { %3589 = vmatpush2.bf16.msra.mxu0 %v7525_v12  ;;  %v7591_v12 = vld [vmem:[%s8048_s12 + $0xce4] ss:$8 sps:$4 sm:$0xff]  }
 0x17a   : > { %3590 = vmatprep.subr.bf16.mxu0 %v7533_v14  ;;  %v7589_v14 = vld [vmem:[%s8048_s12 + $0xce0] ss:$8 sps:$4 sm:$0xff]  }
 0x17b   : > { %3630 = vmatpush2.bf16.msra.mxu1 %v7528_v15  ;;  %v7594_v15 = vld [vmem:[%s8048_s12 + $0xcd4] ss:$8 sps:$4 sm:$0xff]  }
 0x17c   : > { %3631 = vmatprep.subr.bf16.mxu1 %v7536_v16  ;;  %v7592_v16 = vld [vmem:[%s8048_s12 + $0xcd0] ss:$8 sps:$4 sm:$0xff]  }
 0x17d   : > { %3591 = vmatpush2.bf16.msra.mxu0 %v7531_v17  ;;  %v7597_v17 = vld [vmem:[%s8048_s12 + $0xcc4] ss:$8 sps:$4 sm:$0xff]  }
 0x17e   : > { %3592 = vmatprep.subr.bf16.mxu0 %v7539_v18  ;;  %v7595_v18 = vld [vmem:[%s8048_s12 + $0xcc0] ss:$8 sps:$4 sm:$0xff]  }
 0x17f   : > { %3632 = vmatpush2.bf16.msra.mxu1 %v7534_v19  ;;  %v7600_v19 = vld [vmem:[%s8048_s12 + $0xcb4] ss:$8 sps:$4 sm:$0xff]  }
 0x180   : > { %3633 = vmatprep.subr.bf16.mxu1 %v7542_v20  ;;  %v7598_v20 = vld [vmem:[%s8048_s12 + $0xcb0] ss:$8 sps:$4 sm:$0xff]  }
 0x181   : > { %3593 = vmatpush2.bf16.msra.mxu0 %v7537_v21  ;;  %v7603_v21 = vld [vmem:[%s8048_s12 + $0xca4] ss:$8 sps:$4 sm:$0xff]  }
 0x182   : > { %3594 = vmatprep.subr.bf16.mxu0 %v7545_v23  ;;  %v7601_v23 = vld [vmem:[%s8048_s12 + $0xca0] ss:$8 sps:$4 sm:$0xff]  }
 0x183   : > { %3634 = vmatpush2.bf16.msra.mxu1 %v7540_v24  ;;  %v7609_v24 = vld [vmem:[%s8048_s12 + $0xc94] ss:$8 sps:$4 sm:$0xff]  }
 0x184   : > { %3635 = vmatprep.subr.bf16.mxu1 %v7548_v25  ;;  %v7607_v25 = vld [vmem:[%s8048_s12 + $0xc90] ss:$8 sps:$4 sm:$0xff]  }
 0x185   : > { %3595 = vmatpush2.bf16.msra.mxu0 %v7543_v42  ;;  %v7615_v42 = vld [vmem:[%s8048_s12 + $0xc84] ss:$8 sps:$4 sm:$0xff]  }
 0x186   : > { %3596 = vmatprep.subr.bf16.mxu0 %v7551_v26  ;;  %v7613_v26 = vld [vmem:[%s8048_s12 + $0xc80] ss:$8 sps:$4 sm:$0xff]  }
 0x187   : > { %3636 = vmatpush2.bf16.msra.mxu1 %v7546_v8 }
 0x188   : > { %3637 = vmatprep.subr.bf16.mxu1 %v7554_v27 }
 0x189   : > { %3597 = vmatpush2.bf16.msra.mxu0 %v7549_v28 }
 0x18a   : > { %3598 = vmatprep.subr.bf16.mxu0 %v7557_v29 }
 0x18b   : > { %3638 = vmatpush2.bf16.msra.mxu1 %v7552_v30 }
 0x18c   : > { %3639 = vmatprep.subr.bf16.mxu1 %v7560_v33 }
 0x18d   : > { %3599 = vmatpush2.bf16.msra.mxu0 %v7555_v10 }
 0x18e   : > { %3650 = vmatprep.subr.bf16.mxu0 %v7564_v39 }
 0x18f   : > { %3640 = vmatpush2.bf16.msra.mxu1 %v7558_v13 }
 0x190   : > { %v3356_v47 = vpop.f32.mrf.mxu0  ;;  %3601 = vmatmul.mubr.bf16.vlgmr.msra.gmra.mxu0 %v986_v37  ;;  %3703 = vmatprep.subr.bf16.mxu1 %v7606_v40  ;;  %v7616_v40 = vld [vmem:[%s8575_s26 + $0x70] ss:$8 sps:$4 sm:$0xff]  }
 0x191   : > { %v3357_v34 = vadd.f32 %v3356_v47, %v8454_v32  ;;  %3651 = vmatpush1.bf16.msra.mxu0 %v7562_v41  ;;  %3682 = vmatprep.mubr.bf16.mxu0 %v1026_v43  ;;  %v7618_v41 = vld [vmem:[%s8575_s26 + $0x74] ss:$8 sps:$4 sm:$0xff]   ;;  %v7621_v43 = vld [vmem:[%s8575_s26 + $0x64] ss:$8 sps:$4 sm:$0xff]  }
 0x192   : > { %v3358_v49 = vpop.f32.mrf.mxu0  ;;  %v3397_v50 = vpop.f32.mrf.mxu1  ;;  %3642 = vmatmul.mubr.bf16.vlgmr.msra.gmra.mxu1 %v1002_v44  ;;  %3652 = vmatprep.subr.bf16.mxu0 %v7567_v45  ;;  %v7619_v44 = vld [vmem:[%s8575_s26 + $0x60] ss:$8 sps:$4 sm:$0xff]   ;;  %v7624_v45 = vld [vmem:[%s8575_s26 + $0x54] ss:$8 sps:$4 sm:$0xff]   ;;  %v7627_v47 = vld [vmem:[%s8575_s26 + $0x44] ss:$8 sps:$4 sm:$0xff]  }
 0x193   : > { %v3359_v53 = vadd.f32 %v3358_v49, %v8458_v36  ;;  %v8533_v54 = vadd.f32 %v3397_v50, %v3357_v34  ;;  %3704 = vmatpush1.bf16.msra.mxu1 %v7604_v46  ;;  %3723 = vmatprep.mubr.bf16.mxu1 %v7977_v22  ;;  %v7573_v36 = vld [vmem:[%s8048_s12 + $0xc44] ss:$8 sps:$4 sm:$0xff]   ;;  %v7622_v46 = vld [vmem:[%s8575_s26 + $0x50] ss:$8 sps:$4 sm:$0xff]   ;;  %v7630_v34 = vld [vmem:[%s8575_s26 + $0x34] ss:$8 sps:$4 sm:$0xff]  }
 0x194   : > { %v3360_v32 = vpop.f32.mrf.mxu0  ;;  %v3399_v56 = vpop.f32.mrf.mxu1  ;;  %3705 = vmatprep.subr.bf16.mxu1 %v7612_v1  ;;  %v7625_v1 = vld [vmem:[%s8575_s26 + $0x40] ss:$8 sps:$4 sm:$0xff]   ;;  %v7633_v49 = vld [vmem:[%s8575_s26 + $0x24] ss:$8 sps:$4 sm:$0xff]  }
 0x195   : > { %v8537_v57 = vadd.f32 %v3399_v56, %v3359_v53  ;;  %3653 = vmatpush1.bf16.msra.mxu0 %v7565_v48  ;;  %v7628_v48 = vld [vmem:[%s8575_s26 + $0x30] ss:$8 sps:$4 sm:$0xff]   ;;  %v7631_v50 = vld [vmem:[%s8575_s26 + $0x20] ss:$8 sps:$4 sm:$0xff]   ;;  %v7639_v53 = vld [vmem:[%s8575_s26 + $0x4] ss:$8 sps:$4 sm:$0xff]  }
 0x196   : > { %v3361_v6 = vpop.f32.mrf.mxu0  ;;  %3654 = vmatprep.subr.bf16.mxu0 %v7570_v51  ;;  %v3401_v59 = vpop.f32.mrf.mxu1  ;;  %v7636_v51 = vld [vmem:[%s8575_s26 + $0x14] ss:$8 sps:$4 sm:$0xff]  }
 0x197   : > { %3706 = vmatpush1.bf16.msra.mxu1 %v7610_v55  ;;  %v3770_v55 = vld [vmem:[%s8575_s26 + $0xa0] sm:$0xff] }
 0x198   : > { %v3402_v22 = vpop.f32.mrf.mxu1  ;;  %3899 = vmatprep.subr.bf16.mxu1 %v7618_v41  ;;  %v6519_v56 = vcombine.high %v3770_v55, %v3770_v55 }
 0x199   : > { %3655 = vmatpush1.bf16.msra.mxu0 %v7568_v58 }
 0x19a   : > { %3656 = vmatprep.subr.bf16.mxu0 %v7573_v36  ;;  %6497 = vmatmul.mubr.msk.bf16.vlgmr.msra.gmra.mxu1 %vm3154_vm0, %v1027_v31 }
 0x19b   : > { %3900 = vmatpush1.bf16.msra.mxu1 %v7616_v40 }
 0x19c   : > { %3901 = vmatprep.subr.bf16.mxu1 %v7621_v43 }
 0x19d   : > { %3657 = vmatpush1.bf16.msra.mxu0 %v7571_v60 }
 0x19e   : > { %3658 = vmatprep.subr.bf16.mxu0 %v7576_v61 }
 0x19f   : > { %3902 = vmatpush1.bf16.msra.mxu1 %v7619_v44 }
 0x1a0   : > { %3903 = vmatprep.subr.bf16.mxu1 %v7624_v45 }
 0x1a1   : > { %3659 = vmatpush1.bf16.msra.mxu0 %v7574_v62  ;;  %v7644_v62 = vld [vmem:[%s8575_s26 + $0x94] ss:$8 sps:$4 sm:$0xff]  }
 0x1a2   : > { %3660 = vmatprep.subr.bf16.mxu0 %v7579_v63 }
 0x1a3   : > { %3904 = vmatpush1.bf16.msra.mxu1 %v7622_v46 }
 0x1a4   : > { %3905 = vmatprep.subr.bf16.mxu1 %v7627_v47 }
 0x1a5   : > { %3661 = vmatpush1.bf16.msra.mxu0 %v7577_v0  ;;  %v7642_v0 = vld [vmem:[%s8575_s26 + $0x90] ss:$8 sps:$4 sm:$0xff]  }
 0x1a6   : > { %3662 = vmatprep.subr.bf16.mxu0 %v7582_v2 }
 0x1a7   : > { %3906 = vmatpush1.bf16.msra.mxu1 %v7625_v1 }
 0x1a8   : > { %3907 = vmatprep.subr.bf16.mxu1 %v7630_v34  ;;  %v7648_v34 = vld [vmem:[%s8604_s10 + $0x70] ss:$8 sps:$4 sm:$0xff]  }
 0x1a9   : > { %3663 = vmatpush1.bf16.msra.mxu0 %v7580_v38 }
 0x1aa   : > { %3664 = vmatprep.subr.bf16.mxu0 %v7585_v4 }
 0x1ab   : > { %3908 = vmatpush1.bf16.msra.mxu1 %v7628_v48 }
 0x1ac   : > { %3909 = vmatprep.subr.bf16.mxu1 %v7633_v49  ;;  %v7653_v49 = vld [vmem:[%s8604_s10 + $0x64] ss:$8 sps:$4 sm:$0xff]  }
 0x1ad   : > { %3665 = vmatpush1.bf16.msra.mxu0 %v7583_v9  ;;  %v7647_v9 = vld [vmem:[%s8575_s26 + $0x84] ss:$8 sps:$4 sm:$0xff]  }
 0x1ae   : > { %3666 = vmatprep.subr.bf16.mxu0 %v7588_v11  ;;  %v7645_v11 = vld [vmem:[%s8575_s26 + $0x80] ss:$8 sps:$4 sm:$0xff]  }
 0x1af   : > { %3910 = vmatpush1.bf16.msra.mxu1 %v7631_v50  ;;  %v7651_v50 = vld [vmem:[%s8604_s10 + $0x60] ss:$8 sps:$4 sm:$0xff]  }
 0x1b0   : > { %3911 = vmatprep.subr.bf16.mxu1 %v7636_v51  ;;  %v7656_v51 = vld [vmem:[%s8604_s10 + $0x54] ss:$8 sps:$4 sm:$0xff]  }
 0x1b1   : > { %3667 = vmatpush2.bf16.msra.mxu0 %v7586_v5  ;;  %v7650_v5 = vld [vmem:[%s8604_s10 + $0x74] ss:$8 sps:$4 sm:$0xff]  }
 0x1b2   : > { %3668 = vmatprep.subr.bf16.mxu0 %v7591_v12 }
 0x1b5   : > { %3669 = vmatpush2.bf16.msra.mxu0 %v7589_v14 }
 0x1b6   : > { %3670 = vmatprep.subr.bf16.mxu0 %v7594_v15 }
 0x1b9   : > { %3671 = vmatpush2.bf16.msra.mxu0 %v7592_v16 }
 0x1ba   : > { %3672 = vmatprep.subr.bf16.mxu0 %v7597_v17 }
 0x1bd   : > { %3673 = vmatpush2.bf16.msra.mxu0 %v7595_v18 }
 0x1be   : > { %3674 = vmatprep.subr.bf16.mxu0 %v7600_v19 }
 0x1c1   : > { %3675 = vmatpush2.bf16.msra.mxu0 %v7598_v20 }
 0x1c2   : > { %3676 = vmatprep.subr.bf16.mxu0 %v7603_v21 }
 0x1c5   : > { %3677 = vmatpush2.bf16.msra.mxu0 %v7601_v23 }
 0x1c6   : > { %3678 = vmatprep.subr.bf16.mxu0 %v7609_v24 }
 0x1c9   : > { %3679 = vmatpush2.bf16.msra.mxu0 %v7607_v25 }
 0x1ca   : > { %3680 = vmatprep.subr.bf16.mxu0 %v7615_v42 }
 0x1cd   : > { %3681 = vmatpush2.bf16.msra.mxu0 %v7613_v26 }
 0x1d0   : > { %v3438_v8 = vpop.f32.mrf.mxu0  ;;  %3683 = vmatmul.mubr.bf16.vlgmr.msra.gmra.mxu0 %v8530_v52  ;;  %v7634_v52 = vld [vmem:[%s8575_s26 + $0x10] ss:$8 sps:$4 sm:$0xff]  }
 0x1d1   : > { %v3439_v27 = vadd.f32 %v3438_v8, %v8533_v54  ;;  %v7637_v54 = vld [vmem:[%s8575_s26] ss:$8 sps:$4 sm:$0xff]   ;;  %3912 = vmatpush1.bf16.msra.mxu1 %v7634_v52  ;;  %v8616_v8 = vsub.s32 0, %v8034_v3  ;;  %v7654_v52 = vld [vmem:[%s8604_s10 + $0x50] ss:$8 sps:$4 sm:$0xff]  }
 0x1d2   : > { %v3440_v28 = vpop.f32.mrf.mxu0  ;;  %v3479_v29 = vpop.f32.mrf.mxu1  ;;  %3913 = vmatprep.subr.bf16.mxu1 %v7639_v53  ;;  %v7659_v53 = vld [vmem:[%s8604_s10 + $0x44] ss:$8 sps:$4 sm:$0xff]  }
 0x1d3   : > { %v3441_v30 = vadd.f32 %v3440_v28, %v8537_v57  ;;  %v3480_v33 = vadd.f32 %v3479_v29, %v3439_v27  ;;  %v6518_v57 = vcombine.low %v3770_v55, %v3770_v55  ;;  %v3732_v27 = vld [vmem:[%s8613_s14] ss:$8 sm:$0x3]  ;;  %v8620_v29 = vsub.s32 1, %v8034_v3  ;;  %v7662_v55 = vld [vmem:[%s8604_s10 + $0x34] ss:$8 sps:$4 sm:$0xff]  }
 0x1d4   : > { %v3442_v7 = vpop.f32.mrf.mxu0  ;;  %v3481_v10 = vpop.f32.mrf.mxu1 }
 0x1d5   : > { %v3482_v35 = vadd.f32 %v3481_v10, %v3441_v30  ;;  %3914 = vmatpush1.bf16.msra.mxu1 %v7637_v54  ;;  %v3894_v59 = vsel %vm3892_vm1, %v6518_v57, 0  ;;  %v3737_v10 = vrot.slane %v3732_v27, %v8616_v8  ;;  %v7657_v54 = vld [vmem:[%s8604_s10 + $0x40] ss:$8 sps:$4 sm:$0xff]  }
 0x1d6   : > { %v3443_v37 = vpop.f32.mrf.mxu0  ;;  %v3483_v39 = vpop.f32.mrf.mxu1  ;;  %6520 = vmatprep.subr.msk.bf16.mxu1 %vm3892_vm1, %v6519_v56  ;;  %v7665_v56 = vld [vmem:[%s8604_s10 + $0x24] ss:$8 sps:$4 sm:$0xff]   ;;  %v7663_v57 = vld [vmem:[%s8604_s10 + $0x20] ss:$8 sps:$4 sm:$0xff]  }
 0x1d8   : > { %v3484_v13 = vpop.f32.mrf.mxu1 }
 0x1d9   : > { %3926 = vmatpush2.bf16.msra.mxu1 %v3894_v59  ;;  %v3741_v13 = vrot.slane %v3732_v27, %v8620_v29  ;;  %v7669_v59 = vld [vmem:[%s8604_s10] ss:$8 sps:$4 sm:$0xff]  }
 0x1da   : > { %3927 = vmatprep.subr.bf16.mxu1 %v7644_v62  ;;  %v7676_v62 = vld [vmem:[%s8604_s10 + $0x94] ss:$8 sps:$4 sm:$0xff]  }
 0x1dd   : > { %3928 = vmatpush2.bf16.msra.mxu1 %v7642_v0  ;;  %v7679_v0 = vld [vmem:[%s8604_s10 + $0x84] ss:$8 sps:$4 sm:$0xff]  }
 0x1de   : > { %3929 = vmatprep.subr.bf16.mxu1 %v7647_v9  ;;  %v7685_v9 = vld [vmem:[%s8575_s26 + $0x10c] ss:$8 sps:$4 sm:$0xff]  }
 0x1e1   : > { %3930 = vmatpush2.bf16.msra.mxu1 %v7645_v11  ;;  %v7683_v11 = vld [vmem:[%s8575_s26 + $0x108] ss:$8 sps:$4 sm:$0xff]  }
 0x1e2   : > { %4108 = vmatprep.subr.bf16.mxu1 %v7650_v5  ;;  %v7688_v5 = vld [vmem:[%s8575_s26 + $0xfc] ss:$8 sps:$4 sm:$0xff]  }
 0x210   : > { %v3520_v32 = vpop.f32.mrf.mxu0 }
 0x211   : > { %v3521_v58 = vadd.f32 %v3520_v32, %v3480_v33  ;;  %v7660_v32 = vld [vmem:[%s8604_s10 + $0x30] ss:$8 sps:$4 sm:$0xff]  }
 0x212   : > { %v3522_v6 = vpop.f32.mrf.mxu0  ;;  %v3561_v36 = vpop.f32.mrf.mxu1 }
 0x213   : > { %v3523_v31 = vadd.f32 %v3522_v6, %v3482_v35  ;;  %v3562_v22 = vadd.f32 %v3561_v36, %v3521_v58  ;;  %v7668_v58 = vld [vmem:[%s8604_s10 + $0x14] ss:$8 sps:$4 sm:$0xff]   ;;  %v7666_v6 = vld [vmem:[%s8604_s10 + $0x10] ss:$8 sps:$4 sm:$0xff]   ;;  %v7671_v36 = vld [vmem:[%s8604_s10 + $0x4] ss:$8 sps:$4 sm:$0xff]  }
 0x214   : > { %v3524_v60 = vpop.f32.mrf.mxu0  ;;  %v3563_v61 = vpop.f32.mrf.mxu1 }
 0x215   : > { %v3564_v63 = vadd.f32 %v3563_v61, %v3523_v31  ;;  %v3980_v31 = vld [vmem:[%s8604_s10 + $0xa0] sm:$0xff] }
 0x216   : > { %v3525_v2 = vpop.f32.mrf.mxu0  ;;  %v3565_v38 = vpop.f32.mrf.mxu1  ;;  %v6544_v60 = vcombine.low %v3980_v31, %v3980_v31 }
 0x217   : > { %v7677_v2 = vld [vmem:[%s8604_s10 + $0x80] ss:$8 sps:$4 sm:$0xff]  }
 0x218   : > { %v3566_v4 = vpop.f32.mrf.mxu1  ;;  %v4103_v61 = vsel %vm3892_vm1, %v6544_v60, 0  ;;  %v7680_v38 = vld [vmem:[%s8575_s26 + $0x118] ss:$8 sps:$4 sm:$0xff]   ;;  %v7732_v60 = vld [vmem:[%s8604_s10 + $0xbc] ss:$8 sps:$4 sm:$0xff]  }
 0x219   : > { %v7682_v4 = vld [vmem:[%s8575_s26 + $0x11c] ss:$8 sps:$4 sm:$0xff]  }
 0x21a   : > { %4302 = vmatprep.subr.bf16.mxu0 %v7682_v4 }
 0x21b   : > { %4303 = vmatpush1.bf16.msra.mxu0 %v7680_v38 }
 0x21c   : > { %4304 = vmatprep.subr.bf16.mxu0 %v7685_v9 }
 0x21f   : > { %4305 = vmatpush1.bf16.msra.mxu0 %v7683_v11 }
 0x220   : > { %4306 = vmatprep.subr.bf16.mxu0 %v7688_v5 }
 0x250   : > { %v3602_v12 = vpop.f32.mrf.mxu0 }
 0x251   : > { %v3603_v42 = vadd.f32 %v3602_v12, %v3562_v22  ;;  %v6545_v22 = vcombine.high %v3980_v31, %v3980_v31  ;;  %v7686_v12 = vld [vmem:[%s8575_s26 + $0xf8] ss:$8 sps:$4 sm:$0xff]   ;;  %v7729_v31 = vld [vmem:[%s8604_s10 + $0xcc] ss:$8 sps:$4 sm:$0xff]  }
 0x252   : > { %v3604_v14 = vpop.f32.mrf.mxu0  ;;  %v3643_v15 = vpop.f32.mrf.mxu1  ;;  %4307 = vmatpush1.bf16.msra.mxu0 %v7686_v12 }
 0x253   : > { %v3605_v26 = vadd.f32 %v3604_v14, %v3564_v63  ;;  %v3644_v28 = vadd.f32 %v3643_v15, %v3603_v42  ;;  %v7674_v63 = vld [vmem:[%s8604_s10 + $0x90] ss:$8 sps:$4 sm:$0xff]   ;;  %v7691_v14 = vld [vmem:[%s8575_s26 + $0xec] ss:$8 sps:$4 sm:$0xff]  }
 0x254   : > { %v3606_v16 = vpop.f32.mrf.mxu0  ;;  %v3645_v17 = vpop.f32.mrf.mxu1  ;;  %v7689_v15 = vld [vmem:[%s8575_s26 + $0xe8] ss:$8 sps:$4 sm:$0xff]   ;;  %4308 = vmatprep.subr.bf16.mxu0 %v7691_v14 }
 0x255   : > { %v3646_v33 = vadd.f32 %v3645_v17, %v3605_v26  ;;  %v7694_v16 = vld [vmem:[%s8575_s26 + $0xdc] ss:$8 sps:$4 sm:$0xff]   ;;  %v7692_v17 = vld [vmem:[%s8575_s26 + $0xd8] ss:$8 sps:$4 sm:$0xff]  }
 0x256   : > { %v3607_v18 = vpop.f32.mrf.mxu0  ;;  %v3647_v19 = vpop.f32.mrf.mxu1  ;;  %4309 = vmatpush1.bf16.msra.mxu0 %v7689_v15 }
 0x257   : > { %4310 = vmatprep.subr.bf16.mxu0 %v7694_v16  ;;  %v7697_v18 = vld [vmem:[%s8575_s26 + $0xcc] ss:$8 sps:$4 sm:$0xff]   ;;  %v7695_v19 = vld [vmem:[%s8575_s26 + $0xc8] ss:$8 sps:$4 sm:$0xff]  }
 0x258   : > { %v3648_v20 = vpop.f32.mrf.mxu1 }
 0x259   : > { %v7700_v20 = vld [vmem:[%s8575_s26 + $0xbc] ss:$8 sps:$4 sm:$0xff]  }
 0x25a   : > { %v3725_v21 = vpop.f32.mrf.mxu1  ;;  %4311 = vmatpush1.bf16.msra.mxu0 %v7692_v17 }
 0x25b   : > { %4312 = vmatprep.subr.bf16.mxu0 %v7697_v18 }
 0x25c   : > { %v3727_v23 = vpop.f32.mrf.mxu1 }
 0x25e   : > { %v3729_v24 = vpop.f32.mrf.mxu1  ;;  %4313 = vmatpush1.bf16.msra.mxu0 %v7695_v19  ;;  %v6614_v19 = vld [vmem:[%s8604_s10 + $0x148] sm:$0xff] }
 0x25f   : > { %4314 = vmatprep.subr.bf16.mxu0 %v7700_v20  ;;  %v6568_v24 = vld [vmem:[%s8575_s26 + $0x148] sm:$0xff]  ;;  %v6637_v20 = vcombine.high %v6614_v19, %v6614_v19 }
 0x260   : > { %v3730_v25 = vpop.f32.mrf.mxu1  ;;  %v6591_v42 = vcombine.high %v6568_v24, %v6568_v24  ;;  %v6590_v26 = vcombine.low %v6568_v24, %v6568_v24  ;;  %v7740_v24 = vld [vmem:[%s8604_s10 + $0x13c] ss:$8 sps:$4 sm:$0xff]  }
 0x261   : > { %v7701_v25 = vld [vmem:[%s8575_s26 + $0xa8] ss:$8 sps:$4 sm:$0xff]  }
 0x262   : > { %v4297_v27 = vsel %vm3892_vm1, %v6590_v26, 0  ;;  %v7741_v26 = vld [vmem:[%s8604_s10 + $0x128] ss:$8 sps:$4 sm:$0xff]  }
 0x290   : > { %v3684_v30 = vpop.f32.mrf.mxu0 }
 0x291   : > { %v3685_v7 = vadd.f32 %v3684_v30, %v3644_v28  ;;  %v3771_v28 = vld [vmem:[%s8671_s17] ss:$8 sm:$0x3] }
 0x292   : > { %v3686_v35 = vpop.f32.mrf.mxu0  ;;  %v3776_v30 = vrot.slane %v3771_v28, %v8616_v8 }
 0x293   : > { %v3726_v37 = vadd.f32 %v3725_v21, %v3685_v7  ;;  %v3687_v39 = vadd.f32 %v3686_v35, %v3646_v33  ;;  %v7698_v21 = vld [vmem:[%s8575_s26 + $0xb8] ss:$8 sps:$4 sm:$0xff]   ;;  %v3780_v33 = vrot.slane %v3771_v28, %v8620_v29  ;;  %v7746_v28 = vld [vmem:[%s8575_s26 + $0x1c4] ss:$8 sps:$4 sm:$0xff]  }
 0x294   : > { %v3688_v40 = vpop.f32.mrf.mxu0  ;;  %4315 = vmatpush1.bf16.msra.mxu0 %v7698_v21  ;;  %v6636_v21 = vcombine.low %v6614_v19, %v6614_v19  ;;  %v7796_v19 = vld [vmem:[%s8604_s10 + $0x164] ss:$8 sps:$4 sm:$0xff]  }
 0x295   : > { %v3744_v41 = vadd.f32 %v3737_v10, %v3726_v37  ;;  %v3728_v43 = vadd.f32 %v3727_v23, %v3687_v39  ;;  %v7703_v23 = vld [vmem:[%s8575_s26 + $0xac] ss:$8 sps:$4 sm:$0xff]   ;;  %v6522_v10 = vld.sshfl [vmem:[%s392_s21] sm:$0x33 pattern:$0x76325410] }
 0x296   : > { %v3689_v44 = vpop.f32.mrf.mxu0  ;;  %4316 = vmatprep.subr.bf16.mxu0 %v7703_v23  ;;  %v3951_v40 = vcombine.high %v6522_v10, %v6522_v10  ;;  %v4495_v23 = vsel %vm3892_vm1, %v6636_v21, 0  ;;  %v7799_v21 = vld [vmem:[%s8604_s10 + $0x154] ss:$8 sps:$4 sm:$0xff]  }
 0x297   : > { %v3745_v45 = vadd.f32 %v3741_v13, %v3728_v43  ;;  %v3746_v46 = vmax.f32 %v3744_v41, 0.0 }
 0x298   : > { %4317 = vmatpush1.bf16.msra.mxu0 %v7701_v25  ;;  %v7738_v25 = vld [vmem:[%s8604_s10 + $0x138] ss:$8 sps:$4 sm:$0xff]  }
 0x299   : > { %v3747_v47 = vmax.f32 %v3745_v45, 0.0  ;;  %v3748_v48 = vpack.c.bf16 %v3746_v46, %v3746_v46  ;;  %6592 = vmatprep.subr.msk.bf16.mxu0 %vm3892_vm1, %v6591_v42  ;;  %v7743_v42 = vld [vmem:[%s8604_s10 + $0x12c] ss:$8 sps:$4 sm:$0xff]  }
 0x29b   : > { %v3749_v1 = vpack.c.bf16 %v3747_v47, %v3747_v47 }
 0x29c   : > { %4329 = vmatpush2.bf16.msra.mxu0 %v4297_v27  ;;  %v7744_v27 = vld [vmem:[%s8575_s26 + $0x1c0] ss:$8 sps:$4 sm:$0xff]  }
 0x29d   : > { %6521 = vmatprep.mubr.msk.bf16.mxu1 %vm3888_vm2, %v3749_v1 }
 0x29e   : > { %3932 = vmatmul.mubr.bf16.vlgmr.msra.gmra.mxu1 %v3748_v48 }
 0x29f   : > { %4109 = vmatpush1.bf16.msra.mxu1 %v7648_v34 }
 0x2a0   : > { %4110 = vmatprep.subr.bf16.mxu1 %v7653_v49  ;;  %v7708_v49 = vld [vmem:[%s8575_s26 + $0x13c] ss:$8 sps:$4 sm:$0xff]  }
 0x2a1   : > { %4330 = vmatprep.subr.bf16.mxu0 %v7708_v49 }
 0x2a3   : > { %4111 = vmatpush1.bf16.msra.mxu1 %v7651_v50  ;;  %v7706_v50 = vld [vmem:[%s8575_s26 + $0x138] ss:$8 sps:$4 sm:$0xff]  }
 0x2a4   : > { %4112 = vmatprep.subr.bf16.mxu1 %v7656_v51  ;;  %4331 = vmatpush2.bf16.msra.mxu0 %v7706_v50  ;;  %v7711_v51 = vld [vmem:[%s8575_s26 + $0x12c] ss:$8 sps:$4 sm:$0xff]  }
 0x2a5   : > { %4332 = vmatprep.subr.bf16.mxu0 %v7711_v51  ;;  %v6569_v51 = vld [vmem:[%s8671_s17 + $0x1] ss:$8 sm:$0x3] }
 0x2a7   : > { %4113 = vmatpush1.bf16.msra.mxu1 %v7654_v52  ;;  %v7709_v52 = vld [vmem:[%s8575_s26 + $0x128] ss:$8 sps:$4 sm:$0xff]  }
 0x2a8   : > { %4114 = vmatprep.subr.bf16.mxu1 %v7659_v53  ;;  %4333 = vmatpush2.bf16.msra.mxu0 %v7709_v52  ;;  %v7712_v53 = vld [vmem:[%s8604_s10 + $0x118] ss:$8 sps:$4 sm:$0xff]   ;;  %v4181_v52 = vrot.slane %v6569_v51, %v8616_v8 }
 0x2a9   : > { %4694 = vmatprep.subr.bf16.mxu0 %v7746_v28 }
 0x2ab   : > { %4115 = vmatpush1.bf16.msra.mxu1 %v7657_v54  ;;  %v7714_v54 = vld [vmem:[%s8604_s10 + $0x11c] ss:$8 sps:$4 sm:$0xff]  }
 0x2ac   : > { %4116 = vmatprep.subr.bf16.mxu1 %v7662_v55  ;;  %v7717_v55 = vld [vmem:[%s8604_s10 + $0x10c] ss:$8 sps:$4 sm:$0xff]  }
 0x2af   : > { %4117 = vmatpush1.bf16.msra.mxu1 %v7660_v32  ;;  %v7715_v32 = vld [vmem:[%s8604_s10 + $0x108] ss:$8 sps:$4 sm:$0xff]  }
 0x2b0   : > { %4118 = vmatprep.subr.bf16.mxu1 %v7665_v56  ;;  %v7720_v56 = vld [vmem:[%s8604_s10 + $0xfc] ss:$8 sps:$4 sm:$0xff]  }
 0x2b3   : > { %4119 = vmatpush1.bf16.msra.mxu1 %v7663_v57  ;;  %v7718_v57 = vld [vmem:[%s8604_s10 + $0xf8] ss:$8 sps:$4 sm:$0xff]  }
 0x2b4   : > { %4120 = vmatprep.subr.bf16.mxu1 %v7668_v58  ;;  %v7723_v58 = vld [vmem:[%s8604_s10 + $0xec] ss:$8 sps:$4 sm:$0xff]  }
 0x2b7   : > { %4121 = vmatpush1.bf16.msra.mxu1 %v7666_v6  ;;  %v7721_v6 = vld [vmem:[%s8604_s10 + $0xe8] ss:$8 sps:$4 sm:$0xff]  }
 0x2b8   : > { %4122 = vmatprep.subr.bf16.mxu1 %v7671_v36  ;;  %v7726_v36 = vld [vmem:[%s8604_s10 + $0xdc] ss:$8 sps:$4 sm:$0xff]  }
 0x2bb   : > { %4123 = vmatpush1.bf16.msra.mxu1 %v7669_v59  ;;  %v7724_v59 = vld [vmem:[%s8604_s10 + $0xd8] ss:$8 sps:$4 sm:$0xff]  }
 0x2bc   : > { %6546 = vmatprep.subr.msk.bf16.mxu1 %vm3892_vm1, %v6545_v22  ;;  %v7727_v22 = vld [vmem:[%s8604_s10 + $0xc8] ss:$8 sps:$4 sm:$0xff]  }
 0x2bf   : > { %4135 = vmatpush2.bf16.msra.mxu1 %v4103_v61  ;;  %v7730_v61 = vld [vmem:[%s8604_s10 + $0xb8] ss:$8 sps:$4 sm:$0xff]  }
 0x2c0   : > { %4136 = vmatprep.subr.bf16.mxu1 %v7676_v62  ;;  %v7735_v62 = vld [vmem:[%s8604_s10 + $0xac] ss:$8 sps:$4 sm:$0xff]  }
 0x2c3   : > { %4137 = vmatpush2.bf16.msra.mxu1 %v7674_v63  ;;  %v7733_v63 = vld [vmem:[%s8604_s10 + $0xa8] ss:$8 sps:$4 sm:$0xff]  }
 0x2c4   : > { %4138 = vmatprep.subr.bf16.mxu1 %v7679_v0  ;;  %v6523_v0 = vld [vmem:[%s8613_s14 + $0x1] ss:$8 sm:$0x3] }
 0x2c5   : > { %v3991_v38 = vrot.slane %v6523_v0, %v8620_v29 }
 0x2c7   : > { %4139 = vmatpush2.bf16.msra.mxu1 %v7677_v2  ;;  %v3987_v2 = vrot.slane %v6523_v0, %v8616_v8  ;;  %v7773_v0 = vld [vmem:[%s8575_s26 + $0x1d0] ss:$8 sps:$4 sm:$0xff]  }
 0x2c8   : > { %4500 = vmatprep.subr.bf16.mxu1 %v7714_v54 }
 0x35e   : > { %v3933_v7 = vpop.f32.mrf.mxu1 }
 0x35f   : > { %v3934_v35 = vadd.f32 %v3933_v7, %v3776_v30  ;;  %v7749_v30 = vld [vmem:[%s8575_s26 + $0x1b4] ss:$8 sps:$4 sm:$0xff]   ;;  %v7752_v7 = vld [vmem:[%s8575_s26 + $0x1a4] ss:$8 sps:$4 sm:$0xff]  }
 0x360   : > { %v3935_v37 = vpop.f32.mrf.mxu1 }
 0x361   : > { %v3940_v39 = vmax.f32 %v3934_v35, 0.0  ;;  %v3936_v13 = vadd.f32 %v3935_v37, %v3780_v33  ;;  %v7747_v33 = vld [vmem:[%s8575_s26 + $0x1b0] ss:$8 sps:$4 sm:$0xff]   ;;  %v7755_v35 = vld [vmem:[%s8575_s26 + $0x194] ss:$8 sps:$4 sm:$0xff]  }
 0x362   : > { %v3937_v41 = vpop.f32.mrf.mxu1  ;;  %v7753_v37 = vld [vmem:[%s8575_s26 + $0x190] ss:$8 sps:$4 sm:$0xff]  }
 0x363   : > { %v3954_v43 = vadd.f32 %v6522_v10, %v3940_v39  ;;  %v3941_v44 = vmax.f32 %v3936_v13, 0.0  ;;  %v7750_v10 = vld [vmem:[%s8575_s26 + $0x1a0] ss:$8 sps:$4 sm:$0xff]   ;;  %v7758_v39 = vld [vmem:[%s8575_s26 + $0x184] ss:$8 sps:$4 sm:$0xff]  }
 0x364   : > { %v3938_v45 = vpop.f32.mrf.mxu1  ;;  %v7756_v13 = vld [vmem:[%s8575_s26 + $0x180] ss:$8 sps:$4 sm:$0xff]   ;;  %v7759_v41 = vld [vmem:[%s8575_s26 + $0x170] ss:$8 sps:$4 sm:$0xff]  }
 0x365   : > { %v3955_v46 = vadd.f32 %v3951_v40, %v3941_v44  ;;  %v8682_v47 = vmax.f32 %v3954_v43, 0.0  ;;  %v7761_v40 = vld [vmem:[%s8575_s26 + $0x174] ss:$8 sps:$4 sm:$0xff]   ;;  %v7764_v43 = vld [vmem:[%s8575_s26 + $0x164] ss:$8 sps:$4 sm:$0xff]  }
 0x366   : > { %v7762_v44 = vld [vmem:[%s8575_s26 + $0x160] ss:$8 sps:$4 sm:$0xff]   ;;  %v7767_v45 = vld [vmem:[%s8575_s26 + $0x154] ss:$8 sps:$4 sm:$0xff]  }
 0x367   : > { %v8684_v1 = vmax.f32 %v3955_v46, 0.0  ;;  %v3958_v48 = vpack.c.bf16 %v8682_v47, %v8682_v47  ;;  %v6660_v46 = vld [vmem:[%s8575_s26 + $0x1f0] sm:$0xff] }
 0x368   : > { %v6682_v49 = vcombine.low %v6660_v46, %v6660_v46 }
 0x369   : > { %v3959_v34 = vpack.c.bf16 %v8684_v1, %v8684_v1 }
 0x36a   : > { %v4689_v50 = vsel %vm3892_vm1, %v6682_v49, 0  ;;  %v7810_v49 = vld [vmem:[%s8575_s26 + $0x26c] ss:$8 sps:$4 sm:$0xff]  }
 0x36b   : > { %6547 = vmatprep.mubr.msk.bf16.mxu1 %vm3888_vm2, %v3959_v34  ;;  %v7765_v34 = vld [vmem:[%s8575_s26 + $0x150] ss:$8 sps:$4 sm:$0xff]  }
 0x36c   : > { %4141 = vmatmul.mubr.bf16.vlgmr.msra.gmra.mxu1 %v3958_v48  ;;  %v6683_v48 = vcombine.high %v6660_v46, %v6660_v46  ;;  %v7807_v46 = vld [vmem:[%s8604_s10 + $0x1d4] ss:$8 sps:$4 sm:$0xff]  }
 0x36d   : > { %4501 = vmatpush1.bf16.msra.mxu1 %v7712_v53  ;;  %v4185_v53 = vrot.slane %v6569_v51, %v8620_v29  ;;  %v7811_v51 = vld [vmem:[%s8575_s26 + $0x258] ss:$8 sps:$4 sm:$0xff]  }
 0x36e   : > { %4502 = vmatprep.subr.bf16.mxu1 %v7717_v55 }
 0x371   : > { %4503 = vmatpush1.bf16.msra.mxu1 %v7715_v32 }
 0x372   : > { %4504 = vmatprep.subr.bf16.mxu1 %v7720_v56 }
 0x375   : > { %4505 = vmatpush1.bf16.msra.mxu1 %v7718_v57 }
 0x376   : > { %4506 = vmatprep.subr.bf16.mxu1 %v7723_v58 }
 0x379   : > { %4507 = vmatpush1.bf16.msra.mxu1 %v7721_v6 }
 0x37a   : > { %4508 = vmatprep.subr.bf16.mxu1 %v7726_v36 }
 0x37d   : > { %4509 = vmatpush1.bf16.msra.mxu1 %v7724_v59 }
 0x37e   : > { %4510 = vmatprep.subr.bf16.mxu1 %v7729_v31 }
 0x381   : > { %4511 = vmatpush1.bf16.msra.mxu1 %v7727_v22 }
 0x382   : > { %4512 = vmatprep.subr.bf16.mxu1 %v7732_v60 }
 0x385   : > { %4513 = vmatpush1.bf16.msra.mxu1 %v7730_v61 }
 0x386   : > { %4514 = vmatprep.subr.bf16.mxu1 %v7735_v62 }
 0x389   : > { %4515 = vmatpush1.bf16.msra.mxu1 %v7733_v63  ;;  %v7770_v63 = vld [vmem:[%s8575_s26 + $0x1e0] ss:$8 sps:$4 sm:$0xff]  }
 0x38a   : > { %6638 = vmatprep.subr.msk.bf16.mxu1 %vm3892_vm1, %v6637_v20  ;;  %v7794_v20 = vld [vmem:[%s8604_s10 + $0x160] ss:$8 sps:$4 sm:$0xff]  }
 0x38d   : > { %4527 = vmatpush2.bf16.msra.mxu1 %v4495_v23  ;;  %v7797_v23 = vld [vmem:[%s8604_s10 + $0x150] ss:$8 sps:$4 sm:$0xff]  }
 0x38e   : > { %4528 = vmatprep.subr.bf16.mxu1 %v7740_v24  ;;  %v6615_v24 = vld [vmem:[%s8613_s14 + $0x2] ss:$8 sm:$0x3] }
 0x391   : > { %4529 = vmatpush2.bf16.msra.mxu1 %v7738_v25  ;;  %v4379_v25 = vrot.slane %v6615_v24, %v8616_v8 }
 0x392   : > { %4530 = vmatprep.subr.bf16.mxu1 %v7743_v42  ;;  %v4383_v42 = vrot.slane %v6615_v24, %v8620_v29  ;;  %v7837_v24 = vld [vmem:[%s8575_s26 + $0x278] ss:$8 sps:$4 sm:$0xff]  }
 0x395   : > { %4531 = vmatpush2.bf16.msra.mxu1 %v7741_v26 }
 0x42c   : > { %v4142_v4 = vpop.f32.mrf.mxu1 }
 0x42d   : > { %v4143_v9 = vadd.f32 %v4142_v4, %v3987_v2  ;;  %v7776_v2 = vld [vmem:[%s8604_s10 + $0x1c0] ss:$8 sps:$4 sm:$0xff]   ;;  %v7781_v4 = vld [vmem:[%s8604_s10 + $0x1b4] ss:$8 sps:$4 sm:$0xff]  }
 0x42e   : > { %v4144_v11 = vpop.f32.mrf.mxu1 }
 0x42f   : > { %v4145_v5 = vadd.f32 %v4144_v11, %v3991_v38  ;;  %v4149_v12 = vmax.f32 %v4143_v9, 0.0  ;;  %v7778_v38 = vld [vmem:[%s8604_s10 + $0x1c4] ss:$8 sps:$4 sm:$0xff]   ;;  %v7779_v9 = vld [vmem:[%s8604_s10 + $0x1b0] ss:$8 sps:$4 sm:$0xff]  }
 0x430   : > { %v4146_v14 = vpop.f32.mrf.mxu1  ;;  %4892 = vmatprep.subr.bf16.mxu1 %v7778_v38  ;;  %v7784_v11 = vld [vmem:[%s8604_s10 + $0x1a4] ss:$8 sps:$4 sm:$0xff]  }
 0x431   : > { %v4150_v15 = vmax.f32 %v4145_v5, 0.0  ;;  %v4151_v18 = vpack.c.bf16 %v4149_v12, %v4149_v12  ;;  %v7782_v5 = vld [vmem:[%s8604_s10 + $0x1a0] ss:$8 sps:$4 sm:$0xff]   ;;  %v7787_v12 = vld [vmem:[%s8604_s10 + $0x194] ss:$8 sps:$4 sm:$0xff]  }
 0x432   : > { %v4147_v16 = vpop.f32.mrf.mxu1  ;;  %v7785_v14 = vld [vmem:[%s8604_s10 + $0x190] ss:$8 sps:$4 sm:$0xff]  }
 0x433   : > { %v4152_v17 = vpack.c.bf16 %v4150_v15, %v4150_v15  ;;  %v7790_v15 = vld [vmem:[%s8604_s10 + $0x184] ss:$8 sps:$4 sm:$0xff]   ;;  %v7788_v16 = vld [vmem:[%s8604_s10 + $0x180] ss:$8 sps:$4 sm:$0xff]  }
 0x435   : > { %6593 = vmatprep.mubr.msk.bf16.mxu0 %vm3888_vm2, %v4152_v17  ;;  %v7793_v17 = vld [vmem:[%s8604_s10 + $0x174] ss:$8 sps:$4 sm:$0xff]  }
 0x436   : > { %4335 = vmatmul.mubr.bf16.vlgmr.msra.gmra.mxu0 %v4151_v18  ;;  %v7791_v18 = vld [vmem:[%s8604_s10 + $0x170] ss:$8 sps:$4 sm:$0xff]  }
 0x437   : > { %4695 = vmatpush1.bf16.msra.mxu0 %v7744_v27 }
 0x438   : > { %4696 = vmatprep.subr.bf16.mxu0 %v7749_v30 }
 0x43b   : > { %4697 = vmatpush1.bf16.msra.mxu0 %v7747_v33 }
 0x43c   : > { %4698 = vmatprep.subr.bf16.mxu0 %v7752_v7 }
 0x43f   : > { %4699 = vmatpush1.bf16.msra.mxu0 %v7750_v10 }
 0x440   : > { %4700 = vmatprep.subr.bf16.mxu0 %v7755_v35 }
 0x443   : > { %4701 = vmatpush1.bf16.msra.mxu0 %v7753_v37 }
 0x444   : > { %4702 = vmatprep.subr.bf16.mxu0 %v7758_v39 }
 0x447   : > { %4703 = vmatpush1.bf16.msra.mxu0 %v7756_v13  ;;  %v6706_v13 = vld [vmem:[%s8604_s10 + $0x1f0] sm:$0xff] }
 0x448   : > { %4704 = vmatprep.subr.bf16.mxu0 %v7761_v40  ;;  %v6729_v40 = vcombine.high %v6706_v13, %v6706_v13 }
 0x44b   : > { %4705 = vmatpush1.bf16.msra.mxu0 %v7759_v41  ;;  %v6728_v41 = vcombine.low %v6706_v13, %v6706_v13  ;;  %v7860_v13 = vld [vmem:[%s8604_s10 + $0x20c] ss:$8 sps:$4 sm:$0xff]  }
 0x44c   : > { %4706 = vmatprep.subr.bf16.mxu0 %v7764_v43 }
 0x44d   : > { %v4887_v43 = vsel %vm3892_vm1, %v6728_v41, 0  ;;  %v7863_v41 = vld [vmem:[%s8604_s10 + $0x1fc] ss:$8 sps:$4 sm:$0xff]  }
 0x44f   : > { %4707 = vmatpush1.bf16.msra.mxu0 %v7762_v44  ;;  %v7804_v44 = vld [vmem:[%s8604_s10 + $0x1e4] ss:$8 sps:$4 sm:$0xff]  }
 0x450   : > { %4708 = vmatprep.subr.bf16.mxu0 %v7767_v45  ;;  %v7802_v45 = vld [vmem:[%s8604_s10 + $0x1e0] ss:$8 sps:$4 sm:$0xff]  }
 0x453   : > { %4709 = vmatpush1.bf16.msra.mxu0 %v7765_v34  ;;  %v7805_v34 = vld [vmem:[%s8604_s10 + $0x1d0] ss:$8 sps:$4 sm:$0xff]  }
 0x454   : > { %6684 = vmatprep.subr.msk.bf16.mxu0 %vm3892_vm1, %v6683_v48  ;;  %v7808_v48 = vld [vmem:[%s8575_s26 + $0x268] ss:$8 sps:$4 sm:$0xff]  }
 0x457   : > { %4721 = vmatpush2.bf16.msra.mxu0 %v4689_v50  ;;  %v7813_v50 = vld [vmem:[%s8575_s26 + $0x25c] ss:$8 sps:$4 sm:$0xff]  }
 0x4f6   : > { %v4336_v54 = vpop.f32.mrf.mxu0 }
 0x4f7   : > { %v4337_v55 = vadd.f32 %v4336_v54, %v4181_v52  ;;  %v7816_v52 = vld [vmem:[%s8575_s26 + $0x24c] ss:$8 sps:$4 sm:$0xff]   ;;  %v7819_v54 = vld [vmem:[%s8575_s26 + $0x23c] ss:$8 sps:$4 sm:$0xff]  }
 0x4f8   : > { %v4338_v32 = vpop.f32.mrf.mxu0 }
 0x4f9   : > { %v4343_v56 = vmax.f32 %v4337_v55, 0.0  ;;  %v4339_v57 = vadd.f32 %v4338_v32, %v4185_v53  ;;  %v7814_v53 = vld [vmem:[%s8575_s26 + $0x248] ss:$8 sps:$4 sm:$0xff]   ;;  %v7817_v55 = vld [vmem:[%s8575_s26 + $0x238] ss:$8 sps:$4 sm:$0xff]  }
 0x4fa   : > { %v4340_v58 = vpop.f32.mrf.mxu0  ;;  %v7822_v32 = vld [vmem:[%s8575_s26 + $0x22c] ss:$8 sps:$4 sm:$0xff]  }
 0x4fb   : > { %v4345_v6 = vadd.f32 %v4343_v56, %v8682_v47  ;;  %v4344_v36 = vmax.f32 %v4339_v57, 0.0  ;;  %v7772_v47 = vld [vmem:[%s8575_s26 + $0x1e4] ss:$8 sps:$4 sm:$0xff]   ;;  %v7820_v56 = vld [vmem:[%s8575_s26 + $0x228] ss:$8 sps:$4 sm:$0xff]  }
 0x4fc   : > { %v4341_v59 = vpop.f32.mrf.mxu0  ;;  %4722 = vmatprep.subr.bf16.mxu0 %v7772_v47  ;;  %v7825_v57 = vld [vmem:[%s8575_s26 + $0x21c] ss:$8 sps:$4 sm:$0xff]   ;;  %v7823_v58 = vld [vmem:[%s8575_s26 + $0x218] ss:$8 sps:$4 sm:$0xff]  }
 0x4fd   : > { %v4346_v31 = vadd.f32 %v4344_v36, %v8684_v1  ;;  %v8746_v22 = vmax.f32 %v4345_v6, 0.0  ;;  %4723 = vmatpush2.bf16.msra.mxu0 %v7770_v63  ;;  %v7775_v1 = vld [vmem:[%s8575_s26 + $0x1d4] ss:$8 sps:$4 sm:$0xff]   ;;  %v7826_v36 = vld [vmem:[%s8575_s26 + $0x208] ss:$8 sps:$4 sm:$0xff]  }
 0x4fe   : > { %4724 = vmatprep.subr.bf16.mxu0 %v7775_v1  ;;  %v7828_v6 = vld [vmem:[%s8575_s26 + $0x20c] ss:$8 sps:$4 sm:$0xff]   ;;  %v7831_v59 = vld [vmem:[%s8575_s26 + $0x1fc] ss:$8 sps:$4 sm:$0xff]  }
 0x4ff   : > { %v8748_v60 = vmax.f32 %v4346_v31, 0.0  ;;  %v4349_v62 = vpack.c.bf16 %v8746_v22, %v8746_v22  ;;  %v6752_v31 = vld [vmem:[%s8575_s26 + $0x298] sm:$0xff]  ;;  %v6661_v1 = vld [vmem:[%s8671_s17 + $0x2] ss:$8 sm:$0x3] }
 0x500   : > { %v6774_v47 = vcombine.low %v6752_v31, %v6752_v31 }
 0x501   : > { %v4350_v61 = vpack.c.bf16 %v8748_v60, %v8748_v60  ;;  %4725 = vmatpush2.bf16.msra.mxu0 %v7773_v0  ;;  %v4573_v0 = vrot.slane %v6661_v1, %v8616_v8 }
 0x502   : > { %5086 = vmatprep.subr.bf16.mxu0 %v7810_v49  ;;  %v5081_v63 = vsel %vm3892_vm1, %v6774_v47, 0  ;;  %v7874_v47 = vld [vmem:[%s8575_s26 + $0x314] ss:$8 sps:$4 sm:$0xff]  }
 0x503   : > { %6639 = vmatprep.mubr.msk.bf16.mxu1 %vm3888_vm2, %v4350_v61  ;;  %v7829_v61 = vld [vmem:[%s8575_s26 + $0x1f8] ss:$8 sps:$4 sm:$0xff]  }
 0x504   : > { %4533 = vmatmul.mubr.bf16.vlgmr.msra.gmra.mxu1 %v4349_v62  ;;  %v6775_v62 = vcombine.high %v6752_v31, %v6752_v31  ;;  %v7871_v31 = vld [vmem:[%s8604_s10 + $0x27c] ss:$8 sps:$4 sm:$0xff]  }
 0x505   : > { %4893 = vmatpush1.bf16.msra.mxu1 %v7776_v2  ;;  %v4577_v2 = vrot.slane %v6661_v1, %v8620_v29  ;;  %v7875_v1 = vld [vmem:[%s8575_s26 + $0x300] ss:$8 sps:$4 sm:$0xff]  }
 0x506   : > { %4894 = vmatprep.subr.bf16.mxu1 %v7781_v4 }
 0x509   : > { %4895 = vmatpush1.bf16.msra.mxu1 %v7779_v9 }
 0x50a   : > { %4896 = vmatprep.subr.bf16.mxu1 %v7784_v11 }
 0x50d   : > { %4897 = vmatpush1.bf16.msra.mxu1 %v7782_v5 }
 0x50e   : > { %4898 = vmatprep.subr.bf16.mxu1 %v7787_v12 }
 0x511   : > { %4899 = vmatpush1.bf16.msra.mxu1 %v7785_v14 }
 0x512   : > { %4900 = vmatprep.subr.bf16.mxu1 %v7790_v15 }
 0x515   : > { %4901 = vmatpush1.bf16.msra.mxu1 %v7788_v16 }
 0x516   : > { %4902 = vmatprep.subr.bf16.mxu1 %v7793_v17 }
 0x519   : > { %4903 = vmatpush1.bf16.msra.mxu1 %v7791_v18 }
 0x51a   : > { %4904 = vmatprep.subr.bf16.mxu1 %v7796_v19 }
 0x51d   : > { %4905 = vmatpush1.bf16.msra.mxu1 %v7794_v20 }
 0x51e   : > { %4906 = vmatprep.subr.bf16.mxu1 %v7799_v21 }
 0x521   : > { %4907 = vmatpush1.bf16.msra.mxu1 %v7797_v23  ;;  %v7834_v23 = vld [vmem:[%s8575_s26 + $0x288] ss:$8 sps:$4 sm:$0xff]  }
 0x522   : > { %6730 = vmatprep.subr.msk.bf16.mxu1 %vm3892_vm1, %v6729_v40  ;;  %v7858_v40 = vld [vmem:[%s8604_s10 + $0x208] ss:$8 sps:$4 sm:$0xff]  }
 0x525   : > { %4919 = vmatpush2.bf16.msra.mxu1 %v4887_v43  ;;  %v7861_v43 = vld [vmem:[%s8604_s10 + $0x1f8] ss:$8 sps:$4 sm:$0xff]  }
 0x526   : > { %4920 = vmatprep.subr.bf16.mxu1 %v7804_v44  ;;  %v6707_v44 = vld [vmem:[%s8613_s14 + $0x3] ss:$8 sm:$0x3] }
 0x529   : > { %4921 = vmatpush2.bf16.msra.mxu1 %v7802_v45  ;;  %v4771_v45 = vrot.slane %v6707_v44, %v8616_v8 }
 0x52a   : > { %4922 = vmatprep.subr.bf16.mxu1 %v7807_v46  ;;  %v4775_v46 = vrot.slane %v6707_v44, %v8620_v29  ;;  %v7901_v44 = vld [vmem:[%s8575_s26 + $0x320] ss:$8 sps:$4 sm:$0xff]  }
 0x52d   : > { %4923 = vmatpush2.bf16.msra.mxu1 %v7805_v34 }
 0x5c4   : > { %v4534_v26 = vpop.f32.mrf.mxu1 }
 0x5c5   : > { %v4535_v27 = vadd.f32 %v4534_v26, %v4379_v25  ;;  %v7840_v25 = vld [vmem:[%s8604_s10 + $0x268] ss:$8 sps:$4 sm:$0xff]   ;;  %v7845_v26 = vld [vmem:[%s8604_s10 + $0x25c] ss:$8 sps:$4 sm:$0xff]  }
 0x5c6   : > { %v4536_v28 = vpop.f32.mrf.mxu1 }
 0x5c7   : > { %v4537_v30 = vadd.f32 %v4536_v28, %v4383_v42  ;;  %v4541_v33 = vmax.f32 %v4535_v27, 0.0  ;;  %v7842_v42 = vld [vmem:[%s8604_s10 + $0x26c] ss:$8 sps:$4 sm:$0xff]   ;;  %v7843_v27 = vld [vmem:[%s8604_s10 + $0x258] ss:$8 sps:$4 sm:$0xff]  }
 0x5c8   : > { %v4538_v7 = vpop.f32.mrf.mxu1  ;;  %5284 = vmatprep.subr.bf16.mxu1 %v7842_v42  ;;  %v7848_v28 = vld [vmem:[%s8604_s10 + $0x24c] ss:$8 sps:$4 sm:$0xff]  }
 0x5c9   : > { %v4542_v10 = vmax.f32 %v4537_v30, 0.0  ;;  %v4543_v39 = vpack.c.bf16 %v4541_v33, %v4541_v33  ;;  %v7846_v30 = vld [vmem:[%s8604_s10 + $0x248] ss:$8 sps:$4 sm:$0xff]   ;;  %v7851_v33 = vld [vmem:[%s8604_s10 + $0x23c] ss:$8 sps:$4 sm:$0xff]  }
 0x5ca   : > { %v4539_v35 = vpop.f32.mrf.mxu1  ;;  %v7849_v7 = vld [vmem:[%s8604_s10 + $0x238] ss:$8 sps:$4 sm:$0xff]  }
 0x5cb   : > { %v4544_v37 = vpack.c.bf16 %v4542_v10, %v4542_v10  ;;  %v7854_v10 = vld [vmem:[%s8604_s10 + $0x22c] ss:$8 sps:$4 sm:$0xff]   ;;  %v7852_v35 = vld [vmem:[%s8604_s10 + $0x228] ss:$8 sps:$4 sm:$0xff]  }
 0x5cd   : > { %6685 = vmatprep.mubr.msk.bf16.mxu0 %vm3888_vm2, %v4544_v37  ;;  %v7857_v37 = vld [vmem:[%s8604_s10 + $0x21c] ss:$8 sps:$4 sm:$0xff]  }
 0x5ce   : > { %4727 = vmatmul.mubr.bf16.vlgmr.msra.gmra.mxu0 %v4543_v39  ;;  %v7855_v39 = vld [vmem:[%s8604_s10 + $0x218] ss:$8 sps:$4 sm:$0xff]  }
 0x5cf   : > { %5087 = vmatpush1.bf16.msra.mxu0 %v7808_v48 }
 0x5d0   : > { %5088 = vmatprep.subr.bf16.mxu0 %v7813_v50 }
 0x5d3   : > { %5089 = vmatpush1.bf16.msra.mxu0 %v7811_v51 }
 0x5d4   : > { %5090 = vmatprep.subr.bf16.mxu0 %v7816_v52 }
 0x5d7   : > { %5091 = vmatpush1.bf16.msra.mxu0 %v7814_v53 }
 0x5d8   : > { %5092 = vmatprep.subr.bf16.mxu0 %v7819_v54 }
 0x5db   : > { %5093 = vmatpush1.bf16.msra.mxu0 %v7817_v55 }
 0x5dc   : > { %5094 = vmatprep.subr.bf16.mxu0 %v7822_v32 }
 0x5df   : > { %5095 = vmatpush1.bf16.msra.mxu0 %v7820_v56  ;;  %v6798_v56 = vld [vmem:[%s8604_s10 + $0x298] sm:$0xff] }
 0x5e0   : > { %5096 = vmatprep.subr.bf16.mxu0 %v7825_v57  ;;  %v6821_v57 = vcombine.high %v6798_v56, %v6798_v56 }
 0x5e3   : > { %5097 = vmatpush1.bf16.msra.mxu0 %v7823_v58  ;;  %v6820_v58 = vcombine.low %v6798_v56, %v6798_v56  ;;  %v7924_v56 = vld [vmem:[%s8604_s10 + $0x2b4] ss:$8 sps:$4 sm:$0xff]  }
 0x5e4   : > { %5098 = vmatprep.subr.bf16.mxu0 %v7828_v6 }
 0x5e5   : > { %v5279_v6 = vsel %vm3892_vm1, %v6820_v58, 0  ;;  %v7927_v58 = vld [vmem:[%s8604_s10 + $0x2a4] ss:$8 sps:$4 sm:$0xff]  }
 0x5e7   : > { %5099 = vmatpush1.bf16.msra.mxu0 %v7826_v36  ;;  %v7868_v36 = vld [vmem:[%s8604_s10 + $0x28c] ss:$8 sps:$4 sm:$0xff]  }
 0x5e8   : > { %5100 = vmatprep.subr.bf16.mxu0 %v7831_v59  ;;  %v7866_v59 = vld [vmem:[%s8604_s10 + $0x288] ss:$8 sps:$4 sm:$0xff]  }
 0x5eb   : > { %5101 = vmatpush1.bf16.msra.mxu0 %v7829_v61  ;;  %v7869_v61 = vld [vmem:[%s8604_s10 + $0x278] ss:$8 sps:$4 sm:$0xff]  }
 0x5ec   : > { %6776 = vmatprep.subr.msk.bf16.mxu0 %vm3892_vm1, %v6775_v62  ;;  %v7872_v62 = vld [vmem:[%s8575_s26 + $0x310] ss:$8 sps:$4 sm:$0xff]  }
 0x5ef   : > { %5113 = vmatpush2.bf16.msra.mxu0 %v5081_v63  ;;  %v7877_v63 = vld [vmem:[%s8575_s26 + $0x304] ss:$8 sps:$4 sm:$0xff]  }
 0x68e   : > { %v4728_v38 = vpop.f32.mrf.mxu0 }
 0x68f   : > { %v4729_v4 = vadd.f32 %v4728_v38, %v4573_v0  ;;  %v7880_v0 = vld [vmem:[%s8575_s26 + $0x2f4] ss:$8 sps:$4 sm:$0xff]   ;;  %v7883_v38 = vld [vmem:[%s8575_s26 + $0x2e4] ss:$8 sps:$4 sm:$0xff]  }
 0x690   : > { %v4730_v9 = vpop.f32.mrf.mxu0 }
 0x691   : > { %v4735_v11 = vmax.f32 %v4729_v4, 0.0  ;;  %v4731_v5 = vadd.f32 %v4730_v9, %v4577_v2  ;;  %v7878_v2 = vld [vmem:[%s8575_s26 + $0x2f0] ss:$8 sps:$4 sm:$0xff]   ;;  %v7881_v4 = vld [vmem:[%s8575_s26 + $0x2e0] ss:$8 sps:$4 sm:$0xff]  }
 0x692   : > { %v4732_v12 = vpop.f32.mrf.mxu0  ;;  %v7886_v9 = vld [vmem:[%s8575_s26 + $0x2d4] ss:$8 sps:$4 sm:$0xff]  }
 0x693   : > { %v4737_v14 = vadd.f32 %v4735_v11, %v8746_v22  ;;  %v4736_v15 = vmax.f32 %v4731_v5, 0.0  ;;  %v7836_v22 = vld [vmem:[%s8575_s26 + $0x28c] ss:$8 sps:$4 sm:$0xff]   ;;  %v7884_v11 = vld [vmem:[%s8575_s26 + $0x2d0] ss:$8 sps:$4 sm:$0xff]  }
 0x694   : > { %v4733_v16 = vpop.f32.mrf.mxu0  ;;  %5114 = vmatprep.subr.bf16.mxu0 %v7836_v22  ;;  %v7889_v5 = vld [vmem:[%s8575_s26 + $0x2c4] ss:$8 sps:$4 sm:$0xff]   ;;  %v7887_v12 = vld [vmem:[%s8575_s26 + $0x2c0] ss:$8 sps:$4 sm:$0xff]  }
 0x695   : > { %v4738_v17 = vadd.f32 %v4736_v15, %v8748_v60  ;;  %v8810_v18 = vmax.f32 %v4737_v14, 0.0  ;;  %5115 = vmatpush2.bf16.msra.mxu0 %v7834_v23  ;;  %v7839_v60 = vld [vmem:[%s8575_s26 + $0x27c] ss:$8 sps:$4 sm:$0xff]   ;;  %v7890_v15 = vld [vmem:[%s8575_s26 + $0x2b0] ss:$8 sps:$4 sm:$0xff]  }
 0x696   : > { %5116 = vmatprep.subr.bf16.mxu0 %v7839_v60  ;;  %v7892_v14 = vld [vmem:[%s8575_s26 + $0x2b4] ss:$8 sps:$4 sm:$0xff]   ;;  %v7895_v16 = vld [vmem:[%s8575_s26 + $0x2a4] ss:$8 sps:$4 sm:$0xff]  }
 0x697   : > { %v8812_v19 = vmax.f32 %v4738_v17, 0.0  ;;  %v4741_v21 = vpack.c.bf16 %v8810_v18, %v8810_v18  ;;  %v6844_v17 = vld [vmem:[%s8575_s26 + $0x340] sm:$0xff] }
 0x698   : > { %v6866_v22 = vcombine.low %v6844_v17, %v6844_v17  ;;  %v6753_v60 = vld [vmem:[%s8671_s17 + $0x3] ss:$8 sm:$0x3] }
 0x699   : > { %v4742_v20 = vpack.c.bf16 %v8812_v19, %v8812_v19  ;;  %5117 = vmatpush2.bf16.msra.mxu0 %v7837_v24  ;;  %v4965_v24 = vrot.slane %v6753_v60, %v8616_v8 }
 0x69a   : > { %5478 = vmatprep.subr.bf16.mxu0 %v7874_v47  ;;  %v5473_v23 = vsel %vm3892_vm1, %v6866_v22, 0  ;;  %v7938_v22 = vld [vmem:[%s8575_s26 + $0x3bc] ss:$8 sps:$4 sm:$0xff]  }
 0x69b   : > { %6731 = vmatprep.mubr.msk.bf16.mxu1 %vm3888_vm2, %v4742_v20  ;;  %v7893_v20 = vld [vmem:[%s8575_s26 + $0x2a0] ss:$8 sps:$4 sm:$0xff]  }
 0x69c   : > { %4925 = vmatmul.mubr.bf16.vlgmr.msra.gmra.mxu1 %v4741_v21  ;;  %v6867_v21 = vcombine.high %v6844_v17, %v6844_v17  ;;  %v7935_v17 = vld [vmem:[%s8604_s10 + $0x324] ss:$8 sps:$4 sm:$0xff]  }
 0x69d   : > { %5285 = vmatpush1.bf16.msra.mxu1 %v7840_v25  ;;  %v4969_v25 = vrot.slane %v6753_v60, %v8620_v29  ;;  %v7939_v60 = vld [vmem:[%s8575_s26 + $0x3a8] ss:$8 sps:$4 sm:$0xff]  }
 0x69e   : > { %5286 = vmatprep.subr.bf16.mxu1 %v7845_v26 }
 0x6a1   : > { %5287 = vmatpush1.bf16.msra.mxu1 %v7843_v27 }
 0x6a2   : > { %5288 = vmatprep.subr.bf16.mxu1 %v7848_v28 }
 0x6a5   : > { %5289 = vmatpush1.bf16.msra.mxu1 %v7846_v30 }
 0x6a6   : > { %5290 = vmatprep.subr.bf16.mxu1 %v7851_v33 }
 0x6a9   : > { %5291 = vmatpush1.bf16.msra.mxu1 %v7849_v7 }
 0x6aa   : > { %5292 = vmatprep.subr.bf16.mxu1 %v7854_v10 }
 0x6ad   : > { %5293 = vmatpush1.bf16.msra.mxu1 %v7852_v35 }
 0x6ae   : > { %5294 = vmatprep.subr.bf16.mxu1 %v7857_v37 }
 0x6b1   : > { %5295 = vmatpush1.bf16.msra.mxu1 %v7855_v39 }
 0x6b2   : > { %5296 = vmatprep.subr.bf16.mxu1 %v7860_v13 }
 0x6b5   : > { %5297 = vmatpush1.bf16.msra.mxu1 %v7858_v40 }
 0x6b6   : > { %5298 = vmatprep.subr.bf16.mxu1 %v7863_v41 }
 0x6b9   : > { %5299 = vmatpush1.bf16.msra.mxu1 %v7861_v43  ;;  %v7898_v43 = vld [vmem:[%s8575_s26 + $0x330] ss:$8 sps:$4 sm:$0xff]  }
 0x6ba   : > { %6822 = vmatprep.subr.msk.bf16.mxu1 %vm3892_vm1, %v6821_v57  ;;  %v7922_v57 = vld [vmem:[%s8604_s10 + $0x2b0] ss:$8 sps:$4 sm:$0xff]  }
 0x6bd   : > { %5311 = vmatpush2.bf16.msra.mxu1 %v5279_v6  ;;  %v7925_v6 = vld [vmem:[%s8604_s10 + $0x2a0] ss:$8 sps:$4 sm:$0xff]  }
 0x6be   : > { %5312 = vmatprep.subr.bf16.mxu1 %v7868_v36  ;;  %v6799_v36 = vld [vmem:[%s8613_s14 + $0x4] ss:$8 sm:$0x3] }
 0x6c1   : > { %5313 = vmatpush2.bf16.msra.mxu1 %v7866_v59  ;;  %v5163_v59 = vrot.slane %v6799_v36, %v8616_v8 }
 0x6c2   : > { %5314 = vmatprep.subr.bf16.mxu1 %v7871_v31  ;;  %v5167_v31 = vrot.slane %v6799_v36, %v8620_v29  ;;  %v7962_v36 = vld [vmem:[%s8575_s26 + $0x3d8] ss:$8 sps:$4 sm:$0xff]  }
 0x6c5   : > { %5315 = vmatpush2.bf16.msra.mxu1 %v7869_v61 }
 0x75c   : > { %v4926_v34 = vpop.f32.mrf.mxu1 }
 0x75d   : > { %v4927_v48 = vadd.f32 %v4926_v34, %v4771_v45  ;;  %v7904_v45 = vld [vmem:[%s8604_s10 + $0x310] ss:$8 sps:$4 sm:$0xff]   ;;  %v7909_v34 = vld [vmem:[%s8604_s10 + $0x304] ss:$8 sps:$4 sm:$0xff]  }
 0x75e   : > { %v4928_v49 = vpop.f32.mrf.mxu1 }
 0x75f   : > { %v4929_v50 = vadd.f32 %v4928_v49, %v4775_v46  ;;  %v4933_v51 = vmax.f32 %v4927_v48, 0.0  ;;  %v7906_v46 = vld [vmem:[%s8604_s10 + $0x314] ss:$8 sps:$4 sm:$0xff]   ;;  %v7907_v48 = vld [vmem:[%s8604_s10 + $0x300] ss:$8 sps:$4 sm:$0xff]  }
 0x760   : > { %v4930_v52 = vpop.f32.mrf.mxu1  ;;  %5676 = vmatprep.subr.bf16.mxu1 %v7906_v46  ;;  %v7912_v49 = vld [vmem:[%s8604_s10 + $0x2f4] ss:$8 sps:$4 sm:$0xff]  }
 0x761   : > { %v4934_v53 = vmax.f32 %v4929_v50, 0.0  ;;  %v4935_v32 = vpack.c.bf16 %v4933_v51, %v4933_v51  ;;  %v7910_v50 = vld [vmem:[%s8604_s10 + $0x2f0] ss:$8 sps:$4 sm:$0xff]   ;;  %v7915_v51 = vld [vmem:[%s8604_s10 + $0x2e4] ss:$8 sps:$4 sm:$0xff]  }
 0x762   : > { %v4931_v54 = vpop.f32.mrf.mxu1  ;;  %v7913_v52 = vld [vmem:[%s8604_s10 + $0x2e0] ss:$8 sps:$4 sm:$0xff]  }
 0x763   : > { %v4936_v55 = vpack.c.bf16 %v4934_v53, %v4934_v53  ;;  %v7918_v53 = vld [vmem:[%s8604_s10 + $0x2d4] ss:$8 sps:$4 sm:$0xff]   ;;  %v7916_v54 = vld [vmem:[%s8604_s10 + $0x2d0] ss:$8 sps:$4 sm:$0xff]  }
 0x765   : > { %6777 = vmatprep.mubr.msk.bf16.mxu0 %vm3888_vm2, %v4936_v55  ;;  %v7921_v55 = vld [vmem:[%s8604_s10 + $0x2c4] ss:$8 sps:$4 sm:$0xff]  }
 0x766   : > { %5119 = vmatmul.mubr.bf16.vlgmr.msra.gmra.mxu0 %v4935_v32  ;;  %v7919_v32 = vld [vmem:[%s8604_s10 + $0x2c0] ss:$8 sps:$4 sm:$0xff]  }
 0x767   : > { %5479 = vmatpush1.bf16.msra.mxu0 %v7872_v62 }
 0x768   : > { %5480 = vmatprep.subr.bf16.mxu0 %v7877_v63 }
 0x76b   : > { %5481 = vmatpush1.bf16.msra.mxu0 %v7875_v1 }
 0x76c   : > { %5482 = vmatprep.subr.bf16.mxu0 %v7880_v0 }
 0x76f   : > { %5483 = vmatpush1.bf16.msra.mxu0 %v7878_v2 }
 0x770   : > { %5484 = vmatprep.subr.bf16.mxu0 %v7883_v38 }
 0x773   : > { %5485 = vmatpush1.bf16.msra.mxu0 %v7881_v4 }
 0x774   : > { %5486 = vmatprep.subr.bf16.mxu0 %v7886_v9 }
 0x777   : > { %5487 = vmatpush1.bf16.msra.mxu0 %v7884_v11  ;;  %v6890_v11 = vld [vmem:[%s8604_s10 + $0x340] sm:$0xff] }
 0x778   : > { %5488 = vmatprep.subr.bf16.mxu0 %v7889_v5  ;;  %v6913_v5 = vcombine.high %v6890_v11, %v6890_v11 }
 0x77b   : > { %5489 = vmatpush1.bf16.msra.mxu0 %v7887_v12  ;;  %v6912_v12 = vcombine.low %v6890_v11, %v6890_v11 }
 0x77c   : > { %5490 = vmatprep.subr.bf16.mxu0 %v7892_v14 }
 0x77d   : > { %v5671_v14 = vsel %vm3892_vm1, %v6912_v12, 0 }
 0x77f   : > { %5491 = vmatpush1.bf16.msra.mxu0 %v7890_v15  ;;  %v7932_v15 = vld [vmem:[%s8604_s10 + $0x334] ss:$8 sps:$4 sm:$0xff]  }
 0x780   : > { %5492 = vmatprep.subr.bf16.mxu0 %v7895_v16  ;;  %v7930_v16 = vld [vmem:[%s8604_s10 + $0x330] ss:$8 sps:$4 sm:$0xff]  }
 0x783   : > { %5493 = vmatpush1.bf16.msra.mxu0 %v7893_v20  ;;  %v7933_v20 = vld [vmem:[%s8604_s10 + $0x320] ss:$8 sps:$4 sm:$0xff]  }
 0x784   : > { %6868 = vmatprep.subr.msk.bf16.mxu0 %vm3892_vm1, %v6867_v21  ;;  %v7936_v21 = vld [vmem:[%s8575_s26 + $0x3b8] ss:$8 sps:$4 sm:$0xff]  }
 0x787   : > { %5505 = vmatpush2.bf16.msra.mxu0 %v5473_v23  ;;  %v7941_v23 = vld [vmem:[%s8575_s26 + $0x3ac] ss:$8 sps:$4 sm:$0xff]  }
 0x826   : > { %v5120_v42 = vpop.f32.mrf.mxu0 }
 0x827   : > { %v5121_v26 = vadd.f32 %v5120_v42, %v4965_v24  ;;  %v7944_v24 = vld [vmem:[%s8575_s26 + $0x39c] ss:$8 sps:$4 sm:$0xff]   ;;  %v7947_v42 = vld [vmem:[%s8575_s26 + $0x38c] ss:$8 sps:$4 sm:$0xff]  }
 0x828   : > { %v5122_v27 = vpop.f32.mrf.mxu0 }
 0x829   : > { %v5127_v28 = vmax.f32 %v5121_v26, 0.0  ;;  %v5123_v30 = vadd.f32 %v5122_v27, %v4969_v25  ;;  %v7942_v25 = vld [vmem:[%s8575_s26 + $0x398] ss:$8 sps:$4 sm:$0xff]   ;;  %v7945_v26 = vld [vmem:[%s8575_s26 + $0x388] ss:$8 sps:$4 sm:$0xff]  }
 0x82a   : > { %v5124_v33 = vpop.f32.mrf.mxu0  ;;  %v7950_v27 = vld [vmem:[%s8575_s26 + $0x37c] ss:$8 sps:$4 sm:$0xff]  }
 0x82b   : > { %v5129_v7 = vadd.f32 %v5127_v28, %v8810_v18  ;;  %v5128_v10 = vmax.f32 %v5123_v30, 0.0  ;;  %v7900_v18 = vld [vmem:[%s8575_s26 + $0x334] ss:$8 sps:$4 sm:$0xff]   ;;  %v7948_v28 = vld [vmem:[%s8575_s26 + $0x378] ss:$8 sps:$4 sm:$0xff]  }
 0x82c   : > { %v5125_v35 = vpop.f32.mrf.mxu0  ;;  %5506 = vmatprep.subr.bf16.mxu0 %v7900_v18  ;;  %v7953_v30 = vld [vmem:[%s8575_s26 + $0x36c] ss:$8 sps:$4 sm:$0xff]   ;;  %v7951_v33 = vld [vmem:[%s8575_s26 + $0x368] ss:$8 sps:$4 sm:$0xff]  }
 0x82d   : > { %v5130_v37 = vadd.f32 %v5128_v10, %v8812_v19  ;;  %v8874_v39 = vmax.f32 %v5129_v7, 0.0  ;;  %5507 = vmatpush2.bf16.msra.mxu0 %v7898_v43  ;;  %v7903_v19 = vld [vmem:[%s8575_s26 + $0x324] ss:$8 sps:$4 sm:$0xff]   ;;  %v7954_v10 = vld [vmem:[%s8575_s26 + $0x358] ss:$8 sps:$4 sm:$0xff]  }
 0x82e   : > { %5508 = vmatprep.subr.bf16.mxu0 %v7903_v19  ;;  %v7956_v7 = vld [vmem:[%s8575_s26 + $0x35c] ss:$8 sps:$4 sm:$0xff]   ;;  %v7959_v35 = vld [vmem:[%s8575_s26 + $0x34c] ss:$8 sps:$4 sm:$0xff]  }
 0x82f   : > { %v8876_v13 = vmax.f32 %v5130_v37, 0.0  ;;  %v5133_v41 = vpack.c.bf16 %v8874_v39, %v8874_v39  ;;  %v6936_v37 = vld [vmem:[%s8575_s26 + $0x3e8] sm:$0xff] }
 0x830   : > { %v6958_v18 = vcombine.low %v6936_v37, %v6936_v37  ;;  %v6845_v19 = vld [vmem:[%s8671_s17 + $0x4] ss:$8 sm:$0x3] }
 0x831   : > { %v5134_v40 = vpack.c.bf16 %v8876_v13, %v8876_v13  ;;  %5509 = vmatpush2.bf16.msra.mxu0 %v7901_v44  ;;  %v5357_v44 = vrot.slane %v6845_v19, %v8616_v8 }
 0x832   : > { %5870 = vmatprep.subr.bf16.mxu0 %v7938_v22  ;;  %v5865_v43 = vsel %vm3892_vm1, %v6958_v18, 0 }
 0x833   : > { %6823 = vmatprep.mubr.msk.bf16.mxu1 %vm3888_vm2, %v5134_v40  ;;  %v7957_v40 = vld [vmem:[%s8575_s26 + $0x348] ss:$8 sps:$4 sm:$0xff]  }
 0x834   : > { %5317 = vmatmul.mubr.bf16.vlgmr.msra.gmra.mxu1 %v5133_v41  ;;  %v6959_v41 = vcombine.high %v6936_v37, %v6936_v37 }
 0x835   : > { %5677 = vmatpush1.bf16.msra.mxu1 %v7904_v45  ;;  %v5361_v45 = vrot.slane %v6845_v19, %v8620_v29 }
 0x836   : > { %5678 = vmatprep.subr.bf16.mxu1 %v7909_v34 }
 0x839   : > { %5679 = vmatpush1.bf16.msra.mxu1 %v7907_v48 }
 0x83a   : > { %5680 = vmatprep.subr.bf16.mxu1 %v7912_v49 }
 0x83d   : > { %5681 = vmatpush1.bf16.msra.mxu1 %v7910_v50 }
 0x83e   : > { %5682 = vmatprep.subr.bf16.mxu1 %v7915_v51 }
 0x841   : > { %5683 = vmatpush1.bf16.msra.mxu1 %v7913_v52 }
 0x842   : > { %5684 = vmatprep.subr.bf16.mxu1 %v7918_v53 }
 0x845   : > { %5685 = vmatpush1.bf16.msra.mxu1 %v7916_v54 }
 0x846   : > { %5686 = vmatprep.subr.bf16.mxu1 %v7921_v55 }
 0x849   : > { %5687 = vmatpush1.bf16.msra.mxu1 %v7919_v32 }
 0x84a   : > { %5688 = vmatprep.subr.bf16.mxu1 %v7924_v56 }
 0x84d   : > { %5689 = vmatpush1.bf16.msra.mxu1 %v7922_v57 }
 0x84e   : > { %5690 = vmatprep.subr.bf16.mxu1 %v7927_v58 }
 0x851   : > { %5691 = vmatpush1.bf16.msra.mxu1 %v7925_v6  ;;  %v7964_v6 = vld [vmem:[%s8575_s26 + $0x3dc] ss:$8 sps:$4 sm:$0xff]  }
 0x852   : > { %6914 = vmatprep.subr.msk.bf16.mxu1 %vm3892_vm1, %v6913_v5  ;;  %v6937_v5 = vld [vmem:[%s8671_s17 + $0x5] ss:$8 sm:$0x3] }
 0x853   : > { %v5749_v12 = vrot.slane %v6937_v5, %v8616_v8 }
 0x855   : > { %5703 = vmatpush2.bf16.msra.mxu1 %v5671_v14  ;;  %v5753_v14 = vrot.slane %v6937_v5, %v8620_v29 }
 0x856   : > { %5704 = vmatprep.subr.bf16.mxu1 %v7932_v15 }
 0x859   : > { %5705 = vmatpush2.bf16.msra.mxu1 %v7930_v16  ;;  %v7978_v16 = vmov 1983009808  }
 0x85a   : > { %5706 = vmatprep.subr.bf16.mxu1 %v7935_v17  ;;  %v5921_v17 = vunpack.c.l.s4 %v7978_v16 }
 0x85d   : > { %5707 = vmatpush2.bf16.msra.mxu1 %v7933_v20 }
 0x8f4   : > { %v5318_v61 = vpop.f32.mrf.mxu1 }
 0x8f5   : > { %v5319_v62 = vadd.f32 %v5318_v61, %v5163_v59  ;;  %v7967_v59 = vld [vmem:[%s8575_s26 + $0x3cc] ss:$8 sps:$4 sm:$0xff]  }
 0x8f6   : > { %v5320_v47 = vpop.f32.mrf.mxu1 }
 0x8f7   : > { %v5321_v63 = vadd.f32 %v5320_v47, %v5167_v31  ;;  %v5325_v1 = vmax.f32 %v5319_v62, 0.0  ;;  %v7965_v31 = vld [vmem:[%s8575_s26 + $0x3c8] ss:$8 sps:$4 sm:$0xff]  }
 0x8f8   : > { %v5322_v0 = vpop.f32.mrf.mxu1 }
 0x8f9   : > { %v5326_v2 = vmax.f32 %v5321_v63, 0.0  ;;  %v5327_v9 = vpack.c.bf16 %v5325_v1, %v5325_v1 }
 0x8fa   : > { %v5323_v38 = vpop.f32.mrf.mxu1 }
 0x8fb   : > { %v5328_v4 = vpack.c.bf16 %v5326_v2, %v5326_v2 }
 0x8fd   : > { %6869 = vmatprep.mubr.msk.bf16.mxu0 %vm3888_vm2, %v5328_v4 }
 0x8fe   : > { %5511 = vmatmul.mubr.bf16.vlgmr.msra.gmra.mxu0 %v5327_v9 }
 0x8ff   : > { %5871 = vmatpush1.bf16.msra.mxu0 %v7936_v21 }
 0x900   : > { %5872 = vmatprep.subr.bf16.mxu0 %v7941_v23 }
 0x903   : > { %5873 = vmatpush1.bf16.msra.mxu0 %v7939_v60  ;;  %v5922_v60 = vunpack.c.0.s8 %v5921_v17 }
 0x904   : > { %5874 = vmatprep.subr.bf16.mxu0 %v7944_v24 }
 0x907   : > { %5875 = vmatpush1.bf16.msra.mxu0 %v7942_v25 }
 0x908   : > { %5876 = vmatprep.subr.bf16.mxu0 %v7947_v42 }
 0x90b   : > { %5877 = vmatpush1.bf16.msra.mxu0 %v7945_v26 }
 0x90c   : > { %5878 = vmatprep.subr.bf16.mxu0 %v7950_v27 }
 0x90f   : > { %5879 = vmatpush1.bf16.msra.mxu0 %v7948_v28  ;;  %v5925_v28 = vsub.s32 %v5922_v60, %v8034_v3 }
 0x910   : > { %5880 = vmatprep.subr.bf16.mxu0 %v7953_v30 }
 0x913   : > { %5881 = vmatpush1.bf16.msra.mxu0 %v7951_v33 }
 0x914   : > { %5882 = vmatprep.subr.bf16.mxu0 %v7956_v7 }
 0x917   : > { %5883 = vmatpush1.bf16.msra.mxu0 %v7954_v10 }
 0x918   : > { %5884 = vmatprep.subr.bf16.mxu0 %v7959_v35 }
 0x91b   : > { %5885 = vmatpush1.bf16.msra.mxu0 %v7957_v40 }
 0x91c   : > { %6960 = vmatprep.subr.msk.bf16.mxu0 %vm3892_vm1, %v6959_v41 }
 0x91f   : > { %5897 = vmatpush2.bf16.msra.mxu0 %v5865_v43 }
 0x920   : > { %5898 = vmatprep.subr.bf16.mxu0 %v7964_v6 }
 0x923   : > { %5899 = vmatpush2.bf16.msra.mxu0 %v7962_v36 }
 0x924   : > { %5900 = vmatprep.subr.bf16.mxu0 %v7967_v59 }
 0x927   : > { %5901 = vmatpush2.bf16.msra.mxu0 %v7965_v31 }
 0x9be   : > { %v5512_v46 = vpop.f32.mrf.mxu0 }
 0x9bf   : > { %v5513_v34 = vadd.f32 %v5512_v46, %v5357_v44 }
 0x9c0   : > { %v5514_v48 = vpop.f32.mrf.mxu0 }
 0x9c1   : > { %v5519_v49 = vmax.f32 %v5513_v34, 0.0  ;;  %v5515_v50 = vadd.f32 %v5514_v48, %v5361_v45 }
 0x9c2   : > { %v5516_v51 = vpop.f32.mrf.mxu0 }
 0x9c3   : > { %v5521_v52 = vadd.f32 %v5519_v49, %v8874_v39  ;;  %v5520_v53 = vmax.f32 %v5515_v50, 0.0  ;;  %v6891_v39 = vld [vmem:[%s8613_s14 + $0x5] ss:$8 sm:$0x3] }
 0x9c4   : > { %v5517_v54 = vpop.f32.mrf.mxu0  ;;  %v5555_v61 = vrot.slane %v6891_v39, %v8616_v8 }
 0x9c5   : > { %v5522_v55 = vadd.f32 %v5520_v53, %v8876_v13  ;;  %v5523_v32 = vmax.f32 %v5521_v52, 0.0  ;;  %v5559_v13 = vrot.slane %v6891_v39, %v8620_v29 }
 0x9c7   : > { %v5524_v56 = vmax.f32 %v5522_v55, 0.0  ;;  %v5525_v58 = vpack.c.bf16 %v5523_v32, %v5523_v32 }
 0x9c9   : > { %v5526_v57 = vpack.c.bf16 %v5524_v56, %v5524_v56 }
 0x9cb   : > { %6915 = vmatprep.mubr.msk.bf16.mxu1 %vm3888_vm2, %v5526_v57 }
 0x9cc   : > { %5709 = vmatmul.mubr.bf16.vlgmr.msra.gmra.mxu1 %v5525_v58 }
 0xa8c   : > { %v5710_v62 = vpop.f32.mrf.mxu1 }
 0xa8d   : > { %v5711_v47 = vadd.f32 %v5710_v62, %v5555_v61 }
 0xa8e   : > { %v5712_v63 = vpop.f32.mrf.mxu1 }
 0xa8f   : > { %v5713_v1 = vadd.f32 %v5712_v63, %v5559_v13  ;;  %v5717_v0 = vmax.f32 %v5711_v47, 0.0 }
 0xa90   : > { %v5714_v2 = vpop.f32.mrf.mxu1 }
 0xa91   : > { %v5718_v38 = vmax.f32 %v5713_v1, 0.0  ;;  %v5719_v11 = vpack.c.bf16 %v5717_v0, %v5717_v0 }
 0xa92   : > { %v5715_v4 = vpop.f32.mrf.mxu1 }
 0xa93   : > { %v5720_v9 = vpack.c.bf16 %v5718_v38, %v5718_v38 }
 0xa95   : > { %6961 = vmatprep.mubr.msk.bf16.mxu0 %vm3888_vm2, %v5720_v9 }
 0xa96   : > { %5903 = vmatmul.mubr.bf16.vlgmr.msra.gmra.mxu0 %v5719_v11 }
 0xb56   : > { %v5904_v15 = vpop.f32.mrf.mxu0 }
 0xb57   : > { %v5905_v20 = vadd.f32 %v5904_v15, %v5749_v12 }
 0xb58   : > { %v5906_v21 = vpop.f32.mrf.mxu0 }
 0xb59   : > { %v5911_v22 = vmax.f32 %v5905_v20, 0.0  ;;  %v5907_v23 = vadd.f32 %v5906_v21, %v5753_v14 }
 0xb5a   : > { %v5908_v24 = vpop.f32.mrf.mxu0 }
 0xb5b   : > { %v5913_v25 = vadd.f32 %v5911_v22, %v5523_v32  ;;  %v5912_v42 = vmax.f32 %v5907_v23, 0.0 }
 0xb5c   : > { %v5909_v26 = vpop.f32.mrf.mxu0 }
 0xb5d   : > { %v5914_v27 = vadd.f32 %v5912_v42, %v5524_v56  ;;  %v5915_v30 = vmax.f32 %v5913_v25, 0.0 }
 0xb5f   : > { %v5916_v8 = vmax.f32 %v5914_v27, 0.0 }
 0xb61   : > { %v5919_v29 = vcombine.low %v5915_v30, %v5916_v8 }
 0xb63   : > { %v5926_v33 = vrot.slane %v5919_v29, %v5925_v28 }
 0xb65   : > { %5931 = vst.msk [vmem:[%s422_s24] sm:$0xf] %vm5930_vm5, %v5926_v33 }
 0xb66 PF: > { %s18_s27 = sadd.s32 1, %s7974_s27  }
 0xb67   : > { %p15_p4 = scmp.ge.s32.totalorder %s18_s27, 5  }
 0xb69   :  { %17 = sbr.rel (!%p15_p4) target bundleno = 1 (0x1), region = 119 }

</bundles_post_ra>
